<compile_context>
chip_gen: v5e
topology: v5e:2x2
jax: 0.10.0
libtpu: 0.0.40
codegen_flags: <defaults>
</compile_context>

<pallas_src>
import numpy as np
import jax
import jax.numpy as jnp
from jax.experimental import pallas as pl
from jax.experimental.pallas import tpu as pltpu

# ----- model hyperparameters (mirror model_params / kwargs) ------------------
CNN_DIMS = [32, 64, 32]
KSIZE = 3
STRIDE = 2
PAD = 1
MLP_VALUES = [512, 128, 64]

IMAGE_SEQ_LEN = 4        # kwargs['image_seq_len']
POSE_SEQ_LEN = 2         # kwargs['pose_seq_len']
IMAGE_H = 16             # kwargs['image_h']
IMAGE_W = 16             # kwargs['image_w']
N_ACTIONS = 2            # len(action_space.low)
N_BRANCH = 4             # forward / right / backward / left cameras
TAPS = KSIZE * KSIZE     # 9

TB = 8                   # batch tile per grid step; keeps every in-kernel row
                         # slice (8,128)-aligned (tap blocks, position blocks)


def conv_out(x, iters=1):
    for _ in range(iters):
        x = (x + 2 * PAD - KSIZE) // STRIDE + 1
    return x


HOUT = [conv_out(IMAGE_H, i) for i in (1, 2, 3)]      # [8, 4, 2]
WOUT = [conv_out(IMAGE_W, i) for i in (1, 2, 3)]      # [8, 4, 2]
NPOS = [h * w for h, w in zip(HOUT, WOUT)]            # [64, 16, 4]
C1, C2, C3 = CNN_DIMS                                 # 32, 64, 32
FEAT_PER_P = N_BRANCH * C3                            # 128
CONV_FEAT = NPOS[2] * FEAT_PER_P                      # 512
PA_DIM = 3 * POSE_SEQ_LEN + N_ACTIONS                 # 8
MLP_IN = CONV_FEAT + PA_DIM                           # 520
PATCH1_K = TAPS * IMAGE_SEQ_LEN * N_BRANCH            # 144


# ---------------- host-side helpers ------------------------------------------
def im2col_nhwc(x):
    """x: (N, H, W, C) -> (N*Ho*Wo, 9*C) with column order (tap, channel)."""
    n, h, w, c = x.shape
    xp = jnp.pad(x, ((0, 0), (PAD, PAD), (PAD, PAD), (0, 0)))
    ho = (h + 2 * PAD - KSIZE) // STRIDE + 1
    wo = (w + 2 * PAD - KSIZE) // STRIDE + 1
    cols = []
    for kh in range(KSIZE):
        for kw in range(KSIZE):
            cols.append(xp[:, kh:kh + (ho - 1) * STRIDE + 1:STRIDE,
                           kw:kw + (wo - 1) * STRIDE + 1:STRIDE, :])
    patches = jnp.stack(cols, axis=3)                 # (N, Ho, Wo, 9, C)
    return patches.reshape(n * ho * wo, TAPS * c), ho, wo


def build_sel(tb, h_in, w_in, h_out, w_out, pos_major):
    """Fixed per-batch-tile 0/1 row-gather matrix for stride-2 / pad-1 im2col.

    rows: (tap, p_out, b) if pos_major else (tap, b, p_out);  cols: (b, p_in).
    Out-of-bounds taps are all-zero rows (zero padding).  Size is O(TB^2),
    independent of the runtime batch (the grid handles batch scaling).
    """
    n_out, n_in = h_out * w_out, h_in * w_in
    sel = np.zeros((TAPS * tb * n_out, tb * n_in), np.float32)
    for t in range(TAPS):
        kh, kw = divmod(t, KSIZE)
        for b in range(tb):
            for oh in range(h_out):
                for ow in range(w_out):
                    ih = oh * STRIDE - PAD + kh
                    iw = ow * STRIDE - PAD + kw
                    if 0 <= ih < h_in and 0 <= iw < w_in:
                        p_out = oh * w_out + ow
                        if pos_major:
                            r = t * tb * n_out + p_out * tb + b
                        else:
                            r = t * tb * n_out + b * n_out + p_out
                        sel[r, b * n_in + ih * w_in + iw] = 1.0
    return sel


# ---------------- deterministic parameter init (torch layout) ----------------
def init_raw_params(key):
    """raw['conv'][layer][branch] = (w (Cout,Cin,3,3), b (Cout,));
       raw['mlp'][i]             = (w (Din,Dout),     b (Dout,))."""
    conv = []
    cins = [IMAGE_SEQ_LEN] + CNN_DIMS[:-1]
    for cin, cout in zip(cins, CNN_DIMS):
        layer = []
        for _g in range(N_BRANCH):
            key, kw_, kb_ = jax.random.split(key, 3)
            fan_in = cin * KSIZE * KSIZE
            w = jax.random.normal(kw_, (cout, cin, KSIZE, KSIZE),
                                  jnp.float32) / np.sqrt(fan_in)
            b = 0.01 * jax.random.normal(kb_, (cout,), jnp.float32)
            layer.append((w, b))
        conv.append(layer)

    dims = [MLP_IN] + MLP_VALUES + [1]
    mlp = []
    for din, dout in zip(dims[:-1], dims[1:]):
        key, kw_, kb_ = jax.random.split(key, 3)
        w = jax.random.normal(kw_, (din, dout), jnp.float32) / np.sqrt(din)
        b = 0.01 * jax.random.normal(kb_, (dout,), jnp.float32)
        mlp.append((w, b))
    return {"conv": conv, "mlp": mlp}


def pack_params(raw):
    """Pack torch-layout params into branch-packed, batch-independent kernel
    operands (bf16 weights, f32 biases, fixed per-tile gather matrices)."""
    bf16, f32 = jnp.bfloat16, jnp.float32
    eye = jnp.eye(N_BRANCH, dtype=f32)

    # conv1: (144, 128). rows = (tap, seq, g_in), cols = (g_out*32 + o).
    w1_all = jnp.stack([w for (w, _) in raw["conv"][0]])       # (g, o, s, kh, kw)
    w1_r = jnp.transpose(w1_all, (3, 4, 2, 0, 1))              # (kh, kw, s, g, o)
    w1p = jnp.einsum("xyzgo,gh->xyzgho", w1_r, eye)            # block-diag branches
    w1p = w1p.reshape(PATCH1_K, N_BRANCH * C1)
    b1p = jnp.concatenate([b for (_, b) in raw["conv"][0]]).reshape(1, -1)

    # conv2: taps pre-concatenated along K -> (9*128, 256), branch-block-diag.
    w2_all = jnp.stack([w for (w, _) in raw["conv"][1]])       # (g, o, c, kh, kw)
    w2_r = jnp.transpose(w2_all, (3, 4, 0, 2, 1))              # (kh, kw, g, c, o)
    w2p = jnp.einsum("xygco,gh->xygcho", w2_r, eye)
    w2p = w2p.reshape(TAPS * N_BRANCH * C1, N_BRANCH * C2)
    b2p = jnp.concatenate([b for (_, b) in raw["conv"][1]]).reshape(1, -1)

    # conv3: taps pre-concatenated along K -> (9*256, 128).
    w3_all = jnp.stack([w for (w, _) in raw["conv"][2]])
    w3_r = jnp.transpose(w3_all, (3, 4, 0, 2, 1))
    w3p = jnp.einsum("xygco,gh->xygcho", w3_r, eye)
    w3p = w3p.reshape(TAPS * N_BRANCH * C2, N_BRANCH * C3)
    b3p = jnp.concatenate([b for (_, b) in raw["conv"][2]]).reshape(1, -1)

    # fixed per-batch-tile im2col gather matrices (batch-independent).
    sel2 = jnp.asarray(build_sel(TB, HOUT[0], WOUT[0], HOUT[1], WOUT[1],
                                 pos_major=False), f32)        # (9*TB*16, TB*64)
    sel3 = jnp.asarray(build_sel(TB, HOUT[1], WOUT[1], HOUT[2], WOUT[2],
                                 pos_major=True), f32)         # (9*TB*4,  TB*16)

    # MLP layer 1: permute conv rows from torch (g, c, h, w) flatten order to
    # the kernel's (p, g, c) lane order; keep pose/action rows separate.
    wm1, bm1 = raw["mlp"][0]
    kidx = np.arange(CONV_FEAT)
    p = kidx // FEAT_PER_P
    rem = kidx % FEAT_PER_P
    g = rem // C3
    c = rem % C3
    torch_idx = g * (C3 * NPOS[2]) + c * NPOS[2] + p
    wm1a = wm1[:CONV_FEAT][torch_idx]                          # (512, 512)
    wm1b = wm1[CONV_FEAT:]                                     # (8, 512)
    (wm2, bm2), (wm3, bm3), (wm4, bm4) = raw["mlp"][1], raw["mlp"][2], raw["mlp"][3]

    return (w1p.astype(bf16), b1p.astype(f32),
            sel2.astype(bf16), w2p.astype(bf16), b2p.astype(f32),
            sel3.astype(bf16), w3p.astype(bf16), b3p.astype(f32),
            wm1a.astype(bf16), wm1b.astype(bf16), bm1.reshape(1, -1).astype(f32),
            wm2.astype(bf16), bm2.reshape(1, -1).astype(f32),
            wm3.astype(bf16), bm3.reshape(1, -1).astype(f32),
            wm4.astype(bf16), bm4.reshape(1, -1).astype(f32))


# ---------------- the fused Pallas kernel (one batch tile per grid step) -----
def _fused_kernel(patches_ref, pa_ref,
                  w1_ref, b1_ref,
                  sel2_ref, w2_ref, b2_ref,
                  sel3_ref, w3_ref, b3_ref,
                  wm1a_ref, wm1b_ref, bm1_ref,
                  wm2_ref, bm2_ref,
                  wm3_ref, bm3_ref,
                  wm4_ref, bm4_ref,
                  o_ref):
    """Whole MultiBranchCnnCritic forward for one TB-row batch tile; every
    intermediate lives in VMEM / vregs."""
    f32, bf16 = jnp.float32, jnp.bfloat16

    def mm(a, b):  # bf16 MXU matmul with f32 accumulation
        return jnp.dot(a.astype(bf16), b.astype(bf16), preferred_element_type=f32)

    # conv1 + ReLU: all 4 branches packed on the 128-lane axis, one matmul.
    a1 = jnp.maximum(mm(patches_ref[...], w1_ref[...]) + b1_ref[...], 0.0)
    a1 = a1.astype(bf16)                                         # (TB*64, 128)

    # conv2: fixed-size gather matmul (block-diag over the tile), lane-concat
    # of the 9 tap blocks, then ONE wide-K (K = 1152) matmul + bias + ReLU.
    t2 = mm(sel2_ref[...], a1).astype(bf16)                      # (9*TB*16, 128)
    r2 = TB * NPOS[1]                                            # 128
    p2 = jnp.concatenate([t2[t * r2:(t + 1) * r2, :] for t in range(TAPS)],
                         axis=1)                                 # (TB*16, 1152)
    a2 = jnp.maximum(mm(p2, w2_ref[...]) + b2_ref[...], 0.0)
    a2 = a2.astype(bf16)                                         # (TB*16, 256)

    # conv3: same, K = 2304.  Gather rows are position-major so the MLP-1 fold
    # below reads 4 aligned contiguous TB-row blocks.
    t3 = mm(sel3_ref[...], a2).astype(bf16)                      # (9*TB*4, 256)
    r3 = TB * NPOS[2]                                            # 32
    p3 = jnp.concatenate([t3[t * r3:(t + 1) * r3, :] for t in range(TAPS)],
                         axis=1)                                 # (TB*4, 2304)
    a3 = jnp.maximum(mm(p3, w3_ref[...]) + b3_ref[...], 0.0)     # rows=(p,b), lanes=(g,c)

    # flatten + concat + MLP layer 1: one (TB,512)@(512,512) matmul (weight
    # rows pre-permuted on the host) + a tiny K=8 pose/action matmul.
    flat = jnp.concatenate([a3[p * TB:(p + 1) * TB, :].astype(bf16)
                            for p in range(NPOS[2])], axis=1)    # (TB, 512)
    h = mm(flat, wm1a_ref[...]) + mm(pa_ref[...], wm1b_ref[...])
    h = jnp.maximum(h + bm1_ref[...], 0.0)                       # (TB, 512)
    h = jnp.maximum(mm(h, wm2_ref[...]) + bm2_ref[...], 0.0)     # (TB, 128)
    h = jnp.maximum(mm(h, wm3_ref[...]) + bm3_ref[...], 0.0)     # (TB, 64)
    o_ref[...] = (mm(h, wm4_ref[...]) + bm4_ref[...]).astype(o_ref.dtype)


# ---------------- forward pass (one pallas_call, batch-tiled grid) -----------
@jax.jit
def multi_branch_cnn_critic(packed, depth_image, relative_position, action):
    depth_image = depth_image.astype(jnp.float32)
    relative_position = relative_position.astype(jnp.float32)
    action = action.astype(jnp.float32)
    batch = depth_image.shape[0]
    b_pad = ((batch + TB - 1) // TB) * TB
    n_tiles = b_pad // TB

    # NCHW (B, seq*4, H, W) -> NHWC; channel index = seq*4 + branch, exactly
    # the torch view (B, seq, 4, H, W).  Layer-1 im2col is host-side static
    # glue on the raw input; conv2/conv3 im2col happens inside the kernel.
    x = jnp.transpose(depth_image, (0, 2, 3, 1))
    patches, _, _ = im2col_nhwc(x)                               # (B*64, 144)
    pa = jnp.concatenate([relative_position, action], axis=1)    # (B, 8)

    if b_pad != batch:                                           # pad batch to TB
        patches = jnp.pad(patches, ((0, (b_pad - batch) * NPOS[0]), (0, 0)))
        pa = jnp.pad(pa, ((0, b_pad - batch), (0, 0)))
    patches = patches.astype(jnp.bfloat16)
    pa = pa.astype(jnp.bfloat16)

    def _const(arr):  # constant-index weight block (same block every step)
        return pl.BlockSpec(arr.shape, lambda i: (0, 0))

    in_specs = ([pl.BlockSpec((TB * NPOS[0], PATCH1_K), lambda i: (i, 0)),
                 pl.BlockSpec((TB, PA_DIM), lambda i: (i, 0))]
                + [_const(p) for p in packed])

    out = pl.pallas_call(
        _fused_kernel,
        out_shape=jax.ShapeDtypeStruct((b_pad, 1), jnp.float32),
        grid=(n_tiles,),
        in_specs=in_specs,
        out_specs=pl.BlockSpec((TB, 1), lambda i: (i, 0)),
        compiler_params=pltpu.CompilerParams(
            dimension_semantics=("parallel",),
            vmem_limit_bytes=32 * 1024 * 1024),
    )(patches, pa, *packed)
    return out[:batch]


# ---------------- straightforward reference (torch-structured) ---------------
def _bf16_dot(a, b):
    return jnp.dot(a.astype(jnp.bfloat16), b.astype(jnp.bfloat16),
                   preferred_element_type=jnp.float32)


@jax.jit
def reference_forward(raw, depth_image, relative_position, action):
    x = depth_image.astype(jnp.float32)
    rp = relative_position.astype(jnp.float32)
    ac = action.astype(jnp.float32)
    batch = x.shape[0]
    x = x.reshape(batch, IMAGE_SEQ_LEN, N_BRANCH, IMAGE_H, IMAGE_W)
    feats = []
    for g in range(N_BRANCH):
        a = jnp.transpose(x[:, :, g, :, :], (0, 2, 3, 1))        # (B, H, W, seq)
        for layer in range(len(CNN_DIMS)):
            w, b = raw["conv"][layer][g]
            cols, ho, wo = im2col_nhwc(a)
            wm = jnp.transpose(w, (2, 3, 1, 0)).reshape(-1, w.shape[0])
            y = _bf16_dot(cols, wm) + b[None, :]
            a = jnp.maximum(y, 0.0).reshape(batch, ho, wo, w.shape[0])
        feats.append(jnp.transpose(a, (0, 3, 1, 2)).reshape(batch, -1))  # torch order
    h = jnp.concatenate(feats + [rp, ac], axis=1)
    n_mlp = len(raw["mlp"])
    for i, (w, b) in enumerate(raw["mlp"]):
        h = _bf16_dot(h, w) + b[None, :]
        if i < n_mlp - 1:
            h = jnp.maximum(h, 0.0)
    return h


# ---------------- demo --------------------------------------------------------
if __name__ == "__main__":
    B = 2
    key = jax.random.PRNGKey(0)
    k1, k2, k3 = jax.random.split(key, 3)
    depth_image = jax.random.uniform(
        k1, (B, IMAGE_SEQ_LEN * N_BRANCH, IMAGE_H, IMAGE_W), jnp.float32)
    relative_position = jax.random.normal(k2, (B, 3 * POSE_SEQ_LEN), jnp.float32)
    action = jax.random.uniform(k3, (B, N_ACTIONS), jnp.float32,
                                minval=-1.0, maxval=1.0)

    raw = init_raw_params(jax.random.PRNGKey(42))
    packed = pack_params(raw)                 # batch-independent packing

    q = multi_branch_cnn_critic(packed, depth_image, relative_position, action)
    q = jax.block_until_ready(q)
    assert q.shape == (B, 1) and q.dtype == jnp.float32
    assert bool(jnp.all(jnp.isfinite(q)))

    q_ref = jax.block_until_ready(
        reference_forward(raw, depth_image, relative_position, action))
    assert jnp.allclose(q, q_ref, rtol=3e-3, atol=3e-3), (q, q_ref)

    print("KERNEL_OK")
</pallas_src>

<mosaic_0001>
module attributes {stable_mosaic.version = 11 : i64} {
  func.func @_fused_kernel(%arg0: i32, %arg1: memref<512x144xbf16, #tpu.memory_space<vmem>>, %arg2: memref<8x8xbf16, #tpu.memory_space<vmem>>, %arg3: memref<144x128xbf16, #tpu.memory_space<vmem>>, %arg4: memref<1x128xf32, #tpu.memory_space<vmem>>, %arg5: memref<1152x512xbf16, #tpu.memory_space<vmem>>, %arg6: memref<1152x256xbf16, #tpu.memory_space<vmem>>, %arg7: memref<1x256xf32, #tpu.memory_space<vmem>>, %arg8: memref<288x128xbf16, #tpu.memory_space<vmem>>, %arg9: memref<2304x128xbf16, #tpu.memory_space<vmem>>, %arg10: memref<1x128xf32, #tpu.memory_space<vmem>>, %arg11: memref<512x512xbf16, #tpu.memory_space<vmem>>, %arg12: memref<8x512xbf16, #tpu.memory_space<vmem>>, %arg13: memref<1x512xf32, #tpu.memory_space<vmem>>, %arg14: memref<512x128xbf16, #tpu.memory_space<vmem>>, %arg15: memref<1x128xf32, #tpu.memory_space<vmem>>, %arg16: memref<128x64xbf16, #tpu.memory_space<vmem>>, %arg17: memref<1x64xf32, #tpu.memory_space<vmem>>, %arg18: memref<64x1xbf16, #tpu.memory_space<vmem>>, %arg19: memref<1x1xf32, #tpu.memory_space<vmem>>, %arg20: memref<8x1xf32, #tpu.memory_space<vmem>>) attributes {dimension_semantics = [#tpu.dimension_semantics<parallel>], iteration_bounds = array<i64: 1>, scalar_prefetch = 0 : i64, scratch_operands = 0 : i64, tpu.core_type = #tpu.core_type<tc>, window_params = [{transform_indices = @transform_0, window_bounds = array<i64: 512, 144>}, {transform_indices = @transform_1, window_bounds = array<i64: 8, 8>}, {pipeline_mode = #tpu.pipeline_mode<synchronous>, transform_indices = @transform_2, window_bounds = array<i64: 144, 128>}, {pipeline_mode = #tpu.pipeline_mode<synchronous>, transform_indices = @transform_3, window_bounds = array<i64: 1, 128>}, {pipeline_mode = #tpu.pipeline_mode<synchronous>, transform_indices = @transform_4, window_bounds = array<i64: 1152, 512>}, {pipeline_mode = #tpu.pipeline_mode<synchronous>, transform_indices = @transform_5, window_bounds = array<i64: 1152, 256>}, {pipeline_mode = #tpu.pipeline_mode<synchronous>, transform_indices = @transform_6, window_bounds = array<i64: 1, 256>}, {pipeline_mode = #tpu.pipeline_mode<synchronous>, transform_indices = @transform_7, window_bounds = array<i64: 288, 128>}, {pipeline_mode = #tpu.pipeline_mode<synchronous>, transform_indices = @transform_8, window_bounds = array<i64: 2304, 128>}, {pipeline_mode = #tpu.pipeline_mode<synchronous>, transform_indices = @transform_9, window_bounds = array<i64: 1, 128>}, {pipeline_mode = #tpu.pipeline_mode<synchronous>, transform_indices = @transform_10, window_bounds = array<i64: 512, 512>}, {pipeline_mode = #tpu.pipeline_mode<synchronous>, transform_indices = @transform_11, window_bounds = array<i64: 8, 512>}, {pipeline_mode = #tpu.pipeline_mode<synchronous>, transform_indices = @transform_12, window_bounds = array<i64: 1, 512>}, {pipeline_mode = #tpu.pipeline_mode<synchronous>, transform_indices = @transform_13, window_bounds = array<i64: 512, 128>}, {pipeline_mode = #tpu.pipeline_mode<synchronous>, transform_indices = @transform_14, window_bounds = array<i64: 1, 128>}, {pipeline_mode = #tpu.pipeline_mode<synchronous>, transform_indices = @transform_15, window_bounds = array<i64: 128, 64>}, {pipeline_mode = #tpu.pipeline_mode<synchronous>, transform_indices = @transform_16, window_bounds = array<i64: 1, 64>}, {pipeline_mode = #tpu.pipeline_mode<synchronous>, transform_indices = @transform_17, window_bounds = array<i64: 64, 1>}, {pipeline_mode = #tpu.pipeline_mode<synchronous>, transform_indices = @transform_18, window_bounds = array<i64: 1, 1>}, {transform_indices = @transform_19, window_bounds = array<i64: 8, 1>}]} {
    %c0 = arith.constant 0 : index
    %c0_0 = arith.constant 0 : index
    %0 = vector.load %arg1[%c0, %c0_0] : memref<512x144xbf16, #tpu.memory_space<vmem>>, vector<512x144xbf16>
    %c0_1 = arith.constant 0 : index
    %c0_2 = arith.constant 0 : index
    %1 = vector.load %arg3[%c0_1, %c0_2] : memref<144x128xbf16, #tpu.memory_space<vmem>>, vector<144x128xbf16>
    %cst = arith.constant dense<0.000000e+00> : vector<512x128xf32>
    %2 = tpu.matmul %0, %1, %cst {dimension_numbers = #tpu.dot_dimension_numbers<[1], [0], [0], [1], [0, 0, 1, 1], [], []>} : vector<512x144xbf16>, vector<144x128xbf16>, vector<512x128xf32> -> vector<512x128xf32>
    %c0_3 = arith.constant 0 : index
    %c0_4 = arith.constant 0 : index
    %3 = vector.load %arg4[%c0_3, %c0_4] : memref<1x128xf32, #tpu.memory_space<vmem>>, vector<1x128xf32>
    %4 = vector.broadcast %3 : vector<1x128xf32> to vector<512x128xf32>
    %5 = arith.addf %2, %4 : vector<512x128xf32>
    %cst_5 = arith.constant 0.000000e+00 : f32
    %6 = vector.broadcast %cst_5 : f32 to vector<512x128xf32>
    %7 = arith.maximumf %5, %6 : vector<512x128xf32>
    %8 = arith.truncf %7 : vector<512x128xf32> to vector<512x128xbf16>
    %c0_6 = arith.constant 0 : index
    %c0_7 = arith.constant 0 : index
    %9 = vector.load %arg5[%c0_6, %c0_7] : memref<1152x512xbf16, #tpu.memory_space<vmem>>, vector<1152x512xbf16>
    %cst_8 = arith.constant dense<0.000000e+00> : vector<1152x128xf32>
    %10 = tpu.matmul %9, %8, %cst_8 {dimension_numbers = #tpu.dot_dimension_numbers<[1], [0], [0], [1], [0, 0, 1, 1], [], []>} : vector<1152x512xbf16>, vector<512x128xbf16>, vector<1152x128xf32> -> vector<1152x128xf32>
    %11 = arith.truncf %10 : vector<1152x128xf32> to vector<1152x128xbf16>
    %12 = vector.extract_strided_slice %11 {offsets = [0, 0], sizes = [128, 128], strides = [1, 1]} : vector<1152x128xbf16> to vector<128x128xbf16>
    %13 = vector.extract_strided_slice %11 {offsets = [128, 0], sizes = [128, 128], strides = [1, 1]} : vector<1152x128xbf16> to vector<128x128xbf16>
    %14 = vector.extract_strided_slice %11 {offsets = [256, 0], sizes = [128, 128], strides = [1, 1]} : vector<1152x128xbf16> to vector<128x128xbf16>
    %15 = vector.extract_strided_slice %11 {offsets = [384, 0], sizes = [128, 128], strides = [1, 1]} : vector<1152x128xbf16> to vector<128x128xbf16>
    %16 = vector.extract_strided_slice %11 {offsets = [512, 0], sizes = [128, 128], strides = [1, 1]} : vector<1152x128xbf16> to vector<128x128xbf16>
    %17 = vector.extract_strided_slice %11 {offsets = [640, 0], sizes = [128, 128], strides = [1, 1]} : vector<1152x128xbf16> to vector<128x128xbf16>
    %18 = vector.extract_strided_slice %11 {offsets = [768, 0], sizes = [128, 128], strides = [1, 1]} : vector<1152x128xbf16> to vector<128x128xbf16>
    %19 = vector.extract_strided_slice %11 {offsets = [896, 0], sizes = [128, 128], strides = [1, 1]} : vector<1152x128xbf16> to vector<128x128xbf16>
    %20 = vector.extract_strided_slice %11 {offsets = [1024, 0], sizes = [128, 128], strides = [1, 1]} : vector<1152x128xbf16> to vector<128x128xbf16>
    %21 = tpu.concatenate %12, %13, %14, %15, %16, %17, %18, %19, %20 in 1 : vector<128x128xbf16>, vector<128x128xbf16>, vector<128x128xbf16>, vector<128x128xbf16>, vector<128x128xbf16>, vector<128x128xbf16>, vector<128x128xbf16>, vector<128x128xbf16>, vector<128x128xbf16> -> vector<128x1152xbf16>
    %c0_9 = arith.constant 0 : index
    %c0_10 = arith.constant 0 : index
    %22 = vector.load %arg6[%c0_9, %c0_10] : memref<1152x256xbf16, #tpu.memory_space<vmem>>, vector<1152x256xbf16>
    %cst_11 = arith.constant dense<0.000000e+00> : vector<128x256xf32>
    %23 = tpu.matmul %21, %22, %cst_11 {dimension_numbers = #tpu.dot_dimension_numbers<[1], [0], [0], [1], [0, 0, 1, 1], [], []>} : vector<128x1152xbf16>, vector<1152x256xbf16>, vector<128x256xf32> -> vector<128x256xf32>
    %c0_12 = arith.constant 0 : index
    %c0_13 = arith.constant 0 : index
    %24 = vector.load %arg7[%c0_12, %c0_13] : memref<1x256xf32, #tpu.memory_space<vmem>>, vector<1x256xf32>
    %25 = vector.broadcast %24 : vector<1x256xf32> to vector<128x256xf32>
    %26 = arith.addf %23, %25 : vector<128x256xf32>
    %cst_14 = arith.constant 0.000000e+00 : f32
    %27 = vector.broadcast %cst_14 : f32 to vector<128x256xf32>
    %28 = arith.maximumf %26, %27 : vector<128x256xf32>
    %29 = arith.truncf %28 : vector<128x256xf32> to vector<128x256xbf16>
    %c0_15 = arith.constant 0 : index
    %c0_16 = arith.constant 0 : index
    %30 = vector.load %arg8[%c0_15, %c0_16] : memref<288x128xbf16, #tpu.memory_space<vmem>>, vector<288x128xbf16>
    %cst_17 = arith.constant dense<0.000000e+00> : vector<288x256xf32>
    %31 = tpu.matmul %30, %29, %cst_17 {dimension_numbers = #tpu.dot_dimension_numbers<[1], [0], [0], [1], [0, 0, 1, 1], [], []>} : vector<288x128xbf16>, vector<128x256xbf16>, vector<288x256xf32> -> vector<288x256xf32>
    %32 = arith.truncf %31 : vector<288x256xf32> to vector<288x256xbf16>
    %33 = vector.extract_strided_slice %32 {offsets = [0, 0], sizes = [32, 256], strides = [1, 1]} : vector<288x256xbf16> to vector<32x256xbf16>
    %34 = vector.extract_strided_slice %32 {offsets = [32, 0], sizes = [32, 256], strides = [1, 1]} : vector<288x256xbf16> to vector<32x256xbf16>
    %35 = vector.extract_strided_slice %32 {offsets = [64, 0], sizes = [32, 256], strides = [1, 1]} : vector<288x256xbf16> to vector<32x256xbf16>
    %36 = vector.extract_strided_slice %32 {offsets = [96, 0], sizes = [32, 256], strides = [1, 1]} : vector<288x256xbf16> to vector<32x256xbf16>
    %37 = vector.extract_strided_slice %32 {offsets = [128, 0], sizes = [32, 256], strides = [1, 1]} : vector<288x256xbf16> to vector<32x256xbf16>
    %38 = vector.extract_strided_slice %32 {offsets = [160, 0], sizes = [32, 256], strides = [1, 1]} : vector<288x256xbf16> to vector<32x256xbf16>
    %39 = vector.extract_strided_slice %32 {offsets = [192, 0], sizes = [32, 256], strides = [1, 1]} : vector<288x256xbf16> to vector<32x256xbf16>
    %40 = vector.extract_strided_slice %32 {offsets = [224, 0], sizes = [32, 256], strides = [1, 1]} : vector<288x256xbf16> to vector<32x256xbf16>
    %41 = vector.extract_strided_slice %32 {offsets = [256, 0], sizes = [32, 256], strides = [1, 1]} : vector<288x256xbf16> to vector<32x256xbf16>
    %42 = tpu.concatenate %33, %34, %35, %36, %37, %38, %39, %40, %41 in 1 : vector<32x256xbf16>, vector<32x256xbf16>, vector<32x256xbf16>, vector<32x256xbf16>, vector<32x256xbf16>, vector<32x256xbf16>, vector<32x256xbf16>, vector<32x256xbf16>, vector<32x256xbf16> -> vector<32x2304xbf16>
    %c0_18 = arith.constant 0 : index
    %c0_19 = arith.constant 0 : index
    %43 = vector.load %arg9[%c0_18, %c0_19] : memref<2304x128xbf16, #tpu.memory_space<vmem>>, vector<2304x128xbf16>
    %cst_20 = arith.constant dense<0.000000e+00> : vector<32x128xf32>
    %44 = tpu.matmul %42, %43, %cst_20 {dimension_numbers = #tpu.dot_dimension_numbers<[1], [0], [0], [1], [0, 0, 1, 1], [], []>} : vector<32x2304xbf16>, vector<2304x128xbf16>, vector<32x128xf32> -> vector<32x128xf32>
    %c0_21 = arith.constant 0 : index
    %c0_22 = arith.constant 0 : index
    %45 = vector.load %arg10[%c0_21, %c0_22] : memref<1x128xf32, #tpu.memory_space<vmem>>, vector<1x128xf32>
    %46 = vector.broadcast %45 : vector<1x128xf32> to vector<32x128xf32>
    %47 = arith.addf %44, %46 : vector<32x128xf32>
    %cst_23 = arith.constant 0.000000e+00 : f32
    %48 = vector.broadcast %cst_23 : f32 to vector<32x128xf32>
    %49 = arith.maximumf %47, %48 : vector<32x128xf32>
    %50 = vector.extract_strided_slice %49 {offsets = [0, 0], sizes = [8, 128], strides = [1, 1]} : vector<32x128xf32> to vector<8x128xf32>
    %51 = arith.truncf %50 : vector<8x128xf32> to vector<8x128xbf16>
    %52 = vector.extract_strided_slice %49 {offsets = [8, 0], sizes = [8, 128], strides = [1, 1]} : vector<32x128xf32> to vector<8x128xf32>
    %53 = arith.truncf %52 : vector<8x128xf32> to vector<8x128xbf16>
    %54 = vector.extract_strided_slice %49 {offsets = [16, 0], sizes = [8, 128], strides = [1, 1]} : vector<32x128xf32> to vector<8x128xf32>
    %55 = arith.truncf %54 : vector<8x128xf32> to vector<8x128xbf16>
    %56 = vector.extract_strided_slice %49 {offsets = [24, 0], sizes = [8, 128], strides = [1, 1]} : vector<32x128xf32> to vector<8x128xf32>
    %57 = arith.truncf %56 : vector<8x128xf32> to vector<8x128xbf16>
    %58 = tpu.concatenate %51, %53, %55, %57 in 1 : vector<8x128xbf16>, vector<8x128xbf16>, vector<8x128xbf16>, vector<8x128xbf16> -> vector<8x512xbf16>
    %c0_24 = arith.constant 0 : index
    %c0_25 = arith.constant 0 : index
    %59 = vector.load %arg11[%c0_24, %c0_25] : memref<512x512xbf16, #tpu.memory_space<vmem>>, vector<512x512xbf16>
    %cst_26 = arith.constant dense<0.000000e+00> : vector<8x512xf32>
    %60 = tpu.matmul %58, %59, %cst_26 {dimension_numbers = #tpu.dot_dimension_numbers<[1], [0], [0], [1], [0, 0, 1, 1], [], []>} : vector<8x512xbf16>, vector<512x512xbf16>, vector<8x512xf32> -> vector<8x512xf32>
    %c0_27 = arith.constant 0 : index
    %c0_28 = arith.constant 0 : index
    %61 = vector.load %arg2[%c0_27, %c0_28] : memref<8x8xbf16, #tpu.memory_space<vmem>>, vector<8x8xbf16>
    %c0_29 = arith.constant 0 : index
    %c0_30 = arith.constant 0 : index
    %62 = vector.load %arg12[%c0_29, %c0_30] : memref<8x512xbf16, #tpu.memory_space<vmem>>, vector<8x512xbf16>
    %cst_31 = arith.constant dense<0.000000e+00> : vector<8x512xf32>
    %63 = tpu.matmul %61, %62, %cst_31 {dimension_numbers = #tpu.dot_dimension_numbers<[1], [0], [0], [1], [0, 0, 1, 1], [], []>} : vector<8x8xbf16>, vector<8x512xbf16>, vector<8x512xf32> -> vector<8x512xf32>
    %64 = arith.addf %60, %63 : vector<8x512xf32>
    %c0_32 = arith.constant 0 : index
    %c0_33 = arith.constant 0 : index
    %65 = vector.load %arg13[%c0_32, %c0_33] : memref<1x512xf32, #tpu.memory_space<vmem>>, vector<1x512xf32>
    %66 = vector.broadcast %65 : vector<1x512xf32> to vector<8x512xf32>
    %67 = arith.addf %64, %66 : vector<8x512xf32>
    %cst_34 = arith.constant 0.000000e+00 : f32
    %68 = vector.broadcast %cst_34 : f32 to vector<8x512xf32>
    %69 = arith.maximumf %67, %68 : vector<8x512xf32>
    %c0_35 = arith.constant 0 : index
    %c0_36 = arith.constant 0 : index
    %70 = vector.load %arg14[%c0_35, %c0_36] : memref<512x128xbf16, #tpu.memory_space<vmem>>, vector<512x128xbf16>
    %71 = arith.truncf %69 : vector<8x512xf32> to vector<8x512xbf16>
    %cst_37 = arith.constant dense<0.000000e+00> : vector<8x128xf32>
    %72 = tpu.matmul %71, %70, %cst_37 {dimension_numbers = #tpu.dot_dimension_numbers<[1], [0], [0], [1], [0, 0, 1, 1], [], []>} : vector<8x512xbf16>, vector<512x128xbf16>, vector<8x128xf32> -> vector<8x128xf32>
    %c0_38 = arith.constant 0 : index
    %c0_39 = arith.constant 0 : index
    %73 = vector.load %arg15[%c0_38, %c0_39] : memref<1x128xf32, #tpu.memory_space<vmem>>, vector<1x128xf32>
    %74 = vector.broadcast %73 : vector<1x128xf32> to vector<8x128xf32>
    %75 = arith.addf %72, %74 : vector<8x128xf32>
    %cst_40 = arith.constant 0.000000e+00 : f32
    %76 = vector.broadcast %cst_40 : f32 to vector<8x128xf32>
    %77 = arith.maximumf %75, %76 : vector<8x128xf32>
    %c0_41 = arith.constant 0 : index
    %c0_42 = arith.constant 0 : index
    %78 = vector.load %arg16[%c0_41, %c0_42] : memref<128x64xbf16, #tpu.memory_space<vmem>>, vector<128x64xbf16>
    %79 = arith.truncf %77 : vector<8x128xf32> to vector<8x128xbf16>
    %cst_43 = arith.constant dense<0.000000e+00> : vector<8x64xf32>
    %80 = tpu.matmul %79, %78, %cst_43 {dimension_numbers = #tpu.dot_dimension_numbers<[1], [0], [0], [1], [0, 0, 1, 1], [], []>} : vector<8x128xbf16>, vector<128x64xbf16>, vector<8x64xf32> -> vector<8x64xf32>
    %c0_44 = arith.constant 0 : index
    %c0_45 = arith.constant 0 : index
    %81 = vector.load %arg17[%c0_44, %c0_45] : memref<1x64xf32, #tpu.memory_space<vmem>>, vector<1x64xf32>
    %82 = vector.broadcast %81 : vector<1x64xf32> to vector<8x64xf32>
    %83 = arith.addf %80, %82 : vector<8x64xf32>
    %cst_46 = arith.constant 0.000000e+00 : f32
    %84 = vector.broadcast %cst_46 : f32 to vector<8x64xf32>
    %85 = arith.maximumf %83, %84 : vector<8x64xf32>
    %c0_47 = arith.constant 0 : index
    %c0_48 = arith.constant 0 : index
    %86 = vector.load %arg18[%c0_47, %c0_48] : memref<64x1xbf16, #tpu.memory_space<vmem>>, vector<64x1xbf16>
    %87 = arith.truncf %85 : vector<8x64xf32> to vector<8x64xbf16>
    %cst_49 = arith.constant dense<0.000000e+00> : vector<8x1xf32>
    %88 = tpu.matmul %87, %86, %cst_49 {dimension_numbers = #tpu.dot_dimension_numbers<[1], [0], [0], [1], [0, 0, 1, 1], [], []>} : vector<8x64xbf16>, vector<64x1xbf16>, vector<8x1xf32> -> vector<8x1xf32>
    %c0_50 = arith.constant 0 : index
    %c0_51 = arith.constant 0 : index
    %89 = vector.load %arg19[%c0_50, %c0_51] : memref<1x1xf32, #tpu.memory_space<vmem>>, vector<1x1xf32>
    %90 = vector.broadcast %89 : vector<1x1xf32> to vector<8x1xf32>
    %91 = arith.addf %88, %90 : vector<8x1xf32>
    %c0_52 = arith.constant 0 : index
    %c0_53 = arith.constant 0 : index
    %92 = vector.load %arg20[%c0_52, %c0_53] : memref<8x1xf32, #tpu.memory_space<vmem>>, vector<8x1xf32>
    tpu.vector_store %arg20[%c0_52, %c0_53], %91 {strides = array<i32>} : memref<8x1xf32, #tpu.memory_space<vmem>>, vector<8x1xf32>,
    return
  }
  func.func @transform_0(%arg0: i32) -> (i32, i32) {
    %c0_i32 = arith.constant 0 : i32
    %c0_i32_0 = arith.constant 0 : i32
    return %arg0, %c0_i32 : i32, i32
  }
  func.func @transform_1(%arg0: i32) -> (i32, i32) {
    %c0_i32 = arith.constant 0 : i32
    %c0_i32_0 = arith.constant 0 : i32
    return %arg0, %c0_i32 : i32, i32
  }
  func.func @transform_2(%arg0: i32) -> (i32, i32) {
    %c0_i32 = arith.constant 0 : i32
    %c0_i32_0 = arith.constant 0 : i32
    %c0_i32_1 = arith.constant 0 : i32
    return %c0_i32, %c0_i32_0 : i32, i32
  }
  func.func @transform_3(%arg0: i32) -> (i32, i32) {
    %c0_i32 = arith.constant 0 : i32
    %c0_i32_0 = arith.constant 0 : i32
    %c0_i32_1 = arith.constant 0 : i32
    return %c0_i32, %c0_i32_0 : i32, i32
  }
  func.func @transform_4(%arg0: i32) -> (i32, i32) {
    %c0_i32 = arith.constant 0 : i32
    %c0_i32_0 = arith.constant 0 : i32
    %c0_i32_1 = arith.constant 0 : i32
    return %c0_i32, %c0_i32_0 : i32, i32
  }
  func.func @transform_5(%arg0: i32) -> (i32, i32) {
    %c0_i32 = arith.constant 0 : i32
    %c0_i32_0 = arith.constant 0 : i32
    %c0_i32_1 = arith.constant 0 : i32
    return %c0_i32, %c0_i32_0 : i32, i32
  }
  func.func @transform_6(%arg0: i32) -> (i32, i32) {
    %c0_i32 = arith.constant 0 : i32
    %c0_i32_0 = arith.constant 0 : i32
    %c0_i32_1 = arith.constant 0 : i32
    return %c0_i32, %c0_i32_0 : i32, i32
  }
  func.func @transform_7(%arg0: i32) -> (i32, i32) {
    %c0_i32 = arith.constant 0 : i32
    %c0_i32_0 = arith.constant 0 : i32
    %c0_i32_1 = arith.constant 0 : i32
    return %c0_i32, %c0_i32_0 : i32, i32
  }
  func.func @transform_8(%arg0: i32) -> (i32, i32) {
    %c0_i32 = arith.constant 0 : i32
    %c0_i32_0 = arith.constant 0 : i32
    %c0_i32_1 = arith.constant 0 : i32
    return %c0_i32, %c0_i32_0 : i32, i32
  }
  func.func @transform_9(%arg0: i32) -> (i32, i32) {
    %c0_i32 = arith.constant 0 : i32
    %c0_i32_0 = arith.constant 0 : i32
    %c0_i32_1 = arith.constant 0 : i32
    return %c0_i32, %c0_i32_0 : i32, i32
  }
  func.func @transform_10(%arg0: i32) -> (i32, i32) {
    %c0_i32 = arith.constant 0 : i32
    %c0_i32_0 = arith.constant 0 : i32
    %c0_i32_1 = arith.constant 0 : i32
    return %c0_i32, %c0_i32_0 : i32, i32
  }
  func.func @transform_11(%arg0: i32) -> (i32, i32) {
    %c0_i32 = arith.constant 0 : i32
    %c0_i32_0 = arith.constant 0 : i32
    %c0_i32_1 = arith.constant 0 : i32
    return %c0_i32, %c0_i32_0 : i32, i32
  }
  func.func @transform_12(%arg0: i32) -> (i32, i32) {
    %c0_i32 = arith.constant 0 : i32
    %c0_i32_0 = arith.constant 0 : i32
    %c0_i32_1 = arith.constant 0 : i32
    return %c0_i32, %c0_i32_0 : i32, i32
  }
  func.func @transform_13(%arg0: i32) -> (i32, i32) {
    %c0_i32 = arith.constant 0 : i32
    %c0_i32_0 = arith.constant 0 : i32
    %c0_i32_1 = arith.constant 0 : i32
    return %c0_i32, %c0_i32_0 : i32, i32
  }
  func.func @transform_14(%arg0: i32) -> (i32, i32) {
    %c0_i32 = arith.constant 0 : i32
    %c0_i32_0 = arith.constant 0 : i32
    %c0_i32_1 = arith.constant 0 : i32
    return %c0_i32, %c0_i32_0 : i32, i32
  }
  func.func @transform_15(%arg0: i32) -> (i32, i32) {
    %c0_i32 = arith.constant 0 : i32
    %c0_i32_0 = arith.constant 0 : i32
    %c0_i32_1 = arith.constant 0 : i32
    return %c0_i32, %c0_i32_0 : i32, i32
  }
  func.func @transform_16(%arg0: i32) -> (i32, i32) {
    %c0_i32 = arith.constant 0 : i32
    %c0_i32_0 = arith.constant 0 : i32
    %c0_i32_1 = arith.constant 0 : i32
    return %c0_i32, %c0_i32_0 : i32, i32
  }
  func.func @transform_17(%arg0: i32) -> (i32, i32) {
    %c0_i32 = arith.constant 0 : i32
    %c0_i32_0 = arith.constant 0 : i32
    %c0_i32_1 = arith.constant 0 : i32
    return %c0_i32, %c0_i32_0 : i32, i32
  }
  func.func @transform_18(%arg0: i32) -> (i32, i32) {
    %c0_i32 = arith.constant 0 : i32
    %c0_i32_0 = arith.constant 0 : i32
    %c0_i32_1 = arith.constant 0 : i32
    return %c0_i32, %c0_i32_0 : i32, i32
  }
  func.func @transform_19(%arg0: i32) -> (i32, i32) {
    %c0_i32 = arith.constant 0 : i32
    %c0_i32_0 = arith.constant 0 : i32
    return %arg0, %c0_i32 : i32, i32
  }
}

</mosaic_0001>

<bundles_post_ra>
// kernel: multi_branch_cnn_critic.1
= control target key start
LH: loop header
LB: loop body
LE: loop exit
PB: predicated region body
PF: predicated region fallthrough
CT: control target
= control target key end

     0   :  { %vm493_vm0 = vcmask 130048   ;;  %vm8813_vm1 = vcmask 1043456   ;;  %vm8809_vm2 = vcmask 64512   ;;  %vm10181_vm3 = vcmask 523264   ;;  %s21641_s2 = inlined_call_operand.vmem [shape: bf16[144,128], index: 2, kind: input, shape index: {}]   ;;  %s21642_s0 = inlined_call_operand.vmem [shape: bf16[512,144], index: 0, kind: input, shape index: {}]   ;;  %s21643_s3 = inlined_call_operand.vmem [shape: f32[1,128], index: 3, kind: input, shape index: {}]   ;;  %s21644_s4 = inlined_call_operand.vmem [shape: bf16[1152,512], index: 4, kind: input, shape index: {}]   ;;  %s21645_s5 = inlined_call_operand.vmem [shape: bf16[1152,256], index: 5, kind: input, shape index: {}]   ;;  %s21646_s6 = inlined_call_operand.vmem [shape: f32[1,256], index: 6, kind: input, shape index: {}]   ;;  %s21647_s7 = inlined_call_operand.vmem [shape: bf16[288,128], index: 7, kind: input, shape index: {}]   ;;  %s21648_s8 = inlined_call_operand.vmem [shape: bf16[2304,128], index: 8, kind: input, shape index: {}]   ;;  %s21649_s9 = inlined_call_operand.vmem [shape: f32[1,128], index: 9, kind: input, shape index: {}]   ;;  %s21650_s10 = inlined_call_operand.vmem [shape: bf16[512,512], index: 10, kind: input, shape index: {}]   ;;  %s21651_s11 = inlined_call_operand.vmem [shape: bf16[8,512], index: 11, kind: input, shape index: {}]   ;;  %s21652_s1 = inlined_call_operand.vmem [shape: bf16[8,8], index: 1, kind: input, shape index: {}]   ;;  %s21653_s14 = inlined_call_operand.vmem [shape: f32[1,128], index: 14, kind: input, shape index: {}]   ;;  %s21654_s13 = inlined_call_operand.vmem [shape: bf16[512,128], index: 13, kind: input, shape index: {}]   ;;  %s21655_s12 = inlined_call_operand.vmem [shape: f32[1,512], index: 12, kind: input, shape index: {}]   ;;  %s21656_s15 = inlined_call_operand.vmem [shape: bf16[128,64], index: 15, kind: input, shape index: {}]   ;;  %s21657_s16 = inlined_call_operand.vmem [shape: f32[1,64], index: 16, kind: input, shape index: {}]   ;;  %s21658_s17 = inlined_call_operand.vmem [shape: bf16[64,1], index: 17, kind: input, shape index: {}]   ;;  %s21659_s18 = inlined_call_operand.<no memory space> [shape: f32[1,1], index: 18, kind: input, shape index: {}]   ;;  %s21660_s19 = inlined_call_operand.vmem [shape: f32[8,1], index: 19, kind: output, shape index: {}]  }
   0x1   :  { %21724 = sst [smem:[#allocation86_spill]] %s21641_s2  ;;  %vm10198_vm4 = vcmask 7168  }
   0x2   :  { %21725 = sst [smem:[#allocation87_spill]] %s21642_s0 }
   0x3   :  { %21726 = sst [smem:[#allocation88_spill]] %s21643_s3 }
   0x4   :  { %21727 = sst [smem:[#allocation89_spill]] %s21644_s4 }
   0x5   :  { %s21728_s20 = sld [smem:[#allocation86_spill]] }
   0x6   :  { %s21729_s25 = sld [smem:[#allocation87_spill]] }
   0x7   :  { %s21730_s2 = sld [smem:[#allocation88_spill]] }
   0x8   :  { %s21731_s30 = sld [smem:[#allocation89_spill]] }
   0xb   :  { %v13668_v0 = vld [vmem:[%s21728_s20 + $0x38] sm:$0xff]  ;;  %v13667_v1 = vld [vmem:[%s21728_s20 + $0x30] sm:$0xff]  ;;  %v13669_v2 = vld [vmem:[%s21728_s20 + $0x40] sm:$0xff] }
   0xc   :  { %590 = vmatpush.bf16.msra.mxu0 %v13668_v0  ;;  %v13597_v3 = vld [vmem:[%s21729_s25 + $0x4] sm:$0xf]  ;;  %v10208_v4 = vld [vmem:[%s21729_s25 + $0x8] sm:$0xf0]  ;;  %766 = vmatpush.bf16.msra.mxu1 %v13669_v2  ;;  %v13664_v8 = vld [vmem:[%s21728_s20 + $0x18] sm:$0xff] }
   0xd   :  { %v10211_v5 = vor.u32 %v13597_v3, %v10208_v4  ;;  %v13666_v6 = vld [vmem:[%s21728_s20 + $0x28] sm:$0xff]  ;;  %v13665_v7 = vld [vmem:[%s21728_s20 + $0x20] sm:$0xff]  ;;  %v13599_v9 = vld [vmem:[%s21729_s25 + $0x14] sm:$0xf] }
   0xe   :  { %v10216_v10 = vld [vmem:[%s21729_s25 + $0x18] sm:$0xf0]  ;;  %v13663_v11 = vld [vmem:[%s21728_s20 + $0x10] sm:$0xff]  ;;  %v13662_v13 = vld [vmem:[%s21728_s20 + $0x8] sm:$0xff] }
   0xf   :  { %10496 = vmatmul.msk.bf16.vlgmr.msra.gmra.mxu1 %vm493_vm0, %v10211_v5  ;;  %v10219_v12 = vor.u32 %v13599_v9, %v10216_v10  ;;  %v13661_v14 = vld [vmem:[%s21728_s20] sm:$0xff]  ;;  %v13598_v16 = vld [vmem:[%s21729_s25 + $0x4] sm:$0xf0]  ;;  %v10224_v19 = vld [vmem:[%s21729_s25 + $0x28] sm:$0xf0] }
  0x10   :  { %591 = vmatpush.bf16.msra.mxu0 %v13667_v1  ;;  %v10206_v15 = vld [vmem:[%s21729_s25] sm:$0xf]  ;;  %v13601_v18 = vld [vmem:[%s21729_s25 + $0x24] sm:$0xf]  ;;  %v10214_v21 = vld [vmem:[%s21729_s25 + $0x10] sm:$0xf] }
  0x11   :  { %v10207_v17 = vor.u32 %v13598_v16, %v10206_v15  ;;  %v10227_v20 = vor.u32 %v13601_v18, %v10224_v19  ;;  %v13600_v22 = vld [vmem:[%s21729_s25 + $0x14] sm:$0xf0]  ;;  %v13603_v24 = vld [vmem:[%s21729_s25 + $0x34] sm:$0xf]  ;;  %v10232_v25 = vld [vmem:[%s21729_s25 + $0x38] sm:$0xf0] }
  0x12   :  { %v10215_v23 = vor.u32 %v13600_v22, %v10214_v21  ;;  %v10235_v26 = vor.u32 %v13603_v24, %v10232_v25  ;;  %v10222_v27 = vld [vmem:[%s21729_s25 + $0x20] sm:$0xf]  ;;  %v13602_v28 = vld [vmem:[%s21729_s25 + $0x24] sm:$0xf0]  ;;  %v13605_v30 = vld [vmem:[%s21729_s25 + $0x44] sm:$0xf] }
  0x13   :  { %v10223_v29 = vor.u32 %v13602_v28, %v10222_v27  ;;  %v10240_v31 = vld [vmem:[%s21729_s25 + $0x48] sm:$0xf0]  ;;  %v10230_v33 = vld [vmem:[%s21729_s25 + $0x30] sm:$0xf]  ;;  %v13604_v34 = vld [vmem:[%s21729_s25 + $0x34] sm:$0xf0] }
  0x14   :  { %592 = vmatpush.bf16.msra.mxu0 %v13666_v6  ;;  %v10243_v32 = vor.u32 %v13605_v30, %v10240_v31  ;;  %v10231_v35 = vor.u32 %v13604_v34, %v10230_v33  ;;  %v13607_v36 = vld [vmem:[%s21729_s25 + $0x54] sm:$0xf]  ;;  %v10248_v37 = vld [vmem:[%s21729_s25 + $0x58] sm:$0xf0]  ;;  %v10238_v39 = vld [vmem:[%s21729_s25 + $0x40] sm:$0xf] }
  0x15   :  { %v10251_v38 = vor.u32 %v13607_v36, %v10248_v37  ;;  %v13606_v40 = vld [vmem:[%s21729_s25 + $0x44] sm:$0xf0]  ;;  %v13609_v42 = vld [vmem:[%s21729_s25 + $0x64] sm:$0xf]  ;;  %v10256_v43 = vld [vmem:[%s21729_s25 + $0x68] sm:$0xf0] }
  0x16   :  { %v10239_v41 = vor.u32 %v13606_v40, %v10238_v39  ;;  %v10259_v44 = vor.u32 %v13609_v42, %v10256_v43  ;;  %v10246_v45 = vld [vmem:[%s21729_s25 + $0x50] sm:$0xf]  ;;  %v13608_v46 = vld [vmem:[%s21729_s25 + $0x54] sm:$0xf0]  ;;  %v13611_v48 = vld [vmem:[%s21729_s25 + $0x74] sm:$0xf] }
  0x17   :  { %v10247_v47 = vor.u32 %v13608_v46, %v10246_v45  ;;  %v10264_v49 = vld [vmem:[%s21729_s25 + $0x78] sm:$0xf0]  ;;  %v10254_v51 = vld [vmem:[%s21729_s25 + $0x60] sm:$0xf]  ;;  %v13610_v52 = vld [vmem:[%s21729_s25 + $0x64] sm:$0xf0] }
  0x18   :  { %593 = vmatpush.bf16.msra.mxu0 %v13665_v7  ;;  %v10267_v50 = vor.u32 %v13611_v48, %v10264_v49  ;;  %v10255_v53 = vor.u32 %v13610_v52, %v10254_v51  ;;  %v13613_v54 = vld [vmem:[%s21729_s25 + $0x84] sm:$0xf]  ;;  %v10272_v55 = vld [vmem:[%s21729_s25 + $0x88] sm:$0xf0]  ;;  %v10262_v58 = vld [vmem:[%s21729_s25 + $0x70] sm:$0xf] }
  0x19   :  { %v10275_v56 = vor.u32 %v13613_v54, %v10272_v55  ;;  %v13612_v59 = vld [vmem:[%s21729_s25 + $0x74] sm:$0xf0]  ;;  %v13615_v62 = vld [vmem:[%s21729_s25 + $0x94] sm:$0xf]  ;;  %v10280_v63 = vld [vmem:[%s21729_s25 + $0x98] sm:$0xf0] }
  0x1a   :  { %v10263_v61 = vor.u32 %v13612_v59, %v10262_v58  ;;  %v10283_v0 = vor.u32 %v13615_v62, %v10280_v63  ;;  %v10270_v2 = vld [vmem:[%s21729_s25 + $0x80] sm:$0xf]  ;;  %v13614_v3 = vld [vmem:[%s21729_s25 + $0x84] sm:$0xf0]  ;;  %v13617_v9 = vld [vmem:[%s21729_s25 + $0xa4] sm:$0xf] }
  0x1b   :  { %v14698_v4 = vld [vmem:[%s21730_s2] ss:$0 sm:$0xff]  ;;  %v10271_v6 = vor.u32 %v13614_v3, %v10270_v2  ;;  %v10288_v10 = vld [vmem:[%s21729_s25 + $0xa8] sm:$0xf0]  ;;  %v13616_v18 = vld [vmem:[%s21729_s25 + $0x94] sm:$0xf0] }
  0x1c   :  { %594 = vmatpush.bf16.msra.mxu0 %v13664_v8  ;;  %v10296_v27 = vld [vmem:[%s21729_s25 + $0xb8] sm:$0xf0]  ;;  %v10286_v34 = vld [vmem:[%s21729_s25 + $0xa0] sm:$0xf]  ;;  %v13621_v43 = vld [vmem:[%s21729_s25 + $0xc4] sm:$0xf] }
  0x1d   :  { %v10294_v51 = vld [vmem:[%s21729_s25 + $0xb0] sm:$0xf]  ;;  %v13620_v52 = vld [vmem:[%s21729_s25 + $0xb4] sm:$0xf0] }
  0x1f   :  { %10497 = vmatmul.msk.bf16.gmra.mxu1 %vm493_vm0, %v10219_v12  ;;  %v10291_v12 = vor.u32 %v13617_v9, %v10288_v10 }
  0x20   :  { %595 = vmatpush.bf16.msra.mxu0 %v13663_v11 }
  0x24   :  { %596 = vmatpush.bf16.msra.mxu0 %v13662_v13 }
  0x28   :  { %597 = vmatpush.bf16.msra.mxu0 %v13661_v14 }
  0x2b   :  { %598 = vmatmul.bf16.vlgmr.msra.gmra.mxu0 %v10207_v17  ;;  %v10278_v17 = vld [vmem:[%s21729_s25 + $0x90] sm:$0xf] }
  0x2c   :  { %v10279_v22 = vor.u32 %v13616_v18, %v10278_v17 }
  0x2f   :  { %10498 = vmatmul.msk.bf16.gmra.mxu1 %vm493_vm0, %v10227_v20 }
  0x3b   :  { %603 = vmatmul.bf16.gmra.mxu0 %v10215_v23 }
  0x3f   :  { %10499 = vmatmul.msk.bf16.gmra.mxu1 %vm493_vm0, %v10235_v26  ;;  %v13619_v26 = vld [vmem:[%s21729_s25 + $0xb4] sm:$0xf] }
  0x4b   :  { %608 = vmatmul.bf16.gmra.mxu0 %v10223_v29  ;;  %v10299_v29 = vor.u32 %v13619_v26, %v10296_v27  ;;  %v13627_v26 = vld [vmem:[%s21729_s25 + $0xf4] sm:$0xf]  ;;  %v10328_v27 = vld [vmem:[%s21729_s25 + $0xf8] sm:$0xf0] }
  0x4f   :  { %10500 = vmatmul.msk.bf16.gmra.mxu1 %vm493_vm0, %v10243_v32 }
  0x5b   :  { %613 = vmatmul.bf16.gmra.mxu0 %v10231_v35  ;;  %v13618_v35 = vld [vmem:[%s21729_s25 + $0xa4] sm:$0xf0] }
  0x5c   :  { %v10287_v39 = vor.u32 %v13618_v35, %v10286_v34 }
  0x5f   :  { %10501 = vmatmul.msk.bf16.gmra.mxu1 %vm493_vm0, %v10251_v38 }
  0x6b   :  { %618 = vmatmul.bf16.gmra.mxu0 %v10239_v41 }
  0x6f   :  { %10502 = vmatmul.msk.bf16.gmra.mxu1 %vm493_vm0, %v10259_v44  ;;  %v10304_v44 = vld [vmem:[%s21729_s25 + $0xc8] sm:$0xf0] }
  0x70   :  { %v10307_v46 = vor.u32 %v13621_v43, %v10304_v44  ;;  %v13628_v43 = vld [vmem:[%s21729_s25 + $0xf4] sm:$0xf0] }
  0x7b   :  { %623 = vmatmul.bf16.gmra.mxu0 %v10247_v47 }
  0x7f   :  { %10503 = vmatmul.msk.bf16.gmra.mxu1 %vm493_vm0, %v10267_v50 }
  0x8b   :  { %628 = vmatmul.bf16.gmra.mxu0 %v10255_v53 }
  0x8c   :  { %v768_v57 = vpop.f32.mrf.mxu1 }
  0x8f   :  { %10504 = vmatmul.msk.bf16.gmra.mxu1 %vm493_vm0, %v10275_v56  ;;  %v10295_v56 = vor.u32 %v13620_v52, %v10294_v51 }
  0x94   :  { %v770_v60 = vpop.f32.mrf.mxu1 }
  0x9b   :  { %633 = vmatmul.bf16.gmra.mxu0 %v10263_v61  ;;  %v10312_v61 = vld [vmem:[%s21729_s25 + $0xd8] sm:$0xf0] }
  0x9c   :  { %v773_v1 = vpop.f32.mrf.mxu1 }
  0x9f   :  { %10505 = vmatmul.msk.bf16.gmra.mxu1 %vm493_vm0, %v10283_v0 }
  0xa4   :  { %v775_v5 = vpop.f32.mrf.mxu1 }
  0xa8   :  { %v599_v7 = vpop.f32.mrf.mxu0 }
  0xa9   :  { %v600_v8 = vadd.f32 %v14698_v4, %v599_v7 }
  0xab   :  { %v769_v11 = vadd.f32 %v768_v57, %v600_v8  ;;  %638 = vmatmul.bf16.gmra.mxu0 %v10271_v6  ;;  %v13622_v6 = vld [vmem:[%s21729_s25 + $0xc4] sm:$0xf0] }
  0xac   :  { %v778_v13 = vpop.f32.mrf.mxu1 }
  0xad   :  { %v928_v19 = vmax.f32 %v769_v11, 0.0 }
  0xaf   :  { %10506 = vmatmul.msk.bf16.gmra.mxu1 %vm493_vm0, %v10291_v12 }
  0xb0   :  { %v601_v14 = vpop.f32.mrf.mxu0 }
  0xb1   :  { %v602_v15 = vadd.f32 %v14698_v4, %v601_v14  ;;  %v13625_v14 = vld [vmem:[%s21729_s25 + $0xe4] sm:$0xf] }
  0xb3   :  { %v771_v16 = vadd.f32 %v770_v60, %v602_v15  ;;  %v13623_v60 = vld [vmem:[%s21729_s25 + $0xd4] sm:$0xf]  ;;  %v10320_v15 = vld [vmem:[%s21729_s25 + $0xe8] sm:$0xf0] }
  0xb4   :  { %v780_v21 = vpop.f32.mrf.mxu1  ;;  %v10315_v63 = vor.u32 %v13623_v60, %v10312_v61  ;;  %v10323_v17 = vor.u32 %v13625_v14, %v10320_v15 }
  0xb5   :  { %v929_v20 = vmax.f32 %v771_v16, 0.0 }
  0xb7   :  { %v14715_v23 = vpack.c.bf16 %v929_v20, %v928_v19  ;;  %v10310_v20 = vld [vmem:[%s21729_s25 + $0xd0] sm:$0xf] }
  0xb8   :  { %v604_v24 = vpop.f32.mrf.mxu0 }
  0xb9   :  { %v605_v25 = vadd.f32 %v14698_v4, %v604_v24 }
  0xbb   :  { %v774_v28 = vadd.f32 %v773_v1, %v605_v25  ;;  %643 = vmatmul.bf16.gmra.mxu0 %v10279_v22 }
  0xbc   :  { %v783_v30 = vpop.f32.mrf.mxu1 }
  0xbd   :  { %v930_v36 = vmax.f32 %v774_v28, 0.0  ;;  %v10331_v28 = vor.u32 %v13627_v26, %v10328_v27 }
  0xbf   :  { %10507 = vmatmul.msk.bf16.gmra.mxu1 %vm493_vm0, %v10299_v29 }
  0xc0   :  { %v606_v31 = vpop.f32.mrf.mxu0 }
  0xc1   :  { %v607_v32 = vadd.f32 %v14698_v4, %v606_v31  ;;  %v10318_v31 = vld [vmem:[%s21729_s25 + $0xe0] sm:$0xf] }
  0xc3   :  { %v776_v33 = vadd.f32 %v775_v5, %v607_v32  ;;  %v10302_v5 = vld [vmem:[%s21729_s25 + $0xc0] sm:$0xf]  ;;  %v13626_v32 = vld [vmem:[%s21729_s25 + $0xe4] sm:$0xf0] }
  0xc4   :  { %v785_v38 = vpop.f32.mrf.mxu1  ;;  %v10303_v10 = vor.u32 %v13622_v6, %v10302_v5  ;;  %v10319_v34 = vor.u32 %v13626_v32, %v10318_v31 }
  0xc5   :  { %v931_v37 = vmax.f32 %v776_v33, 0.0 }
  0xc7   :  { %v14732_v40 = vpack.c.bf16 %v931_v37, %v930_v36  ;;  %v13629_v36 = vld [vmem:[%s21729_s25 + $0x104] sm:$0xf]  ;;  %v10336_v37 = vld [vmem:[%s21729_s25 + $0x108] sm:$0xf0] }
  0xc8   :  { %v609_v41 = vpop.f32.mrf.mxu0 }
  0xc9   :  { %v610_v42 = vadd.f32 %v14698_v4, %v609_v41 }
  0xcb   :  { %v779_v45 = vadd.f32 %v778_v13, %v610_v42  ;;  %648 = vmatmul.bf16.gmra.mxu0 %v10287_v39  ;;  %v10326_v42 = vld [vmem:[%s21729_s25 + $0xf0] sm:$0xf] }
  0xcc   :  { %v788_v47 = vpop.f32.mrf.mxu1 }
  0xcd   :  { %v932_v53 = vmax.f32 %v779_v45, 0.0  ;;  %v10327_v45 = vor.u32 %v13628_v43, %v10326_v42  ;;  %v13635_v42 = vld [vmem:[%s21729_s25 + $0x134] sm:$0xf]  ;;  %v10360_v43 = vld [vmem:[%s21729_s25 + $0x138] sm:$0xf0] }
  0xcf   :  { %10508 = vmatmul.msk.bf16.gmra.mxu1 %vm493_vm0, %v10307_v46 }
  0xd0   :  { %v611_v48 = vpop.f32.mrf.mxu0 }
  0xd1   :  { %v612_v49 = vadd.f32 %v14698_v4, %v611_v48  ;;  %v10344_v48 = vld [vmem:[%s21729_s25 + $0x118] sm:$0xf0] }
  0xd3   :  { %v781_v50 = vadd.f32 %v780_v21, %v612_v49  ;;  %v13624_v21 = vld [vmem:[%s21729_s25 + $0xd4] sm:$0xf0] }
  0xd4   :  { %v14749_v55 = vpop.f32.mrf.mxu1  ;;  %v10311_v24 = vor.u32 %v13624_v21, %v10310_v20 }
  0xd5   :  { %v933_v54 = vmax.f32 %v781_v50, 0.0 }
  0xd7   :  { %v14751_v57 = vpack.c.bf16 %v933_v54, %v932_v53 }
  0xd8   :  { %v614_v58 = vpop.f32.mrf.mxu0 }
  0xd9   :  { %v615_v59 = vadd.f32 %v14698_v4, %v614_v58 }
  0xdb   :  { %v784_v62 = vadd.f32 %v783_v30, %v615_v59  ;;  %653 = vmatmul.bf16.gmra.mxu0 %v10295_v56 }
  0xdc   :  { %v14760_v0 = vpop.f32.mrf.mxu1 }
  0xdd   :  { %v934_v7 = vmax.f32 %v784_v62, 0.0  ;;  %v10334_v62 = vld [vmem:[%s21729_s25 + $0x100] sm:$0xf] }
  0xdf   :  { %10509 = vmatmul.msk.bf16.gmra.mxu1 %vm493_vm0, %v10315_v63  ;;  %v13630_v63 = vld [vmem:[%s21729_s25 + $0x104] sm:$0xf0] }
  0xe0   :  { %v616_v1 = vpop.f32.mrf.mxu0 }
  0xe1   :  { %v617_v2 = vadd.f32 %v14698_v4, %v616_v1 }
  0xe3   :  { %v786_v3 = vadd.f32 %v785_v38, %v617_v2  ;;  %v10339_v38 = vor.u32 %v13629_v36, %v10336_v37 }
  0xe4   :  { %v14770_v9 = vpop.f32.mrf.mxu1 }
  0xe5   :  { %v935_v8 = vmax.f32 %v786_v3, 0.0 }
  0xe7   :  { %v14772_v11 = vpack.c.bf16 %v935_v8, %v934_v7 }
  0xe8   :  { %v619_v12 = vpop.f32.mrf.mxu0 }
  0xe9   :  { %v620_v13 = vadd.f32 %v14698_v4, %v619_v12  ;;  %v10335_v12 = vor.u32 %v13630_v63, %v10334_v62  ;;  %v10368_v62 = vld [vmem:[%s21729_s25 + $0x148] sm:$0xf0] }
  0xeb   :  { %v14781_v16 = vadd.f32 %v788_v47, %v620_v13  ;;  %658 = vmatmul.bf16.gmra.mxu0 %v10303_v10  ;;  %v13631_v47 = vld [vmem:[%s21729_s25 + $0x114] sm:$0xf] }
  0xec   :  { %v798_v18 = vpop.f32.mrf.mxu1  ;;  %v10347_v50 = vor.u32 %v13631_v47, %v10344_v48 }
  0xef   :  { %10510 = vmatmul.msk.bf16.gmra.mxu1 %vm493_vm0, %v10323_v17 }
  0xf0   :  { %v621_v19 = vpop.f32.mrf.mxu0 }
  0xf1   :  { %v622_v6 = vadd.f32 %v14698_v4, %v621_v19  ;;  %v10352_v19 = vld [vmem:[%s21729_s25 + $0x128] sm:$0xf0] }
  0xf4   :  { %v800_v22 = vpop.f32.mrf.mxu1 }
  0xf8   :  { %v624_v25 = vpop.f32.mrf.mxu0 }
  0xf9   :  { %v625_v1 = vadd.f32 %v14698_v4, %v624_v25 }
  0xfb   :  { %663 = vmatmul.bf16.gmra.mxu0 %v10311_v24  ;;  %v794_v15 = vadd.f32 %v14760_v0, %v625_v1 }
  0xfc   :  { %v803_v29 = vpop.f32.mrf.mxu1 }
  0xfd   :  { %v938_v25 = vmax.f32 %v794_v15, 0.0 }
  0xff   :  { %10511 = vmatmul.msk.bf16.gmra.mxu1 %vm493_vm0, %v10331_v28 }
 0x100   :  { %v626_v30 = vpop.f32.mrf.mxu0 }
 0x101   :  { %v627_v59 = vadd.f32 %v14698_v4, %v626_v30  ;;  %v936_v30 = vmax.f32 %v14781_v16, 0.0 }
 0x103   :  { %v796_v8 = vadd.f32 %v14770_v9, %v627_v59  ;;  %v791_v9 = vadd.f32 %v14749_v55, %v622_v6  ;;  %v13676_v6 = vld [vmem:[%s21731_s30 + $0x2c] sm:$0xf0] }
 0x104   :  { %v805_v33 = vpop.f32.mrf.mxu1 }
 0x105   :  { %v939_v24 = vmax.f32 %v796_v8, 0.0  ;;  %v937_v28 = vmax.f32 %v791_v9, 0.0  ;;  %v13639_v9 = vld [vmem:[%s21729_s25 + $0x154] sm:$0xf] }
 0x107   :  { %v997_v27 = vpack.c.bf16 %v939_v24, %v938_v25  ;;  %v996_v55 = vpack.c.bf16 %v937_v28, %v936_v30  ;;  %v13680_v28 = vld [vmem:[%s21731_s30 + $0x4c] sm:$0xf0] }
 0x108   :  { %v629_v35 = vpop.f32.mrf.mxu0 }
 0x109   :  { %v630_v54 = vadd.f32 %v14698_v4, %v629_v35 }
 0x10b   :  { %668 = vmatmul.bf16.gmra.mxu0 %v10319_v34  ;;  %v799_v2 = vadd.f32 %v798_v18, %v630_v54  ;;  %v13633_v18 = vld [vmem:[%s21729_s25 + $0x124] sm:$0xf]  ;;  %v13632_v34 = vld [vmem:[%s21729_s25 + $0x114] sm:$0xf0] }
 0x10c   :  { %v808_v39 = vpop.f32.mrf.mxu1  ;;  %v10355_v0 = vor.u32 %v13633_v18, %v10352_v19 }
 0x10d   :  { %v940_v17 = vmax.f32 %v799_v2, 0.0 }
 0x10f   :  { %10512 = vmatmul.msk.bf16.gmra.mxu1 %vm493_vm0, %v10339_v38 }
 0x110   :  { %v631_v41 = vpop.f32.mrf.mxu0 }
 0x111   :  { %v632_v52 = vadd.f32 %v14698_v4, %v631_v41 }
 0x113   :  { %v801_v60 = vadd.f32 %v800_v22, %v632_v52 }
 0x114   :  { %v810_v44 = vpop.f32.mrf.mxu1 }
 0x115   :  { %v941_v13 = vmax.f32 %v801_v60, 0.0 }
 0x117   :  { %v998_v22 = vpack.c.bf16 %v941_v13, %v940_v17 }
 0x118   :  { %v634_v46 = vpop.f32.mrf.mxu0 }
 0x119   :  { %v635_v49 = vadd.f32 %v14698_v4, %v634_v46 }
 0x11b   :  { %673 = vmatmul.bf16.gmra.mxu0 %v10327_v45  ;;  %v804_v58 = vadd.f32 %v803_v29, %v635_v49  ;;  %v10363_v45 = vor.u32 %v13635_v42, %v10360_v43  ;;  %v13672_v49 = vld [vmem:[%s21731_s30 + $0xc] sm:$0xf0] }
 0x11c   :  { %v813_v51 = vpop.f32.mrf.mxu1 }
 0x11d   :  { %v942_v3 = vmax.f32 %v804_v58, 0.0 }
 0x11f   :  { %10513 = vmatmul.msk.bf16.gmra.mxu1 %vm493_vm0, %v10347_v50 }
 0x120   :  { %v636_v53 = vpop.f32.mrf.mxu0 }
 0x121   :  { %v637_v56 = vadd.f32 %v14698_v4, %v636_v53 }
 0x123   :  { %v806_v61 = vadd.f32 %v805_v33, %v637_v56  ;;  %v10342_v33 = vld [vmem:[%s21729_s25 + $0x110] sm:$0xf] }
 0x124   :  { %v815_v7 = vpop.f32.mrf.mxu1  ;;  %v10343_v16 = vor.u32 %v13632_v34, %v10342_v33 }
 0x125   :  { %v943_v5 = vmax.f32 %v806_v61, 0.0  ;;  %v13637_v61 = vld [vmem:[%s21729_s25 + $0x144] sm:$0xf] }
 0x127   :  { %v999_v10 = vpack.c.bf16 %v943_v5, %v942_v3  ;;  %v10546_v5 = vld [vmem:[%s21731_s30 + $0x20] sm:$0xf] }
 0x128   :  { %v639_v14 = vpop.f32.mrf.mxu0  ;;  %v10547_v8 = vor.u32 %v13676_v6, %v10546_v5  ;;  %v10400_v5 = vld [vmem:[%s21729_s25 + $0x188] sm:$0xf0] }
 0x129   :  { %v640_v20 = vadd.f32 %v14698_v4, %v639_v14  ;;  %2752 = vmatpush.bf16.msra.mxu2 %v999_v10  ;;  %v10358_v10 = vld [vmem:[%s21729_s25 + $0x130] sm:$0xf] }
 0x12b   :  { %v809_v21 = vadd.f32 %v808_v39, %v640_v20  ;;  %678 = vmatmul.bf16.gmra.mxu0 %v10335_v12  ;;  %v13636_v12 = vld [vmem:[%s21729_s25 + $0x134] sm:$0xf0] }
 0x12c   :  { %v818_v26 = vpop.f32.mrf.mxu1  ;;  %v10359_v17 = vor.u32 %v13636_v12, %v10358_v10  ;;  %v10610_v10 = vld [vmem:[%s21731_s30 + $0xa0] sm:$0xf]  ;;  %v13692_v12 = vld [vmem:[%s21731_s30 + $0xac] sm:$0xf0] }
 0x12d   :  { %2753 = vmatpush.bf16.msra.mxu2 %v998_v22  ;;  %v944_v35 = vmax.f32 %v809_v21, 0.0  ;;  %v10376_v21 = vld [vmem:[%s21729_s25 + $0x158] sm:$0xf0] }
 0x12e   :  { %v10379_v24 = vor.u32 %v13639_v9, %v10376_v21  ;;  %v13647_v21 = vld [vmem:[%s21729_s25 + $0x194] sm:$0xf] }
 0x12f   :  { %10514 = vmatmul.msk.bf16.gmra.mxu1 %vm493_vm0, %v10355_v0 }
 0x130   :  { %v641_v29 = vpop.f32.mrf.mxu0 }
 0x131   :  { %v642_v31 = vadd.f32 %v14698_v4, %v641_v29  ;;  %2754 = vmatpush.bf16.msra.mxu2 %v997_v27  ;;  %v10562_v27 = vld [vmem:[%s21731_s30 + $0x40] sm:$0xf] }
 0x132   :  { %v10563_v30 = vor.u32 %v13680_v28, %v10562_v27 }
 0x133   :  { %v811_v32 = vadd.f32 %v810_v44, %v642_v31  ;;  %v10366_v31 = vld [vmem:[%s21729_s25 + $0x140] sm:$0xf] }
 0x134   :  { %v820_v37 = vpop.f32.mrf.mxu1 }
 0x135   :  { %2755 = vmatpush.bf16.msra.mxu2 %v996_v55  ;;  %v945_v36 = vmax.f32 %v811_v32, 0.0  ;;  %v13638_v32 = vld [vmem:[%s21729_s25 + $0x144] sm:$0xf0] }
 0x137   :  { %v14855_v38 = vpack.c.bf16 %v945_v36, %v944_v35  ;;  %v10367_v35 = vor.u32 %v13638_v32, %v10366_v31  ;;  %v10626_v31 = vld [vmem:[%s21731_s30 + $0xc0] sm:$0xf]  ;;  %v13696_v32 = vld [vmem:[%s21731_s30 + $0xcc] sm:$0xf0] }
 0x138   :  { %v644_v39 = vpop.f32.mrf.mxu0 }
 0x139   :  { %v645_v41 = vadd.f32 %v14698_v4, %v644_v39  ;;  %2756 = vmatpush.bf16.msra.mxu2 %v14772_v11  ;;  %v10530_v11 = vld [vmem:[%s21731_s30] sm:$0xf]  ;;  %v13641_v39 = vld [vmem:[%s21729_s25 + $0x164] sm:$0xf] }
 0x13b   :  { %v814_v44 = vadd.f32 %v813_v51, %v645_v41  ;;  %683 = vmatmul.bf16.gmra.mxu0 %v10343_v16  ;;  %v10531_v51 = vor.u32 %v13672_v49, %v10530_v11  ;;  %v10384_v41 = vld [vmem:[%s21729_s25 + $0x168] sm:$0xf0]  ;;  %v10374_v11 = vld [vmem:[%s21729_s25 + $0x150] sm:$0xf]  ;;  %v13640_v49 = vld [vmem:[%s21729_s25 + $0x154] sm:$0xf0] }
 0x13c   :  { %v823_v46 = vpop.f32.mrf.mxu1  ;;  %v10387_v43 = vor.u32 %v13641_v39, %v10384_v41  ;;  %v10398_v39 = vld [vmem:[%s21729_s25 + $0x180] sm:$0xf]  ;;  %v13646_v41 = vld [vmem:[%s21729_s25 + $0x184] sm:$0xf0] }
 0x13d   :  { %2757 = vmatpush.bf16.msra.mxu2 %v14751_v57  ;;  %v10350_v57 = vld [vmem:[%s21729_s25 + $0x120] sm:$0xf]  ;;  %v946_v52 = vmax.f32 %v814_v44, 0.0 }
 0x13f   :  { %10515 = vmatmul.msk.bf16.gmra.mxu1 %vm493_vm0, %v10363_v45 }
 0x140   :  { %v646_v47 = vpop.f32.mrf.mxu0 }
 0x141   :  { %v647_v48 = vadd.f32 %v14698_v4, %v646_v47  ;;  %2758 = vmatpush.bf16.msra.mxu2 %v14732_v40  ;;  %v13634_v40 = vld [vmem:[%s21729_s25 + $0x124] sm:$0xf0]  ;;  %v13684_v47 = vld [vmem:[%s21731_s30 + $0x6c] sm:$0xf0] }
 0x142   :  { %v10351_v56 = vor.u32 %v13634_v40, %v10350_v57  ;;  %v13643_v40 = vld [vmem:[%s21729_s25 + $0x174] sm:$0xf] }
 0x143   :  { %v816_v50 = vadd.f32 %v815_v7, %v647_v48 }
 0x144   :  { %v825_v54 = vpop.f32.mrf.mxu1 }
 0x145   :  { %2759 = vmatpush.bf16.msra.mxu2 %v14715_v23  ;;  %v947_v53 = vmax.f32 %v816_v50, 0.0  ;;  %v10371_v23 = vor.u32 %v13637_v61, %v10368_v62  ;;  %v10382_v62 = vld [vmem:[%s21729_s25 + $0x160] sm:$0xf] }
 0x147   :  { %v14882_v58 = vpack.c.bf16 %v947_v53, %v946_v52  ;;  %v10392_v52 = vld [vmem:[%s21729_s25 + $0x178] sm:$0xf0] }
 0x148   :  { %v649_v59 = vpop.f32.mrf.mxu0  ;;  %2760 = vmatmul.bf16.vlgmr.msra.gmra.mxu2 %v10531_v51  ;;  %v10375_v51 = vor.u32 %v13640_v49, %v10374_v11  ;;  %v10395_v53 = vor.u32 %v13643_v40, %v10392_v52  ;;  %v10399_v40 = vor.u32 %v13646_v41, %v10398_v39  ;;  %v10432_v39 = vld [vmem:[%s21729_s25 + $0x1c8] sm:$0xf0] }
 0x149   :  { %v650_v60 = vadd.f32 %v14698_v4, %v649_v59  ;;  %v10594_v59 = vld [vmem:[%s21731_s30 + $0x80] sm:$0xf] }
 0x14b   :  { %v819_v63 = vadd.f32 %v818_v26, %v650_v60  ;;  %688 = vmatmul.bf16.gmra.mxu0 %v10351_v56  ;;  %v13688_v60 = vld [vmem:[%s21731_s30 + $0x8c] sm:$0xf0] }
 0x14c   :  { %v828_v1 = vpop.f32.mrf.mxu1  ;;  %v10595_v61 = vor.u32 %v13688_v60, %v10594_v59 }
 0x14d   :  { %v948_v13 = vmax.f32 %v819_v63, 0.0  ;;  %v13642_v63 = vld [vmem:[%s21729_s25 + $0x164] sm:$0xf0] }
 0x14f   :  { %10516 = vmatmul.msk.bf16.gmra.mxu1 %vm493_vm0, %v10371_v23 }
 0x150   :  { %v651_v2 = vpop.f32.mrf.mxu0 }
 0x151   :  { %v652_v3 = vadd.f32 %v14698_v4, %v651_v2 }
 0x153   :  { %v821_v7 = vadd.f32 %v820_v37, %v652_v3  ;;  %v13645_v3 = vld [vmem:[%s21729_s25 + $0x184] sm:$0xf] }
 0x154   :  { %v14905_v15 = vpop.f32.mrf.mxu1  ;;  %v10403_v6 = vor.u32 %v13645_v3, %v10400_v5 }
 0x155   :  { %v949_v14 = vmax.f32 %v821_v7, 0.0 }
 0x157   :  { %v14907_v20 = vpack.c.bf16 %v949_v14, %v948_v13  ;;  %v10611_v13 = vor.u32 %v13692_v12, %v10610_v10  ;;  %v10390_v14 = vld [vmem:[%s21729_s25 + $0x170] sm:$0xf]  ;;  %v13648_v12 = vld [vmem:[%s21729_s25 + $0x194] sm:$0xf0] }
 0x158   :  { %v654_v18 = vpop.f32.mrf.mxu0  ;;  %2765 = vmatmul.bf16.gmra.mxu2 %v10547_v8 }
 0x159   :  { %v655_v19 = vadd.f32 %v14698_v4, %v654_v18 }
 0x15b   :  { %v824_v22 = vadd.f32 %v823_v46, %v655_v19  ;;  %693 = vmatmul.bf16.gmra.mxu0 %v10359_v17  ;;  %v10578_v46 = vld [vmem:[%s21731_s30 + $0x60] sm:$0xf]  ;;  %v13644_v17 = vld [vmem:[%s21729_s25 + $0x174] sm:$0xf0] }
 0x15c   :  { %v14916_v25 = vpop.f32.mrf.mxu1  ;;  %v10579_v48 = vor.u32 %v13684_v47, %v10578_v46  ;;  %v10391_v19 = vor.u32 %v13644_v17, %v10390_v14 }
 0x15d   :  { %v950_v55 = vmax.f32 %v824_v22, 0.0  ;;  %v10408_v22 = vld [vmem:[%s21729_s25 + $0x198] sm:$0xf0] }
 0x15f   :  { %10517 = vmatmul.msk.bf16.gmra.mxu1 %vm493_vm0, %v10379_v24 }
 0x160   :  { %v656_v0 = vpop.f32.mrf.mxu0 }
 0x161   :  { %v657_v26 = vadd.f32 %v14698_v4, %v656_v0  ;;  %v10411_v0 = vor.u32 %v13647_v21, %v10408_v22 }
 0x163   :  { %v826_v29 = vadd.f32 %v825_v54, %v657_v26 }
 0x164   :  { %v14932_v34 = vpop.f32.mrf.mxu1 }
 0x165   :  { %v951_v33 = vmax.f32 %v826_v29, 0.0 }
 0x167   :  { %v14934_v36 = vpack.c.bf16 %v951_v33, %v950_v55 }
 0x168   :  { %v659_v37 = vpop.f32.mrf.mxu0  ;;  %2770 = vmatmul.bf16.gmra.mxu2 %v10563_v30 }
 0x169   :  { %v660_v16 = vadd.f32 %v14698_v4, %v659_v37 }
 0x16b   :  { %v14943_v42 = vadd.f32 %v828_v1, %v660_v16  ;;  %698 = vmatmul.bf16.gmra.mxu0 %v10367_v35  ;;  %v10383_v1 = vor.u32 %v13642_v63, %v10382_v62  ;;  %v10627_v16 = vor.u32 %v13696_v32, %v10626_v31  ;;  %v13650_v32 = vld [vmem:[%s21729_s25 + $0x1a4] sm:$0xf0] }
 0x16c   :  { %v14945_v44 = vpop.f32.mrf.mxu1 }
 0x16d   :  { %v952_v3 = vmax.f32 %v14943_v42, 0.0  ;;  %v10406_v42 = vld [vmem:[%s21729_s25 + $0x190] sm:$0xf] }
 0x16e   :  { %v10407_v14 = vor.u32 %v13648_v12, %v10406_v42 }
 0x16f   :  { %10518 = vmatmul.msk.bf16.gmra.mxu1 %vm493_vm0, %v10387_v43 }
 0x170   :  { %v14947_v45 = vpop.f32.mrf.mxu0 }
 0x171   :  { %v662_v11 = vadd.f32 %v14698_v4, %v14947_v45  ;;  %v10416_v45 = vld [vmem:[%s21729_s25 + $0x1a8] sm:$0xf0] }
 0x174   :  { %v840_v50 = vpop.f32.mrf.mxu1 }
 0x178   :  { %v664_v57 = vpop.f32.mrf.mxu0  ;;  %2775 = vmatmul.bf16.gmra.mxu2 %v10579_v48 }
 0x179   :  { %v665_v43 = vadd.f32 %v14698_v4, %v664_v57 }
 0x17b   :  { %703 = vmatmul.bf16.gmra.mxu0 %v10375_v51 }
 0x17c   :  { %v843_v54 = vpop.f32.mrf.mxu1 }
 0x17f   :  { %10519 = vmatmul.msk.bf16.gmra.mxu1 %vm493_vm0, %v10395_v53 }
 0x180   :  { %v666_v56 = vpop.f32.mrf.mxu0 }
 0x181   :  { %v667_v33 = vadd.f32 %v14698_v4, %v666_v56 }
 0x184   :  { %v845_v23 = vpop.f32.mrf.mxu1 }
 0x188   :  { %v669_v2 = vpop.f32.mrf.mxu0  ;;  %2780 = vmatmul.bf16.gmra.mxu2 %v10595_v61 }
 0x189   :  { %v670_v29 = vadd.f32 %v14698_v4, %v669_v2 }
 0x18b   :  { %708 = vmatmul.bf16.gmra.mxu0 %v10383_v1  ;;  %v839_v46 = vadd.f32 %v14945_v44, %v670_v29  ;;  %v13649_v44 = vld [vmem:[%s21729_s25 + $0x1a4] sm:$0xf] }
 0x18c   :  { %v848_v7 = vpop.f32.mrf.mxu1  ;;  %v10419_v62 = vor.u32 %v13649_v44, %v10416_v45 }
 0x18d   :  { %v956_v56 = vmax.f32 %v839_v46, 0.0 }
 0x18f   :  { %10520 = vmatmul.msk.bf16.gmra.mxu1 %vm493_vm0, %v10403_v6  ;;  %v13700_v6 = vld [vmem:[%s21731_s30 + $0xec] sm:$0xf0] }
 0x190   :  { %v671_v8 = vpop.f32.mrf.mxu0 }
 0x191   :  { %v672_v27 = vadd.f32 %v14698_v4, %v671_v8 }
 0x193   :  { %v841_v35 = vadd.f32 %v840_v50, %v672_v27  ;;  %v836_v50 = vadd.f32 %v14932_v34, %v667_v33  ;;  %v831_v34 = vadd.f32 %v14905_v15, %v662_v11  ;;  %v10642_v15 = vld [vmem:[%s21731_s30 + $0xe0] sm:$0xf] }
 0x194   :  { %v850_v18 = vpop.f32.mrf.mxu1  ;;  %v10643_v10 = vor.u32 %v13700_v6, %v10642_v15  ;;  %v13712_v15 = vld [vmem:[%s21731_s30 + $0x14c] sm:$0xf0]  ;;  %v13678_v6 = vld [vmem:[%s21731_s30 + $0x44] sm:$0xf] }
 0x195   :  { %v957_v52 = vmax.f32 %v841_v35, 0.0  ;;  %v955_v61 = vmax.f32 %v836_v50, 0.0  ;;  %v953_v1 = vmax.f32 %v831_v34, 0.0  ;;  %v13674_v50 = vld [vmem:[%s21731_s30 + $0x24] sm:$0xf] }
 0x197   :  { %v1006_v60 = vpack.c.bf16 %v957_v52, %v956_v56  ;;  %v1004_v8 = vpack.c.bf16 %v953_v1, %v952_v3  ;;  %v10422_v56 = vld [vmem:[%s21729_s25 + $0x1b0] sm:$0xf]  ;;  %v10690_v3 = vld [vmem:[%s21731_s30 + $0x140] sm:$0xf] }
 0x198   :  { %v674_v9 = vpop.f32.mrf.mxu0  ;;  %2785 = vmatmul.bf16.gmra.mxu2 %v10611_v13  ;;  %v10691_v12 = vor.u32 %v13712_v15, %v10690_v3 }
 0x199   :  { %v675_v24 = vadd.f32 %v14698_v4, %v674_v9  ;;  %v10424_v9 = vld [vmem:[%s21729_s25 + $0x1b8] sm:$0xf0] }
 0x19b   :  { %713 = vmatmul.bf16.gmra.mxu0 %v10391_v19  ;;  %v844_v55 = vadd.f32 %v843_v54, %v675_v24  ;;  %v834_v54 = vadd.f32 %v14916_v25, %v665_v43 }
 0x19c   :  { %v15007_v26 = vpop.f32.mrf.mxu1 }
 0x19d   :  { %v958_v47 = vmax.f32 %v844_v55, 0.0  ;;  %v954_v25 = vmax.f32 %v834_v54, 0.0 }
 0x19f   :  { %10521 = vmatmul.msk.bf16.gmra.mxu1 %vm493_vm0, %v10411_v0 }
 0x1a0   :  { %v676_v28 = vpop.f32.mrf.mxu0 }
 0x1a1   :  { %v677_v30 = vadd.f32 %v14698_v4, %v676_v28  ;;  %v13704_v28 = vld [vmem:[%s21731_s30 + $0x10c] sm:$0xf0] }
 0x1a3   :  { %v846_v37 = vadd.f32 %v845_v23, %v677_v30  ;;  %v1005_v23 = vpack.c.bf16 %v955_v61, %v954_v25  ;;  %v13655_v61 = vld [vmem:[%s21729_s25 + $0x1d4] sm:$0xf]  ;;  %v10440_v25 = vld [vmem:[%s21729_s25 + $0x1d8] sm:$0xf0] }
 0x1a4   :  { %v855_v49 = vpop.f32.mrf.mxu1 }
 0x1a5   :  { %v959_v48 = vmax.f32 %v846_v37, 0.0 }
 0x1a7   :  { %v1007_v51 = vpack.c.bf16 %v959_v48, %v958_v47  ;;  %v10674_v48 = vld [vmem:[%s21731_s30 + $0x120] sm:$0xf] }
 0x1a8   :  { %v679_v53 = vpop.f32.mrf.mxu0  ;;  %2790 = vmatmul.bf16.gmra.mxu2 %v10627_v16  ;;  %v13653_v16 = vld [vmem:[%s21729_s25 + $0x1c4] sm:$0xf] }
 0x1a9   :  { %v680_v57 = vadd.f32 %v14698_v4, %v679_v53  ;;  %3121 = vmatpush.bf16.msra.mxu3 %v1007_v51  ;;  %v10548_v51 = vld [vmem:[%s21731_s30 + $0x30] sm:$0xf0] }
 0x1aa   :  { %v10551_v54 = vor.u32 %v13674_v50, %v10548_v51  ;;  %v10722_v51 = vld [vmem:[%s21731_s30 + $0x180] sm:$0xf] }
 0x1ab   :  { %v15040_v59 = vadd.f32 %v848_v7, %v680_v57  ;;  %718 = vmatmul.bf16.gmra.mxu0 %v10399_v40  ;;  %v13652_v57 = vld [vmem:[%s21729_s25 + $0x1b4] sm:$0xf0] }
 0x1ac   :  { %v858_v63 = vpop.f32.mrf.mxu1  ;;  %v10423_v45 = vor.u32 %v13652_v57, %v10422_v56  ;;  %v10596_v56 = vld [vmem:[%s21731_s30 + $0x90] sm:$0xf0] }
 0x1ad   :  { %3122 = vmatpush.bf16.msra.mxu3 %v1006_v60 }
 0x1af   :  { %10522 = vmatmul.msk.bf16.gmra.mxu1 %vm493_vm0, %v10419_v62 }
 0x1b0   :  { %v681_v2 = vpop.f32.mrf.mxu0 }
 0x1b1   :  { %v682_v5 = vadd.f32 %v14698_v4, %v681_v2  ;;  %3123 = vmatpush.bf16.msra.mxu3 %v1005_v23  ;;  %v10443_v23 = vor.u32 %v13655_v61, %v10440_v25  ;;  %v13658_v61 = vld [vmem:[%s21729_s25 + $0x1e4] sm:$0xf0]  ;;  %v960_v25 = vmax.f32 %v15040_v59, 0.0  ;;  %v13724_v59 = vld [vmem:[%s21731_s30 + $0x1ac] sm:$0xf0] }
 0x1b3   :  { %v15051_v7 = vadd.f32 %v850_v18, %v682_v5  ;;  %v13651_v18 = vld [vmem:[%s21729_s25 + $0x1b4] sm:$0xf] }
 0x1b4   :  { %v860_v13 = vpop.f32.mrf.mxu1  ;;  %v10427_v22 = vor.u32 %v13651_v18, %v10424_v9 }
 0x1b5   :  { %3124 = vmatpush.bf16.msra.mxu3 %v1004_v8  ;;  %v10564_v8 = vld [vmem:[%s21731_s30 + $0x50] sm:$0xf0]  ;;  %v961_v3 = vmax.f32 %v15051_v7, 0.0  ;;  %v13690_v7 = vld [vmem:[%s21731_s30 + $0xa4] sm:$0xf] }
 0x1b7   :  { %v15242_v15 = vpack.c.bf16 %v961_v3, %v960_v25 }
 0x1b8   :  { %v684_v17 = vpop.f32.mrf.mxu0  ;;  %2795 = vmatmul.bf16.gmra.mxu2 %v10643_v10 }
 0x1b9   :  { %v685_v19 = vadd.f32 %v14698_v4, %v684_v17  ;;  %3125 = vmatpush.bf16.msra.mxu3 %v14934_v36  ;;  %v10658_v36 = vld [vmem:[%s21731_s30 + $0x100] sm:$0xf]  ;;  %v13654_v17 = vld [vmem:[%s21729_s25 + $0x1c4] sm:$0xf0] }
 0x1ba   :  { %v10659_v30 = vor.u32 %v13704_v28, %v10658_v36 }
 0x1bb   :  { %v15068_v21 = vadd.f32 %v15007_v26, %v685_v19  ;;  %723 = vmatmul.bf16.gmra.mxu0 %v10407_v14  ;;  %v13670_v26 = vld [vmem:[%s21731_s30 + $0x4] sm:$0xf]  ;;  %v10430_v14 = vld [vmem:[%s21729_s25 + $0x1c0] sm:$0xf] }
 0x1bc   :  { %v863_v24 = vpop.f32.mrf.mxu1  ;;  %v10431_v18 = vor.u32 %v13654_v17, %v10430_v14  ;;  %v10612_v14 = vld [vmem:[%s21731_s30 + $0xb0] sm:$0xf0] }
 0x1bd   :  { %3126 = vmatpush.bf16.msra.mxu3 %v14907_v20  ;;  %v10532_v20 = vld [vmem:[%s21731_s30 + $0x10] sm:$0xf0] }
 0x1be   :  { %v10535_v31 = vor.u32 %v13670_v26, %v10532_v20 }
 0x1bf   :  { %10523 = vmatmul.msk.bf16.gmra.mxu1 %vm493_vm0, %v10427_v22 }
 0x1c0   :  { %v686_v0 = vpop.f32.mrf.mxu0 }
 0x1c1   :  { %v687_v27 = vadd.f32 %v14698_v4, %v686_v0  ;;  %3127 = vmatpush.bf16.msra.mxu3 %v14882_v58  ;;  %v10414_v58 = vld [vmem:[%s21729_s25 + $0x1a0] sm:$0xf]  ;;  %v10448_v0 = vld [vmem:[%s21729_s25 + $0x1e8] sm:$0xf0] }
 0x1c2   :  { %v10415_v33 = vor.u32 %v13650_v32, %v10414_v58  ;;  %v10580_v58 = vld [vmem:[%s21731_s30 + $0x70] sm:$0xf0] }
 0x1c3   :  { %v15086_v29 = vadd.f32 %v855_v49, %v687_v27  ;;  %v13708_v49 = vld [vmem:[%s21731_s30 + $0x12c] sm:$0xf0] }
 0x1c4   :  { %v865_v55 = vpop.f32.mrf.mxu1  ;;  %v10675_v53 = vor.u32 %v13708_v49, %v10674_v48 }
 0x1c5   :  { %3128 = vmatpush.bf16.msra.mxu3 %v14855_v38  ;;  %v10435_v38 = vor.u32 %v13653_v16, %v10432_v39 }
 0x1c8   :  { %v689_v35 = vpop.f32.mrf.mxu0  ;;  %2800 = vmatmul.bf16.gmra.mxu2 %v10659_v30  ;;  %3129 = vmatmul.bf16.vlgmr.msra.gmra.mxu3 %v10535_v31  ;;  %v13716_v30 = vld [vmem:[%s21731_s30 + $0x16c] sm:$0xf0]  ;;  %v13682_v31 = vld [vmem:[%s21731_s30 + $0x64] sm:$0xf] }
 0x1c9   :  { %v690_v37 = vadd.f32 %v14698_v4, %v689_v35  ;;  %v10438_v35 = vld [vmem:[%s21729_s25 + $0x1d0] sm:$0xf] }
 0x1cb   :  { %v15102_v41 = vadd.f32 %v858_v63, %v690_v37  ;;  %728 = vmatmul.bf16.gmra.mxu0 %v10415_v33  ;;  %v15104_v43 = vpop.f32.mrf.mxu2  ;;  %v10583_v33 = vor.u32 %v13682_v31, %v10580_v58  ;;  %v13656_v37 = vld [vmem:[%s21729_s25 + $0x1d4] sm:$0xf0] }
 0x1cc   :  { %v868_v46 = vpop.f32.mrf.mxu1  ;;  %v10439_v39 = vor.u32 %v13656_v37, %v10438_v35 }
 0x1cf   :  { %10524 = vmatmul.msk.bf16.gmra.mxu1 %vm493_vm0, %v10435_v38 }
 0x1d0   :  { %v691_v47 = vpop.f32.mrf.mxu0 }
 0x1d1   :  { %v692_v11 = vadd.f32 %v14698_v4, %v691_v47  ;;  %v10456_v47 = vld [vmem:[%s21729_s25 + $0x1f8] sm:$0xf0] }
 0x1d3   :  { %v15120_v40 = vadd.f32 %v860_v13, %v692_v11  ;;  %v15122_v52 = vpop.f32.mrf.mxu2  ;;  %v10567_v13 = vor.u32 %v13678_v6, %v10564_v8 }
 0x1d4   :  { %v15130_v44 = vpop.f32.mrf.mxu1 }
 0x1d5   :  { %v965_v35 = vmax.f32 %v15120_v40, 0.0 }
 0x1d8   :  { %v694_v34 = vpop.f32.mrf.mxu0  ;;  %2805 = vmatmul.bf16.gmra.mxu2 %v10675_v53  ;;  %3134 = vmatmul.bf16.gmra.mxu3 %v10551_v54  ;;  %v13720_v53 = vld [vmem:[%s21731_s30 + $0x18c] sm:$0xf0]  ;;  %v13686_v54 = vld [vmem:[%s21731_s30 + $0x84] sm:$0xf] }
 0x1d9   :  { %v695_v60 = vadd.f32 %v14698_v4, %v694_v34  ;;  %v10599_v34 = vor.u32 %v13686_v54, %v10596_v56 }
 0x1db   :  { %v15139_v62 = vadd.f32 %v863_v24, %v695_v60  ;;  %733 = vmatmul.bf16.gmra.mxu0 %v10423_v45  ;;  %v15141_v63 = vpop.f32.mrf.mxu2  ;;  %v13657_v24 = vld [vmem:[%s21729_s25 + $0x1e4] sm:$0xf]  ;;  %v10723_v45 = vor.u32 %v13720_v53, %v10722_v51  ;;  %v10446_v60 = vld [vmem:[%s21729_s25 + $0x1e0] sm:$0xf] }
 0x1dc   :  { %v15143_v1 = vpop.f32.mrf.mxu1  ;;  %v10451_v28 = vor.u32 %v13657_v24, %v10448_v0  ;;  %v10454_v24 = vld [vmem:[%s21729_s25 + $0x1f0] sm:$0xf]  ;;  %v13660_v0 = vld [vmem:[%s21729_s25 + $0x1f4] sm:$0xf0]  ;;  %v10754_v53 = vld [vmem:[%s21731_s30 + $0x1c0] sm:$0xf] }
 0x1dd   :  { %v966_v17 = vmax.f32 %v15139_v62, 0.0  ;;  %v964_v62 = vmax.f32 %v15102_v41, 0.0  ;;  %v10455_v31 = vor.u32 %v13660_v0, %v10454_v24 }
 0x1df   :  { %10525 = vmatmul.msk.bf16.gmra.mxu1 %vm493_vm0, %v10443_v23 }
 0x1e0   :  { %v696_v2 = vpop.f32.mrf.mxu0 }
 0x1e1   :  { %v697_v5 = vadd.f32 %v14698_v4, %v696_v2  ;;  %v10447_v2 = vor.u32 %v13658_v61, %v10446_v60  ;;  %v10628_v60 = vld [vmem:[%s21731_s30 + $0xd0] sm:$0xf0] }
 0x1e3   :  { %v15159_v10 = vadd.f32 %v865_v55, %v697_v5  ;;  %v15161_v42 = vpop.f32.mrf.mxu2 }
 0x1e4   :  { %v15169_v19 = vpop.f32.mrf.mxu1 }
 0x1e8   :  { %v699_v9 = vpop.f32.mrf.mxu0  ;;  %2810 = vmatmul.bf16.gmra.mxu2 %v10691_v12  ;;  %3139 = vmatmul.bf16.gmra.mxu3 %v10567_v13  ;;  %v10738_v13 = vld [vmem:[%s21731_s30 + $0x1a0] sm:$0xf] }
 0x1e9   :  { %v700_v22 = vadd.f32 %v14698_v4, %v699_v9  ;;  %v10706_v4 = vld [vmem:[%s21731_s30 + $0x160] sm:$0xf]  ;;  %v10739_v9 = vor.u32 %v13724_v59, %v10738_v13 }
 0x1ea   :  { %v10707_v55 = vor.u32 %v13716_v30, %v10706_v4  ;;  %v967_v4 = vmax.f32 %v15159_v10, 0.0 }
 0x1eb   :  { %v15178_v36 = vadd.f32 %v868_v46, %v700_v22  ;;  %738 = vmatmul.bf16.gmra.mxu0 %v10431_v18  ;;  %v15180_v27 = vpop.f32.mrf.mxu2  ;;  %v13659_v46 = vld [vmem:[%s21729_s25 + $0x1f4] sm:$0xf]  ;;  %v10615_v22 = vor.u32 %v13690_v7, %v10612_v14 }
 0x1ec   :  { %v15182_v26 = vpop.f32.mrf.mxu1  ;;  %v10459_v11 = vor.u32 %v13659_v46, %v10456_v47  ;;  %v15274_v58 = vpack.c.bf16 %v967_v4, %v966_v17 }
 0x1ed   :  { %v968_v0 = vmax.f32 %v15178_v36, 0.0  ;;  %v10644_v36 = vld [vmem:[%s21731_s30 + $0xf0] sm:$0xf0] }
 0x1ef   :  { %10526 = vmatmul.msk.bf16.gmra.mxu1 %vm493_vm0, %v10451_v28  ;;  %v962_v28 = vmax.f32 %v15068_v21, 0.0  ;;  %v15283_v21 = vld [vmem:[%s21730_s2] ss:$0 sm:$0xff] }
 0x1f0   :  { %v15184_v20 = vpop.f32.mrf.mxu0 }
 0x1f3   :  { %v15199_v32 = vpop.f32.mrf.mxu2 }
 0x1f4   :  { %v15207_v16 = vpop.f32.mrf.mxu1 }
 0x1f8   :  { %v15209_v38 = vpop.f32.mrf.mxu0  ;;  %2815 = vmatmul.bf16.gmra.mxu2 %v10707_v55  ;;  %3144 = vmatmul.bf16.gmra.mxu3 %v10583_v33  ;;  %v963_v55 = vmax.f32 %v15086_v29, 0.0 }
 0x1f9   :  { %v705_v40 = vadd.f32 %v15283_v21, %v15209_v38  ;;  %v13694_v38 = vld [vmem:[%s21731_s30 + $0xc4] sm:$0xf] }
 0x1fa   :  { %v15278_v37 = vpack.c.bf16 %v963_v55, %v962_v28  ;;  %v10631_v3 = vor.u32 %v13694_v38, %v10628_v60  ;;  %v13698_v55 = vld [vmem:[%s21731_s30 + $0xe4] sm:$0xf] }
 0x1fb   :  { %743 = vmatmul.bf16.gmra.mxu0 %v10439_v39  ;;  %v15217_v48 = vpop.f32.mrf.mxu2  ;;  %v1010_v39 = vpack.c.bf16 %v965_v35, %v964_v62  ;;  %v10770_v62 = vld [vmem:[%s21731_s30 + $0x1e0] sm:$0xf] }
 0x1fc   :  { %v883_v49 = vpop.f32.mrf.mxu1 }
 0x1ff   :  { %10527 = vmatmul.msk.bf16.gmra.mxu1 %vm493_vm0, %v10459_v11 }
 0x200   :  { %v706_v50 = vpop.f32.mrf.mxu0 }
 0x201   :  { %v707_v54 = vadd.f32 %v15283_v21, %v706_v50 }
 0x203   :  { %v15232_v57 = vpop.f32.mrf.mxu2 }
 0x204   :  { %v885_v23 = vpop.f32.mrf.mxu1 }
 0x208   :  { %v709_v5 = vpop.f32.mrf.mxu0  ;;  %2820 = vmatmul.bf16.gmra.mxu2 %v10723_v45  ;;  %3149 = vmatmul.bf16.gmra.mxu3 %v10599_v34 }
 0x209   :  { %v710_v29 = vadd.f32 %v15283_v21, %v709_v5  ;;  %v876_v5 = vadd.f32 %v15169_v19, %v707_v54 }
 0x20b   :  { %748 = vmatmul.bf16.gmra.mxu0 %v10447_v2  ;;  %v15244_v6 = vpop.f32.mrf.mxu2  ;;  %v879_v56 = vadd.f32 %v15182_v26, %v710_v29  ;;  %v702_v26 = vadd.f32 %v15283_v21, %v15184_v20  ;;  %v10647_v29 = vor.u32 %v13698_v55, %v10644_v36 }
 0x20c   :  { %v15246_v8 = vpop.f32.mrf.mxu1 }
 0x20d   :  { %v871_v14 = vadd.f32 %v15130_v44, %v702_v26 }
 0x20f   :  { %v969_v28 = vmax.f32 %v871_v14, 0.0  ;;  %v10554_v14 = vld [vmem:[%s21731_s30 + $0x28] sm:$0xf] }
 0x210   :  { %v711_v12 = vpop.f32.mrf.mxu0 }
 0x211   :  { %v712_v46 = vadd.f32 %v15283_v21, %v711_v12  ;;  %v972_v12 = vmax.f32 %v879_v56, 0.0  ;;  %v10786_v56 = vld [vmem:[%s21731_s30 + $0x200] sm:$0xf] }
 0x213   :  { %v15261_v18 = vpop.f32.mrf.mxu2  ;;  %v881_v45 = vadd.f32 %v15207_v16, %v712_v46  ;;  %v874_v16 = vadd.f32 %v15143_v1, %v705_v40 }
 0x214   :  { %v15271_v30 = vpop.f32.mrf.mxu1 }
 0x215   :  { %v973_v59 = vmax.f32 %v881_v45, 0.0  ;;  %v13736_v45 = vld [vmem:[%s21731_s30 + $0x20c] sm:$0xf0] }
 0x217   :  { %v1014_v1 = vpack.c.bf16 %v973_v59, %v972_v12  ;;  %v13706_v59 = vld [vmem:[%s21731_s30 + $0x124] sm:$0xf] }
 0x218   :  { %v714_v33 = vpop.f32.mrf.mxu0  ;;  %2825 = vmatmul.bf16.gmra.mxu2 %v10739_v9  ;;  %3154 = vmatmul.bf16.gmra.mxu3 %v10615_v22  ;;  %v970_v9 = vmax.f32 %v874_v16, 0.0  ;;  %v971_v22 = vmax.f32 %v876_v5, 0.0 }
 0x219   :  { %v715_v10 = vadd.f32 %v15283_v21, %v714_v33 }
 0x21a   :  { %v1013_v44 = vpack.c.bf16 %v971_v22, %v970_v9 }
 0x21b   :  { %753 = vmatmul.bf16.gmra.mxu0 %v10455_v31  ;;  %v15286_v41 = vpop.f32.mrf.mxu2  ;;  %v884_v11 = vadd.f32 %v883_v49, %v715_v10  ;;  %v13728_v49 = vld [vmem:[%s21731_s30 + $0x1cc] sm:$0xf0]  ;;  %v1012_v31 = vpack.c.bf16 %v969_v28, %v968_v0 }
 0x21c   :  { %21732 = vst [vmem:[#allocation3_spill] sm:$0xff] %v15286_v41  ;;  %v893_v47 = vpop.f32.mrf.mxu1  ;;  %v10755_v2 = vor.u32 %v13728_v49, %v10754_v53  ;;  %v10787_v49 = vor.u32 %v13736_v45, %v10786_v56  ;;  %v13681_v56 = vld [vmem:[%s21731_s30 + $0x54] sm:$0xf0] }
 0x21d   :  { %v974_v61 = vmax.f32 %v884_v11, 0.0 }
 0x220   :  { %v716_v51 = vpop.f32.mrf.mxu0 }
 0x221   :  { %v717_v34 = vadd.f32 %v15283_v21, %v716_v51 }
 0x223   :  { %v886_v50 = vadd.f32 %v885_v23, %v717_v34  ;;  %v15308_v25 = vpop.f32.mrf.mxu2 }
 0x224   :  { %21733 = vst [vmem:[#allocation4_spill] sm:$0xff] %v15308_v25  ;;  %v15315_v23 = vpop.f32.mrf.mxu1 }
 0x225   :  { %v975_v13 = vmax.f32 %v886_v50, 0.0 }
 0x227   :  { %v1015_v7 = vpack.c.bf16 %v975_v13, %v974_v61  ;;  %v13740_v13 = vld [vmem:[%s21731_s30 + $0x22c] sm:$0xf0] }
 0x228   :  { %v719_v17 = vpop.f32.mrf.mxu0  ;;  %2830 = vmatmul.bf16.gmra.mxu2 %v10755_v2  ;;  %3159 = vmatmul.bf16.gmra.mxu3 %v10631_v3 }
 0x229   :  { %v720_v20 = vadd.f32 %v15283_v21, %v719_v17  ;;  %3490 = vmatpush.bf16.msrb.mxu1 %v1015_v7  ;;  %v10676_v7 = vld [vmem:[%s21731_s30 + $0x130] sm:$0xf0]  ;;  %v13677_v17 = vld [vmem:[%s21731_s30 + $0x34] sm:$0xf0] }
 0x22a   :  { %v10679_v22 = vor.u32 %v13706_v59, %v10676_v7  ;;  %v10555_v0 = vor.u32 %v13677_v17, %v10554_v14  ;;  %v10834_v59 = vld [vmem:[%s21731_s30 + $0x260] sm:$0xf]  ;;  %v13748_v7 = vld [vmem:[%s21731_s30 + $0x26c] sm:$0xf0]  ;;  %v13714_v14 = vld [vmem:[%s21731_s30 + $0x164] sm:$0xf] }
 0x22b   :  { %v15319_v24 = vadd.f32 %v15246_v8, %v720_v20  ;;  %v15321_v19 = vpop.f32.mrf.mxu2  ;;  %v13732_v8 = vld [vmem:[%s21731_s30 + $0x1ec] sm:$0xf0]  ;;  %v10708_v17 = vld [vmem:[%s21731_s30 + $0x170] sm:$0xf0] }
 0x22c   :  { %21734 = vst [vmem:[#allocation5_spill] sm:$0xff] %v15321_v19  ;;  %v898_v33 = vpop.f32.mrf.mxu1  ;;  %v10771_v10 = vor.u32 %v13732_v8, %v10770_v62 }
 0x22d   :  { %3491 = vmatpush.bf16.msrb.mxu1 %v1014_v1 }
 0x230   :  { %v15324_v4 = vpop.f32.mrf.mxu0 }
 0x231   :  { %3492 = vmatpush.bf16.msrb.mxu1 %v1013_v44 }
 0x233   :  { %v15338_v35 = vpop.f32.mrf.mxu2 }
 0x234   :  { %21735 = vst [vmem:[#allocation6_spill] sm:$0xff] %v15338_v35  ;;  %v15346_v53 = vpop.f32.mrf.mxu1 }
 0x235   :  { %3493 = vmatpush.bf16.msrb.mxu1 %v1012_v31 }
 0x238   :  { %v724_v46 = vpop.f32.mrf.mxu0  ;;  %2835 = vmatmul.bf16.gmra.mxu2 %v10771_v10  ;;  %3164 = vmatmul.bf16.gmra.mxu3 %v10647_v29  ;;  %v13744_v10 = vld [vmem:[%s21731_s30 + $0x24c] sm:$0xf0]  ;;  %v13710_v29 = vld [vmem:[%s21731_s30 + $0x144] sm:$0xf] }
 0x239   :  { %v725_v11 = vadd.f32 %v15283_v21, %v724_v46  ;;  %3494 = vmatpush.bf16.msrb.mxu1 %v15274_v58  ;;  %v13702_v58 = vld [vmem:[%s21731_s30 + $0x104] sm:$0xf]  ;;  %v10692_v46 = vld [vmem:[%s21731_s30 + $0x150] sm:$0xf0] }
 0x23b   :  { %v15342_v40 = vadd.f32 %v893_v47, %v725_v11  ;;  %v15344_v51 = vpop.f32.mrf.mxu2  ;;  %v10538_v47 = vld [vmem:[%s21731_s30 + $0x8] sm:$0xf] }
 0x23c   :  { %21736 = vst [vmem:[#allocation7_spill] sm:$0xff] %v15344_v51  ;;  %v903_v61 = vpop.f32.mrf.mxu1  ;;  %v10570_v11 = vld [vmem:[%s21731_s30 + $0x48] sm:$0xf] }
 0x23d   :  { %3495 = vmatpush.bf16.msrb.mxu1 %v1010_v39  ;;  %v10660_v39 = vld [vmem:[%s21731_s30 + $0x110] sm:$0xf0] }
 0x23e   :  { %v10663_v38 = vor.u32 %v13702_v58, %v10660_v39 }
 0x240   :  { %v15348_v54 = vpop.f32.mrf.mxu0 }
 0x241   :  { %3496 = vmatpush.bf16.msrb.mxu1 %v15278_v37  ;;  %v13673_v37 = vld [vmem:[%s21731_s30 + $0x14] sm:$0xf0] }
 0x242   :  { %v10539_v60 = vor.u32 %v13673_v37, %v10538_v47  ;;  %v10695_v47 = vor.u32 %v13710_v29, %v10692_v46 }
 0x243   :  { %v15369_v34 = vpop.f32.mrf.mxu2 }
 0x244   :  { %21737 = vst [vmem:[#allocation8_spill] sm:$0xff] %v15369_v34  ;;  %v15384_v12 = vpop.f32.mrf.mxu1 }
 0x245   :  { %3497 = vmatpush.bf16.msrb.mxu1 %v15242_v15  ;;  %v10802_v15 = vld [vmem:[%s21731_s30 + $0x220] sm:$0xf] }
 0x246   :  { %v10803_v1 = vor.u32 %v13740_v13, %v10802_v15 }
 0x248   :  { %v729_v50 = vpop.f32.mrf.mxu0  ;;  %2840 = vmatmul.bf16.gmra.mxu2 %v10787_v49  ;;  %3169 = vmatmul.bf16.gmra.mxu3 %v10663_v38  ;;  %v10571_v49 = vor.u32 %v13681_v56, %v10570_v11 }
 0x249   :  { %v730_v26 = vadd.f32 %v15283_v21, %v729_v50  ;;  %3498 = vmatmul.bf16.vlgmr.msrb.gmra.mxu1 %v10539_v60 }
 0x24b   :  { %v15373_v16 = vadd.f32 %v898_v33, %v730_v26  ;;  %v15375_v2 = vpop.f32.mrf.mxu2  ;;  %v15377_v3 = vpop.f32.mrf.mxu3  ;;  %v10818_v33 = vld [vmem:[%s21731_s30 + $0x240] sm:$0xf] }
 0x24c   :  { %21738 = vst [vmem:[#allocation9_spill] sm:$0xff] %v15375_v2  ;;  %v908_v62 = vpop.f32.mrf.mxu1  ;;  %v10819_v39 = vor.u32 %v13744_v10, %v10818_v33 }
 0x250   :  { %v15379_v5 = vpop.f32.mrf.mxu0 }
 0x253   :  { %v15401_v9 = vpop.f32.mrf.mxu2  ;;  %v15403_v20 = vpop.f32.mrf.mxu3 }
 0x254   :  { %21739 = vst [vmem:[#allocation10_spill] sm:$0xff] %v15401_v9  ;;  %v15436_v37 = vpop.f32.mrf.mxu1 }
 0x258   :  { %v734_v44 = vpop.f32.mrf.mxu0  ;;  %2845 = vmatmul.bf16.gmra.mxu2 %v10803_v1  ;;  %3174 = vmatmul.bf16.gmra.mxu3 %v10679_v22  ;;  %v10586_v1 = vld [vmem:[%s21731_s30 + $0x68] sm:$0xf]  ;;  %v13685_v22 = vld [vmem:[%s21731_s30 + $0x74] sm:$0xf0] }
 0x259   :  { %v735_v28 = vadd.f32 %v15283_v21, %v734_v44  ;;  %3503 = vmatmul.bf16.gmra.mxu1 %v10555_v0  ;;  %v10587_v33 = vor.u32 %v13685_v22, %v10586_v1 }
 0x25b   :  { %v15406_v31 = vadd.f32 %v903_v61, %v735_v28  ;;  %v15408_v8 = vpop.f32.mrf.mxu2  ;;  %v15410_v55 = vpop.f32.mrf.mxu3  ;;  %v10835_v28 = vor.u32 %v13748_v7, %v10834_v59  ;;  %v10602_v59 = vld [vmem:[%s21731_s30 + $0x88] sm:$0xf]  ;;  %v13689_v7 = vld [vmem:[%s21731_s30 + $0x94] sm:$0xf0] }
 0x25c   :  { %21740 = vst [vmem:[#allocation11_spill] sm:$0xff] %v15408_v8  ;;  %v15445_v15 = vpop.f32.mrf.mxu1 }
 0x260   :  { %v15412_v36 = vpop.f32.mrf.mxu0 }
 0x263   :  { %v15432_v45 = vpop.f32.mrf.mxu2  ;;  %v15434_v58 = vpop.f32.mrf.mxu3 }
 0x264   :  { %21741 = vst [vmem:[#allocation12_spill] sm:$0xff] %v15432_v45  ;;  %v15471_v29 = vpop.f32.mrf.mxu1  ;;  %v10866_v45 = vld [vmem:[%s21731_s30 + $0x2a0] sm:$0xf] }
 0x268   :  { %v739_v38 = vpop.f32.mrf.mxu0  ;;  %2850 = vmatmul.bf16.gmra.mxu2 %v10819_v39  ;;  %3179 = vmatmul.bf16.gmra.mxu3 %v10695_v47  ;;  %v10850_v39 = vld [vmem:[%s21731_s30 + $0x280] sm:$0xf]  ;;  %v13752_v47 = vld [vmem:[%s21731_s30 + $0x28c] sm:$0xf0] }
 0x269   :  { %v740_v60 = vadd.f32 %v15283_v21, %v739_v38  ;;  %3508 = vmatmul.bf16.gmra.mxu1 %v10571_v49  ;;  %v13718_v49 = vld [vmem:[%s21731_s30 + $0x184] sm:$0xf]  ;;  %v10724_v38 = vld [vmem:[%s21731_s30 + $0x190] sm:$0xf0]  ;;  %v10851_v1 = vor.u32 %v13752_v47, %v10850_v39  ;;  %v13756_v39 = vld [vmem:[%s21731_s30 + $0x2ac] sm:$0xf0] }
 0x26a   :  { %v10727_v22 = vor.u32 %v13718_v49, %v10724_v38  ;;  %v13722_v47 = vld [vmem:[%s21731_s30 + $0x1a4] sm:$0xf]  ;;  %v10740_v49 = vld [vmem:[%s21731_s30 + $0x1b0] sm:$0xf0]  ;;  %v10618_v38 = vld [vmem:[%s21731_s30 + $0xa8] sm:$0xf] }
 0x26b   :  { %v15439_v61 = vadd.f32 %v908_v62, %v740_v60  ;;  %v15441_v50 = vpop.f32.mrf.mxu2  ;;  %v15443_v26 = vpop.f32.mrf.mxu3  ;;  %v10711_v62 = vor.u32 %v13714_v14, %v10708_v17 }
 0x26c   :  { %21742 = vst [vmem:[#allocation13_spill] sm:$0xff] %v15441_v50  ;;  %v918_v60 = vpop.f32.mrf.mxu1 }
 0x270   :  { %v15447_v13 = vpop.f32.mrf.mxu0 }
 0x273   :  { %v15467_v0 = vpop.f32.mrf.mxu2  ;;  %v15469_v44 = vpop.f32.mrf.mxu3 }
 0x274   :  { %21743 = vst [vmem:[#allocation14_spill] sm:$0xff] %v15467_v0  ;;  %v920_v0 = vpop.f32.mrf.mxu1 }
 0x278   :  { %v744_v10 = vpop.f32.mrf.mxu0  ;;  %2855 = vmatmul.bf16.gmra.mxu2 %v10835_v28  ;;  %3184 = vmatmul.bf16.gmra.mxu3 %v10711_v62  ;;  %v10603_v28 = vor.u32 %v13689_v7, %v10602_v59  ;;  %v13693_v59 = vld [vmem:[%s21731_s30 + $0xb4] sm:$0xf0] }
 0x279   :  { %3513 = vmatmul.bf16.gmra.mxu1 %v10587_v33 }
 0x27b   :  { %v15473_v46 = vpop.f32.mrf.mxu2  ;;  %v15475_v11 = vpop.f32.mrf.mxu3 }
 0x27c   :  { %21744 = vst [vmem:[#allocation15_spill] sm:$0xff] %v15473_v46 }
 0x280   :  { %v746_v56 = vpop.f32.mrf.mxu0 }
 0x283   :  { %v15495_v14 = vpop.f32.mrf.mxu2  ;;  %v15497_v17 = vpop.f32.mrf.mxu3 }
 0x284   :  { %21745 = vst [vmem:[#allocation16_spill] sm:$0xff] %v15495_v14  ;;  %v923_v14 = vpop.f32.mrf.mxu1 }
 0x288   :  { %v749_v62 = vpop.f32.mrf.mxu0  ;;  %2860 = vmatmul.bf16.gmra.mxu2 %v10851_v1  ;;  %3189 = vmatmul.bf16.gmra.mxu3 %v10727_v22  ;;  %v10867_v22 = vor.u32 %v13756_v39, %v10866_v45  ;;  %v745_v45 = vadd.f32 %v15283_v21, %v744_v10  ;;  %v747_v39 = vadd.f32 %v15283_v21, %v746_v56  ;;  %v10634_v10 = vld [vmem:[%s21731_s30 + $0xc8] sm:$0xf] }
 0x289   :  { %3518 = vmatmul.bf16.gmra.mxu1 %v10603_v28  ;;  %v10743_v28 = vor.u32 %v13722_v47, %v10740_v49  ;;  %v750_v51 = vadd.f32 %v15283_v21, %v749_v62  ;;  %v13760_v62 = vld [vmem:[%s21731_s30 + $0x2cc] sm:$0xf0] }
 0x28b   :  { %v15499_v33 = vpop.f32.mrf.mxu2  ;;  %v15501_v46 = vpop.f32.mrf.mxu3 }
 0x28c   :  { %21746 = vst [vmem:[#allocation17_spill] sm:$0xff] %v15499_v33  ;;  %v10619_v33 = vor.u32 %v13693_v59, %v10618_v38  ;;  %v925_v47 = vpop.f32.mrf.mxu1 }
 0x290   :  { %v751_v50 = vpop.f32.mrf.mxu0 }
 0x293   :  { %v15521_v7 = vpop.f32.mrf.mxu2  ;;  %v15523_v1 = vpop.f32.mrf.mxu3 }
 0x294   :  { %21747 = vst [vmem:[#allocation18_spill] sm:$0xff] %v15521_v7  ;;  %v752_v7 = vadd.f32 %v15283_v21, %v751_v50  ;;  %v10756_v50 = vld [vmem:[%s21731_s30 + $0x1d0] sm:$0xf0] }
 0x295   :  { %21748 = vst [vmem:[#allocation19_spill] sm:$0xff] %v15523_v1 }
 0x296   :  { %v921_v38 = vadd.f32 %v920_v0, %v752_v7  ;;  %v742_v0 = vadd.f32 %v15283_v21, %v15447_v13  ;;  %v737_v13 = vadd.f32 %v15283_v21, %v15412_v36  ;;  %v984_v36 = vmax.f32 %v15439_v61, 0.0  ;;  %v10772_v61 = vld [vmem:[%s21731_s30 + $0x1f0] sm:$0xf0] }
 0x298   :  { %v754_v8 = vpop.f32.mrf.mxu0  ;;  %2865 = vmatmul.bf16.gmra.mxu2 %v10867_v22  ;;  %3194 = vmatmul.bf16.gmra.mxu3 %v10743_v28  ;;  %v914_v22 = vadd.f32 %v15445_v15, %v745_v45  ;;  %v916_v28 = vadd.f32 %v15471_v29, %v747_v39  ;;  %v732_v39 = vadd.f32 %v15283_v21, %v15379_v5 }
 0x299   :  { %3523 = vmatmul.bf16.gmra.mxu1 %v10619_v33  ;;  %v755_v9 = vadd.f32 %v15283_v21, %v754_v8  ;;  %v10882_v33 = vld [vmem:[%s21731_s30 + $0x2c0] sm:$0xf]  ;;  %v919_v8 = vadd.f32 %v918_v60, %v750_v51  ;;  %v13697_v51 = vld [vmem:[%s21731_s30 + $0xd4] sm:$0xf0] }
 0x29a   :  { %v10635_v41 = vor.u32 %v13697_v51, %v10634_v10  ;;  %v987_v15 = vmax.f32 %v916_v28, 0.0  ;;  %v980_v10 = vmax.f32 %v15373_v16, 0.0 }
 0x29b   :  { %v15526_v2 = vpop.f32.mrf.mxu2  ;;  %v15528_v34 = vpop.f32.mrf.mxu3  ;;  %v924_v35 = vadd.f32 %v923_v14, %v755_v9  ;;  %v13726_v9 = vld [vmem:[%s21731_s30 + $0x1c4] sm:$0xf]  ;;  %v988_v19 = vmax.f32 %v919_v8, 0.0  ;;  %v10650_v8 = vld [vmem:[%s21731_s30 + $0xe8] sm:$0xf] }
 0x29c   :  { %21749 = vst [vmem:[#allocation20_spill] sm:$0xff] %v15526_v2  ;;  %v10759_v2 = vor.u32 %v13726_v9, %v10756_v50 }
 0x29d   :  { %21750 = vst [vmem:[#allocation21_spill] sm:$0xff] %v15528_v34  ;;  %v990_v56 = vmax.f32 %v924_v35, 0.0  ;;  %v989_v34 = vmax.f32 %v921_v38, 0.0  ;;  %v911_v35 = vadd.f32 %v15436_v37, %v742_v0  ;;  %v982_v37 = vmax.f32 %v15406_v31, 0.0 }
 0x29e   :  { %v727_v31 = vadd.f32 %v15283_v21, %v15348_v54 }
 0x2a0   :  { %v756_v49 = vpop.f32.mrf.mxu0 }
 0x2a1   :  { %v757_v59 = vadd.f32 %v15283_v21, %v756_v49  ;;  %v10883_v49 = vor.u32 %v13760_v62, %v10882_v33  ;;  %v985_v33 = vmax.f32 %v911_v35, 0.0 }
 0x2a3   :  { %v926_v60 = vadd.f32 %v925_v47, %v757_v59  ;;  %v15555_v14 = vpop.f32.mrf.mxu2  ;;  %v15557_v7 = vpop.f32.mrf.mxu3  ;;  %v986_v47 = vmax.f32 %v914_v22, 0.0  ;;  %v1022_v59 = vpack.c.bf16 %v989_v34, %v988_v19  ;;  %v10898_v19 = vld [vmem:[%s21731_s30 + $0x2e0] sm:$0xf]  ;;  %v901_v34 = vadd.f32 %v15346_v53, %v732_v39  ;;  %v13701_v53 = vld [vmem:[%s21731_s30 + $0xf4] sm:$0xf0] }
 0x2a4   :  { %v1020_v5 = vpack.c.bf16 %v985_v33, %v984_v36  ;;  %v896_v22 = vadd.f32 %v15315_v23, %v727_v31  ;;  %v10914_v23 = vld [vmem:[%s21731_s30 + $0x300] sm:$0xf]  ;;  %v10666_v39 = vld [vmem:[%s21731_s30 + $0x108] sm:$0xf] }
 0x2a5   :  { %v991_v25 = vmax.f32 %v926_v60, 0.0  ;;  %v981_v0 = vmax.f32 %v901_v34, 0.0  ;;  %v722_v60 = vadd.f32 %v15283_v21, %v15324_v4  ;;  %v3131_v34 = vadd.f32 %v15377_v3, %v15104_v43  ;;  %v10930_v43 = vld [vmem:[%s21731_s30 + $0x320] sm:$0xf]  ;;  %v13772_v3 = vld [vmem:[%s21731_s30 + $0x32c] sm:$0xf0] }
 0x2a6   :  { %v979_v35 = vmax.f32 %v896_v22, 0.0  ;;  %v10931_v22 = vor.u32 %v13772_v3, %v10930_v43 }
 0x2a7   :  { %v1023_v1 = vpack.c.bf16 %v991_v25, %v990_v56  ;;  %v906_v25 = vadd.f32 %v15384_v12, %v737_v13  ;;  %v13730_v12 = vld [vmem:[%s21731_s30 + $0x1e4] sm:$0xf]  ;;  %v10651_v56 = vor.u32 %v13701_v53, %v10650_v8  ;;  %v1018_v54 = vpack.c.bf16 %v981_v0, %v980_v10  ;;  %v10804_v10 = vld [vmem:[%s21731_s30 + $0x230] sm:$0xf0]  ;;  %v13709_v0 = vld [vmem:[%s21731_s30 + $0x134] sm:$0xf0] }
 0x2a8   :  { %2870 = vmatmul.bf16.gmra.mxu2 %v10883_v49  ;;  %3199 = vmatmul.bf16.gmra.mxu3 %v10759_v2  ;;  %v1021_v2 = vpack.c.bf16 %v987_v15, %v986_v47  ;;  %v10775_v50 = vor.u32 %v13730_v12, %v10772_v61  ;;  %v891_v28 = vadd.f32 %v15271_v30, %v722_v60  ;;  %v978_v49 = vmax.f32 %v15342_v40, 0.0  ;;  %v13768_v30 = vld [vmem:[%s21731_s30 + $0x30c] sm:$0xf0]  ;;  %v13734_v40 = vld [vmem:[%s21731_s30 + $0x204] sm:$0xf] }
 0x2a9   :  { %3859 = vmatpush.bf16.msrb.mxu0 %v1023_v1  ;;  %3528 = vmatmul.bf16.gmra.mxu1 %v10635_v41  ;;  %v13764_v41 = vld [vmem:[%s21731_s30 + $0x2ec] sm:$0xf0]  ;;  %v983_v1 = vmax.f32 %v906_v25, 0.0  ;;  %v976_v47 = vmax.f32 %v15319_v24, 0.0  ;;  %v13671_v24 = vld [vmem:[%s21731_s30 + $0xc] sm:$0xf]  ;;  %v3133_v53 = vadd.f32 %v15403_v20, %v15122_v52 }
 0x2aa   :  { %v10899_v9 = vor.u32 %v13764_v41, %v10898_v19  ;;  %v1017_v21 = vpack.c.bf16 %v979_v35, %v978_v49  ;;  %v977_v4 = vmax.f32 %v891_v28, 0.0  ;;  %v10540_v15 = vld [vmem:[%s21731_s30 + $0x18] sm:$0xf0]  ;;  %v13705_v25 = vld [vmem:[%s21731_s30 + $0x114] sm:$0xf0]  ;;  %v10915_v19 = vor.u32 %v13768_v30, %v10914_v23 }
 0x2ab   :  { %v15564_v29 = vpop.f32.mrf.mxu2  ;;  %v15566_v45 = vpop.f32.mrf.mxu3  ;;  %v1019_v51 = vpack.c.bf16 %v983_v1, %v982_v37  ;;  %v10543_v37 = vor.u32 %v13671_v24, %v10540_v15  ;;  %v13675_v52 = vld [vmem:[%s21731_s30 + $0x2c] sm:$0xf]  ;;  %v10556_v20 = vld [vmem:[%s21731_s30 + $0x38] sm:$0xf0]  ;;  %v3136_v28 = vadd.f32 %v15410_v55, %v15141_v63  ;;  %v3138_v30 = vadd.f32 %v15434_v58, %v15161_v42  ;;  %v10946_v63 = vld [vmem:[%s21731_s30 + $0x340] sm:$0xf] }
 0x2ac   :  { %v1016_v33 = vpack.c.bf16 %v977_v4, %v976_v47  ;;  %v10559_v49 = vor.u32 %v13675_v52, %v10556_v20  ;;  %v13776_v55 = vld [vmem:[%s21731_s30 + $0x34c] sm:$0xf0]  ;;  %v13742_v24 = vld [vmem:[%s21731_s30 + $0x244] sm:$0xf]  ;;  %v10820_v15 = vld [vmem:[%s21731_s30 + $0x250] sm:$0xf0] }
 0x2ad   :  { %3860 = vmatpush.bf16.msrb.mxu0 %v1022_v59  ;;  %v10788_v59 = vld [vmem:[%s21731_s30 + $0x210] sm:$0xf0]  ;;  %v13679_v42 = vld [vmem:[%s21731_s30 + $0x4c] sm:$0xf]  ;;  %v10572_v58 = vld [vmem:[%s21731_s30 + $0x58] sm:$0xf0] }
 0x2ae   :  { %v10791_v41 = vor.u32 %v13734_v40, %v10788_v59  ;;  %v13746_v20 = vld [vmem:[%s21731_s30 + $0x264] sm:$0xf] }
 0x2b1   :  { %3861 = vmatpush.bf16.msrb.mxu0 %v1021_v2 }
 0x2b3   :  { %v15594_v38 = vpop.f32.mrf.mxu2  ;;  %v15596_v62 = vpop.f32.mrf.mxu3 }
 0x2b5   :  { %3862 = vmatpush.bf16.msrb.mxu0 %v1020_v5  ;;  %v10667_v5 = vor.u32 %v13705_v25, %v10666_v39  ;;  %v10698_v39 = vld [vmem:[%s21731_s30 + $0x148] sm:$0xf]  ;;  %v13713_v25 = vld [vmem:[%s21731_s30 + $0x154] sm:$0xf0] }
 0x2b8   :  { %2875 = vmatmul.bf16.gmra.mxu2 %v10899_v9  ;;  %3204 = vmatmul.bf16.gmra.mxu3 %v10775_v50  ;;  %v13738_v50 = vld [vmem:[%s21731_s30 + $0x224] sm:$0xf] }
 0x2b9   :  { %3863 = vmatpush.bf16.msrb.mxu0 %v1019_v51  ;;  %3533 = vmatmul.bf16.gmra.mxu1 %v10651_v56  ;;  %v10682_v51 = vld [vmem:[%s21731_s30 + $0x128] sm:$0xf] }
 0x2ba   :  { %v10683_v35 = vor.u32 %v13709_v0, %v10682_v51  ;;  %v10836_v51 = vld [vmem:[%s21731_s30 + $0x270] sm:$0xf0]  ;;  %v10714_v0 = vld [vmem:[%s21731_s30 + $0x168] sm:$0xf] }
 0x2bb   :  { %v15604_v13 = vpop.f32.mrf.mxu2  ;;  %v15606_v16 = vpop.f32.mrf.mxu3 }
 0x2bd   :  { %3864 = vmatpush.bf16.msrb.mxu0 %v1018_v54  ;;  %v10807_v54 = vor.u32 %v13738_v50, %v10804_v10  ;;  %v3143_v50 = vadd.f32 %v15469_v44, %v15199_v32  ;;  %v13683_v32 = vld [vmem:[%s21731_s30 + $0x6c] sm:$0xf]  ;;  %v10588_v44 = vld [vmem:[%s21731_s30 + $0x78] sm:$0xf0] }
 0x2c1   :  { %3865 = vmatpush.bf16.msrb.mxu0 %v1017_v21 }
 0x2c3   :  { %v15633_v36 = vpop.f32.mrf.mxu2  ;;  %v15635_v2 = vpop.f32.mrf.mxu3 }
 0x2c5   :  { %3866 = vmatpush.bf16.msrb.mxu0 %v1016_v33 }
 0x2c6   :  { %v3499_v12 = vpop.f32.mrf.mxu1 }
 0x2c7   :  { %v15639_v61 = vadd.f32 %v3499_v12, %v3131_v34  ;;  %v10823_v34 = vor.u32 %v13742_v24, %v10820_v15  ;;  %v10699_v12 = vor.u32 %v13713_v25, %v10698_v39  ;;  %v13750_v25 = vld [vmem:[%s21731_s30 + $0x284] sm:$0xf] }
 0x2c8   :  { %2880 = vmatmul.bf16.gmra.mxu2 %v10915_v19  ;;  %3209 = vmatmul.bf16.gmra.mxu3 %v10791_v41  ;;  %v10947_v41 = vor.u32 %v13776_v55, %v10946_v63 }
 0x2c9   :  { %3867 = vmatmul.bf16.vlgmr.msrb.gmra.mxu0 %v10543_v37  ;;  %3538 = vmatmul.bf16.gmra.mxu1 %v10667_v5  ;;  %v3141_v37 = vadd.f32 %v15443_v26, %v15180_v27  ;;  %v10575_v5 = vor.u32 %v13679_v42, %v10572_v58  ;;  %v10962_v27 = vld [vmem:[%s21731_s30 + $0x360] sm:$0xf]  ;;  %v13780_v26 = vld [vmem:[%s21731_s30 + $0x36c] sm:$0xf0]  ;;  %v3148_v42 = vadd.f32 %v15497_v17, %v15232_v57  ;;  %v13687_v57 = vld [vmem:[%s21731_s30 + $0x8c] sm:$0xf] }
 0x2ca   :  { %v10604_v17 = vld [vmem:[%s21731_s30 + $0x98] sm:$0xf0] }
 0x2cb   :  { %v15641_v1 = vpop.f32.mrf.mxu2  ;;  %v15643_v8 = vpop.f32.mrf.mxu3 }
 0x2ce   :  { %v3501_v31 = vpop.f32.mrf.mxu1 }
 0x2cf   :  { %v15647_v9 = vadd.f32 %v3501_v31, %v3133_v53 }
 0x2d3   :  { %v15673_v56 = vpop.f32.mrf.mxu2  ;;  %v15675_v60 = vpop.f32.mrf.mxu3 }
 0x2d6   :  { %v3504_v47 = vpop.f32.mrf.mxu1 }
 0x2d7   :  { %v15679_v21 = vadd.f32 %v3504_v47, %v3136_v28  ;;  %v3146_v47 = vadd.f32 %v15475_v11, %v15217_v48  ;;  %v10978_v48 = vld [vmem:[%s21731_s30 + $0x380] sm:$0xf]  ;;  %v13784_v11 = vld [vmem:[%s21731_s30 + $0x38c] sm:$0xf0] }
 0x2d8   :  { %2885 = vmatmul.bf16.gmra.mxu2 %v10931_v22  ;;  %3214 = vmatmul.bf16.gmra.mxu3 %v10807_v54  ;;  %v13717_v22 = vld [vmem:[%s21731_s30 + $0x174] sm:$0xf0] }
 0x2d9   :  { %3872 = vmatmul.bf16.gmra.mxu0 %v10559_v49  ;;  %3543 = vmatmul.bf16.gmra.mxu1 %v10683_v35  ;;  %v10963_v49 = vor.u32 %v13780_v26, %v10962_v27  ;;  %v10839_v35 = vor.u32 %v13746_v20, %v10836_v51  ;;  %v10607_v27 = vor.u32 %v13687_v57, %v10604_v17  ;;  %v13725_v57 = vld [vmem:[%s21731_s30 + $0x1b4] sm:$0xf0] }
 0x2db   :  { %v15681_v4 = vpop.f32.mrf.mxu2  ;;  %v15683_v23 = vpop.f32.mrf.mxu3 }
 0x2de   :  { %v3506_v40 = vpop.f32.mrf.mxu1 }
 0x2df   :  { %v15687_v59 = vadd.f32 %v3506_v40, %v3138_v30  ;;  %v10591_v30 = vor.u32 %v13683_v32, %v10588_v44  ;;  %v10715_v40 = vor.u32 %v13717_v22, %v10714_v0  ;;  %v11738_v0 = vld [vmem:[%s21645_s5 + $0x70] sm:$0xf]  ;;  %v21757_v22 = vld [vmem:[#allocation19_spill] sm:$0xff] }
 0x2e3   :  { %v15713_v33 = vpop.f32.mrf.mxu2  ;;  %v15715_v19 = vpop.f32.mrf.mxu3 }
 0x2e4   :  { %21751 = vst [vmem:[#allocation22_spill] sm:$0xff] %v15713_v33 }
 0x2e6   :  { %v3509_v53 = vpop.f32.mrf.mxu1 }
 0x2e7   :  { %v15719_v31 = vadd.f32 %v3509_v53, %v3141_v37  ;;  %v13721_v37 = vld [vmem:[%s21731_s30 + $0x194] sm:$0xf0]  ;;  %v10979_v53 = vor.u32 %v13784_v11, %v10978_v48  ;;  %v10868_v48 = vld [vmem:[%s21731_s30 + $0x2b0] sm:$0xf0]  ;;  %v13691_v11 = vld [vmem:[%s21731_s30 + $0xac] sm:$0xf] }
 0x2e8   :  { %2890 = vmatmul.bf16.gmra.mxu2 %v10947_v41  ;;  %3219 = vmatmul.bf16.gmra.mxu3 %v10823_v34  ;;  %v10852_v41 = vld [vmem:[%s21731_s30 + $0x290] sm:$0xf0]  ;;  %v10730_v34 = vld [vmem:[%s21731_s30 + $0x188] sm:$0xf] }
 0x2e9   :  { %3877 = vmatmul.bf16.gmra.mxu0 %v10575_v5  ;;  %3548 = vmatmul.bf16.gmra.mxu1 %v10699_v12  ;;  %v10731_v26 = vor.u32 %v13721_v37, %v10730_v34 }
 0x2eb   :  { %v15721_v43 = vpop.f32.mrf.mxu2  ;;  %v15723_v3 = vpop.f32.mrf.mxu3 }
 0x2ec   :  { %21752 = vst [vmem:[#allocation23_spill] sm:$0xff] %v15721_v43 }
 0x2ee   :  { %v3511_v10 = vpop.f32.mrf.mxu1 }
 0x2ef   :  { %v15727_v52 = vadd.f32 %v3511_v10, %v3143_v50  ;;  %v10855_v50 = vor.u32 %v13750_v25, %v10852_v41  ;;  %v3151_v10 = vadd.f32 %v15501_v46, %v15244_v6  ;;  %v13973_v6 = vld [vmem:[%s21645_s5 + $0x74] sm:$0xf0]  ;;  %v11802_v46 = vld [vmem:[%s21645_s5 + $0xf0] sm:$0xf]  ;;  %v10620_v25 = vld [vmem:[%s21731_s30 + $0xb8] sm:$0xf0] }
 0x2f0   :  { %v10746_v41 = vld [vmem:[%s21731_s30 + $0x1a8] sm:$0xf] }
 0x2f3   :  { %v15753_v54 = vpop.f32.mrf.mxu2  ;;  %v15755_v28 = vpop.f32.mrf.mxu3 }
 0x2f4   :  { %21753 = vst [vmem:[#allocation24_spill] sm:$0xff] %v15753_v54 }
 0x2f6   :  { %v3514_v63 = vpop.f32.mrf.mxu1 }
 0x2f7   :  { %v15759_v55 = vadd.f32 %v3514_v63, %v3146_v47  ;;  %v13989_v47 = vld [vmem:[%s21645_s5 + $0xf4] sm:$0xf0] }
 0x2f8   :  { %2895 = vmatmul.bf16.gmra.mxu2 %v10963_v49  ;;  %3224 = vmatmul.bf16.gmra.mxu3 %v10839_v35  ;;  %v3153_v49 = vadd.f32 %v21757_v22, %v15261_v18  ;;  %v11739_v35 = vor.u32 %v13973_v6, %v11738_v0  ;;  %v13754_v18 = vld [vmem:[%s21731_s30 + $0x2a4] sm:$0xf] }
 0x2f9   :  { %3882 = vmatmul.bf16.gmra.mxu0 %v10591_v30  ;;  %3553 = vmatmul.bf16.gmra.mxu1 %v10715_v40  ;;  %v11803_v30 = vor.u32 %v13989_v47, %v11802_v46 }
 0x2fa   :  { %5674 = vmatpush.bf16.msrb.mxu2 %v11739_v35 }
 0x2fb   :  { %v15761_v24 = vpop.f32.mrf.mxu2  ;;  %v15763_v15 = vpop.f32.mrf.mxu3  ;;  %5723 = vmatpush.bf16.msrb.mxu3 %v11803_v30 }
 0x2fc   :  { %21754 = vst [vmem:[#allocation25_spill] sm:$0xff] %v15761_v24 }
 0x2fe   :  { %v3516_v58 = vpop.f32.mrf.mxu1 }
 0x2ff   :  { %v15767_v39 = vadd.f32 %v3516_v58, %v3148_v42  ;;  %v10994_v42 = vld [vmem:[%s21731_s30 + $0x3a0] sm:$0xf]  ;;  %v13788_v58 = vld [vmem:[%s21731_s30 + $0x3ac] sm:$0xf0] }
 0x300   :  { %v10995_v37 = vor.u32 %v13788_v58, %v10994_v42  ;;  %v13792_v42 = vld [vmem:[%s21731_s30 + $0x3cc] sm:$0xf0]  ;;  %v13758_v58 = vld [vmem:[%s21731_s30 + $0x2c4] sm:$0xf] }
 0x303   :  { %v15793_v5 = vpop.f32.mrf.mxu2  ;;  %v15795_v12 = vpop.f32.mrf.mxu3 }
 0x304   :  { %21755 = vst [vmem:[#allocation26_spill] sm:$0xff] %v15793_v5 }
 0x306   :  { %v3519_v20 = vpop.f32.mrf.mxu1 }
 0x307   :  { %v15799_v51 = vadd.f32 %v3519_v20, %v3151_v10  ;;  %v21760_v10 = vld [vmem:[#allocation21_spill] sm:$0xff]  ;;  %v10747_v20 = vor.u32 %v13725_v57, %v10746_v41 }
 0x308   :  { %2900 = vmatmul.bf16.gmra.mxu2 %v10979_v53  ;;  %3229 = vmatmul.bf16.gmra.mxu3 %v10855_v50  ;;  %v10871_v53 = vor.u32 %v13754_v18, %v10868_v48  ;;  %v21759_v50 = vld [vmem:[#allocation3_spill] sm:$0xff]  ;;  %v10884_v18 = vld [vmem:[%s21731_s30 + $0x2d0] sm:$0xf0]  ;;  %v10636_v48 = vld [vmem:[%s21731_s30 + $0xd8] sm:$0xf0] }
 0x309   :  { %3887 = vmatmul.bf16.gmra.mxu0 %v10607_v27  ;;  %3558 = vmatmul.bf16.gmra.mxu1 %v10731_v26  ;;  %v3156_v27 = vadd.f32 %v21760_v10, %v21759_v50  ;;  %v10623_v26 = vor.u32 %v13691_v11, %v10620_v25  ;;  %v10762_v11 = vld [vmem:[%s21731_s30 + $0x1c8] sm:$0xf]  ;;  %v13729_v25 = vld [vmem:[%s21731_s30 + $0x1d4] sm:$0xf0] }
 0x30a   :  { %v21764_v50 = vld [vmem:[#allocation5_spill] sm:$0xff] }
 0x30b   :  { %v15801_v32 = vpop.f32.mrf.mxu2  ;;  %v15803_v44 = vpop.f32.mrf.mxu3  ;;  %v3161_v10 = vadd.f32 %v15566_v45, %v21764_v50  ;;  %v11026_v45 = vld [vmem:[%s21731_s30 + $0x3e0] sm:$0xf] }
 0x30c   :  { %21756 = vst [vmem:[#allocation27_spill] sm:$0xff] %v15801_v32 }
 0x30e   :  { %v3521_v40 = vpop.f32.mrf.mxu1 }
 0x30f   :  { %v15819_v63 = vadd.f32 %v3521_v40, %v3153_v49  ;;  %v21762_v49 = vld [vmem:[#allocation4_spill] sm:$0xff]  ;;  %v11010_v40 = vld [vmem:[%s21731_s30 + $0x3c0] sm:$0xf] }
 0x310   :  { %v3158_v35 = vadd.f32 %v15557_v7, %v21762_v49  ;;  %v13695_v7 = vld [vmem:[%s21731_s30 + $0xcc] sm:$0xf] }
 0x313   :  { %v15845_v17 = vpop.f32.mrf.mxu2  ;;  %v15847_v34 = vpop.f32.mrf.mxu3 }
 0x314   :  { %21758 = vst [vmem:[#allocation19_spill] sm:$0xff] %v15845_v17 }
 0x316   :  { %v3524_v0 = vpop.f32.mrf.mxu1 }
 0x317   :  { %v15851_v6 = vadd.f32 %v3524_v0, %v3156_v27  ;;  %v10639_v27 = vor.u32 %v13695_v7, %v10636_v48  ;;  %v13762_v7 = vld [vmem:[%s21731_s30 + $0x2e4] sm:$0xf]  ;;  %v10900_v48 = vld [vmem:[%s21731_s30 + $0x2f0] sm:$0xf0] }
 0x318   :  { %2905 = vmatmul.bf16.gmra.mxu2 %v10995_v37  ;;  %3234 = vmatmul.bf16.gmra.mxu3 %v10871_v53  ;;  %v11011_v37 = vor.u32 %v13792_v42, %v11010_v40  ;;  %v10887_v53 = vor.u32 %v13758_v58, %v10884_v18  ;;  %v13796_v18 = vld [vmem:[%s21731_s30 + $0x3ec] sm:$0xf0] }
 0x319   :  { %3892 = vmatmul.bf16.gmra.mxu0 %v10623_v26  ;;  %3563 = vmatmul.bf16.gmra.mxu1 %v10747_v20  ;;  %v10763_v26 = vor.u32 %v13729_v25, %v10762_v11  ;;  %v10652_v11 = vld [vmem:[%s21731_s30 + $0xf8] sm:$0xf0]  ;;  %v10778_v25 = vld [vmem:[%s21731_s30 + $0x1e8] sm:$0xf] }
 0x31b   :  { %v15853_v46 = vpop.f32.mrf.mxu2  ;;  %v15855_v22 = vpop.f32.mrf.mxu3 }
 0x31c   :  { %21761 = vst [vmem:[#allocation3_spill] sm:$0xff] %v15853_v46 }
 0x31e   :  { %v3526_v47 = vpop.f32.mrf.mxu1 }
 0x31f   :  { %v15859_v30 = vadd.f32 %v3526_v47, %v3158_v35  ;;  %v21766_v47 = vld [vmem:[#allocation6_spill] sm:$0xff] }
 0x320   :  { %v3163_v40 = vadd.f32 %v15596_v62, %v21766_v47  ;;  %v13699_v62 = vld [vmem:[%s21731_s30 + $0xec] sm:$0xf] }
 0x321   :  { %v10655_v47 = vor.u32 %v13699_v62, %v10652_v11  ;;  %v13766_v62 = vld [vmem:[%s21731_s30 + $0x304] sm:$0xf]  ;;  %v10916_v11 = vld [vmem:[%s21731_s30 + $0x310] sm:$0xf0] }
 0x323   :  { %v15885_v41 = vpop.f32.mrf.mxu2  ;;  %v15887_v57 = vpop.f32.mrf.mxu3 }
 0x324   :  { %21763 = vst [vmem:[#allocation21_spill] sm:$0xff] %v15885_v41 }
 0x326   :  { %v3529_v20 = vpop.f32.mrf.mxu1 }
 0x327   :  { %v15891_v0 = vadd.f32 %v3529_v20, %v3161_v10  ;;  %v11027_v10 = vor.u32 %v13796_v18, %v11026_v45 }
 0x328   :  { %2910 = vmatmul.bf16.gmra.mxu2 %v11011_v37  ;;  %3239 = vmatmul.bf16.gmra.mxu3 %v10887_v53  ;;  %v13733_v37 = vld [vmem:[%s21731_s30 + $0x1f4] sm:$0xf0] }
 0x329   :  { %3897 = vmatmul.bf16.gmra.mxu0 %v10639_v27  ;;  %3568 = vmatmul.bf16.gmra.mxu1 %v10763_v26  ;;  %v10903_v27 = vor.u32 %v13762_v7, %v10900_v48  ;;  %v21768_v26 = vld [vmem:[#allocation7_spill] sm:$0xff]  ;;  %v13800_v48 = vld [vmem:[%s21731_s30 + $0x40c] sm:$0xf0] }
 0x32a   :  { %v3166_v20 = vadd.f32 %v15606_v16, %v21768_v26  ;;  %v11042_v16 = vld [vmem:[%s21731_s30 + $0x400] sm:$0xf] }
 0x32b   :  { %v15893_v49 = vpop.f32.mrf.mxu2  ;;  %v15895_v35 = vpop.f32.mrf.mxu3  ;;  %v11043_v26 = vor.u32 %v13800_v48, %v11042_v16  ;;  %v21774_v16 = vld [vmem:[#allocation10_spill] sm:$0xff] }
 0x32c   :  { %21765 = vst [vmem:[#allocation4_spill] sm:$0xff] %v15893_v49  ;;  %v3173_v48 = vadd.f32 %v15675_v60, %v21774_v16  ;;  %v13770_v60 = vld [vmem:[%s21731_s30 + $0x324] sm:$0xf] }
 0x32e   :  { %v3531_v42 = vpop.f32.mrf.mxu1 }
 0x32f   :  { %v15899_v58 = vadd.f32 %v3531_v42, %v3163_v40  ;;  %v10779_v40 = vor.u32 %v13733_v37, %v10778_v25  ;;  %v10668_v25 = vld [vmem:[%s21731_s30 + $0x118] sm:$0xf0]  ;;  %v10794_v37 = vld [vmem:[%s21731_s30 + $0x208] sm:$0xf] }
 0x333   :  { %v15925_v53 = vpop.f32.mrf.mxu2  ;;  %v15927_v50 = vpop.f32.mrf.mxu3 }
 0x334   :  { %21767 = vst [vmem:[#allocation5_spill] sm:$0xff] %v15925_v53  ;;  %v21770_v53 = vld [vmem:[#allocation8_spill] sm:$0xff] }
 0x335   :  { %v3168_v45 = vadd.f32 %v15635_v2, %v21770_v53  ;;  %v13703_v2 = vld [vmem:[%s21731_s30 + $0x10c] sm:$0xf]  ;;  %v13737_v53 = vld [vmem:[%s21731_s30 + $0x214] sm:$0xf0] }
 0x336   :  { %v3534_v42 = vpop.f32.mrf.mxu1 }
 0x337   :  { %v15931_v49 = vadd.f32 %v3534_v42, %v3166_v20  ;;  %v10919_v20 = vor.u32 %v13766_v62, %v10916_v11  ;;  %v10671_v42 = vor.u32 %v13703_v2, %v10668_v25 }
 0x338   :  { %2915 = vmatmul.bf16.gmra.mxu2 %v11027_v10  ;;  %3244 = vmatmul.bf16.gmra.mxu3 %v10903_v27 }
 0x339   :  { %3902 = vmatmul.bf16.gmra.mxu0 %v10655_v47  ;;  %3573 = vmatmul.bf16.gmra.mxu1 %v10779_v40  ;;  %v21772_v47 = vld [vmem:[#allocation9_spill] sm:$0xff] }
 0x33a   :  { %v3171_v40 = vadd.f32 %v15643_v8, %v21772_v47 }
 0x33b   :  { %v15933_v41 = vpop.f32.mrf.mxu2  ;;  %v15935_v46 = vpop.f32.mrf.mxu3 }
 0x33c   :  { %21769 = vst [vmem:[#allocation6_spill] sm:$0xff] %v15933_v41 }
 0x33e   :  { %v3536_v18 = vpop.f32.mrf.mxu1 }
 0x33f   :  { %v15939_v7 = vadd.f32 %v3536_v18, %v3168_v45  ;;  %v10795_v45 = vor.u32 %v13737_v53, %v10794_v37  ;;  %v10684_v53 = vld [vmem:[%s21731_s30 + $0x138] sm:$0xf0] }
 0x343   :  { %v15965_v10 = vpop.f32.mrf.mxu2  ;;  %v15967_v27 = vpop.f32.mrf.mxu3 }
 0x344   :  { %21771 = vst [vmem:[#allocation7_spill] sm:$0xff] %v15965_v10 }
 0x346   :  { %v3868_v18 = vpop.f32.mrf.mxu0  ;;  %v3539_v41 = vpop.f32.mrf.mxu1 }
 0x347   :  { %v3869_v17 = vadd.f32 %v3868_v18, %v15639_v61  ;;  %v15972_v32 = vadd.f32 %v3539_v41, %v3171_v40  ;;  %v11058_v61 = vld [vmem:[%s21731_s30 + $0x420] sm:$0xf]  ;;  %v13804_v41 = vld [vmem:[%s21731_s30 + $0x42c] sm:$0xf0] }
 0x348   :  { %2920 = vmatmul.bf16.gmra.mxu2 %v11043_v26  ;;  %3249 = vmatmul.bf16.gmra.mxu3 %v10919_v20  ;;  %v10810_v26 = vld [vmem:[%s21731_s30 + $0x228] sm:$0xf]  ;;  %v13741_v20 = vld [vmem:[%s21731_s30 + $0x234] sm:$0xf0]  ;;  %v11059_v18 = vor.u32 %v13804_v41, %v11058_v61 }
 0x349   :  { %3907 = vmatmul.bf16.gmra.mxu0 %v10671_v42  ;;  %3578 = vmatmul.bf16.gmra.mxu1 %v10795_v45  ;;  %v4228_v11 = vpack.c.bf16 %v3869_v17, %v3869_v17  ;;  %v10932_v17 = vld [vmem:[%s21731_s30 + $0x330] sm:$0xf0]  ;;  %v21779_v41 = vld [vmem:[#allocation12_spill] sm:$0xff] }
 0x34a   :  { %v10935_v16 = vor.u32 %v13770_v60, %v10932_v17 }
 0x34b   :  { %v15974_v10 = vpop.f32.mrf.mxu2  ;;  %v15976_v5 = vpop.f32.mrf.mxu3  ;;  %v4388_v47 = vunpack.c.l.b16 %v4228_v11 }
 0x34c   :  { %21773 = vst [vmem:[#allocation8_spill] sm:$0xff] %v15974_v10  ;;  %v10811_v10 = vor.u32 %v13741_v20, %v10810_v26  ;;  %v10826_v26 = vld [vmem:[%s21731_s30 + $0x248] sm:$0xf]  ;;  %v13745_v20 = vld [vmem:[%s21731_s30 + $0x254] sm:$0xf0] }
 0x34e   :  { %v3870_v8 = vpop.f32.mrf.mxu0  ;;  %v3541_v62 = vpop.f32.mrf.mxu1 }
 0x34f   :  { %v3871_v2 = vadd.f32 %v3870_v8, %v15647_v9  ;;  %v15981_v25 = vadd.f32 %v3541_v62, %v3173_v48  ;;  %v13707_v9 = vld [vmem:[%s21731_s30 + $0x12c] sm:$0xf]  ;;  %v21776_v48 = vld [vmem:[#allocation11_spill] sm:$0xff] }
 0x350   :  { %v3176_v8 = vadd.f32 %v15683_v23, %v21776_v48  ;;  %v3178_v23 = vadd.f32 %v15715_v19, %v21779_v41  ;;  %v13774_v19 = vld [vmem:[%s21731_s30 + $0x344] sm:$0xf] }
 0x351   :  { %v4229_v37 = vpack.c.bf16 %v3871_v2, %v3871_v2  ;;  %v10687_v2 = vor.u32 %v13707_v9, %v10684_v53 }
 0x353   :  { %v4389_v40 = vunpack.c.l.b16 %v4229_v37  ;;  %v16007_v42 = vpop.f32.mrf.mxu2  ;;  %v16009_v45 = vpop.f32.mrf.mxu3 }
 0x354   :  { %21775 = vst [vmem:[#allocation9_spill] sm:$0xff] %v16007_v42 }
 0x355   :  { %v16013_v62 = vpack.c.b16 %v4389_v40, %v4388_v47 }
 0x356   :  { %v3873_v24 = vpop.f32.mrf.mxu0  ;;  %v3544_v54 = vpop.f32.mrf.mxu1 }
 0x357   :  { %21777 = vst [vmem:[#allocation10_spill] sm:$0xff] %v16013_v62  ;;  %v3874_v43 = vadd.f32 %v3873_v24, %v15679_v21  ;;  %v16016_v33 = vadd.f32 %v3544_v54, %v3176_v8  ;;  %v11074_v21 = vld [vmem:[%s21731_s30 + $0x440] sm:$0xf]  ;;  %v13808_v54 = vld [vmem:[%s21731_s30 + $0x44c] sm:$0xf0] }
 0x358   :  { %2925 = vmatmul.bf16.gmra.mxu2 %v11059_v18  ;;  %3254 = vmatmul.bf16.gmra.mxu3 %v10935_v16  ;;  %v11075_v48 = vor.u32 %v13808_v54, %v11074_v21  ;;  %v21784_v54 = vld [vmem:[#allocation14_spill] sm:$0xff] }
 0x359   :  { %3912 = vmatmul.bf16.gmra.mxu0 %v10687_v2  ;;  %3583 = vmatmul.bf16.gmra.mxu1 %v10811_v10  ;;  %v4230_v17 = vpack.c.bf16 %v3874_v43, %v3874_v43  ;;  %v10948_v43 = vld [vmem:[%s21731_s30 + $0x350] sm:$0xf0]  ;;  %v10700_v10 = vld [vmem:[%s21731_s30 + $0x158] sm:$0xf0] }
 0x35a   :  { %v10951_v8 = vor.u32 %v13774_v19, %v10948_v43  ;;  %v21781_v2 = vld [vmem:[#allocation13_spill] sm:$0xff] }
 0x35b   :  { %v16018_v11 = vpop.f32.mrf.mxu2  ;;  %v16020_v61 = vpop.f32.mrf.mxu3  ;;  %v4390_v47 = vunpack.c.l.b16 %v4230_v17  ;;  %v3181_v41 = vadd.f32 %v15723_v3, %v21781_v2  ;;  %v3183_v3 = vadd.f32 %v15755_v28, %v21784_v54  ;;  %v13778_v28 = vld [vmem:[%s21731_s30 + $0x364] sm:$0xf] }
 0x35c   :  { %21778 = vst [vmem:[#allocation11_spill] sm:$0xff] %v16018_v11 }
 0x35e   :  { %v3875_v37 = vpop.f32.mrf.mxu0  ;;  %v3546_v60 = vpop.f32.mrf.mxu1 }
 0x35f   :  { %v3876_v9 = vadd.f32 %v3875_v37, %v15687_v59  ;;  %v16025_v53 = vadd.f32 %v3546_v60, %v3178_v23  ;;  %v13711_v59 = vld [vmem:[%s21731_s30 + $0x14c] sm:$0xf]  ;;  %v10827_v37 = vor.u32 %v13745_v20, %v10826_v26  ;;  %v10716_v20 = vld [vmem:[%s21731_s30 + $0x178] sm:$0xf0] }
 0x360   :  { %v10703_v23 = vor.u32 %v13711_v59, %v10700_v10 }
 0x361   :  { %v4231_v24 = vpack.c.bf16 %v3876_v9, %v3876_v9 }
 0x363   :  { %v4391_v40 = vunpack.c.l.b16 %v4231_v24  ;;  %v16051_v18 = vpop.f32.mrf.mxu2  ;;  %v16053_v16 = vpop.f32.mrf.mxu3 }
 0x364   :  { %21780 = vst [vmem:[#allocation12_spill] sm:$0xff] %v16051_v18 }
 0x365   :  { %v16057_v60 = vpack.c.b16 %v4391_v40, %v4390_v47  ;;  %v10842_v47 = vld [vmem:[%s21731_s30 + $0x268] sm:$0xf]  ;;  %v13749_v40 = vld [vmem:[%s21731_s30 + $0x274] sm:$0xf0] }
 0x366   :  { %v3878_v9 = vpop.f32.mrf.mxu0  ;;  %v3549_v62 = vpop.f32.mrf.mxu1 }
 0x367   :  { %21782 = vst [vmem:[#allocation13_spill] sm:$0xff] %v16057_v60  ;;  %v3879_v11 = vadd.f32 %v3878_v9, %v15719_v31  ;;  %v16060_v42 = vadd.f32 %v3549_v62, %v3181_v41  ;;  %v11090_v31 = vld [vmem:[%s21731_s30 + $0x460] sm:$0xf]  ;;  %v13812_v62 = vld [vmem:[%s21731_s30 + $0x46c] sm:$0xf0] }
 0x368   :  { %2930 = vmatmul.bf16.gmra.mxu2 %v11075_v48  ;;  %3259 = vmatmul.bf16.gmra.mxu3 %v10951_v8  ;;  %v21786_v9 = vld [vmem:[#allocation15_spill] sm:$0xff] }
 0x369   :  { %3917 = vmatmul.bf16.gmra.mxu0 %v10703_v23  ;;  %3588 = vmatmul.bf16.gmra.mxu1 %v10827_v37  ;;  %v4232_v43 = vpack.c.bf16 %v3879_v11, %v3879_v11  ;;  %v10964_v11 = vld [vmem:[%s21731_s30 + $0x370] sm:$0xf0]  ;;  %v11091_v23 = vor.u32 %v13812_v62, %v11090_v31  ;;  %v3186_v54 = vadd.f32 %v15763_v15, %v21786_v9  ;;  %v21789_v62 = vld [vmem:[#allocation16_spill] sm:$0xff] }
 0x36a   :  { %v10967_v37 = vor.u32 %v13778_v28, %v10964_v11  ;;  %v3188_v15 = vadd.f32 %v15795_v12, %v21789_v62  ;;  %v13782_v12 = vld [vmem:[%s21731_s30 + $0x384] sm:$0xf] }
 0x36b   :  { %v16062_v17 = vpop.f32.mrf.mxu2  ;;  %v16064_v21 = vpop.f32.mrf.mxu3  ;;  %v4392_v48 = vunpack.c.l.b16 %v4232_v43 }
 0x36c   :  { %21783 = vst [vmem:[#allocation28_spill] sm:$0xff] %v16062_v17 }
 0x36e   :  { %v3880_v24 = vpop.f32.mrf.mxu0  ;;  %v3551_v19 = vpop.f32.mrf.mxu1 }
 0x36f   :  { %v3881_v59 = vadd.f32 %v3880_v24, %v15727_v52  ;;  %v16069_v10 = vadd.f32 %v3551_v19, %v3183_v3  ;;  %v13715_v52 = vld [vmem:[%s21731_s30 + $0x16c] sm:$0xf]  ;;  %v10843_v24 = vor.u32 %v13749_v40, %v10842_v47  ;;  %v10732_v40 = vld [vmem:[%s21731_s30 + $0x198] sm:$0xf0] }
 0x370   :  { %v10719_v3 = vor.u32 %v13715_v52, %v10716_v20 }
 0x371   :  { %v4233_v26 = vpack.c.bf16 %v3881_v59, %v3881_v59 }
 0x373   :  { %v4393_v8 = vunpack.c.l.b16 %v4233_v26  ;;  %v16095_v2 = vpop.f32.mrf.mxu2  ;;  %v16097_v41 = vpop.f32.mrf.mxu3 }
 0x374   :  { %21785 = vst [vmem:[#allocation14_spill] sm:$0xff] %v16095_v2 }
 0x375   :  { %v16101_v19 = vpack.c.b16 %v4393_v8, %v4392_v48  ;;  %v10858_v48 = vld [vmem:[%s21731_s30 + $0x288] sm:$0xf]  ;;  %v13753_v8 = vld [vmem:[%s21731_s30 + $0x294] sm:$0xf0] }
 0x376   :  { %v3883_v59 = vpop.f32.mrf.mxu0  ;;  %v3554_v60 = vpop.f32.mrf.mxu1 }
 0x377   :  { %21787 = vst [vmem:[#allocation15_spill] sm:$0xff] %v16101_v19  ;;  %v3884_v17 = vadd.f32 %v3883_v59, %v15759_v55  ;;  %v16104_v18 = vadd.f32 %v3554_v60, %v3186_v54  ;;  %v11106_v55 = vld [vmem:[%s21731_s30 + $0x480] sm:$0xf]  ;;  %v13816_v60 = vld [vmem:[%s21731_s30 + $0x48c] sm:$0xf0] }
 0x378   :  { %2935 = vmatmul.bf16.gmra.mxu2 %v11091_v23  ;;  %3264 = vmatmul.bf16.gmra.mxu3 %v10967_v37  ;;  %v21791_v59 = vld [vmem:[#allocation17_spill] sm:$0xff] }
 0x379   :  { %3922 = vmatmul.bf16.gmra.mxu0 %v10719_v3  ;;  %3593 = vmatmul.bf16.gmra.mxu1 %v10843_v24  ;;  %v4234_v11 = vpack.c.bf16 %v3884_v17, %v3884_v17  ;;  %v10980_v17 = vld [vmem:[%s21731_s30 + $0x390] sm:$0xf0]  ;;  %v11107_v3 = vor.u32 %v13816_v60, %v11106_v55  ;;  %v3191_v62 = vadd.f32 %v15803_v44, %v21791_v59  ;;  %v21794_v60 = vld [vmem:[#allocation18_spill] sm:$0xff] }
 0x37a   :  { %v10983_v24 = vor.u32 %v13782_v12, %v10980_v17  ;;  %v3193_v44 = vadd.f32 %v15847_v34, %v21794_v60  ;;  %v13786_v34 = vld [vmem:[%s21731_s30 + $0x3a4] sm:$0xf] }
 0x37b   :  { %v16106_v43 = vpop.f32.mrf.mxu2  ;;  %v16108_v31 = vpop.f32.mrf.mxu3  ;;  %v4394_v23 = vunpack.c.l.b16 %v4234_v11 }
 0x37c   :  { %21788 = vst [vmem:[#allocation29_spill] sm:$0xff] %v16106_v43 }
 0x37e   :  { %v3885_v26 = vpop.f32.mrf.mxu0  ;;  %v3556_v28 = vpop.f32.mrf.mxu1 }
 0x37f   :  { %v3886_v52 = vadd.f32 %v3885_v26, %v15767_v39  ;;  %v16113_v20 = vadd.f32 %v3556_v28, %v3188_v15  ;;  %v13719_v39 = vld [vmem:[%s21731_s30 + $0x18c] sm:$0xf]  ;;  %v10859_v26 = vor.u32 %v13753_v8, %v10858_v48  ;;  %v10748_v8 = vld [vmem:[%s21731_s30 + $0x1b8] sm:$0xf0] }
 0x380   :  { %v10735_v15 = vor.u32 %v13719_v39, %v10732_v40 }
 0x381   :  { %v4235_v47 = vpack.c.bf16 %v3886_v52, %v3886_v52 }
 0x383   :  { %v4395_v37 = vunpack.c.l.b16 %v4235_v47  ;;  %v16139_v9 = vpop.f32.mrf.mxu2  ;;  %v16141_v54 = vpop.f32.mrf.mxu3 }
 0x384   :  { %21790 = vst [vmem:[#allocation16_spill] sm:$0xff] %v16139_v9 }
 0x385   :  { %v16145_v28 = vpack.c.b16 %v4395_v37, %v4394_v23  ;;  %v10874_v23 = vld [vmem:[%s21731_s30 + $0x2a8] sm:$0xf]  ;;  %v13757_v37 = vld [vmem:[%s21731_s30 + $0x2b4] sm:$0xf0] }
 0x386   :  { %v3888_v52 = vpop.f32.mrf.mxu0  ;;  %v3559_v19 = vpop.f32.mrf.mxu1 }
 0x387   :  { %21792 = vst [vmem:[#allocation17_spill] sm:$0xff] %v16145_v28  ;;  %v3889_v43 = vadd.f32 %v3888_v52, %v15799_v51  ;;  %v16148_v2 = vadd.f32 %v3559_v19, %v3191_v62  ;;  %v11122_v51 = vld [vmem:[%s21731_s30 + $0x4a0] sm:$0xf]  ;;  %v13820_v19 = vld [vmem:[%s21731_s30 + $0x4ac] sm:$0xf0] }
 0x388   :  { %2940 = vmatmul.bf16.gmra.mxu2 %v11107_v3  ;;  %3269 = vmatmul.bf16.gmra.mxu3 %v10983_v24  ;;  %v21796_v52 = vld [vmem:[#allocation20_spill] sm:$0xff] }
 0x389   :  { %3927 = vmatmul.bf16.gmra.mxu0 %v10735_v15  ;;  %3598 = vmatmul.bf16.gmra.mxu1 %v10859_v26  ;;  %v4236_v17 = vpack.c.bf16 %v3889_v43, %v3889_v43  ;;  %v10996_v43 = vld [vmem:[%s21731_s30 + $0x3b0] sm:$0xf0]  ;;  %v11123_v15 = vor.u32 %v13820_v19, %v11122_v51  ;;  %v3196_v60 = vadd.f32 %v15855_v22, %v21796_v52  ;;  %v11730_v52 = vld [vmem:[%s21645_s5 + $0x60] sm:$0xf] }
 0x38a   :  { %v10999_v26 = vor.u32 %v13786_v34, %v10996_v43  ;;  %v3198_v22 = vadd.f32 %v15887_v57, %v15555_v14  ;;  %v13790_v14 = vld [vmem:[%s21731_s30 + $0x3c4] sm:$0xf]  ;;  %v11012_v57 = vld [vmem:[%s21731_s30 + $0x3d0] sm:$0xf0] }
 0x38b   :  { %v16150_v11 = vpop.f32.mrf.mxu2  ;;  %v16152_v55 = vpop.f32.mrf.mxu3  ;;  %v4396_v3 = vunpack.c.l.b16 %v4236_v17 }
 0x38c   :  { %21793 = vst [vmem:[#allocation30_spill] sm:$0xff] %v16150_v11 }
 0x38e   :  { %v3890_v47 = vpop.f32.mrf.mxu0  ;;  %v3561_v12 = vpop.f32.mrf.mxu1 }
 0x38f   :  { %v3891_v39 = vadd.f32 %v3890_v47, %v15819_v63  ;;  %v16157_v40 = vadd.f32 %v3561_v12, %v3193_v44  ;;  %v13723_v63 = vld [vmem:[%s21731_s30 + $0x1ac] sm:$0xf]  ;;  %v10875_v47 = vor.u32 %v13757_v37, %v10874_v23  ;;  %v10890_v23 = vld [vmem:[%s21731_s30 + $0x2c8] sm:$0xf]  ;;  %v13761_v37 = vld [vmem:[%s21731_s30 + $0x2d4] sm:$0xf0] }
 0x390   :  { %v10751_v44 = vor.u32 %v13723_v63, %v10748_v8 }
 0x391   :  { %v4237_v48 = vpack.c.bf16 %v3891_v39, %v3891_v39 }
 0x393   :  { %v4397_v24 = vunpack.c.l.b16 %v4237_v48  ;;  %v16183_v59 = vpop.f32.mrf.mxu2  ;;  %v16185_v62 = vpop.f32.mrf.mxu3 }
 0x394   :  { %21795 = vst [vmem:[#allocation18_spill] sm:$0xff] %v16183_v59 }
 0x395   :  { %v16189_v12 = vpack.c.b16 %v4397_v24, %v4396_v3 }
 0x396   :  { %v3893_v39 = vpop.f32.mrf.mxu0  ;;  %v3564_v28 = vpop.f32.mrf.mxu1 }
 0x397   :  { %21797 = vst [vmem:[#allocation20_spill] sm:$0xff] %v16189_v12  ;;  %v3894_v11 = vadd.f32 %v3893_v39, %v15851_v6  ;;  %v16192_v9 = vadd.f32 %v3564_v28, %v3196_v60  ;;  %v11138_v6 = vld [vmem:[%s21731_s30 + $0x4c0] sm:$0xf]  ;;  %v13824_v28 = vld [vmem:[%s21731_s30 + $0x4cc] sm:$0xf0] }
 0x398   :  { %2945 = vmatmul.bf16.gmra.mxu2 %v11123_v15  ;;  %3274 = vmatmul.bf16.gmra.mxu3 %v10999_v26  ;;  %v13971_v60 = vld [vmem:[%s21645_s5 + $0x64] sm:$0xf0]  ;;  %v11139_v39 = vor.u32 %v13824_v28, %v11138_v6  ;;  %v3203_v6 = vadd.f32 %v15927_v50, %v15594_v38  ;;  %v13794_v38 = vld [vmem:[%s21731_s30 + $0x3e4] sm:$0xf]  ;;  %v11028_v50 = vld [vmem:[%s21731_s30 + $0x3f0] sm:$0xf0] }
 0x399   :  { %3932 = vmatmul.bf16.gmra.mxu0 %v10751_v44  ;;  %3603 = vmatmul.bf16.gmra.mxu1 %v10875_v47  ;;  %v4238_v34 = vpack.c.bf16 %v3894_v11, %v3894_v11  ;;  %v10764_v11 = vld [vmem:[%s21731_s30 + $0x1d8] sm:$0xf0]  ;;  %v11794_v44 = vld [vmem:[%s21645_s5 + $0xe0] sm:$0xf]  ;;  %v3201_v47 = vadd.f32 %v15895_v35, %v15564_v29 }
 0x39b   :  { %v16194_v17 = vpop.f32.mrf.mxu2  ;;  %v16196_v51 = vpop.f32.mrf.mxu3  ;;  %v4398_v3 = vunpack.c.l.b16 %v4238_v34 }
 0x39c   :  { %21798 = vst [vmem:[#allocation31_spill] sm:$0xff] %v16194_v17 }
 0x39e   :  { %v3895_v19 = vpop.f32.mrf.mxu0  ;;  %v3566_v48 = vpop.f32.mrf.mxu1 }
 0x39f   :  { %v3896_v43 = vadd.f32 %v3895_v19, %v15859_v30  ;;  %v16201_v63 = vadd.f32 %v3566_v48, %v3198_v22  ;;  %v13727_v30 = vld [vmem:[%s21731_s30 + $0x1cc] sm:$0xf]  ;;  %v11015_v22 = vor.u32 %v13790_v14, %v11012_v57  ;;  %v11731_v19 = vor.u32 %v13971_v60, %v11730_v52  ;;  %v13987_v48 = vld [vmem:[%s21645_s5 + $0xe4] sm:$0xf0] }
 0x3a0   :  { %v10767_v34 = vor.u32 %v13727_v30, %v10764_v11  ;;  %v13828_v11 = vld [vmem:[%s21731_s30 + $0x4ec] sm:$0xf0] }
 0x3a1   :  { %21799 = vst [vmem:[#allocation32_spill] sm:$0xff] %v16201_v63  ;;  %v4239_v8 = vpack.c.bf16 %v3896_v43, %v3896_v43  ;;  %v11795_v43 = vor.u32 %v13987_v48, %v11794_v44  ;;  %5675 = vmatpush.bf16.msrb.mxu2 %v11731_v19 }
 0x3a3   :  { %v4399_v24 = vunpack.c.l.b16 %v4239_v8  ;;  %v16227_v15 = vpop.f32.mrf.mxu2  ;;  %v16229_v26 = vpop.f32.mrf.mxu3  ;;  %v10891_v8 = vor.u32 %v13761_v37, %v10890_v23  ;;  %5724 = vmatpush.bf16.msrb.mxu3 %v11795_v43  ;;  %v10906_v37 = vld [vmem:[%s21731_s30 + $0x2e8] sm:$0xf] }
 0x3a4   :  { %21800 = vst [vmem:[#allocation33_spill] sm:$0xff] %v16227_v15 }
 0x3a5   :  { %v16245_v12 = vpack.c.b16 %v4399_v24, %v4398_v3  ;;  %v13765_v3 = vld [vmem:[%s21731_s30 + $0x2f4] sm:$0xf0] }
 0x3a6   :  { %v3898_v15 = vpop.f32.mrf.mxu0  ;;  %v3569_v17 = vpop.f32.mrf.mxu1  ;;  %v10907_v19 = vor.u32 %v13765_v3, %v10906_v37 }
 0x3a7   :  { %21801 = vst [vmem:[#allocation34_spill] sm:$0xff] %v16245_v12  ;;  %v3899_v59 = vadd.f32 %v3898_v15, %v15891_v0  ;;  %v16248_v63 = vadd.f32 %v3569_v17, %v3201_v47  ;;  %v11154_v17 = vld [vmem:[%s21731_s30 + $0x4e0] sm:$0xf]  ;;  %v11031_v47 = vor.u32 %v13794_v38, %v11028_v50  ;;  %v10796_v50 = vld [vmem:[%s21731_s30 + $0x218] sm:$0xf0] }
 0x3a8   :  { %2950 = vmatmul.bf16.gmra.mxu2 %v11139_v39  ;;  %3279 = vmatmul.bf16.gmra.mxu3 %v11015_v22  ;;  %v11155_v44 = vor.u32 %v13828_v11, %v11154_v17  ;;  %v3206_v39 = vadd.f32 %v15935_v46, %v15604_v13  ;;  %v3208_v13 = vadd.f32 %v15967_v27, %v15633_v36  ;;  %v13798_v36 = vld [vmem:[%s21731_s30 + $0x404] sm:$0xf]  ;;  %v11044_v27 = vld [vmem:[%s21731_s30 + $0x410] sm:$0xf0] }
 0x3a9   :  { %3937 = vmatmul.bf16.gmra.mxu0 %v10767_v34  ;;  %3608 = vmatmul.bf16.gmra.mxu1 %v10891_v8  ;;  %v4240_v57 = vpack.c.bf16 %v3899_v59, %v3899_v59  ;;  %v10780_v59 = vld [vmem:[%s21731_s30 + $0x1f8] sm:$0xf0] }
 0x3ab   :  { %v16250_v29 = vpop.f32.mrf.mxu2  ;;  %v16252_v35 = vpop.f32.mrf.mxu3  ;;  %v4400_v24 = vunpack.c.l.b16 %v4240_v57 }
 0x3ae   :  { %v3900_v28 = vpop.f32.mrf.mxu0  ;;  %v3571_v14 = vpop.f32.mrf.mxu1 }
 0x3af   :  { %v3901_v30 = vadd.f32 %v3900_v28, %v15899_v58  ;;  %v16257_v0 = vadd.f32 %v3571_v14, %v3203_v6  ;;  %v13731_v58 = vld [vmem:[%s21731_s30 + $0x1ec] sm:$0xf] }
 0x3b0   :  { %v10783_v22 = vor.u32 %v13731_v58, %v10780_v59  ;;  %v10922_v58 = vld [vmem:[%s21731_s30 + $0x308] sm:$0xf]  ;;  %v13769_v59 = vld [vmem:[%s21731_s30 + $0x314] sm:$0xf0] }
 0x3b1   :  { %v4241_v23 = vpack.c.bf16 %v3901_v30, %v3901_v30 }
 0x3b3   :  { %v4401_v15 = vunpack.c.l.b16 %v4241_v23  ;;  %v16283_v52 = vpop.f32.mrf.mxu2  ;;  %v16285_v60 = vpop.f32.mrf.mxu3  ;;  %v13832_v23 = vld [vmem:[%s21731_s30 + $0x50c] sm:$0xf0] }
 0x3b5   :  { %v16289_v48 = vpack.c.b16 %v4401_v15, %v4400_v24 }
 0x3b6   :  { %v3903_v34 = vpop.f32.mrf.mxu0  ;;  %v3574_v43 = vpop.f32.mrf.mxu1 }
 0x3b7   :  { %21802 = vst [vmem:[#allocation35_spill] sm:$0xff] %v16289_v48  ;;  %v3904_v8 = vadd.f32 %v3903_v34, %v15931_v49  ;;  %v16292_v6 = vadd.f32 %v3574_v43, %v3206_v39  ;;  %v11170_v49 = vld [vmem:[%s21731_s30 + $0x500] sm:$0xf]  ;;  %v3211_v39 = vadd.f32 %v15976_v5, %v15641_v1  ;;  %v3213_v1 = vadd.f32 %v16009_v45, %v15673_v56  ;;  %v13802_v56 = vld [vmem:[%s21731_s30 + $0x424] sm:$0xf] }
 0x3b8   :  { %2955 = vmatmul.bf16.gmra.mxu2 %v11155_v44  ;;  %3284 = vmatmul.bf16.gmra.mxu3 %v11031_v47  ;;  %v11171_v44 = vor.u32 %v13832_v23, %v11170_v49  ;;  %v11047_v47 = vor.u32 %v13798_v36, %v11044_v27  ;;  %v13836_v36 = vld [vmem:[%s21731_s30 + $0x52c] sm:$0xf0]  ;;  %v11060_v45 = vld [vmem:[%s21731_s30 + $0x430] sm:$0xf0] }
 0x3b9   :  { %3942 = vmatmul.bf16.gmra.mxu0 %v10783_v22  ;;  %3613 = vmatmul.bf16.gmra.mxu1 %v10907_v19  ;;  %v4242_v30 = vpack.c.bf16 %v3904_v8, %v3904_v8  ;;  %v10923_v19 = vor.u32 %v13769_v59, %v10922_v58  ;;  %v13773_v58 = vld [vmem:[%s21731_s30 + $0x334] sm:$0xf0] }
 0x3bb   :  { %v16294_v28 = vpop.f32.mrf.mxu2  ;;  %v16296_v14 = vpop.f32.mrf.mxu3  ;;  %v4402_v37 = vunpack.c.l.b16 %v4242_v30 }
 0x3be   :  { %v3905_v46 = vpop.f32.mrf.mxu0  ;;  %v3576_v57 = vpop.f32.mrf.mxu1 }
 0x3bf   :  { %v3906_v17 = vadd.f32 %v3905_v46, %v15939_v7  ;;  %v16301_v11 = vadd.f32 %v3576_v57, %v3208_v13  ;;  %v13735_v7 = vld [vmem:[%s21731_s30 + $0x20c] sm:$0xf] }
 0x3c0   :  { %v10799_v22 = vor.u32 %v13735_v7, %v10796_v50  ;;  %v10812_v7 = vld [vmem:[%s21731_s30 + $0x238] sm:$0xf0]  ;;  %v10938_v50 = vld [vmem:[%s21731_s30 + $0x328] sm:$0xf] }
 0x3c1   :  { %v4243_v38 = vpack.c.bf16 %v3906_v17, %v3906_v17 }
 0x3c3   :  { %v4403_v3 = vunpack.c.l.b16 %v4243_v38  ;;  %v16327_v24 = vpop.f32.mrf.mxu2  ;;  %v16329_v15 = vpop.f32.mrf.mxu3 }
 0x3c5   :  { %v16333_v34 = vpack.c.b16 %v4403_v3, %v4402_v37 }
 0x3c6   :  { %v3908_v43 = vpop.f32.mrf.mxu0  ;;  %v3579_v8 = vpop.f32.mrf.mxu1 }
 0x3c7   :  { %21803 = vst [vmem:[#allocation36_spill] sm:$0xff] %v16333_v34  ;;  %v3909_v13 = vadd.f32 %v3908_v43, %v15972_v32  ;;  %v16336_v46 = vadd.f32 %v3579_v8, %v3211_v39  ;;  %v11186_v32 = vld [vmem:[%s21731_s30 + $0x520] sm:$0xf]  ;;  %v11063_v39 = vor.u32 %v13802_v56, %v11060_v45  ;;  %v10939_v8 = vor.u32 %v13773_v58, %v10938_v50  ;;  %v11076_v50 = vld [vmem:[%s21731_s30 + $0x450] sm:$0xf0] }
 0x3c8   :  { %2960 = vmatmul.bf16.gmra.mxu2 %v11171_v44  ;;  %3289 = vmatmul.bf16.gmra.mxu3 %v11047_v47  ;;  %v11187_v47 = vor.u32 %v13836_v36, %v11186_v32  ;;  %v21805_v32 = vld [vmem:[#allocation22_spill] sm:$0xff] }
 0x3c9   :  { %3947 = vmatmul.bf16.gmra.mxu0 %v10799_v22  ;;  %3618 = vmatmul.bf16.gmra.mxu1 %v10923_v19  ;;  %v4244_v49 = vpack.c.bf16 %v3909_v13, %v3909_v13  ;;  %v3216_v22 = vadd.f32 %v16020_v61, %v15681_v4  ;;  %v3218_v4 = vadd.f32 %v16053_v16, %v21805_v32  ;;  %v13806_v16 = vld [vmem:[%s21731_s30 + $0x444] sm:$0xf]  ;;  %v10828_v58 = vld [vmem:[%s21731_s30 + $0x258] sm:$0xf0] }
 0x3cb   :  { %v16338_v57 = vpop.f32.mrf.mxu2  ;;  %v16340_v30 = vpop.f32.mrf.mxu3  ;;  %v4436_v59 = vunpack.c.l.b16 %v4244_v49 }
 0x3ce   :  { %v3910_v5 = vpop.f32.mrf.mxu0  ;;  %v3581_v17 = vpop.f32.mrf.mxu1 }
 0x3cf   :  { %v3911_v23 = vadd.f32 %v3910_v5, %v15981_v25  ;;  %v16345_v38 = vadd.f32 %v3581_v17, %v3213_v1  ;;  %v13739_v25 = vld [vmem:[%s21731_s30 + $0x22c] sm:$0xf] }
 0x3d0   :  { %v10815_v43 = vor.u32 %v13739_v25, %v10812_v7  ;;  %v13840_v25 = vld [vmem:[%s21731_s30 + $0x54c] sm:$0xf0] }
 0x3d1   :  { %v4245_v27 = vpack.c.bf16 %v3911_v23, %v3911_v23 }
 0x3d3   :  { %v4437_v37 = vunpack.c.l.b16 %v4245_v27  ;;  %v16371_v3 = vpop.f32.mrf.mxu2  ;;  %v16373_v44 = vpop.f32.mrf.mxu3 }
 0x3d5   :  { %v16377_v19 = vpack.c.b16 %v4437_v37, %v4436_v59  ;;  %v10954_v59 = vld [vmem:[%s21731_s30 + $0x348] sm:$0xf]  ;;  %v13777_v37 = vld [vmem:[%s21731_s30 + $0x354] sm:$0xf0] }
 0x3d6   :  { %v3913_v13 = vpop.f32.mrf.mxu0  ;;  %v3584_v1 = vpop.f32.mrf.mxu1 }
 0x3d7   :  { %21804 = vst [vmem:[#allocation37_spill] sm:$0xff] %v16377_v19  ;;  %v3914_v5 = vadd.f32 %v3913_v13, %v16016_v33  ;;  %v16380_v17 = vadd.f32 %v3584_v1, %v3216_v22  ;;  %v11202_v33 = vld [vmem:[%s21731_s30 + $0x540] sm:$0xf]  ;;  %v11079_v13 = vor.u32 %v13806_v16, %v11076_v50 }
 0x3d8   :  { %2965 = vmatmul.bf16.gmra.mxu2 %v11187_v47  ;;  %3294 = vmatmul.bf16.gmra.mxu3 %v11063_v39  ;;  %v21806_v1 = vld [vmem:[#allocation23_spill] sm:$0xff] }
 0x3d9   :  { %3952 = vmatmul.bf16.gmra.mxu0 %v10815_v43  ;;  %3623 = vmatmul.bf16.gmra.mxu1 %v10939_v8  ;;  %v4246_v27 = vpack.c.bf16 %v3914_v5, %v3914_v5  ;;  %v11203_v8 = vor.u32 %v13840_v25, %v11202_v33  ;;  %v3221_v5 = vadd.f32 %v16064_v21, %v21806_v1  ;;  %v21809_v25 = vld [vmem:[#allocation24_spill] sm:$0xff] }
 0x3da   :  { %v3223_v21 = vadd.f32 %v16097_v41, %v21809_v25  ;;  %v13810_v41 = vld [vmem:[%s21731_s30 + $0x464] sm:$0xf] }
 0x3db   :  { %v16382_v49 = vpop.f32.mrf.mxu2  ;;  %v16384_v23 = vpop.f32.mrf.mxu3  ;;  %v4438_v47 = vunpack.c.l.b16 %v4246_v27 }
 0x3de   :  { %v3915_v61 = vpop.f32.mrf.mxu0  ;;  %v3586_v36 = vpop.f32.mrf.mxu1 }
 0x3df   :  { %v3916_v56 = vadd.f32 %v3915_v61, %v16025_v53  ;;  %v16389_v45 = vadd.f32 %v3586_v36, %v3218_v4  ;;  %v13743_v53 = vld [vmem:[%s21731_s30 + $0x24c] sm:$0xf]  ;;  %v10955_v4 = vor.u32 %v13777_v37, %v10954_v59  ;;  %v13844_v59 = vld [vmem:[%s21731_s30 + $0x56c] sm:$0xf0] }
 0x3e0   :  { %v10831_v32 = vor.u32 %v13743_v53, %v10828_v58 }
 0x3e1   :  { %v4247_v7 = vpack.c.bf16 %v3916_v56, %v3916_v56 }
 0x3e3   :  { %v4439_v39 = vunpack.c.l.b16 %v4247_v7  ;;  %v16415_v22 = vpop.f32.mrf.mxu2  ;;  %v16417_v43 = vpop.f32.mrf.mxu3 }
 0x3e5   :  { %v16421_v61 = vpack.c.b16 %v4439_v39, %v4438_v47  ;;  %v10844_v47 = vld [vmem:[%s21731_s30 + $0x278] sm:$0xf0]  ;;  %v10970_v39 = vld [vmem:[%s21731_s30 + $0x368] sm:$0xf] }
 0x3e6   :  { %v3918_v36 = vpop.f32.mrf.mxu0  ;;  %v3589_v56 = vpop.f32.mrf.mxu1 }
 0x3e7   :  { %21807 = vst [vmem:[#allocation22_spill] sm:$0xff] %v16421_v61  ;;  %v3919_v19 = vadd.f32 %v3918_v36, %v16060_v42  ;;  %v16424_v34 = vadd.f32 %v3589_v56, %v3221_v5  ;;  %v11218_v42 = vld [vmem:[%s21731_s30 + $0x560] sm:$0xf]  ;;  %v21811_v56 = vld [vmem:[#allocation25_spill] sm:$0xff] }
 0x3e8   :  { %2970 = vmatmul.bf16.gmra.mxu2 %v11203_v8  ;;  %3299 = vmatmul.bf16.gmra.mxu3 %v11079_v13  ;;  %v13781_v8 = vld [vmem:[%s21731_s30 + $0x374] sm:$0xf0]  ;;  %v3226_v25 = vadd.f32 %v16108_v31, %v21811_v56 }
 0x3e9   :  { %3957 = vmatmul.bf16.gmra.mxu0 %v10831_v32  ;;  %3628 = vmatmul.bf16.gmra.mxu1 %v10955_v4  ;;  %v4248_v50 = vpack.c.bf16 %v3919_v19, %v3919_v19  ;;  %v11092_v19 = vld [vmem:[%s21731_s30 + $0x470] sm:$0xf0]  ;;  %v11219_v4 = vor.u32 %v13844_v59, %v11218_v42  ;;  %v21814_v59 = vld [vmem:[#allocation26_spill] sm:$0xff] }
 0x3ea   :  { %v11095_v36 = vor.u32 %v13810_v41, %v11092_v19  ;;  %v3228_v31 = vadd.f32 %v16141_v54, %v21814_v59  ;;  %v13814_v54 = vld [vmem:[%s21731_s30 + $0x484] sm:$0xf] }
 0x3eb   :  { %v16426_v27 = vpop.f32.mrf.mxu2  ;;  %v16428_v33 = vpop.f32.mrf.mxu3  ;;  %v4440_v13 = vunpack.c.l.b16 %v4248_v50 }
 0x3ec   :  { %21808 = vst [vmem:[#allocation23_spill] sm:$0xff] %v16426_v27 }
 0x3ee   :  { %v3920_v7 = vpop.f32.mrf.mxu0  ;;  %v3591_v16 = vpop.f32.mrf.mxu1 }
 0x3ef   :  { %v3921_v53 = vadd.f32 %v3920_v7, %v16069_v10  ;;  %v16433_v58 = vadd.f32 %v3591_v16, %v3223_v21  ;;  %v13747_v10 = vld [vmem:[%s21731_s30 + $0x26c] sm:$0xf]  ;;  %v10971_v7 = vor.u32 %v13781_v8, %v10970_v39  ;;  %v10860_v8 = vld [vmem:[%s21731_s30 + $0x298] sm:$0xf0] }
 0x3f0   :  { %v10847_v21 = vor.u32 %v13747_v10, %v10844_v47 }
 0x3f1   :  { %v4249_v37 = vpack.c.bf16 %v3921_v53, %v3921_v53 }
 0x3f3   :  { %v4441_v1 = vunpack.c.l.b16 %v4249_v37  ;;  %v16459_v5 = vpop.f32.mrf.mxu2  ;;  %v16461_v32 = vpop.f32.mrf.mxu3 }
 0x3f4   :  { %21810 = vst [vmem:[#allocation24_spill] sm:$0xff] %v16459_v5 }
 0x3f5   :  { %v16465_v16 = vpack.c.b16 %v4441_v1, %v4440_v13  ;;  %v10986_v13 = vld [vmem:[%s21731_s30 + $0x388] sm:$0xf]  ;;  %v13785_v1 = vld [vmem:[%s21731_s30 + $0x394] sm:$0xf0] }
 0x3f6   :  { %v3923_v53 = vpop.f32.mrf.mxu0  ;;  %v3594_v61 = vpop.f32.mrf.mxu1 }
 0x3f7   :  { %21812 = vst [vmem:[#allocation25_spill] sm:$0xff] %v16465_v16  ;;  %v3924_v48 = vadd.f32 %v3923_v53, %v16104_v18  ;;  %v16468_v12 = vadd.f32 %v3594_v61, %v3226_v25  ;;  %v11234_v18 = vld [vmem:[%s21731_s30 + $0x580] sm:$0xf]  ;;  %v13848_v61 = vld [vmem:[%s21731_s30 + $0x58c] sm:$0xf0] }
 0x3f8   :  { %2975 = vmatmul.bf16.gmra.mxu2 %v11219_v4  ;;  %3304 = vmatmul.bf16.gmra.mxu3 %v11095_v36  ;;  %v21816_v53 = vld [vmem:[#allocation27_spill] sm:$0xff] }
 0x3f9   :  { %3962 = vmatmul.bf16.gmra.mxu0 %v10847_v21  ;;  %3633 = vmatmul.bf16.gmra.mxu1 %v10971_v7  ;;  %v4250_v19 = vpack.c.bf16 %v3924_v48, %v3924_v48  ;;  %v11108_v48 = vld [vmem:[%s21731_s30 + $0x490] sm:$0xf0]  ;;  %v11235_v21 = vor.u32 %v13848_v61, %v11234_v18  ;;  %v3231_v59 = vadd.f32 %v16152_v55, %v21816_v53  ;;  %v21819_v61 = vld [vmem:[#allocation19_spill] sm:$0xff] }
 0x3fa   :  { %v11111_v7 = vor.u32 %v13814_v54, %v11108_v48  ;;  %v3233_v55 = vadd.f32 %v16185_v62, %v21819_v61  ;;  %v13818_v62 = vld [vmem:[%s21731_s30 + $0x4a4] sm:$0xf] }
 0x3fb   :  { %v16470_v50 = vpop.f32.mrf.mxu2  ;;  %v16472_v42 = vpop.f32.mrf.mxu3  ;;  %v4442_v4 = vunpack.c.l.b16 %v4250_v19 }
 0x3fc   :  { %21813 = vst [vmem:[#allocation38_spill] sm:$0xff] %v16470_v50 }
 0x3fe   :  { %v3925_v37 = vpop.f32.mrf.mxu0  ;;  %v3596_v41 = vpop.f32.mrf.mxu1 }
 0x3ff   :  { %v3926_v10 = vadd.f32 %v3925_v37, %v16113_v20  ;;  %v16477_v47 = vadd.f32 %v3596_v41, %v3228_v31  ;;  %v13751_v20 = vld [vmem:[%s21731_s30 + $0x28c] sm:$0xf]  ;;  %v10987_v37 = vor.u32 %v13785_v1, %v10986_v13  ;;  %v10876_v1 = vld [vmem:[%s21731_s30 + $0x2b8] sm:$0xf0] }
 0x400   :  { %v10863_v31 = vor.u32 %v13751_v20, %v10860_v8 }
 0x401   :  { %v4251_v39 = vpack.c.bf16 %v3926_v10, %v3926_v10 }
 0x403   :  { %v4443_v36 = vunpack.c.l.b16 %v4251_v39  ;;  %v16503_v56 = vpop.f32.mrf.mxu2  ;;  %v16505_v25 = vpop.f32.mrf.mxu3 }
 0x404   :  { %21815 = vst [vmem:[#allocation26_spill] sm:$0xff] %v16503_v56 }
 0x405   :  { %v16509_v41 = vpack.c.b16 %v4443_v36, %v4442_v4  ;;  %v11002_v4 = vld [vmem:[%s21731_s30 + $0x3a8] sm:$0xf]  ;;  %v13789_v36 = vld [vmem:[%s21731_s30 + $0x3b4] sm:$0xf0] }
 0x406   :  { %v3928_v10 = vpop.f32.mrf.mxu0  ;;  %v3599_v16 = vpop.f32.mrf.mxu1 }
 0x407   :  { %21817 = vst [vmem:[#allocation27_spill] sm:$0xff] %v16509_v41  ;;  %v3929_v50 = vadd.f32 %v3928_v10, %v16148_v2  ;;  %v16512_v5 = vadd.f32 %v3599_v16, %v3231_v59  ;;  %v11250_v2 = vld [vmem:[%s21731_s30 + $0x5a0] sm:$0xf]  ;;  %v13852_v16 = vld [vmem:[%s21731_s30 + $0x5ac] sm:$0xf0] }
 0x408   :  { %2980 = vmatmul.bf16.gmra.mxu2 %v11235_v21  ;;  %3309 = vmatmul.bf16.gmra.mxu3 %v11111_v7  ;;  %v21821_v10 = vld [vmem:[#allocation3_spill] sm:$0xff] }
 0x409   :  { %3967 = vmatmul.bf16.gmra.mxu0 %v10863_v31  ;;  %3638 = vmatmul.bf16.gmra.mxu1 %v10987_v37  ;;  %v4252_v48 = vpack.c.bf16 %v3929_v50, %v3929_v50  ;;  %v11124_v50 = vld [vmem:[%s21731_s30 + $0x4b0] sm:$0xf0]  ;;  %v11251_v31 = vor.u32 %v13852_v16, %v11250_v2  ;;  %v3236_v61 = vadd.f32 %v16196_v51, %v21821_v10 }
 0x40a   :  { %v11127_v37 = vor.u32 %v13818_v62, %v11124_v50  ;;  %v21824_v16 = vld [vmem:[#allocation21_spill] sm:$0xff] }
 0x40b   :  { %v16514_v19 = vpop.f32.mrf.mxu2  ;;  %v16516_v18 = vpop.f32.mrf.mxu3  ;;  %v4444_v21 = vunpack.c.l.b16 %v4252_v48  ;;  %v3238_v51 = vadd.f32 %v16229_v26, %v21824_v16  ;;  %v13822_v26 = vld [vmem:[%s21731_s30 + $0x4c4] sm:$0xf] }
 0x40c   :  { %21818 = vst [vmem:[#allocation39_spill] sm:$0xff] %v16514_v19 }
 0x40e   :  { %v3930_v39 = vpop.f32.mrf.mxu0  ;;  %v3601_v54 = vpop.f32.mrf.mxu1 }
 0x40f   :  { %v3931_v20 = vadd.f32 %v3930_v39, %v16157_v40  ;;  %v16521_v8 = vadd.f32 %v3601_v54, %v3233_v55  ;;  %v13755_v40 = vld [vmem:[%s21731_s30 + $0x2ac] sm:$0xf]  ;;  %v11003_v39 = vor.u32 %v13789_v36, %v11002_v4 }
 0x410   :  { %v10879_v55 = vor.u32 %v13755_v40, %v10876_v1  ;;  %v21825_v40 = vld [vmem:[#allocation32_spill] sm:$0xff] }
 0x411   :  { %v4253_v13 = vpack.c.bf16 %v3931_v20, %v3931_v20 }
 0x413   :  { %v4445_v7 = vunpack.c.l.b16 %v4253_v13  ;;  %v16547_v53 = vpop.f32.mrf.mxu2  ;;  %v16549_v59 = vpop.f32.mrf.mxu3 }
 0x414   :  { %21820 = vst [vmem:[#allocation19_spill] sm:$0xff] %v16547_v53 }
 0x415   :  { %v16553_v54 = vpack.c.b16 %v4445_v7, %v4444_v21  ;;  %v13759_v21 = vld [vmem:[%s21731_s30 + $0x2cc] sm:$0xf]  ;;  %v10892_v7 = vld [vmem:[%s21731_s30 + $0x2d8] sm:$0xf0] }
 0x416   :  { %v3933_v20 = vpop.f32.mrf.mxu0  ;;  %v3604_v41 = vpop.f32.mrf.mxu1 }
 0x417   :  { %21822 = vst [vmem:[#allocation3_spill] sm:$0xff] %v16553_v54  ;;  %v3934_v19 = vadd.f32 %v3933_v20, %v16192_v9  ;;  %v16556_v56 = vadd.f32 %v3604_v41, %v3236_v61  ;;  %v11266_v9 = vld [vmem:[%s21731_s30 + $0x5c0] sm:$0xf]  ;;  %v13856_v41 = vld [vmem:[%s21731_s30 + $0x5cc] sm:$0xf0] }
 0x418   :  { %2985 = vmatmul.bf16.gmra.mxu2 %v11251_v31  ;;  %3314 = vmatmul.bf16.gmra.mxu3 %v11127_v37  ;;  %v11018_v31 = vld [vmem:[%s21731_s30 + $0x3c8] sm:$0xf]  ;;  %v13793_v37 = vld [vmem:[%s21731_s30 + $0x3d4] sm:$0xf0]  ;;  %v11267_v20 = vor.u32 %v13856_v41, %v11266_v9 }
 0x419   :  { %3972 = vmatmul.bf16.gmra.mxu0 %v10879_v55  ;;  %3643 = vmatmul.bf16.gmra.mxu1 %v11003_v39  ;;  %v4254_v50 = vpack.c.bf16 %v3934_v19, %v3934_v19  ;;  %v11140_v19 = vld [vmem:[%s21731_s30 + $0x4d0] sm:$0xf0] }
 0x41a   :  { %v11143_v16 = vor.u32 %v13822_v26, %v11140_v19  ;;  %v21828_v41 = vld [vmem:[#allocation5_spill] sm:$0xff] }
 0x41b   :  { %v16558_v48 = vpop.f32.mrf.mxu2  ;;  %v16560_v2 = vpop.f32.mrf.mxu3  ;;  %v4446_v10 = vunpack.c.l.b16 %v4254_v50 }
 0x41c   :  { %21823 = vst [vmem:[#allocation40_spill] sm:$0xff] %v16558_v48 }
 0x41e   :  { %v3935_v13 = vpop.f32.mrf.mxu0  ;;  %v3606_v62 = vpop.f32.mrf.mxu1 }
 0x41f   :  { %v3936_v1 = vadd.f32 %v3935_v13, %v21825_v40  ;;  %v16565_v4 = vadd.f32 %v3606_v62, %v3238_v51  ;;  %v21826_v51 = vld [vmem:[#allocation4_spill] sm:$0xff]  ;;  %v10895_v62 = vor.u32 %v13759_v21, %v10892_v7  ;;  %v11019_v40 = vor.u32 %v13793_v37, %v11018_v31  ;;  %v10908_v31 = vld [vmem:[%s21731_s30 + $0x2f8] sm:$0xf0] }
 0x420   :  { %v3241_v13 = vadd.f32 %v16252_v35, %v21826_v51  ;;  %v3243_v35 = vadd.f32 %v16285_v60, %v21828_v41  ;;  %v13826_v60 = vld [vmem:[%s21731_s30 + $0x4e4] sm:$0xf]  ;;  %v13797_v51 = vld [vmem:[%s21731_s30 + $0x3f4] sm:$0xf0] }
 0x421   :  { %v4255_v36 = vpack.c.bf16 %v3936_v1, %v3936_v1 }
 0x423   :  { %v4447_v61 = vunpack.c.l.b16 %v4255_v36  ;;  %v16591_v55 = vpop.f32.mrf.mxu2  ;;  %v16593_v39 = vpop.f32.mrf.mxu3 }
 0x425   :  { %v16597_v1 = vpack.c.b16 %v4447_v61, %v4446_v10 }
 0x426   :  { %v3938_v54 = vpop.f32.mrf.mxu0  ;;  %v3609_v48 = vpop.f32.mrf.mxu1 }
 0x427   :  { %21827 = vst [vmem:[#allocation21_spill] sm:$0xff] %v16597_v1  ;;  %v3939_v53 = vadd.f32 %v3938_v54, %v16248_v63  ;;  %v16600_v27 = vadd.f32 %v3609_v48, %v3241_v13  ;;  %v11282_v63 = vld [vmem:[%s21731_s30 + $0x5e0] sm:$0xf]  ;;  %v13860_v48 = vld [vmem:[%s21731_s30 + $0x5ec] sm:$0xf0] }
 0x428   :  { %2990 = vmatmul.bf16.gmra.mxu2 %v11267_v20  ;;  %3319 = vmatmul.bf16.gmra.mxu3 %v11143_v16  ;;  %v11034_v16 = vld [vmem:[%s21731_s30 + $0x3e8] sm:$0xf]  ;;  %v11283_v13 = vor.u32 %v13860_v48, %v11282_v63 }
 0x429   :  { %3977 = vmatmul.bf16.gmra.mxu0 %v10895_v62  ;;  %3648 = vmatmul.bf16.gmra.mxu1 %v11019_v40  ;;  %v4256_v19 = vpack.c.bf16 %v3939_v53, %v3939_v53  ;;  %v11156_v53 = vld [vmem:[%s21731_s30 + $0x4f0] sm:$0xf0]  ;;  %v21830_v40 = vld [vmem:[#allocation6_spill] sm:$0xff] }
 0x42a   :  { %v11159_v62 = vor.u32 %v13826_v60, %v11156_v53  ;;  %v3246_v41 = vadd.f32 %v16296_v14, %v21830_v40  ;;  %v13985_v14 = vld [vmem:[%s21645_s5 + $0xd4] sm:$0xf0]  ;;  %v11035_v60 = vor.u32 %v13797_v51, %v11034_v16  ;;  %v21833_v40 = vld [vmem:[#allocation7_spill] sm:$0xff] }
 0x42b   :  { %v16602_v50 = vpop.f32.mrf.mxu2  ;;  %v16604_v9 = vpop.f32.mrf.mxu3  ;;  %v4448_v37 = vunpack.c.l.b16 %v4256_v19  ;;  %v11786_v19 = vld [vmem:[%s21645_s5 + $0xd0] sm:$0xf] }
 0x42e   :  { %v3940_v36 = vpop.f32.mrf.mxu0  ;;  %v3611_v26 = vpop.f32.mrf.mxu1 }
 0x42f   :  { %v3941_v21 = vadd.f32 %v3940_v36, %v16257_v0  ;;  %v16609_v7 = vadd.f32 %v3611_v26, %v3243_v35  ;;  %v13763_v0 = vld [vmem:[%s21731_s30 + $0x2ec] sm:$0xf]  ;;  %v11722_v36 = vld [vmem:[%s21645_s5 + $0x50] sm:$0xf]  ;;  %v13969_v26 = vld [vmem:[%s21645_s5 + $0x54] sm:$0xf0] }
 0x430   :  { %v10911_v35 = vor.u32 %v13763_v0, %v10908_v31  ;;  %v11787_v0 = vor.u32 %v13985_v14, %v11786_v19  ;;  %v11172_v19 = vld [vmem:[%s21731_s30 + $0x510] sm:$0xf0] }
 0x431   :  { %v4257_v54 = vpack.c.bf16 %v3941_v21, %v3941_v21 }
 0x432   :  { %5725 = vmatpush.bf16.msrb.mxu3 %v11787_v0  ;;  %v13801_v0 = vld [vmem:[%s21731_s30 + $0x414] sm:$0xf0] }
 0x433   :  { %v4449_v10 = vunpack.c.l.b16 %v4257_v54  ;;  %v16629_v61 = vpop.f32.mrf.mxu2  ;;  %v16631_v20 = vpop.f32.mrf.mxu3  ;;  %v11723_v54 = vor.u32 %v13969_v26, %v11722_v36  ;;  %v3248_v36 = vadd.f32 %v16329_v15, %v21833_v40  ;;  %v13830_v15 = vld [vmem:[%s21731_s30 + $0x504] sm:$0xf] }
 0x434   :  { %21829 = vst [vmem:[#allocation32_spill] sm:$0xff] %v16629_v61 }
 0x435   :  { %v16650_v21 = vpack.c.b16 %v4449_v10, %v4448_v37  ;;  %5676 = vmatpush.bf16.msrb.mxu2 %v11723_v54 }
 0x436   :  { %v3943_v63 = vpop.f32.mrf.mxu0  ;;  %v3614_v48 = vpop.f32.mrf.mxu1 }
 0x437   :  { %21831 = vst [vmem:[#allocation4_spill] sm:$0xff] %v16650_v21  ;;  %v3944_v53 = vadd.f32 %v3943_v63, %v16292_v6  ;;  %v16656_v31 = vadd.f32 %v3614_v48, %v3246_v41  ;;  %v10924_v63 = vld [vmem:[%s21731_s30 + $0x318] sm:$0xf0] }
 0x438   :  { %2995 = vmatmul.bf16.gmra.mxu2 %v11283_v13  ;;  %3324 = vmatmul.bf16.gmra.mxu3 %v11159_v62  ;;  %v11298_v13 = vld [vmem:[%s21731_s30 + $0x600] sm:$0xf] }
 0x439   :  { %3982 = vmatmul.bf16.gmra.mxu0 %v10911_v35  ;;  %3653 = vmatmul.bf16.gmra.mxu1 %v11035_v60  ;;  %v4258_v51 = vpack.c.bf16 %v3944_v53, %v3944_v53  ;;  %v13864_v35 = vld [vmem:[%s21731_s30 + $0x60c] sm:$0xf0]  ;;  %v11050_v53 = vld [vmem:[%s21731_s30 + $0x408] sm:$0xf] }
 0x43a   :  { %v11299_v40 = vor.u32 %v13864_v35, %v11298_v13  ;;  %v11051_v1 = vor.u32 %v13801_v0, %v11050_v53  ;;  %v21838_v35 = vld [vmem:[#allocation9_spill] sm:$0xff] }
 0x43b   :  { %v16658_v37 = vpop.f32.mrf.mxu2  ;;  %v16660_v10 = vpop.f32.mrf.mxu3  ;;  %v4450_v54 = vunpack.c.l.b16 %v4258_v51 }
 0x43c   :  { %21832 = vst [vmem:[#allocation5_spill] sm:$0xff] %v16658_v37 }
 0x43e   :  { %v3945_v26 = vpop.f32.mrf.mxu0  ;;  %v3616_v16 = vpop.f32.mrf.mxu1 }
 0x43f   :  { %v3946_v6 = vadd.f32 %v3945_v26, %v16301_v11  ;;  %v16665_v41 = vadd.f32 %v3616_v16, %v3248_v36  ;;  %v13767_v11 = vld [vmem:[%s21731_s30 + $0x30c] sm:$0xf]  ;;  %v11175_v36 = vor.u32 %v13830_v15, %v11172_v19 }
 0x440   :  { %v21835_v26 = vld [vmem:[#allocation8_spill] sm:$0xff] }
 0x441   :  { %v4259_v62 = vpack.c.bf16 %v3946_v6, %v3946_v6  ;;  %v3251_v16 = vadd.f32 %v16340_v30, %v21835_v26  ;;  %v10927_v6 = vor.u32 %v13767_v11, %v10924_v63  ;;  %v3253_v30 = vadd.f32 %v16373_v44, %v21838_v35  ;;  %v13834_v44 = vld [vmem:[%s21731_s30 + $0x524] sm:$0xf]  ;;  %v11066_v26 = vld [vmem:[%s21731_s30 + $0x428] sm:$0xf] }
 0x442   :  { %v21840_v35 = vld [vmem:[#allocation11_spill] sm:$0xff] }
 0x443   :  { %v4451_v14 = vunpack.c.l.b16 %v4259_v62  ;;  %v16685_v48 = vpop.f32.mrf.mxu2  ;;  %v16687_v60 = vpop.f32.mrf.mxu3 }
 0x444   :  { %21834 = vst [vmem:[#allocation6_spill] sm:$0xff] %v16685_v48 }
 0x445   :  { %v16697_v51 = vpack.c.b16 %v4451_v14, %v4450_v54  ;;  %v11188_v14 = vld [vmem:[%s21731_s30 + $0x530] sm:$0xf0] }
 0x446   :  { %v3948_v62 = vpop.f32.mrf.mxu0  ;;  %v3619_v21 = vpop.f32.mrf.mxu1 }
 0x447   :  { %21836 = vst [vmem:[#allocation7_spill] sm:$0xff] %v16697_v51  ;;  %v3949_v48 = vadd.f32 %v3948_v62, %v16336_v46  ;;  %v16700_v37 = vadd.f32 %v3619_v21, %v3251_v16  ;;  %v11314_v46 = vld [vmem:[%s21731_s30 + $0x620] sm:$0xf]  ;;  %v13805_v16 = vld [vmem:[%s21731_s30 + $0x434] sm:$0xf0]  ;;  %v11191_v62 = vor.u32 %v13834_v44, %v11188_v14 }
 0x448   :  { %3000 = vmatmul.bf16.gmra.mxu2 %v11299_v40  ;;  %3329 = vmatmul.bf16.gmra.mxu3 %v11175_v36 }
 0x449   :  { %3987 = vmatmul.bf16.gmra.mxu0 %v10927_v6  ;;  %3658 = vmatmul.bf16.gmra.mxu1 %v11051_v1  ;;  %v4260_v11 = vpack.c.bf16 %v3949_v48, %v3949_v48  ;;  %v13868_v1 = vld [vmem:[%s21731_s30 + $0x62c] sm:$0xf0]  ;;  %v10940_v48 = vld [vmem:[%s21731_s30 + $0x338] sm:$0xf0] }
 0x44a   :  { %v11315_v6 = vor.u32 %v13868_v1, %v11314_v46  ;;  %v21843_v1 = vld [vmem:[#allocation12_spill] sm:$0xff] }
 0x44b   :  { %v16702_v61 = vpop.f32.mrf.mxu2  ;;  %v16704_v13 = vpop.f32.mrf.mxu3  ;;  %v4484_v53 = vunpack.c.l.b16 %v4260_v11 }
 0x44c   :  { %21837 = vst [vmem:[#allocation8_spill] sm:$0xff] %v16702_v61 }
 0x44e   :  { %v3950_v15 = vpop.f32.mrf.mxu0  ;;  %v3621_v19 = vpop.f32.mrf.mxu1 }
 0x44f   :  { %v3951_v63 = vadd.f32 %v3950_v15, %v16345_v38  ;;  %v16709_v54 = vadd.f32 %v3621_v19, %v3253_v30  ;;  %v13771_v38 = vld [vmem:[%s21731_s30 + $0x32c] sm:$0xf]  ;;  %v3256_v30 = vadd.f32 %v16384_v23, %v21840_v35  ;;  %v3258_v23 = vadd.f32 %v16417_v43, %v21843_v1  ;;  %v13838_v43 = vld [vmem:[%s21731_s30 + $0x544] sm:$0xf] }
 0x450   :  { %v10943_v19 = vor.u32 %v13771_v38, %v10940_v48  ;;  %v21845_v1 = vld [vmem:[#allocation28_spill] sm:$0xff] }
 0x451   :  { %v4261_v21 = vpack.c.bf16 %v3951_v63, %v3951_v63 }
 0x453   :  { %v4485_v0 = vunpack.c.l.b16 %v4261_v21  ;;  %v16729_v40 = vpop.f32.mrf.mxu2  ;;  %v16731_v36 = vpop.f32.mrf.mxu3  ;;  %v11067_v21 = vor.u32 %v13805_v16, %v11066_v26  ;;  %v13872_v26 = vld [vmem:[%s21731_s30 + $0x64c] sm:$0xf0]  ;;  %v10956_v16 = vld [vmem:[%s21731_s30 + $0x358] sm:$0xf0] }
 0x454   :  { %21839 = vst [vmem:[#allocation9_spill] sm:$0xff] %v16729_v40 }
 0x455   :  { %v16741_v15 = vpack.c.b16 %v4485_v0, %v4484_v53 }
 0x456   :  { %v3953_v11 = vpop.f32.mrf.mxu0  ;;  %v3624_v63 = vpop.f32.mrf.mxu1 }
 0x457   :  { %21841 = vst [vmem:[#allocation11_spill] sm:$0xff] %v16741_v15  ;;  %v3954_v51 = vadd.f32 %v3953_v11, %v16380_v17  ;;  %v16744_v40 = vadd.f32 %v3624_v63, %v3256_v30  ;;  %v11330_v17 = vld [vmem:[%s21731_s30 + $0x640] sm:$0xf]  ;;  %v13809_v11 = vld [vmem:[%s21731_s30 + $0x454] sm:$0xf0] }
 0x458   :  { %3005 = vmatmul.bf16.gmra.mxu2 %v11315_v6  ;;  %3334 = vmatmul.bf16.gmra.mxu3 %v11191_v62  ;;  %v11331_v63 = vor.u32 %v13872_v26, %v11330_v17  ;;  %v21848_v26 = vld [vmem:[#allocation14_spill] sm:$0xff] }
 0x459   :  { %3992 = vmatmul.bf16.gmra.mxu0 %v10943_v19  ;;  %3663 = vmatmul.bf16.gmra.mxu1 %v11067_v21  ;;  %v4262_v38 = vpack.c.bf16 %v3954_v51, %v3954_v51  ;;  %v11204_v51 = vld [vmem:[%s21731_s30 + $0x550] sm:$0xf0]  ;;  %v11082_v19 = vld [vmem:[%s21731_s30 + $0x448] sm:$0xf] }
 0x45a   :  { %v11207_v21 = vor.u32 %v13838_v43, %v11204_v51 }
 0x45b   :  { %v16746_v61 = vpop.f32.mrf.mxu2  ;;  %v16748_v46 = vpop.f32.mrf.mxu3  ;;  %v4486_v6 = vunpack.c.l.b16 %v4262_v38 }
 0x45c   :  { %21842 = vst [vmem:[#allocation41_spill] sm:$0xff] %v16746_v61 }
 0x45e   :  { %v3955_v44 = vpop.f32.mrf.mxu0  ;;  %v3626_v14 = vpop.f32.mrf.mxu1 }
 0x45f   :  { %v3956_v48 = vadd.f32 %v3955_v44, %v16389_v45  ;;  %v16753_v53 = vadd.f32 %v3626_v14, %v3258_v23  ;;  %v13775_v45 = vld [vmem:[%s21731_s30 + $0x34c] sm:$0xf]  ;;  %v3261_v23 = vadd.f32 %v16428_v33, %v21845_v1  ;;  %v3263_v33 = vadd.f32 %v16461_v32, %v21848_v26  ;;  %v13842_v32 = vld [vmem:[%s21731_s30 + $0x564] sm:$0xf]  ;;  %v21850_v26 = vld [vmem:[#allocation29_spill] sm:$0xff] }
 0x460   :  { %v10959_v44 = vor.u32 %v13775_v45, %v10956_v16 }
 0x461   :  { %v4263_v0 = vpack.c.bf16 %v3956_v48, %v3956_v48 }
 0x463   :  { %v4487_v62 = vunpack.c.l.b16 %v4263_v0  ;;  %v16773_v35 = vpop.f32.mrf.mxu2  ;;  %v16775_v30 = vpop.f32.mrf.mxu3  ;;  %v11083_v0 = vor.u32 %v13809_v11, %v11082_v19  ;;  %v13876_v19 = vld [vmem:[%s21731_s30 + $0x66c] sm:$0xf0]  ;;  %v10972_v11 = vld [vmem:[%s21731_s30 + $0x378] sm:$0xf0] }
 0x464   :  { %21844 = vst [vmem:[#allocation12_spill] sm:$0xff] %v16773_v35 }
 0x465   :  { %v16785_v14 = vpack.c.b16 %v4487_v62, %v4486_v6 }
 0x466   :  { %v3958_v38 = vpop.f32.mrf.mxu0  ;;  %v3629_v48 = vpop.f32.mrf.mxu1 }
 0x467   :  { %21846 = vst [vmem:[#allocation28_spill] sm:$0xff] %v16785_v14  ;;  %v3959_v15 = vadd.f32 %v3958_v38, %v16424_v34  ;;  %v16788_v35 = vadd.f32 %v3629_v48, %v3261_v23  ;;  %v11346_v34 = vld [vmem:[%s21731_s30 + $0x660] sm:$0xf]  ;;  %v13813_v38 = vld [vmem:[%s21731_s30 + $0x474] sm:$0xf0] }
 0x468   :  { %3010 = vmatmul.bf16.gmra.mxu2 %v11331_v63  ;;  %3339 = vmatmul.bf16.gmra.mxu3 %v11207_v21  ;;  %v11347_v48 = vor.u32 %v13876_v19, %v11346_v34  ;;  %v21853_v19 = vld [vmem:[#allocation16_spill] sm:$0xff] }
 0x469   :  { %3997 = vmatmul.bf16.gmra.mxu0 %v10959_v44  ;;  %3668 = vmatmul.bf16.gmra.mxu1 %v11083_v0  ;;  %v4264_v45 = vpack.c.bf16 %v3959_v15, %v3959_v15  ;;  %v11220_v15 = vld [vmem:[%s21731_s30 + $0x570] sm:$0xf0]  ;;  %v11098_v44 = vld [vmem:[%s21731_s30 + $0x468] sm:$0xf] }
 0x46a   :  { %v11223_v0 = vor.u32 %v13842_v32, %v11220_v15 }
 0x46b   :  { %v16790_v61 = vpop.f32.mrf.mxu2  ;;  %v16792_v17 = vpop.f32.mrf.mxu3  ;;  %v4488_v63 = vunpack.c.l.b16 %v4264_v45 }
 0x46c   :  { %21847 = vst [vmem:[#allocation42_spill] sm:$0xff] %v16790_v61 }
 0x46e   :  { %v3960_v43 = vpop.f32.mrf.mxu0  ;;  %v3631_v51 = vpop.f32.mrf.mxu1 }
 0x46f   :  { %v3961_v16 = vadd.f32 %v3960_v43, %v16433_v58  ;;  %v16797_v6 = vadd.f32 %v3631_v51, %v3263_v33  ;;  %v13779_v58 = vld [vmem:[%s21731_s30 + $0x36c] sm:$0xf]  ;;  %v3266_v33 = vadd.f32 %v16472_v42, %v21850_v26  ;;  %v3268_v42 = vadd.f32 %v16505_v25, %v21853_v19  ;;  %v13846_v25 = vld [vmem:[%s21731_s30 + $0x584] sm:$0xf]  ;;  %v21855_v19 = vld [vmem:[#allocation30_spill] sm:$0xff] }
 0x470   :  { %v10975_v43 = vor.u32 %v13779_v58, %v10972_v11 }
 0x471   :  { %v4265_v62 = vpack.c.bf16 %v3961_v16, %v3961_v16 }
 0x473   :  { %v4489_v21 = vunpack.c.l.b16 %v4265_v62  ;;  %v16817_v1 = vpop.f32.mrf.mxu2  ;;  %v16819_v23 = vpop.f32.mrf.mxu3  ;;  %v11099_v62 = vor.u32 %v13813_v38, %v11098_v44  ;;  %v13880_v44 = vld [vmem:[%s21731_s30 + $0x68c] sm:$0xf0]  ;;  %v10988_v38 = vld [vmem:[%s21731_s30 + $0x398] sm:$0xf0] }
 0x474   :  { %21849 = vst [vmem:[#allocation14_spill] sm:$0xff] %v16817_v1 }
 0x475   :  { %v16829_v51 = vpack.c.b16 %v4489_v21, %v4488_v63 }
 0x476   :  { %v3963_v45 = vpop.f32.mrf.mxu0  ;;  %v3634_v16 = vpop.f32.mrf.mxu1 }
 0x477   :  { %21851 = vst [vmem:[#allocation29_spill] sm:$0xff] %v16829_v51  ;;  %v3964_v14 = vadd.f32 %v3963_v45, %v16468_v12  ;;  %v16832_v1 = vadd.f32 %v3634_v16, %v3266_v33  ;;  %v11362_v12 = vld [vmem:[%s21731_s30 + $0x680] sm:$0xf]  ;;  %v13817_v45 = vld [vmem:[%s21731_s30 + $0x494] sm:$0xf0] }
 0x478   :  { %3015 = vmatmul.bf16.gmra.mxu2 %v11347_v48  ;;  %3344 = vmatmul.bf16.gmra.mxu3 %v11223_v0  ;;  %v11363_v16 = vor.u32 %v13880_v44, %v11362_v12  ;;  %v21858_v44 = vld [vmem:[#allocation18_spill] sm:$0xff] }
 0x479   :  { %4002 = vmatmul.bf16.gmra.mxu0 %v10975_v43  ;;  %3673 = vmatmul.bf16.gmra.mxu1 %v11099_v62  ;;  %v4266_v58 = vpack.c.bf16 %v3964_v14, %v3964_v14  ;;  %v11236_v14 = vld [vmem:[%s21731_s30 + $0x590] sm:$0xf0]  ;;  %v11114_v43 = vld [vmem:[%s21731_s30 + $0x488] sm:$0xf] }
 0x47a   :  { %v11239_v62 = vor.u32 %v13846_v25, %v11236_v14 }
 0x47b   :  { %v16834_v61 = vpop.f32.mrf.mxu2  ;;  %v16836_v34 = vpop.f32.mrf.mxu3  ;;  %v4490_v48 = vunpack.c.l.b16 %v4266_v58 }
 0x47c   :  { %21852 = vst [vmem:[#allocation43_spill] sm:$0xff] %v16834_v61 }
 0x47e   :  { %v3965_v32 = vpop.f32.mrf.mxu0  ;;  %v3636_v15 = vpop.f32.mrf.mxu1 }
 0x47f   :  { %v3966_v11 = vadd.f32 %v3965_v32, %v16477_v47  ;;  %v16841_v63 = vadd.f32 %v3636_v15, %v3268_v42  ;;  %v13783_v47 = vld [vmem:[%s21731_s30 + $0x38c] sm:$0xf]  ;;  %v3271_v42 = vadd.f32 %v16516_v18, %v21855_v19  ;;  %v3273_v18 = vadd.f32 %v16549_v59, %v21858_v44  ;;  %v13850_v59 = vld [vmem:[%s21731_s30 + $0x5a4] sm:$0xf] }
 0x480   :  { %v10991_v32 = vor.u32 %v13783_v47, %v10988_v38  ;;  %v21860_v44 = vld [vmem:[#allocation31_spill] sm:$0xff] }
 0x481   :  { %v4267_v21 = vpack.c.bf16 %v3966_v11, %v3966_v11 }
 0x483   :  { %v4491_v0 = vunpack.c.l.b16 %v4267_v21  ;;  %v16861_v26 = vpop.f32.mrf.mxu2  ;;  %v16863_v33 = vpop.f32.mrf.mxu3  ;;  %v11115_v21 = vor.u32 %v13817_v45, %v11114_v43  ;;  %v13884_v43 = vld [vmem:[%s21731_s30 + $0x6ac] sm:$0xf0]  ;;  %v11004_v45 = vld [vmem:[%s21731_s30 + $0x3b8] sm:$0xf0] }
 0x484   :  { %21854 = vst [vmem:[#allocation16_spill] sm:$0xff] %v16861_v26 }
 0x485   :  { %v16873_v15 = vpack.c.b16 %v4491_v0, %v4490_v48 }
 0x486   :  { %v3968_v58 = vpop.f32.mrf.mxu0  ;;  %v3639_v11 = vpop.f32.mrf.mxu1 }
 0x487   :  { %21856 = vst [vmem:[#allocation30_spill] sm:$0xff] %v16873_v15  ;;  %v3969_v51 = vadd.f32 %v3968_v58, %v16512_v5  ;;  %v16876_v26 = vadd.f32 %v3639_v11, %v3271_v42  ;;  %v11378_v5 = vld [vmem:[%s21731_s30 + $0x6a0] sm:$0xf]  ;;  %v13821_v58 = vld [vmem:[%s21731_s30 + $0x4b4] sm:$0xf0] }
 0x488   :  { %3020 = vmatmul.bf16.gmra.mxu2 %v11363_v16  ;;  %3349 = vmatmul.bf16.gmra.mxu3 %v11239_v62  ;;  %v11379_v11 = vor.u32 %v13884_v43, %v11378_v5  ;;  %v14101_v43 = vld [vmem:[%s21645_s5 + $0x474] sm:$0xf0] }
 0x489   :  { %4007 = vmatmul.bf16.gmra.mxu0 %v10991_v32  ;;  %3678 = vmatmul.bf16.gmra.mxu1 %v11115_v21  ;;  %v4268_v47 = vpack.c.bf16 %v3969_v51, %v3969_v51  ;;  %v11252_v51 = vld [vmem:[%s21731_s30 + $0x5b0] sm:$0xf0]  ;;  %v11130_v32 = vld [vmem:[%s21731_s30 + $0x4a8] sm:$0xf] }
 0x48a   :  { %v11255_v21 = vor.u32 %v13850_v59, %v11252_v51  ;;  %v11740_v51 = vld [vmem:[%s21645_s5 + $0x78] sm:$0xf0] }
 0x48b   :  { %v16878_v61 = vpop.f32.mrf.mxu2  ;;  %v16880_v12 = vpop.f32.mrf.mxu3  ;;  %v4492_v16 = vunpack.c.l.b16 %v4268_v47 }
 0x48c   :  { %21857 = vst [vmem:[#allocation44_spill] sm:$0xff] %v16878_v61 }
 0x48e   :  { %v3970_v25 = vpop.f32.mrf.mxu0  ;;  %v3641_v14 = vpop.f32.mrf.mxu1 }
 0x48f   :  { %v3971_v38 = vadd.f32 %v3970_v25, %v16521_v8  ;;  %v16885_v48 = vadd.f32 %v3641_v14, %v3273_v18  ;;  %v13787_v8 = vld [vmem:[%s21731_s30 + $0x3ac] sm:$0xf]  ;;  %v3276_v18 = vadd.f32 %v16560_v2, %v21860_v44  ;;  %v12250_v2 = vld [vmem:[%s21645_s5 + $0x470] sm:$0xf]  ;;  %v11394_v44 = vld [vmem:[%s21731_s30 + $0x6c0] sm:$0xf] }
 0x490   :  { %v11007_v25 = vor.u32 %v13787_v8, %v11004_v45  ;;  %v12251_v59 = vor.u32 %v14101_v43, %v12250_v2  ;;  %v21862_v8 = vld [vmem:[#allocation33_spill] sm:$0xff] }
 0x491   :  { %v4269_v0 = vpack.c.bf16 %v3971_v38, %v3971_v38  ;;  %v3278_v45 = vadd.f32 %v16593_v39, %v21862_v8  ;;  %v13854_v39 = vld [vmem:[%s21731_s30 + $0x5c4] sm:$0xf] }
 0x492   :  { %6066 = vmatpush.bf16.msra.mxu1 %v12251_v59  ;;  %v13825_v59 = vld [vmem:[%s21731_s30 + $0x4d4] sm:$0xf0] }
 0x493   :  { %v4493_v62 = vunpack.c.l.b16 %v4269_v0  ;;  %v16905_v19 = vpop.f32.mrf.mxu2  ;;  %v16907_v42 = vpop.f32.mrf.mxu3  ;;  %v11131_v0 = vor.u32 %v13821_v58, %v11130_v32 }
 0x494   :  { %21859 = vst [vmem:[#allocation18_spill] sm:$0xff] %v16905_v19 }
 0x495   :  { %v16917_v14 = vpack.c.b16 %v4493_v62, %v4492_v16 }
 0x496   :  { %v3973_v47 = vpop.f32.mrf.mxu0  ;;  %v3644_v38 = vpop.f32.mrf.mxu1 }
 0x497   :  { %21861 = vst [vmem:[#allocation31_spill] sm:$0xff] %v16917_v14  ;;  %v3974_v15 = vadd.f32 %v3973_v47, %v16556_v56  ;;  %v16920_v19 = vadd.f32 %v3644_v38, %v3276_v18  ;;  %v13972_v56 = vld [vmem:[%s21645_s5 + $0x74] sm:$0xf]  ;;  %v11020_v47 = vld [vmem:[%s21731_s30 + $0x3d8] sm:$0xf0] }
 0x498   :  { %3025 = vmatmul.bf16.gmra.mxu2 %v11379_v11  ;;  %3354 = vmatmul.bf16.gmra.mxu3 %v11255_v21  ;;  %v11743_v16 = vor.u32 %v13972_v56, %v11740_v51  ;;  %v11146_v56 = vld [vmem:[%s21731_s30 + $0x4c8] sm:$0xf] }
 0x499   :  { %4012 = vmatmul.bf16.gmra.mxu0 %v11007_v25  ;;  %3683 = vmatmul.bf16.gmra.mxu1 %v11131_v0  ;;  %v4270_v58 = vpack.c.bf16 %v3974_v15, %v3974_v15  ;;  %v13888_v25 = vld [vmem:[%s21731_s30 + $0x6cc] sm:$0xf0]  ;;  %v13791_v15 = vld [vmem:[%s21731_s30 + $0x3cc] sm:$0xf] }
 0x49a   :  { %6115 = vmatpush.bf16.msra.mxu0 %v11743_v16  ;;  %v11395_v51 = vor.u32 %v13888_v25, %v11394_v44  ;;  %v11023_v16 = vor.u32 %v13791_v15, %v11020_v47 }
 0x49b   :  { %v16922_v61 = vpop.f32.mrf.mxu2  ;;  %v16924_v5 = vpop.f32.mrf.mxu3  ;;  %v4494_v38 = vunpack.c.l.b16 %v4270_v58 }
 0x49e   :  { %v3975_v62 = vpop.f32.mrf.mxu0  ;;  %v3646_v32 = vpop.f32.mrf.mxu1 }
 0x49f   :  { %v3976_v11 = vadd.f32 %v3975_v62, %v16565_v4  ;;  %v16941_v21 = vadd.f32 %v3646_v32, %v3278_v45  ;;  %v11268_v4 = vld [vmem:[%s21731_s30 + $0x5d0] sm:$0xf0]  ;;  %v3281_v45 = vadd.f32 %v16604_v9, %v16250_v29  ;;  %v3283_v29 = vadd.f32 %v16631_v20, %v16283_v52  ;;  %v13858_v52 = vld [vmem:[%s21731_s30 + $0x5e4] sm:$0xf] }
 0x4a0   :  { %v11271_v8 = vor.u32 %v13854_v39, %v11268_v4  ;;  %v11284_v20 = vld [vmem:[%s21731_s30 + $0x5f0] sm:$0xf0] }
 0x4a1   :  { %v4271_v18 = vpack.c.bf16 %v3976_v11, %v3976_v11  ;;  %v11147_v11 = vor.u32 %v13825_v59, %v11146_v56 }
 0x4a3   :  { %v4495_v0 = vunpack.c.l.b16 %v4271_v18  ;;  %v16961_v2 = vpop.f32.mrf.mxu2  ;;  %v16963_v43 = vpop.f32.mrf.mxu3 }
 0x4a4   :  { %21863 = vst [vmem:[#allocation33_spill] sm:$0xff] %v16961_v2 }
 0x4a5   :  { %v16973_v62 = vpack.c.b16 %v4495_v0, %v4494_v38  ;;  %v13892_v38 = vld [vmem:[%s21731_s30 + $0x6ec] sm:$0xf0]  ;;  %v11036_v0 = vld [vmem:[%s21731_s30 + $0x3f8] sm:$0xf0] }
 0x4a6   :  { %v3978_v32 = vpop.f32.mrf.mxu0  ;;  %v3649_v58 = vpop.f32.mrf.mxu1 }
 0x4a7   :  { %21864 = vst [vmem:[#allocation45_spill] sm:$0xff] %v16973_v62  ;;  %v3979_v18 = vadd.f32 %v3978_v32, %v16600_v27  ;;  %v16976_v14 = vadd.f32 %v3649_v58, %v3281_v45  ;;  %v11410_v27 = vld [vmem:[%s21731_s30 + $0x6e0] sm:$0xf]  ;;  %v11162_v45 = vld [vmem:[%s21731_s30 + $0x4e8] sm:$0xf]  ;;  %v11287_v58 = vor.u32 %v13858_v52, %v11284_v20 }
 0x4a8   :  { %3030 = vmatmul.bf16.gmra.mxu2 %v11395_v51  ;;  %3359 = vmatmul.bf16.gmra.mxu3 %v11271_v8  ;;  %v11411_v32 = vor.u32 %v13892_v38, %v11410_v27  ;;  %v3288_v38 = vadd.f32 %v16687_v60, %v16327_v24  ;;  %v13862_v24 = vld [vmem:[%s21731_s30 + $0x604] sm:$0xf]  ;;  %v13799_v60 = vld [vmem:[%s21731_s30 + $0x40c] sm:$0xf] }
 0x4a9   :  { %4017 = vmatmul.bf16.gmra.mxu0 %v11023_v16  ;;  %3688 = vmatmul.bf16.gmra.mxu1 %v11147_v11  ;;  %v4272_v39 = vpack.c.bf16 %v3979_v18, %v3979_v18  ;;  %v13829_v16 = vld [vmem:[%s21731_s30 + $0x4f4] sm:$0xf0] }
 0x4ab   :  { %v16978_v2 = vpop.f32.mrf.mxu2  ;;  %v16980_v44 = vpop.f32.mrf.mxu3  ;;  %v4496_v56 = vunpack.c.l.b16 %v4272_v39 }
 0x4ae   :  { %v3980_v9 = vpop.f32.mrf.mxu0  ;;  %v3651_v25 = vpop.f32.mrf.mxu1 }
 0x4af   :  { %v3981_v4 = vadd.f32 %v3980_v9, %v16609_v7  ;;  %v16985_v15 = vadd.f32 %v3651_v25, %v3283_v29  ;;  %v13795_v7 = vld [vmem:[%s21731_s30 + $0x3ec] sm:$0xf]  ;;  %v3286_v29 = vadd.f32 %v16660_v10, %v16294_v28  ;;  %v11163_v25 = vor.u32 %v13829_v16, %v11162_v45  ;;  %v11178_v45 = vld [vmem:[%s21731_s30 + $0x508] sm:$0xf]  ;;  %v13833_v16 = vld [vmem:[%s21731_s30 + $0x514] sm:$0xf0] }
 0x4b0   :  { %v11039_v11 = vor.u32 %v13795_v7, %v11036_v0  ;;  %v13896_v7 = vld [vmem:[%s21731_s30 + $0x70c] sm:$0xf0] }
 0x4b1   :  { %v4273_v47 = vpack.c.bf16 %v3981_v4, %v3981_v4 }
 0x4b3   :  { %v4497_v59 = vunpack.c.l.b16 %v4273_v47  ;;  %v17005_v51 = vpop.f32.mrf.mxu2  ;;  %v17007_v8 = vpop.f32.mrf.mxu3 }
 0x4b4   :  { %21865 = vst [vmem:[#allocation46_spill] sm:$0xff] %v17005_v51 }
 0x4b5   :  { %v17015_v18 = vpack.c.b16 %v4497_v59, %v4496_v56  ;;  %v11052_v59 = vld [vmem:[%s21731_s30 + $0x418] sm:$0xf0] }
 0x4b6   :  { %v3983_v9 = vpop.f32.mrf.mxu0  ;;  %v3654_v4 = vpop.f32.mrf.mxu1 }
 0x4b7   :  { %21866 = vst [vmem:[#allocation47_spill] sm:$0xff] %v17015_v18  ;;  %v3984_v39 = vadd.f32 %v3983_v9, %v16656_v31  ;;  %v17020_v47 = vadd.f32 %v3654_v4, %v3286_v29  ;;  %v11426_v31 = vld [vmem:[%s21731_s30 + $0x700] sm:$0xf]  ;;  %v3291_v18 = vadd.f32 %v16704_v13, %v16338_v57  ;;  %v3293_v57 = vadd.f32 %v16731_v36, %v16371_v3  ;;  %v13866_v3 = vld [vmem:[%s21731_s30 + $0x624] sm:$0xf] }
 0x4b8   :  { %3035 = vmatmul.bf16.gmra.mxu2 %v11411_v32  ;;  %3364 = vmatmul.bf16.gmra.mxu3 %v11287_v58  ;;  %v11714_v9 = vld [vmem:[%s21645_s5 + $0x40] sm:$0xf]  ;;  %v11427_v4 = vor.u32 %v13896_v7, %v11426_v31  ;;  %v13803_v36 = vld [vmem:[%s21731_s30 + $0x42c] sm:$0xf] }
 0x4b9   :  { %4022 = vmatmul.bf16.gmra.mxu0 %v11039_v11  ;;  %3693 = vmatmul.bf16.gmra.mxu1 %v11163_v25  ;;  %v4274_v28 = vpack.c.bf16 %v3984_v39, %v3984_v39  ;;  %v13967_v25 = vld [vmem:[%s21645_s5 + $0x44] sm:$0xf0]  ;;  %v11778_v39 = vld [vmem:[%s21645_s5 + $0xc0] sm:$0xf] }
 0x4bb   :  { %v17022_v62 = vpop.f32.mrf.mxu2  ;;  %v17024_v27 = vpop.f32.mrf.mxu3  ;;  %v4498_v32 = vunpack.c.l.b16 %v4274_v28  ;;  %v13983_v28 = vld [vmem:[%s21645_s5 + $0xc4] sm:$0xf0] }
 0x4bc   :  { %21867 = vst [vmem:[#allocation48_spill] sm:$0xff] %v17022_v62  ;;  %v11179_v62 = vor.u32 %v13833_v16, %v11178_v45  ;;  %v11442_v45 = vld [vmem:[%s21731_s30 + $0x720] sm:$0xf] }
 0x4be   :  { %v3985_v52 = vpop.f32.mrf.mxu0  ;;  %v3656_v20 = vpop.f32.mrf.mxu1 }
 0x4bf   :  { %v3986_v10 = vadd.f32 %v3985_v52, %v16665_v41  ;;  %v17035_v0 = vadd.f32 %v3656_v20, %v3288_v38  ;;  %v11300_v41 = vld [vmem:[%s21731_s30 + $0x610] sm:$0xf0]  ;;  %v11715_v52 = vor.u32 %v13967_v25, %v11714_v9  ;;  %v11779_v20 = vor.u32 %v13983_v28, %v11778_v39  ;;  %v11194_v25 = vld [vmem:[%s21731_s30 + $0x528] sm:$0xf]  ;;  %v13837_v39 = vld [vmem:[%s21731_s30 + $0x534] sm:$0xf0] }
 0x4c0   :  { %v11303_v38 = vor.u32 %v13862_v24, %v11300_v41 }
 0x4c1   :  { %v4275_v56 = vpack.c.bf16 %v3986_v10, %v3986_v10  ;;  %v11055_v10 = vor.u32 %v13799_v60, %v11052_v59  ;;  %5677 = vmatpush.bf16.msrb.mxu2 %v11715_v52  ;;  %5726 = vmatpush.bf16.msrb.mxu3 %v11779_v20 }
 0x4c3   :  { %v4499_v58 = vunpack.c.l.b16 %v4275_v56  ;;  %v17055_v11 = vpop.f32.mrf.mxu2  ;;  %v17057_v29 = vpop.f32.mrf.mxu3 }
 0x4c4   :  { %21868 = vst [vmem:[#allocation49_spill] sm:$0xff] %v17055_v11 }
 0x4c5   :  { %v17071_v56 = vpack.c.b16 %v4499_v58, %v4498_v32 }
 0x4c6   :  { %v3988_v11 = vpop.f32.mrf.mxu0  ;;  %v3659_v31 = vpop.f32.mrf.mxu1 }
 0x4c7   :  { %21869 = vst [vmem:[#allocation50_spill] sm:$0xff] %v17071_v56  ;;  %v3989_v51 = vadd.f32 %v3988_v11, %v16700_v37  ;;  %v17076_v7 = vadd.f32 %v3659_v31, %v3291_v18  ;;  %v11195_v31 = vor.u32 %v13837_v39, %v11194_v25 }
 0x4c8   :  { %3040 = vmatmul.bf16.gmra.mxu2 %v11427_v4  ;;  %3369 = vmatmul.bf16.gmra.mxu3 %v11303_v38 }
 0x4c9   :  { %4027 = vmatmul.bf16.gmra.mxu0 %v11055_v10  ;;  %3698 = vmatmul.bf16.gmra.mxu1 %v11179_v62  ;;  %v4276_v60 = vpack.c.bf16 %v3989_v51, %v3989_v51  ;;  %v13900_v62 = vld [vmem:[%s21731_s30 + $0x72c] sm:$0xf0]  ;;  %v11068_v51 = vld [vmem:[%s21731_s30 + $0x438] sm:$0xf0]  ;;  %v3296_v10 = vadd.f32 %v16748_v46, %v16382_v49 }
 0x4ca   :  { %v11443_v4 = vor.u32 %v13900_v62, %v11442_v45  ;;  %v11071_v28 = vor.u32 %v13803_v36, %v11068_v51  ;;  %v3298_v45 = vadd.f32 %v16775_v30, %v16415_v22  ;;  %v13904_v36 = vld [vmem:[%s21731_s30 + $0x74c] sm:$0xf0]  ;;  %v13870_v22 = vld [vmem:[%s21731_s30 + $0x644] sm:$0xf]  ;;  %v13807_v30 = vld [vmem:[%s21731_s30 + $0x44c] sm:$0xf] }
 0x4cb   :  { %v17078_v24 = vpop.f32.mrf.mxu2  ;;  %v17080_v41 = vpop.f32.mrf.mxu3  ;;  %v4532_v32 = vunpack.c.l.b16 %v4276_v60  ;;  %v11084_v51 = vld [vmem:[%s21731_s30 + $0x458] sm:$0xf0] }
 0x4ce   :  { %v3990_v13 = vpop.f32.mrf.mxu0  ;;  %v3661_v37 = vpop.f32.mrf.mxu1 }
 0x4cf   :  { %v3991_v59 = vadd.f32 %v3990_v13, %v16709_v54  ;;  %v17088_v18 = vadd.f32 %v3661_v37, %v3293_v57  ;;  %v11316_v54 = vld [vmem:[%s21731_s30 + $0x630] sm:$0xf0] }
 0x4d0   :  { %v11319_v38 = vor.u32 %v13866_v3, %v11316_v54 }
 0x4d1   :  { %v4277_v16 = vpack.c.bf16 %v3991_v59, %v3991_v59 }
 0x4d3   :  { %v4533_v58 = vunpack.c.l.b16 %v4277_v16  ;;  %v17105_v11 = vpop.f32.mrf.mxu2  ;;  %v17107_v9 = vpop.f32.mrf.mxu3 }
 0x4d5   :  { %v17115_v52 = vpack.c.b16 %v4533_v58, %v4532_v32 }
 0x4d6   :  { %v3993_v20 = vpop.f32.mrf.mxu0  ;;  %v3664_v13 = vpop.f32.mrf.mxu1 }
 0x4d7   :  { %21870 = vst [vmem:[#allocation51_spill] sm:$0xff] %v17115_v52  ;;  %v3994_v57 = vadd.f32 %v3993_v20, %v16744_v40  ;;  %v17120_v60 = vadd.f32 %v3664_v13, %v3296_v10  ;;  %v11458_v40 = vld [vmem:[%s21731_s30 + $0x740] sm:$0xf]  ;;  %v11087_v20 = vor.u32 %v13807_v30, %v11084_v51 }
 0x4d8   :  { %3045 = vmatmul.bf16.gmra.mxu2 %v11443_v4  ;;  %3374 = vmatmul.bf16.gmra.mxu3 %v11319_v38  ;;  %v11210_v4 = vld [vmem:[%s21731_s30 + $0x548] sm:$0xf]  ;;  %v13841_v38 = vld [vmem:[%s21731_s30 + $0x554] sm:$0xf0] }
 0x4d9   :  { %4032 = vmatmul.bf16.gmra.mxu0 %v11071_v28  ;;  %3703 = vmatmul.bf16.gmra.mxu1 %v11195_v31  ;;  %v4278_v49 = vpack.c.bf16 %v3994_v57, %v3994_v57  ;;  %v11459_v28 = vor.u32 %v13904_v36, %v11458_v40  ;;  %v21872_v57 = vld [vmem:[#allocation23_spill] sm:$0xff]  ;;  %v21873_v36 = vld [vmem:[#allocation24_spill] sm:$0xff] }
 0x4da   :  { %v3301_v13 = vadd.f32 %v16792_v17, %v21872_v57 }
 0x4db   :  { %v17122_v59 = vpop.f32.mrf.mxu2  ;;  %v17124_v37 = vpop.f32.mrf.mxu3  ;;  %v4534_v32 = vunpack.c.l.b16 %v4278_v49 }
 0x4de   :  { %v3995_v16 = vpop.f32.mrf.mxu0  ;;  %v3666_v62 = vpop.f32.mrf.mxu1 }
 0x4df   :  { %v3996_v46 = vadd.f32 %v3995_v16, %v16753_v53  ;;  %v17132_v3 = vadd.f32 %v3666_v62, %v3298_v45  ;;  %v11332_v53 = vld [vmem:[%s21731_s30 + $0x650] sm:$0xf0]  ;;  %v11211_v16 = vor.u32 %v13841_v38, %v11210_v4  ;;  %v13908_v4 = vld [vmem:[%s21731_s30 + $0x76c] sm:$0xf0]  ;;  %v13811_v38 = vld [vmem:[%s21731_s30 + $0x46c] sm:$0xf] }
 0x4e0   :  { %v11335_v10 = vor.u32 %v13870_v22, %v11332_v53  ;;  %v3303_v22 = vadd.f32 %v16819_v23, %v21873_v36  ;;  %v13874_v23 = vld [vmem:[%s21731_s30 + $0x664] sm:$0xf] }
 0x4e1   :  { %v4279_v54 = vpack.c.bf16 %v3996_v46, %v3996_v46 }
 0x4e3   :  { %v4535_v58 = vunpack.c.l.b16 %v4279_v54  ;;  %v17149_v25 = vpop.f32.mrf.mxu2  ;;  %v17151_v39 = vpop.f32.mrf.mxu3 }
 0x4e5   :  { %v17159_v31 = vpack.c.b16 %v4535_v58, %v4534_v32 }
 0x4e6   :  { %v3998_v45 = vpop.f32.mrf.mxu0  ;;  %v3669_v46 = vpop.f32.mrf.mxu1 }
 0x4e7   :  { %21871 = vst [vmem:[#allocation52_spill] sm:$0xff] %v17159_v31  ;;  %v3999_v49 = vadd.f32 %v3998_v45, %v16788_v35  ;;  %v17164_v62 = vadd.f32 %v3669_v46, %v3301_v13  ;;  %v11474_v35 = vld [vmem:[%s21731_s30 + $0x760] sm:$0xf]  ;;  %v11226_v45 = vld [vmem:[%s21731_s30 + $0x568] sm:$0xf] }
 0x4e8   :  { %3050 = vmatmul.bf16.gmra.mxu2 %v11459_v28  ;;  %3379 = vmatmul.bf16.gmra.mxu3 %v11335_v10  ;;  %v11100_v28 = vld [vmem:[%s21731_s30 + $0x478] sm:$0xf0] }
 0x4e9   :  { %4037 = vmatmul.bf16.gmra.mxu0 %v11087_v20  ;;  %3708 = vmatmul.bf16.gmra.mxu1 %v11211_v16  ;;  %v4280_v17 = vpack.c.bf16 %v3999_v49, %v3999_v49  ;;  %v13845_v16 = vld [vmem:[%s21731_s30 + $0x574] sm:$0xf0]  ;;  %v11475_v49 = vor.u32 %v13908_v4, %v11474_v35  ;;  %v11103_v36 = vor.u32 %v13811_v38, %v11100_v28 }
 0x4ea   :  { %v21878_v4 = vld [vmem:[#allocation26_spill] sm:$0xff] }
 0x4eb   :  { %v17166_v54 = vpop.f32.mrf.mxu2  ;;  %v17168_v40 = vpop.f32.mrf.mxu3  ;;  %v4536_v10 = vunpack.c.l.b16 %v4280_v17 }
 0x4ee   :  { %v4000_v53 = vpop.f32.mrf.mxu0  ;;  %v3671_v51 = vpop.f32.mrf.mxu1 }
 0x4ef   :  { %v4001_v30 = vadd.f32 %v4000_v53, %v16797_v6  ;;  %v17176_v32 = vadd.f32 %v3671_v51, %v3303_v22  ;;  %v11348_v6 = vld [vmem:[%s21731_s30 + $0x670] sm:$0xf0]  ;;  %v21876_v53 = vld [vmem:[#allocation38_spill] sm:$0xff]  ;;  %v11227_v51 = vor.u32 %v13845_v16, %v11226_v45  ;;  %v13815_v45 = vld [vmem:[%s21731_s30 + $0x48c] sm:$0xf] }
 0x4f0   :  { %v11351_v46 = vor.u32 %v13874_v23, %v11348_v6  ;;  %v3306_v17 = vadd.f32 %v16836_v34, %v21876_v53  ;;  %v3308_v23 = vadd.f32 %v16863_v33, %v21878_v4  ;;  %v13878_v33 = vld [vmem:[%s21731_s30 + $0x684] sm:$0xf]  ;;  %v11116_v16 = vld [vmem:[%s21731_s30 + $0x498] sm:$0xf0] }
 0x4f1   :  { %v4281_v58 = vpack.c.bf16 %v4001_v30, %v4001_v30  ;;  %v11119_v4 = vor.u32 %v13815_v45, %v11116_v16 }
 0x4f3   :  { %v4537_v20 = vunpack.c.l.b16 %v4281_v58  ;;  %v17193_v57 = vpop.f32.mrf.mxu2  ;;  %v17195_v13 = vpop.f32.mrf.mxu3 }
 0x4f4   :  { %21874 = vst [vmem:[#allocation23_spill] sm:$0xff] %v17193_v57 }
 0x4f5   :  { %v17203_v22 = vpack.c.b16 %v4537_v20, %v4536_v10  ;;  %v13912_v20 = vld [vmem:[%s21731_s30 + $0x78c] sm:$0xf0] }
 0x4f6   :  { %v4003_v30 = vpop.f32.mrf.mxu0  ;;  %v3674_v31 = vpop.f32.mrf.mxu1 }
 0x4f7   :  { %21875 = vst [vmem:[#allocation24_spill] sm:$0xff] %v17203_v22  ;;  %v4004_v58 = vadd.f32 %v4003_v30, %v16832_v1  ;;  %v17208_v52 = vadd.f32 %v3674_v31, %v3306_v17  ;;  %v11490_v1 = vld [vmem:[%s21731_s30 + $0x780] sm:$0xf]  ;;  %v11242_v17 = vld [vmem:[%s21731_s30 + $0x588] sm:$0xf] }
 0x4f8   :  { %3055 = vmatmul.bf16.gmra.mxu2 %v11475_v49  ;;  %3384 = vmatmul.bf16.gmra.mxu3 %v11351_v46  ;;  %v13849_v30 = vld [vmem:[%s21731_s30 + $0x594] sm:$0xf0] }
 0x4f9   :  { %4042 = vmatmul.bf16.gmra.mxu0 %v11103_v36  ;;  %3713 = vmatmul.bf16.gmra.mxu1 %v11227_v51  ;;  %v4282_v34 = vpack.c.bf16 %v4004_v58, %v4004_v58  ;;  %v11491_v51 = vor.u32 %v13912_v20, %v11490_v1  ;;  %v21883_v20 = vld [vmem:[#allocation19_spill] sm:$0xff] }
 0x4fb   :  { %v17210_v56 = vpop.f32.mrf.mxu2  ;;  %v17212_v35 = vpop.f32.mrf.mxu3  ;;  %v4538_v49 = vunpack.c.l.b16 %v4282_v34 }
 0x4fc   :  { %21877 = vst [vmem:[#allocation38_spill] sm:$0xff] %v17210_v56 }
 0x4fe   :  { %v4005_v6 = vpop.f32.mrf.mxu0  ;;  %v3676_v28 = vpop.f32.mrf.mxu1 }
 0x4ff   :  { %v4006_v38 = vadd.f32 %v4005_v6, %v16841_v63  ;;  %v17220_v31 = vadd.f32 %v3676_v28, %v3308_v23  ;;  %v11364_v63 = vld [vmem:[%s21731_s30 + $0x690] sm:$0xf0]  ;;  %v21881_v6 = vld [vmem:[#allocation39_spill] sm:$0xff]  ;;  %v11243_v28 = vor.u32 %v13849_v30, %v11242_v17  ;;  %v13819_v17 = vld [vmem:[%s21731_s30 + $0x4ac] sm:$0xf] }
 0x500   :  { %v11367_v58 = vor.u32 %v13878_v33, %v11364_v63  ;;  %v3311_v34 = vadd.f32 %v16880_v12, %v21881_v6  ;;  %v3313_v33 = vadd.f32 %v16907_v42, %v21883_v20  ;;  %v13882_v42 = vld [vmem:[%s21731_s30 + $0x6a4] sm:$0xf]  ;;  %v11132_v30 = vld [vmem:[%s21731_s30 + $0x4b8] sm:$0xf0] }
 0x501   :  { %v4283_v10 = vpack.c.bf16 %v4006_v38, %v4006_v38  ;;  %v11135_v20 = vor.u32 %v13819_v17, %v11132_v30 }
 0x503   :  { %v4539_v46 = vunpack.c.l.b16 %v4283_v10  ;;  %v17237_v36 = vpop.f32.mrf.mxu2  ;;  %v17239_v53 = vpop.f32.mrf.mxu3 }
 0x504   :  { %21879 = vst [vmem:[#allocation26_spill] sm:$0xff] %v17237_v36 }
 0x505   :  { %v17247_v23 = vpack.c.b16 %v4539_v46, %v4538_v49  ;;  %v13916_v46 = vld [vmem:[%s21731_s30 + $0x7ac] sm:$0xf0] }
 0x506   :  { %v4008_v38 = vpop.f32.mrf.mxu0  ;;  %v3679_v22 = vpop.f32.mrf.mxu1 }
 0x507   :  { %21880 = vst [vmem:[#allocation53_spill] sm:$0xff] %v17247_v23  ;;  %v4009_v10 = vadd.f32 %v4008_v38, %v16876_v26  ;;  %v17252_v36 = vadd.f32 %v3679_v22, %v3311_v34  ;;  %v11506_v26 = vld [vmem:[%s21731_s30 + $0x7a0] sm:$0xf]  ;;  %v11258_v34 = vld [vmem:[%s21731_s30 + $0x5a8] sm:$0xf] }
 0x508   :  { %3060 = vmatmul.bf16.gmra.mxu2 %v11491_v51  ;;  %3389 = vmatmul.bf16.gmra.mxu3 %v11367_v58  ;;  %v13853_v38 = vld [vmem:[%s21731_s30 + $0x5b4] sm:$0xf0] }
 0x509   :  { %4047 = vmatmul.bf16.gmra.mxu0 %v11119_v4  ;;  %3718 = vmatmul.bf16.gmra.mxu1 %v11243_v28  ;;  %v4284_v12 = vpack.c.bf16 %v4009_v10, %v4009_v10  ;;  %v11507_v28 = vor.u32 %v13916_v46, %v11506_v26  ;;  %v3318_v46 = vadd.f32 %v16963_v43, %v16591_v55  ;;  %v13886_v55 = vld [vmem:[%s21731_s30 + $0x6c4] sm:$0xf]  ;;  %v13823_v43 = vld [vmem:[%s21731_s30 + $0x4cc] sm:$0xf] }
 0x50b   :  { %v17254_v56 = vpop.f32.mrf.mxu2  ;;  %v17256_v1 = vpop.f32.mrf.mxu3  ;;  %v4540_v51 = vunpack.c.l.b16 %v4284_v12 }
 0x50c   :  { %21882 = vst [vmem:[#allocation39_spill] sm:$0xff] %v17254_v56 }
 0x50e   :  { %v4010_v63 = vpop.f32.mrf.mxu0  ;;  %v3681_v16 = vpop.f32.mrf.mxu1 }
 0x50f   :  { %v4011_v45 = vadd.f32 %v4010_v63, %v16885_v48  ;;  %v17264_v22 = vadd.f32 %v3681_v16, %v3313_v33  ;;  %v11380_v48 = vld [vmem:[%s21731_s30 + $0x6b0] sm:$0xf0]  ;;  %v21886_v63 = vld [vmem:[#allocation40_spill] sm:$0xff]  ;;  %v11259_v16 = vor.u32 %v13853_v38, %v11258_v34 }
 0x510   :  { %v11383_v10 = vor.u32 %v13882_v42, %v11380_v48  ;;  %v3316_v12 = vadd.f32 %v16924_v5, %v21886_v63  ;;  %v13857_v63 = vld [vmem:[%s21731_s30 + $0x5d4] sm:$0xf0] }
 0x511   :  { %v4285_v49 = vpack.c.bf16 %v4011_v45, %v4011_v45 }
 0x513   :  { %v4541_v58 = vunpack.c.l.b16 %v4285_v49  ;;  %v17281_v4 = vpop.f32.mrf.mxu2  ;;  %v17283_v6 = vpop.f32.mrf.mxu3 }
 0x514   :  { %21884 = vst [vmem:[#allocation19_spill] sm:$0xff] %v17281_v4 }
 0x515   :  { %v17291_v33 = vpack.c.b16 %v4541_v58, %v4540_v51  ;;  %v13920_v51 = vld [vmem:[%s21731_s30 + $0x7cc] sm:$0xf0]  ;;  %v11148_v58 = vld [vmem:[%s21731_s30 + $0x4d8] sm:$0xf0] }
 0x516   :  { %v4013_v45 = vpop.f32.mrf.mxu0  ;;  %v3684_v23 = vpop.f32.mrf.mxu1 }
 0x517   :  { %21885 = vst [vmem:[#allocation54_spill] sm:$0xff] %v17291_v33  ;;  %v4014_v49 = vadd.f32 %v4013_v45, %v16920_v19  ;;  %v17296_v4 = vadd.f32 %v3684_v23, %v3316_v12  ;;  %v11522_v19 = vld [vmem:[%s21731_s30 + $0x7c0] sm:$0xf] }
 0x518   :  { %3065 = vmatmul.bf16.gmra.mxu2 %v11507_v28  ;;  %3394 = vmatmul.bf16.gmra.mxu3 %v11383_v10  ;;  %v11523_v12 = vor.u32 %v13920_v51, %v11522_v19  ;;  %v12242_v51 = vld [vmem:[%s21645_s5 + $0x460] sm:$0xf] }
 0x519   :  { %4052 = vmatmul.bf16.gmra.mxu0 %v11135_v20  ;;  %3723 = vmatmul.bf16.gmra.mxu1 %v11259_v16  ;;  %v4286_v5 = vpack.c.bf16 %v4014_v49, %v4014_v49  ;;  %v11274_v20 = vld [vmem:[%s21731_s30 + $0x5c8] sm:$0xf]  ;;  %v11151_v16 = vor.u32 %v13823_v43, %v11148_v58 }
 0x51a   :  { %v21891_v43 = vld [vmem:[#allocation32_spill] sm:$0xff] }
 0x51b   :  { %v17298_v56 = vpop.f32.mrf.mxu2  ;;  %v17300_v26 = vpop.f32.mrf.mxu3  ;;  %v4542_v34 = vunpack.c.l.b16 %v4286_v5  ;;  %v11275_v5 = vor.u32 %v13857_v63, %v11274_v20  ;;  %v3323_v58 = vadd.f32 %v17007_v8, %v21891_v43  ;;  %v13890_v8 = vld [vmem:[%s21731_s30 + $0x6e4] sm:$0xf] }
 0x51c   :  { %21887 = vst [vmem:[#allocation40_spill] sm:$0xff] %v17298_v56 }
 0x51e   :  { %v4015_v42 = vpop.f32.mrf.mxu0  ;;  %v3686_v17 = vpop.f32.mrf.mxu1 }
 0x51f   :  { %v4016_v48 = vadd.f32 %v4015_v42, %v16941_v21  ;;  %v17308_v23 = vadd.f32 %v3686_v17, %v3318_v46  ;;  %v11396_v21 = vld [vmem:[%s21731_s30 + $0x6d0] sm:$0xf0]  ;;  %v3321_v46 = vadd.f32 %v16980_v44, %v16602_v50  ;;  %v14099_v50 = vld [vmem:[%s21645_s5 + $0x464] sm:$0xf0] }
 0x520   :  { %v11399_v45 = vor.u32 %v13886_v55, %v11396_v21  ;;  %v12243_v44 = vor.u32 %v14099_v50, %v12242_v51  ;;  %v11732_v55 = vld [vmem:[%s21645_s5 + $0x68] sm:$0xf0] }
 0x521   :  { %v4287_v30 = vpack.c.bf16 %v4016_v48, %v4016_v48 }
 0x522   :  { %6067 = vmatpush.bf16.msra.mxu1 %v12243_v44  ;;  %v13861_v44 = vld [vmem:[%s21731_s30 + $0x5f4] sm:$0xf0] }
 0x523   :  { %v4543_v38 = vunpack.c.l.b16 %v4287_v30  ;;  %v17325_v28 = vpop.f32.mrf.mxu2  ;;  %v17327_v10 = vpop.f32.mrf.mxu3 }
 0x524   :  { %21888 = vst [vmem:[#allocation55_spill] sm:$0xff] %v17325_v28 }
 0x525   :  { %v17335_v49 = vpack.c.b16 %v4543_v38, %v4542_v34 }
 0x526   :  { %v4018_v42 = vpop.f32.mrf.mxu0  ;;  %v3689_v17 = vpop.f32.mrf.mxu1 }
 0x527   :  { %21889 = vst [vmem:[#allocation56_spill] sm:$0xff] %v17335_v49  ;;  %v4019_v48 = vadd.f32 %v4018_v42, %v16976_v14  ;;  %v17340_v30 = vadd.f32 %v3689_v17, %v3321_v46  ;;  %v13970_v14 = vld [vmem:[%s21645_s5 + $0x64] sm:$0xf]  ;;  %v13924_v46 = vld [vmem:[%s21731_s30 + $0x7ec] sm:$0xf0] }
 0x528   :  { %3070 = vmatmul.bf16.gmra.mxu2 %v11523_v12  ;;  %3399 = vmatmul.bf16.gmra.mxu3 %v11399_v45  ;;  %v11735_v21 = vor.u32 %v13970_v14, %v11732_v55  ;;  %v11538_v12 = vld [vmem:[%s21731_s30 + $0x7e0] sm:$0xf]  ;;  %v13827_v42 = vld [vmem:[%s21731_s30 + $0x4ec] sm:$0xf]  ;;  %v11290_v14 = vld [vmem:[%s21731_s30 + $0x5e8] sm:$0xf] }
 0x529   :  { %4057 = vmatmul.bf16.gmra.mxu0 %v11151_v16  ;;  %3728 = vmatmul.bf16.gmra.mxu1 %v11275_v5  ;;  %v4288_v38 = vpack.c.bf16 %v4019_v48, %v4019_v48  ;;  %v11164_v5 = vld [vmem:[%s21731_s30 + $0x4f8] sm:$0xf0]  ;;  %v11539_v55 = vor.u32 %v13924_v46, %v11538_v12 }
 0x52a   :  { %6116 = vmatpush.bf16.msra.mxu0 %v11735_v21  ;;  %v11167_v43 = vor.u32 %v13827_v42, %v11164_v5  ;;  %v21896_v46 = vld [vmem:[#allocation6_spill] sm:$0xff] }
 0x52b   :  { %v17342_v33 = vpop.f32.mrf.mxu2  ;;  %v17344_v19 = vpop.f32.mrf.mxu3  ;;  %v4544_v48 = vunpack.c.l.b16 %v4288_v38 }
 0x52c   :  { %21890 = vst [vmem:[#allocation57_spill] sm:$0xff] %v17342_v33 }
 0x52e   :  { %v4020_v34 = vpop.f32.mrf.mxu0  ;;  %v3691_v63 = vpop.f32.mrf.mxu1 }
 0x52f   :  { %v4021_v20 = vadd.f32 %v4020_v34, %v16985_v15  ;;  %v17364_v45 = vadd.f32 %v3691_v63, %v3323_v58  ;;  %v11412_v15 = vld [vmem:[%s21731_s30 + $0x6f0] sm:$0xf0]  ;;  %v11291_v63 = vor.u32 %v13861_v44, %v11290_v14  ;;  %v13831_v14 = vld [vmem:[%s21731_s30 + $0x50c] sm:$0xf]  ;;  %v11180_v44 = vld [vmem:[%s21731_s30 + $0x518] sm:$0xf0] }
 0x530   :  { %v11415_v21 = vor.u32 %v13890_v8, %v11412_v15  ;;  %v21894_v34 = vld [vmem:[#allocation5_spill] sm:$0xff]  ;;  %v3328_v8 = vadd.f32 %v17057_v29, %v21896_v46  ;;  %v13894_v29 = vld [vmem:[%s21731_s30 + $0x704] sm:$0xf]  ;;  %v11183_v46 = vor.u32 %v13831_v14, %v11180_v44 }
 0x531   :  { %v4289_v16 = vpack.c.bf16 %v4021_v20, %v4021_v20  ;;  %v3326_v38 = vadd.f32 %v17024_v27, %v21894_v34 }
 0x533   :  { %v4545_v17 = vunpack.c.l.b16 %v4289_v16  ;;  %v17381_v51 = vpop.f32.mrf.mxu2  ;;  %v17383_v50 = vpop.f32.mrf.mxu3 }
 0x534   :  { %21892 = vst [vmem:[#allocation32_spill] sm:$0xff] %v17381_v51 }
 0x535   :  { %v17391_v58 = vpack.c.b16 %v4545_v17, %v4544_v48  ;;  %v13928_v17 = vld [vmem:[%s21731_s30 + $0x80c] sm:$0xf0] }
 0x536   :  { %v4023_v20 = vpop.f32.mrf.mxu0  ;;  %v3694_v49 = vpop.f32.mrf.mxu1 }
 0x537   :  { %21893 = vst [vmem:[#allocation58_spill] sm:$0xff] %v17391_v58  ;;  %v4024_v16 = vadd.f32 %v4023_v20, %v17020_v47  ;;  %v17396_v51 = vadd.f32 %v3694_v49, %v3326_v38  ;;  %v11554_v47 = vld [vmem:[%s21731_s30 + $0x800] sm:$0xf]  ;;  %v11306_v38 = vld [vmem:[%s21731_s30 + $0x608] sm:$0xf] }
 0x538   :  { %3075 = vmatmul.bf16.gmra.mxu2 %v11539_v55  ;;  %3404 = vmatmul.bf16.gmra.mxu3 %v11415_v21  ;;  %v13865_v20 = vld [vmem:[%s21731_s30 + $0x614] sm:$0xf0] }
 0x539   :  { %4062 = vmatmul.bf16.gmra.mxu0 %v11167_v43  ;;  %3733 = vmatmul.bf16.gmra.mxu1 %v11291_v63  ;;  %v4290_v27 = vpack.c.bf16 %v4024_v16, %v4024_v16  ;;  %v11555_v63 = vor.u32 %v13928_v17, %v11554_v47  ;;  %v21901_v17 = vld [vmem:[#allocation9_spill] sm:$0xff] }
 0x53b   :  { %v17398_v33 = vpop.f32.mrf.mxu2  ;;  %v17400_v12 = vpop.f32.mrf.mxu3  ;;  %v4546_v55 = vunpack.c.l.b16 %v4290_v27 }
 0x53c   :  { %21895 = vst [vmem:[#allocation5_spill] sm:$0xff] %v17398_v33 }
 0x53e   :  { %v4025_v15 = vpop.f32.mrf.mxu0  ;;  %v3696_v5 = vpop.f32.mrf.mxu1 }
 0x53f   :  { %v4026_v42 = vadd.f32 %v4025_v15, %v17035_v0  ;;  %v17408_v49 = vadd.f32 %v3696_v5, %v3328_v8  ;;  %v11428_v0 = vld [vmem:[%s21731_s30 + $0x710] sm:$0xf0]  ;;  %v21899_v15 = vld [vmem:[#allocation8_spill] sm:$0xff]  ;;  %v11307_v5 = vor.u32 %v13865_v20, %v11306_v38  ;;  %v11196_v20 = vld [vmem:[%s21731_s30 + $0x538] sm:$0xf0] }
 0x540   :  { %v11431_v16 = vor.u32 %v13894_v29, %v11428_v0  ;;  %v3331_v27 = vadd.f32 %v17080_v41, %v21899_v15  ;;  %v3333_v29 = vadd.f32 %v17107_v9, %v21901_v17  ;;  %v13898_v9 = vld [vmem:[%s21731_s30 + $0x724] sm:$0xf]  ;;  %v13835_v38 = vld [vmem:[%s21731_s30 + $0x52c] sm:$0xf]  ;;  %v11770_v17 = vld [vmem:[%s21645_s5 + $0xb0] sm:$0xf] }
 0x541   :  { %v4291_v48 = vpack.c.bf16 %v4026_v42, %v4026_v42 }
 0x543   :  { %v4547_v21 = vunpack.c.l.b16 %v4291_v48  ;;  %v17425_v43 = vpop.f32.mrf.mxu2  ;;  %v17427_v34 = vpop.f32.mrf.mxu3 }
 0x544   :  { %21897 = vst [vmem:[#allocation6_spill] sm:$0xff] %v17425_v43 }
 0x545   :  { %v17435_v8 = vpack.c.b16 %v4547_v21, %v4546_v55 }
 0x546   :  { %v4028_v42 = vpop.f32.mrf.mxu0  ;;  %v3699_v58 = vpop.f32.mrf.mxu1 }
 0x547   :  { %21898 = vst [vmem:[#allocation59_spill] sm:$0xff] %v17435_v8  ;;  %v4029_v48 = vadd.f32 %v4028_v42, %v17076_v7  ;;  %v17440_v43 = vadd.f32 %v3699_v58, %v3331_v27  ;;  %v11570_v7 = vld [vmem:[%s21731_s30 + $0x820] sm:$0xf]  ;;  %v13932_v58 = vld [vmem:[%s21731_s30 + $0x82c] sm:$0xf0] }
 0x548   :  { %3080 = vmatmul.bf16.gmra.mxu2 %v11555_v63  ;;  %3409 = vmatmul.bf16.gmra.mxu3 %v11431_v16  ;;  %v11322_v63 = vld [vmem:[%s21731_s30 + $0x628] sm:$0xf]  ;;  %v13869_v16 = vld [vmem:[%s21731_s30 + $0x634] sm:$0xf0] }
 0x549   :  { %4067 = vmatmul.bf16.gmra.mxu0 %v11183_v46  ;;  %3738 = vmatmul.bf16.gmra.mxu1 %v11307_v5  ;;  %v4292_v41 = vpack.c.bf16 %v4029_v48, %v4029_v48  ;;  %v11706_v5 = vld [vmem:[%s21645_s5 + $0x30] sm:$0xf]  ;;  %v13965_v48 = vld [vmem:[%s21645_s5 + $0x34] sm:$0xf0]  ;;  %v11323_v56 = vor.u32 %v13869_v16, %v11322_v63  ;;  %v11212_v16 = vld [vmem:[%s21731_s30 + $0x558] sm:$0xf0] }
 0x54b   :  { %v17442_v33 = vpop.f32.mrf.mxu2  ;;  %v17444_v47 = vpop.f32.mrf.mxu3  ;;  %v4580_v46 = vunpack.c.l.b16 %v4292_v41  ;;  %v11707_v41 = vor.u32 %v13965_v48, %v11706_v5 }
 0x54c   :  { %21900 = vst [vmem:[#allocation8_spill] sm:$0xff] %v17442_v33 }
 0x54d   :  { %5678 = vmatpush.bf16.msrb.mxu2 %v11707_v41 }
 0x54e   :  { %v4030_v0 = vpop.f32.mrf.mxu0  ;;  %v3701_v44 = vpop.f32.mrf.mxu1 }
 0x54f   :  { %v4031_v14 = vadd.f32 %v4030_v0, %v17088_v18  ;;  %v17455_v55 = vadd.f32 %v3701_v44, %v3333_v29  ;;  %v11444_v18 = vld [vmem:[%s21731_s30 + $0x730] sm:$0xf0]  ;;  %v11571_v29 = vor.u32 %v13932_v58, %v11570_v7 }
 0x550   :  { %v11447_v0 = vor.u32 %v13898_v9, %v11444_v18 }
 0x551   :  { %v4293_v21 = vpack.c.bf16 %v4031_v14, %v4031_v14  ;;  %v13981_v14 = vld [vmem:[%s21645_s5 + $0xb4] sm:$0xf0] }
 0x552   :  { %v11771_v8 = vor.u32 %v13981_v14, %v11770_v17  ;;  %v11338_v17 = vld [vmem:[%s21731_s30 + $0x648] sm:$0xf] }
 0x553   :  { %v4581_v15 = vunpack.c.l.b16 %v4293_v21  ;;  %v17475_v27 = vpop.f32.mrf.mxu2  ;;  %v17477_v42 = vpop.f32.mrf.mxu3  ;;  %v11199_v21 = vor.u32 %v13835_v38, %v11196_v20  ;;  %v21905_v38 = vld [vmem:[#allocation12_spill] sm:$0xff] }
 0x554   :  { %21902 = vst [vmem:[#allocation9_spill] sm:$0xff] %v17475_v27  ;;  %v21904_v27 = vld [vmem:[#allocation41_spill] sm:$0xff]  ;;  %5727 = vmatpush.bf16.msrb.mxu3 %v11771_v8 }
 0x555   :  { %v17491_v44 = vpack.c.b16 %v4581_v15, %v4580_v46  ;;  %v3336_v33 = vadd.f32 %v17124_v37, %v21904_v27  ;;  %v3338_v37 = vadd.f32 %v17151_v39, %v21905_v38  ;;  %v13902_v39 = vld [vmem:[%s21731_s30 + $0x744] sm:$0xf] }
 0x556   :  { %v4033_v28 = vpop.f32.mrf.mxu0  ;;  %v3704_v7 = vpop.f32.mrf.mxu1 }
 0x557   :  { %21903 = vst [vmem:[#allocation60_spill] sm:$0xff] %v17491_v44  ;;  %v4034_v57 = vadd.f32 %v4033_v28, %v17120_v60  ;;  %v17496_v58 = vadd.f32 %v3704_v7, %v3336_v33  ;;  %v11586_v28 = vld [vmem:[%s21731_s30 + $0x840] sm:$0xf] }
 0x558   :  { %3085 = vmatmul.bf16.gmra.mxu2 %v11571_v29  ;;  %3414 = vmatmul.bf16.gmra.mxu3 %v11447_v0  ;;  %v13873_v29 = vld [vmem:[%s21731_s30 + $0x654] sm:$0xf0] }
 0x559   :  { %4072 = vmatmul.bf16.gmra.mxu0 %v11199_v21  ;;  %3743 = vmatmul.bf16.gmra.mxu1 %v11323_v56  ;;  %v4294_v46 = vpack.c.bf16 %v4034_v57, %v4034_v57  ;;  %v13936_v56 = vld [vmem:[%s21731_s30 + $0x84c] sm:$0xf0]  ;;  %v13839_v57 = vld [vmem:[%s21731_s30 + $0x54c] sm:$0xf]  ;;  %v21907_v7 = vld [vmem:[#allocation42_spill] sm:$0xff] }
 0x55a   :  { %v11587_v0 = vor.u32 %v13936_v56, %v11586_v28  ;;  %v11215_v14 = vor.u32 %v13839_v57, %v11212_v16  ;;  %v3341_v38 = vadd.f32 %v17168_v40, %v21907_v7  ;;  %v21908_v56 = vld [vmem:[#allocation14_spill] sm:$0xff] }
 0x55b   :  { %v17498_v9 = vpop.f32.mrf.mxu2  ;;  %v17500_v18 = vpop.f32.mrf.mxu3  ;;  %v4582_v15 = vunpack.c.l.b16 %v4294_v46 }
 0x55e   :  { %v4035_v20 = vpop.f32.mrf.mxu0  ;;  %v3706_v60 = vpop.f32.mrf.mxu1 }
 0x55f   :  { %v4036_v63 = vadd.f32 %v4035_v20, %v17132_v3  ;;  %v17508_v33 = vadd.f32 %v3706_v60, %v3338_v37  ;;  %v11460_v3 = vld [vmem:[%s21731_s30 + $0x750] sm:$0xf0]  ;;  %v11339_v20 = vor.u32 %v13873_v29, %v11338_v17  ;;  %v13940_v17 = vld [vmem:[%s21731_s30 + $0x86c] sm:$0xf0]  ;;  %v13843_v29 = vld [vmem:[%s21731_s30 + $0x56c] sm:$0xf] }
 0x560   :  { %v11463_v41 = vor.u32 %v13902_v39, %v11460_v3  ;;  %v3343_v39 = vadd.f32 %v17195_v13, %v21908_v56  ;;  %v13906_v13 = vld [vmem:[%s21731_s30 + $0x764] sm:$0xf] }
 0x561   :  { %v4295_v8 = vpack.c.bf16 %v4036_v63, %v4036_v63 }
 0x563   :  { %v4583_v27 = vunpack.c.l.b16 %v4295_v8  ;;  %v17525_v5 = vpop.f32.mrf.mxu2  ;;  %v17527_v48 = vpop.f32.mrf.mxu3 }
 0x565   :  { %v17535_v21 = vpack.c.b16 %v4583_v27, %v4582_v15 }
 0x566   :  { %v4038_v37 = vpop.f32.mrf.mxu0  ;;  %v3709_v63 = vpop.f32.mrf.mxu1 }
 0x567   :  { %21906 = vst [vmem:[#allocation41_spill] sm:$0xff] %v17535_v21  ;;  %v4039_v46 = vadd.f32 %v4038_v37, %v17164_v62  ;;  %v17540_v60 = vadd.f32 %v3709_v63, %v3341_v38  ;;  %v11602_v62 = vld [vmem:[%s21731_s30 + $0x860] sm:$0xf]  ;;  %v11354_v37 = vld [vmem:[%s21731_s30 + $0x668] sm:$0xf] }
 0x568   :  { %3090 = vmatmul.bf16.gmra.mxu2 %v11587_v0  ;;  %3419 = vmatmul.bf16.gmra.mxu3 %v11463_v41  ;;  %v11228_v0 = vld [vmem:[%s21731_s30 + $0x578] sm:$0xf0] }
 0x569   :  { %4077 = vmatmul.bf16.gmra.mxu0 %v11215_v14  ;;  %3748 = vmatmul.bf16.gmra.mxu1 %v11339_v20  ;;  %v4296_v40 = vpack.c.bf16 %v4039_v46, %v4039_v46  ;;  %v13877_v20 = vld [vmem:[%s21731_s30 + $0x674] sm:$0xf0]  ;;  %v11603_v46 = vor.u32 %v13940_v17, %v11602_v62  ;;  %v11231_v56 = vor.u32 %v13843_v29, %v11228_v0  ;;  %v21913_v17 = vld [vmem:[#allocation16_spill] sm:$0xff] }
 0x56b   :  { %v17542_v8 = vpop.f32.mrf.mxu2  ;;  %v17544_v28 = vpop.f32.mrf.mxu3  ;;  %v4584_v41 = vunpack.c.l.b16 %v4296_v40 }
 0x56e   :  { %v4040_v3 = vpop.f32.mrf.mxu0  ;;  %v3711_v16 = vpop.f32.mrf.mxu1 }
 0x56f   :  { %v4041_v57 = vadd.f32 %v4040_v3, %v17176_v32  ;;  %v17552_v15 = vadd.f32 %v3711_v16, %v3343_v39  ;;  %v11476_v32 = vld [vmem:[%s21731_s30 + $0x770] sm:$0xf0]  ;;  %v21911_v3 = vld [vmem:[#allocation43_spill] sm:$0xff]  ;;  %v11355_v16 = vor.u32 %v13877_v20, %v11354_v37  ;;  %v13847_v37 = vld [vmem:[%s21731_s30 + $0x58c] sm:$0xf] }
 0x570   :  { %v11479_v63 = vor.u32 %v13906_v13, %v11476_v32  ;;  %v3346_v40 = vadd.f32 %v17212_v35, %v21911_v3  ;;  %v3348_v13 = vadd.f32 %v17239_v53, %v21913_v17  ;;  %v13910_v53 = vld [vmem:[%s21731_s30 + $0x784] sm:$0xf]  ;;  %v11244_v20 = vld [vmem:[%s21731_s30 + $0x598] sm:$0xf0] }
 0x571   :  { %v4297_v27 = vpack.c.bf16 %v4041_v57, %v4041_v57  ;;  %v11247_v17 = vor.u32 %v13847_v37, %v11244_v20 }
 0x573   :  { %v4585_v14 = vunpack.c.l.b16 %v4297_v27  ;;  %v17569_v7 = vpop.f32.mrf.mxu2  ;;  %v17571_v38 = vpop.f32.mrf.mxu3 }
 0x574   :  { %21909 = vst [vmem:[#allocation12_spill] sm:$0xff] %v17569_v7 }
 0x575   :  { %v17579_v39 = vpack.c.b16 %v4585_v14, %v4584_v41  ;;  %v13944_v14 = vld [vmem:[%s21731_s30 + $0x88c] sm:$0xf0] }
 0x576   :  { %v4043_v57 = vpop.f32.mrf.mxu0  ;;  %v3714_v21 = vpop.f32.mrf.mxu1 }
 0x577   :  { %21910 = vst [vmem:[#allocation42_spill] sm:$0xff] %v17579_v39  ;;  %v4044_v27 = vadd.f32 %v4043_v57, %v17208_v52  ;;  %v17584_v44 = vadd.f32 %v3714_v21, %v3346_v40  ;;  %v11618_v52 = vld [vmem:[%s21731_s30 + $0x880] sm:$0xf]  ;;  %v11370_v40 = vld [vmem:[%s21731_s30 + $0x688] sm:$0xf] }
 0x578   :  { %3095 = vmatmul.bf16.gmra.mxu2 %v11603_v46  ;;  %3424 = vmatmul.bf16.gmra.mxu3 %v11479_v63  ;;  %v13881_v57 = vld [vmem:[%s21731_s30 + $0x694] sm:$0xf0] }
 0x579   :  { %4082 = vmatmul.bf16.gmra.mxu0 %v11231_v56  ;;  %3753 = vmatmul.bf16.gmra.mxu1 %v11355_v16  ;;  %v4298_v35 = vpack.c.bf16 %v4044_v27, %v4044_v27  ;;  %v11619_v16 = vor.u32 %v13944_v14, %v11618_v52  ;;  %v21917_v14 = vld [vmem:[#allocation18_spill] sm:$0xff] }
 0x57b   :  { %v17586_v7 = vpop.f32.mrf.mxu2  ;;  %v17588_v62 = vpop.f32.mrf.mxu3  ;;  %v4586_v46 = vunpack.c.l.b16 %v4298_v35 }
 0x57c   :  { %21912 = vst [vmem:[#allocation14_spill] sm:$0xff] %v17586_v7 }
 0x57e   :  { %v4045_v32 = vpop.f32.mrf.mxu0  ;;  %v3716_v0 = vpop.f32.mrf.mxu1 }
 0x57f   :  { %v4046_v29 = vadd.f32 %v4045_v32, %v17220_v31  ;;  %v17596_v21 = vadd.f32 %v3716_v0, %v3348_v13  ;;  %v11492_v31 = vld [vmem:[%s21731_s30 + $0x790] sm:$0xf0]  ;;  %v21916_v32 = vld [vmem:[#allocation44_spill] sm:$0xff]  ;;  %v11371_v0 = vor.u32 %v13881_v57, %v11370_v40  ;;  %v11260_v57 = vld [vmem:[%s21731_s30 + $0x5b8] sm:$0xf0] }
 0x580   :  { %v11495_v27 = vor.u32 %v13910_v53, %v11492_v31  ;;  %v3351_v35 = vadd.f32 %v17256_v1, %v21916_v32  ;;  %v3353_v53 = vadd.f32 %v17283_v6, %v21917_v14  ;;  %v13914_v6 = vld [vmem:[%s21731_s30 + $0x7a4] sm:$0xf]  ;;  %v13851_v40 = vld [vmem:[%s21731_s30 + $0x5ac] sm:$0xf] }
 0x581   :  { %v4299_v41 = vpack.c.bf16 %v4046_v29, %v4046_v29  ;;  %v11263_v14 = vor.u32 %v13851_v40, %v11260_v57 }
 0x583   :  { %v4587_v63 = vunpack.c.l.b16 %v4299_v41  ;;  %v17613_v56 = vpop.f32.mrf.mxu2  ;;  %v17615_v3 = vpop.f32.mrf.mxu3 }
 0x584   :  { %21914 = vst [vmem:[#allocation43_spill] sm:$0xff] %v17613_v56 }
 0x585   :  { %v17623_v13 = vpack.c.b16 %v4587_v63, %v4586_v46  ;;  %v13948_v63 = vld [vmem:[%s21731_s30 + $0x8ac] sm:$0xf0] }
 0x586   :  { %v4048_v29 = vpop.f32.mrf.mxu0  ;;  %v3719_v39 = vpop.f32.mrf.mxu1 }
 0x587   :  { %21915 = vst [vmem:[#allocation16_spill] sm:$0xff] %v17623_v13  ;;  %v4049_v41 = vadd.f32 %v4048_v29, %v17252_v36  ;;  %v17628_v56 = vadd.f32 %v3719_v39, %v3351_v35  ;;  %v11634_v36 = vld [vmem:[%s21731_s30 + $0x8a0] sm:$0xf]  ;;  %v11386_v35 = vld [vmem:[%s21731_s30 + $0x6a8] sm:$0xf] }
 0x588   :  { %3100 = vmatmul.bf16.gmra.mxu2 %v11619_v16  ;;  %3429 = vmatmul.bf16.gmra.mxu3 %v11495_v27  ;;  %v13885_v29 = vld [vmem:[%s21731_s30 + $0x6b4] sm:$0xf0] }
 0x589   :  { %4087 = vmatmul.bf16.gmra.mxu0 %v11247_v17  ;;  %3758 = vmatmul.bf16.gmra.mxu1 %v11371_v0  ;;  %v4300_v1 = vpack.c.bf16 %v4049_v41, %v4049_v41  ;;  %v11635_v0 = vor.u32 %v13948_v63, %v11634_v36  ;;  %v11698_v63 = vld [vmem:[%s21645_s5 + $0x20] sm:$0xf] }
 0x58b   :  { %v17630_v7 = vpop.f32.mrf.mxu2  ;;  %v17632_v52 = vpop.f32.mrf.mxu3  ;;  %v4588_v16 = vunpack.c.l.b16 %v4300_v1 }
 0x58e   :  { %v4050_v31 = vpop.f32.mrf.mxu0  ;;  %v3721_v20 = vpop.f32.mrf.mxu1 }
 0x58f   :  { %v4051_v37 = vadd.f32 %v4050_v31, %v17264_v22  ;;  %v17640_v39 = vadd.f32 %v3721_v20, %v3353_v53  ;;  %v11508_v22 = vld [vmem:[%s21731_s30 + $0x7b0] sm:$0xf0]  ;;  %v3356_v31 = vadd.f32 %v17300_v26, %v16922_v61  ;;  %v13963_v61 = vld [vmem:[%s21645_s5 + $0x24] sm:$0xf0] }
 0x590   :  { %v11511_v41 = vor.u32 %v13914_v6, %v11508_v22  ;;  %v21920_v26 = vld [vmem:[#allocation33_spill] sm:$0xff] }
 0x591   :  { %v4301_v46 = vpack.c.bf16 %v4051_v37, %v4051_v37  ;;  %v11387_v37 = vor.u32 %v13885_v29, %v11386_v35  ;;  %v3358_v6 = vadd.f32 %v17327_v10, %v21920_v26  ;;  %v11690_v35 = vld [vmem:[%s21645_s5 + $0x10] sm:$0xf]  ;;  %v13961_v29 = vld [vmem:[%s21645_s5 + $0x14] sm:$0xf0] }
 0x592   :  { %v13889_v26 = vld [vmem:[%s21731_s30 + $0x6d4] sm:$0xf0] }
 0x593   :  { %v4589_v27 = vunpack.c.l.b16 %v4301_v46  ;;  %v17657_v17 = vpop.f32.mrf.mxu2  ;;  %v17659_v32 = vpop.f32.mrf.mxu3 }
 0x594   :  { %21918 = vst [vmem:[#allocation44_spill] sm:$0xff] %v17657_v17 }
 0x595   :  { %v17667_v53 = vpack.c.b16 %v4589_v27, %v4588_v16  ;;  %v11650_v27 = vld [vmem:[%s21731_s30 + $0x8c0] sm:$0xf] }
 0x596   :  { %v4053_v1 = vpop.f32.mrf.mxu0  ;;  %v3724_v46 = vpop.f32.mrf.mxu1 }
 0x597   :  { %21919 = vst [vmem:[#allocation18_spill] sm:$0xff] %v17667_v53  ;;  %v4054_v20 = vadd.f32 %v4053_v1, %v17296_v4  ;;  %v17672_v17 = vadd.f32 %v3724_v46, %v3356_v31  ;;  %v11699_v4 = vor.u32 %v13963_v61, %v11698_v63  ;;  %v11691_v31 = vor.u32 %v13961_v29, %v11690_v35  ;;  %v13855_v1 = vld [vmem:[%s21731_s30 + $0x5cc] sm:$0xf] }
 0x598   :  { %3105 = vmatmul.bf16.gmra.mxu2 %v11635_v0  ;;  %3434 = vmatmul.bf16.gmra.mxu3 %v11511_v41  ;;  %v13918_v41 = vld [vmem:[%s21731_s30 + $0x7c4] sm:$0xf] }
 0x599   :  { %4092 = vmatmul.bf16.gmra.mxu0 %v11263_v14  ;;  %3763 = vmatmul.bf16.gmra.mxu1 %v11387_v37  ;;  %v4302_v40 = vpack.c.bf16 %v4054_v20, %v4054_v20  ;;  %v11524_v14 = vld [vmem:[%s21731_s30 + $0x7d0] sm:$0xf0]  ;;  %v11276_v37 = vld [vmem:[%s21731_s30 + $0x5d8] sm:$0xf0] }
 0x59a   :  { %5679 = vmatpush.bf16.msrb.mxu2 %v11699_v4  ;;  %v11402_v4 = vld [vmem:[%s21731_s30 + $0x6c8] sm:$0xf] }
 0x59b   :  { %v17674_v13 = vpop.f32.mrf.mxu2  ;;  %v17676_v36 = vpop.f32.mrf.mxu3  ;;  %v4590_v20 = vunpack.c.l.b16 %v4302_v40  ;;  %v11682_v40 = vld [vmem:[%s21645_s5] sm:$0xf] }
 0x59e   :  { %v4055_v22 = vpop.f32.mrf.mxu0  ;;  %v3726_v16 = vpop.f32.mrf.mxu1  ;;  %5680 = vmatpush.bf16.msrb.mxu2 %v11691_v31 }
 0x59f   :  { %v4056_v57 = vadd.f32 %v4055_v22, %v17308_v23  ;;  %v17696_v0 = vadd.f32 %v3726_v16, %v3358_v6  ;;  %v13952_v23 = vld [vmem:[%s21731_s30 + $0x8cc] sm:$0xf0]  ;;  %v11527_v22 = vor.u32 %v13918_v41, %v11524_v14  ;;  %v11279_v16 = vor.u32 %v13855_v1, %v11276_v37  ;;  %v21924_v37 = vld [vmem:[#allocation46_spill] sm:$0xff] }
 0x5a0   :  { %v11651_v6 = vor.u32 %v13952_v23, %v11650_v27 }
 0x5a1   :  { %v4303_v10 = vpack.c.bf16 %v4056_v57, %v4056_v57  ;;  %v13959_v57 = vld [vmem:[%s21645_s5 + $0x4] sm:$0xf0] }
 0x5a2   :  { %v11683_v35 = vor.u32 %v13959_v57, %v11682_v40  ;;  %v11292_v40 = vld [vmem:[%s21731_s30 + $0x5f8] sm:$0xf0] }
 0x5a3   :  { %v4591_v46 = vunpack.c.l.b16 %v4303_v10  ;;  %v17713_v63 = vpop.f32.mrf.mxu2  ;;  %v17715_v61 = vpop.f32.mrf.mxu3  ;;  %v3361_v10 = vadd.f32 %v17344_v19, %v16978_v2 }
 0x5a4   :  { %21921 = vst [vmem:[#allocation33_spill] sm:$0xff] %v17713_v63  ;;  %v11403_v63 = vor.u32 %v13889_v26, %v11402_v4  ;;  %5681 = vmatpush.bf16.msrb.mxu2 %v11683_v35  ;;  %v11666_v4 = vld [vmem:[%s21731_s30 + $0x8e0] sm:$0xf] }
 0x5a5   :  { %v17729_v29 = vpack.c.b16 %v4591_v46, %v4590_v20  ;;  %v3363_v20 = vadd.f32 %v17383_v50, %v21924_v37  ;;  %v13922_v50 = vld [vmem:[%s21731_s30 + $0x7e4] sm:$0xf] }
 0x5a6   :  { %v4058_v31 = vpop.f32.mrf.mxu0  ;;  %v3729_v23 = vpop.f32.mrf.mxu1 }
 0x5a7   :  { %21922 = vst [vmem:[#allocation61_spill] sm:$0xff] %v17729_v29  ;;  %v4059_v27 = vadd.f32 %v4058_v31, %v17340_v30  ;;  %v17734_v41 = vadd.f32 %v3729_v23, %v3361_v10  ;;  %v11418_v31 = vld [vmem:[%s21731_s30 + $0x6e8] sm:$0xf] }
 0x5a8   :  { %3110 = vmatmul.bf16.gmra.mxu2 %v11651_v6  ;;  %3439 = vmatmul.bf16.gmra.mxu3 %v11527_v22  ;;  %v13859_v22 = vld [vmem:[%s21731_s30 + $0x5ec] sm:$0xf] }
 0x5a9   :  { %4097 = vmatmul.bf16.gmra.mxu0 %v11279_v16  ;;  %3768 = vmatmul.bf16.gmra.mxu1 %v11403_v63  ;;  %v4304_v19 = vpack.c.bf16 %v4059_v27, %v4059_v27  ;;  %v13956_v63 = vld [vmem:[%s21731_s30 + $0x8ec] sm:$0xf0]  ;;  %v13893_v27 = vld [vmem:[%s21731_s30 + $0x6f4] sm:$0xf0] }
 0x5aa   :  { %v11667_v23 = vor.u32 %v13956_v63, %v11666_v4  ;;  %v12234_v63 = vld [vmem:[%s21645_s5 + $0x450] sm:$0xf] }
 0x5ab   :  { %v17736_v14 = vpop.f32.mrf.mxu2  ;;  %v17738_v1 = vpop.f32.mrf.mxu3  ;;  %v4592_v57 = vunpack.c.l.b16 %v4304_v19 }
 0x5ac   :  { %21923 = vst [vmem:[#allocation62_spill] sm:$0xff] %v17736_v14 }
 0x5ae   :  { %v4060_v2 = vpop.f32.mrf.mxu0  ;;  %v3731_v30 = vpop.f32.mrf.mxu1 }
 0x5af   :  { %v4061_v46 = vadd.f32 %v4060_v2, %v17364_v45  ;;  %v17746_v26 = vadd.f32 %v3731_v30, %v3363_v20  ;;  %v11540_v45 = vld [vmem:[%s21731_s30 + $0x7f0] sm:$0xf0]  ;;  %v11295_v20 = vor.u32 %v13859_v22, %v11292_v40 }
 0x5b0   :  { %v11543_v37 = vor.u32 %v13922_v50, %v11540_v45  ;;  %v11724_v50 = vld [vmem:[%s21645_s5 + $0x58] sm:$0xf0]  ;;  %v21927_v22 = vld [vmem:[#allocation49_spill] sm:$0xff] }
 0x5b1   :  { %v4305_v6 = vpack.c.bf16 %v4061_v46, %v4061_v46  ;;  %v21926_v46 = vld [vmem:[#allocation48_spill] sm:$0xff]  ;;  %v3368_v40 = vadd.f32 %v17427_v34, %v21927_v22 }
 0x5b2   :  { %v3366_v19 = vadd.f32 %v17400_v12, %v21926_v46  ;;  %v14097_v12 = vld [vmem:[%s21645_s5 + $0x454] sm:$0xf0]  ;;  %v11556_v46 = vld [vmem:[%s21731_s30 + $0x810] sm:$0xf0]  ;;  %v13863_v34 = vld [vmem:[%s21731_s30 + $0x60c] sm:$0xf] }
 0x5b3   :  { %v4593_v16 = vunpack.c.l.b16 %v4305_v6  ;;  %v17763_v35 = vpop.f32.mrf.mxu2  ;;  %v17765_v10 = vpop.f32.mrf.mxu3  ;;  %v11419_v6 = vor.u32 %v13893_v27, %v11418_v31 }
 0x5b4   :  { %21925 = vst [vmem:[#allocation46_spill] sm:$0xff] %v17763_v35 }
 0x5b5   :  { %v17773_v2 = vpack.c.b16 %v4593_v16, %v4592_v57 }
 0x5b6   :  { %v4063_v30 = vpop.f32.mrf.mxu0  ;;  %v3734_v29 = vpop.f32.mrf.mxu1 }
 0x5b7   :  { %v4064_v35 = vadd.f32 %v4063_v30, %v17396_v51  ;;  %v17778_v53 = vadd.f32 %v3734_v29, %v3366_v19  ;;  %v13968_v51 = vld [vmem:[%s21645_s5 + $0x54] sm:$0xf]  ;;  %v12235_v29 = vor.u32 %v14097_v12, %v12234_v63  ;;  %v11434_v63 = vld [vmem:[%s21731_s30 + $0x708] sm:$0xf]  ;;  %v13897_v12 = vld [vmem:[%s21731_s30 + $0x714] sm:$0xf0] }
 0x5b8   :  { %3115 = vmatmul.bf16.gmra.mxu2 %v11667_v23  ;;  %3444 = vmatmul.bf16.gmra.mxu3 %v11543_v37  ;;  %v11727_v45 = vor.u32 %v13968_v51, %v11724_v50 }
 0x5b9   :  { %4102 = vmatmul.bf16.gmra.mxu0 %v11295_v20  ;;  %3773 = vmatmul.bf16.gmra.mxu1 %v11419_v6  ;;  %v4306_v16 = vpack.c.bf16 %v4064_v35, %v4064_v35  ;;  %v13926_v20 = vld [vmem:[%s21731_s30 + $0x804] sm:$0xf] }
 0x5ba   :  { %6068 = vmatpush.bf16.msra.mxu1 %v12235_v29  ;;  %6117 = vmatpush.bf16.msra.mxu0 %v11727_v45  ;;  %v11559_v51 = vor.u32 %v13926_v20, %v11556_v46  ;;  %v3371_v45 = vadd.f32 %v17444_v47, %v17078_v24  ;;  %v3373_v46 = vadd.f32 %v17477_v42, %v17105_v11  ;;  %v13867_v11 = vld [vmem:[%s21731_s30 + $0x62c] sm:$0xf] }
 0x5bb   :  { %v17780_v14 = vpop.f32.mrf.mxu2  ;;  %v17782_v4 = vpop.f32.mrf.mxu3  ;;  %v4594_v35 = vunpack.c.l.b16 %v4306_v16 }
 0x5be   :  { %v4065_v57 = vpop.f32.mrf.mxu0  ;;  %v3736_v27 = vpop.f32.mrf.mxu1 }
 0x5bf   :  { %v4066_v31 = vadd.f32 %v4065_v57, %v17408_v49  ;;  %v17799_v23 = vadd.f32 %v3736_v27, %v3368_v40  ;;  %v11308_v49 = vld [vmem:[%s21731_s30 + $0x618] sm:$0xf0]  ;;  %v11435_v40 = vor.u32 %v13897_v12, %v11434_v63  ;;  %v11572_v63 = vld [vmem:[%s21731_s30 + $0x830] sm:$0xf0] }
 0x5c0   :  { %v11311_v29 = vor.u32 %v13863_v34, %v11308_v49 }
 0x5c1   :  { %v4307_v37 = vpack.c.bf16 %v4066_v31, %v4066_v31  ;;  %v21928_v31 = vld [vmem:[#allocation10_spill] sm:$0xff] }
 0x5c3   :  { %v4595_v19 = vunpack.c.l.b16 %v4307_v37  ;;  %v17813_v30 = vpop.f32.mrf.mxu2  ;;  %v17815_v6 = vpop.f32.mrf.mxu3 }
 0x5c5   :  { %v17823_v50 = vpack.c.b16 %v4595_v19, %v4594_v35  ;;  %v13930_v19 = vld [vmem:[%s21731_s30 + $0x824] sm:$0xf] }
 0x5c6   :  { %v4068_v22 = vpop.f32.mrf.mxu0  ;;  %v3739_v16 = vpop.f32.mrf.mxu1 }
 0x5c7   :  { %v4069_v57 = vadd.f32 %v4068_v22, %v17440_v43  ;;  %v17829_v27 = vadd.f32 %v3739_v16, %v3371_v45  ;;  %v11450_v45 = vld [vmem:[%s21731_s30 + $0x728] sm:$0xf]  ;;  %v13901_v22 = vld [vmem:[%s21731_s30 + $0x734] sm:$0xf0] }
 0x5c8   :  { %3449 = vmatmul.bf16.gmra.mxu3 %v11559_v51  ;;  %5682 = vmatmul.bf16.vlgmr.msrb.gmra.mxu2 %v21928_v31 }
 0x5c9   :  { %4107 = vmatmul.bf16.gmra.mxu0 %v11311_v29  ;;  %3778 = vmatmul.bf16.gmra.mxu1 %v11435_v40  ;;  %v4308_v47 = vpack.c.bf16 %v4069_v57, %v4069_v57  ;;  %v11575_v40 = vor.u32 %v13930_v19, %v11572_v63  ;;  %v3378_v63 = vadd.f32 %v17527_v48, %v17149_v25  ;;  %v13871_v25 = vld [vmem:[%s21731_s30 + $0x64c] sm:$0xf]  ;;  %v11466_v48 = vld [vmem:[%s21731_s30 + $0x748] sm:$0xf] }
 0x5cb   :  { %v17831_v37 = vpop.f32.mrf.mxu2  ;;  %v17833_v20 = vpop.f32.mrf.mxu3  ;;  %v4628_v42 = vunpack.c.l.b16 %v4308_v47  ;;  %v11451_v47 = vor.u32 %v13901_v22, %v11450_v45  ;;  %v11588_v45 = vld [vmem:[%s21731_s30 + $0x850] sm:$0xf0] }
 0x5ce   :  { %v4070_v24 = vpop.f32.mrf.mxu0  ;;  %v3741_v43 = vpop.f32.mrf.mxu1 }
 0x5cf   :  { %v4071_v34 = vadd.f32 %v4070_v24, %v17455_v55  ;;  %v17838_v49 = vadd.f32 %v3741_v43, %v3373_v46  ;;  %v11324_v55 = vld [vmem:[%s21731_s30 + $0x638] sm:$0xf0]  ;;  %v3376_v46 = vadd.f32 %v17500_v18, %v17122_v59 }
 0x5d0   :  { %v11327_v16 = vor.u32 %v13867_v11, %v11324_v55 }
 0x5d1   :  { %v4309_v35 = vpack.c.bf16 %v4071_v34, %v4071_v34 }
 0x5d3   :  { %v4629_v12 = vunpack.c.l.b16 %v4309_v35  ;;  %v17852_v51 = vpop.f32.mrf.mxu2  ;;  %v17854_v29 = vpop.f32.mrf.mxu3  ;;  %v21931_v35 = vld [vmem:[#allocation13_spill] sm:$0xff] }
 0x5d4   :  { %21929 = vst [vmem:[#allocation48_spill] sm:$0xff] %v17852_v51 }
 0x5d5   :  { %v17862_v57 = vpack.c.b16 %v4629_v12, %v4628_v42  ;;  %v13934_v12 = vld [vmem:[%s21731_s30 + $0x844] sm:$0xf] }
 0x5d6   :  { %v4073_v24 = vpop.f32.mrf.mxu0  ;;  %v3744_v43 = vpop.f32.mrf.mxu1 }
 0x5d7   :  { %21930 = vst [vmem:[#allocation49_spill] sm:$0xff] %v17862_v57  ;;  %v4074_v34 = vadd.f32 %v4073_v24, %v17496_v58  ;;  %v17868_v51 = vadd.f32 %v3744_v43, %v3376_v46  ;;  %v11762_v24 = vld [vmem:[%s21645_s5 + $0xa0] sm:$0xf]  ;;  %v11591_v43 = vor.u32 %v13934_v12, %v11588_v45 }
 0x5d8   :  { %3454 = vmatmul.bf16.gmra.mxu3 %v11575_v40  ;;  %5687 = vmatmul.bf16.gmra.mxu2 %v21931_v35 }
 0x5d9   :  { %4112 = vmatmul.bf16.gmra.mxu0 %v11327_v16  ;;  %3783 = vmatmul.bf16.gmra.mxu1 %v11451_v47  ;;  %v4310_v18 = vpack.c.bf16 %v4074_v34, %v4074_v34  ;;  %v13979_v47 = vld [vmem:[%s21645_s5 + $0xa4] sm:$0xf0]  ;;  %v13905_v34 = vld [vmem:[%s21731_s30 + $0x754] sm:$0xf0] }
 0x5db   :  { %v17870_v31 = vpop.f32.mrf.mxu2  ;;  %v17872_v19 = vpop.f32.mrf.mxu3  ;;  %v4630_v22 = vunpack.c.l.b16 %v4310_v18 }
 0x5dc   :  { %21932 = vst [vmem:[#allocation63_spill] sm:$0xff] %v17870_v31  ;;  %v21935_v31 = vld [vmem:[#allocation15_spill] sm:$0xff] }
 0x5de   :  { %v4075_v59 = vpop.f32.mrf.mxu0  ;;  %v3746_v58 = vpop.f32.mrf.mxu1 }
 0x5df   :  { %v4076_v11 = vadd.f32 %v4075_v59, %v17508_v33  ;;  %v17877_v55 = vadd.f32 %v3746_v58, %v3378_v63  ;;  %v11340_v33 = vld [vmem:[%s21731_s30 + $0x658] sm:$0xf0]  ;;  %v11763_v63 = vor.u32 %v13979_v47, %v11762_v24  ;;  %v11604_v24 = vld [vmem:[%s21731_s30 + $0x870] sm:$0xf0] }
 0x5e0   :  { %v11343_v59 = vor.u32 %v13871_v25, %v11340_v33  ;;  %v21937_v25 = vld [vmem:[#allocation23_spill] sm:$0xff] }
 0x5e1   :  { %v4311_v42 = vpack.c.bf16 %v4076_v11, %v4076_v11  ;;  %v3381_v11 = vadd.f32 %v17544_v28, %v17166_v54  ;;  %5728 = vmatpush.bf16.msrb.mxu3 %v11763_v63  ;;  %v3383_v54 = vadd.f32 %v17571_v38, %v21937_v25  ;;  %v13875_v38 = vld [vmem:[%s21731_s30 + $0x66c] sm:$0xf]  ;;  %v11482_v63 = vld [vmem:[%s21731_s30 + $0x768] sm:$0xf]  ;;  %v21940_v25 = vld [vmem:[#allocation38_spill] sm:$0xff] }
 0x5e3   :  { %v4631_v40 = vunpack.c.l.b16 %v4311_v42  ;;  %v17894_v16 = vpop.f32.mrf.mxu2  ;;  %v17896_v46 = vpop.f32.mrf.mxu3  ;;  %v11467_v42 = vor.u32 %v13905_v34, %v11466_v48 }
 0x5e4   :  { %21933 = vst [vmem:[#allocation64_spill] sm:$0xff] %v17894_v16 }
 0x5e5   :  { %v17907_v18 = vpack.c.b16 %v4631_v40, %v4630_v22 }
 0x5e6   :  { %v4078_v58 = vpop.f32.mrf.mxu0  ;;  %v3749_v35 = vpop.f32.mrf.mxu1 }
 0x5e7   :  { %21934 = vst [vmem:[#allocation65_spill] sm:$0xff] %v17907_v18  ;;  %v4079_v16 = vadd.f32 %v4078_v58, %v17540_v60  ;;  %v17913_v57 = vadd.f32 %v3749_v35, %v3381_v11  ;;  %v13938_v35 = vld [vmem:[%s21731_s30 + $0x864] sm:$0xf] }
 0x5e8   :  { %3459 = vmatmul.bf16.gmra.mxu3 %v11591_v43  ;;  %5692 = vmatmul.bf16.gmra.mxu2 %v21935_v31  ;;  %v11607_v11 = vor.u32 %v13938_v35, %v11604_v24  ;;  %v21943_v24 = vld [vmem:[#allocation26_spill] sm:$0xff]  ;;  %v21959_v18 = vld [vmem:[#allocation35_spill] sm:$0xff] }
 0x5e9   :  { %4117 = vmatmul.bf16.gmra.mxu0 %v11343_v59  ;;  %3788 = vmatmul.bf16.gmra.mxu1 %v11467_v42  ;;  %v4312_v33 = vpack.c.bf16 %v4079_v16, %v4079_v16  ;;  %v13909_v59 = vld [vmem:[%s21731_s30 + $0x774] sm:$0xf0] }
 0x5eb   :  { %v17915_v12 = vpop.f32.mrf.mxu2  ;;  %v17917_v45 = vpop.f32.mrf.mxu3  ;;  %v4632_v16 = vunpack.c.l.b16 %v4312_v33  ;;  %v11483_v33 = vor.u32 %v13909_v59, %v11482_v63  ;;  %v13942_v59 = vld [vmem:[%s21731_s30 + $0x884] sm:$0xf] }
 0x5ec   :  { %21936 = vst [vmem:[#allocation66_spill] sm:$0xff] %v17915_v12 }
 0x5ee   :  { %v4080_v28 = vpop.f32.mrf.mxu0  ;;  %v3751_v60 = vpop.f32.mrf.mxu1 }
 0x5ef   :  { %v4081_v48 = vadd.f32 %v4080_v28, %v17552_v15  ;;  %v17922_v22 = vadd.f32 %v3751_v60, %v3383_v54  ;;  %v11356_v15 = vld [vmem:[%s21731_s30 + $0x678] sm:$0xf0]  ;;  %v3386_v54 = vadd.f32 %v17588_v62, %v21940_v25 }
 0x5f0   :  { %v11359_v58 = vor.u32 %v13875_v38, %v11356_v15  ;;  %v3388_v38 = vadd.f32 %v17615_v3, %v21943_v24  ;;  %v13879_v3 = vld [vmem:[%s21731_s30 + $0x68c] sm:$0xf] }
 0x5f1   :  { %v4313_v40 = vpack.c.bf16 %v4081_v48, %v4081_v48 }
 0x5f3   :  { %v4633_v47 = vunpack.c.l.b16 %v4313_v40  ;;  %v17936_v34 = vpop.f32.mrf.mxu2  ;;  %v17938_v43 = vpop.f32.mrf.mxu3  ;;  %v21941_v40 = vld [vmem:[#allocation17_spill] sm:$0xff] }
 0x5f4   :  { %21938 = vst [vmem:[#allocation23_spill] sm:$0xff] %v17936_v34 }
 0x5f5   :  { %v17946_v42 = vpack.c.b16 %v4633_v47, %v4632_v16 }
 0x5f6   :  { %v4083_v28 = vpop.f32.mrf.mxu0  ;;  %v3754_v60 = vpop.f32.mrf.mxu1 }
 0x5f7   :  { %21939 = vst [vmem:[#allocation67_spill] sm:$0xff] %v17946_v42  ;;  %v4084_v48 = vadd.f32 %v4083_v28, %v17584_v44  ;;  %v17952_v34 = vadd.f32 %v3754_v60, %v3386_v54  ;;  %v11834_v42 = vld [vmem:[%s21645_s5 + $0x130] sm:$0xf] }
 0x5f8   :  { %3464 = vmatmul.bf16.gmra.mxu3 %v11607_v11  ;;  %5697 = vmatmul.bf16.gmra.mxu2 %v21941_v40  ;;  %v11620_v11 = vld [vmem:[%s21731_s30 + $0x890] sm:$0xf0]  ;;  %v21947_v40 = vld [vmem:[#allocation20_spill] sm:$0xff] }
 0x5f9   :  { %4122 = vmatmul.bf16.gmra.mxu0 %v11359_v58  ;;  %3793 = vmatmul.bf16.gmra.mxu1 %v11483_v33  ;;  %v4314_v15 = vpack.c.bf16 %v4084_v48, %v4084_v48  ;;  %v11498_v33 = vld [vmem:[%s21731_s30 + $0x788] sm:$0xf]  ;;  %v13913_v48 = vld [vmem:[%s21731_s30 + $0x794] sm:$0xf0]  ;;  %v11623_v60 = vor.u32 %v13942_v59, %v11620_v11 }
 0x5fa   :  { %v14005_v59 = vld [vmem:[%s21645_s5 + $0x174] sm:$0xf0] }
 0x5fb   :  { %v17954_v31 = vpop.f32.mrf.mxu2  ;;  %v17956_v35 = vpop.f32.mrf.mxu3  ;;  %v4634_v58 = vunpack.c.l.b16 %v4314_v15 }
 0x5fc   :  { %21942 = vst [vmem:[#allocation38_spill] sm:$0xff] %v17954_v31  ;;  %v11866_v31 = vld [vmem:[%s21645_s5 + $0x170] sm:$0xf] }
 0x5fe   :  { %v4085_v62 = vpop.f32.mrf.mxu0  ;;  %v3756_v44 = vpop.f32.mrf.mxu1 }
 0x5ff   :  { %v4086_v16 = vadd.f32 %v4085_v62, %v17596_v21  ;;  %v17961_v47 = vadd.f32 %v3756_v44, %v3388_v38  ;;  %v11372_v21 = vld [vmem:[%s21731_s30 + $0x698] sm:$0xf0]  ;;  %v21946_v62 = vld [vmem:[#allocation39_spill] sm:$0xff]  ;;  %v11499_v44 = vor.u32 %v13913_v48, %v11498_v33 }
 0x600   :  { %v11375_v24 = vor.u32 %v13879_v3, %v11372_v21  ;;  %v3391_v15 = vadd.f32 %v17632_v52, %v21946_v62  ;;  %v11867_v52 = vor.u32 %v14005_v59, %v11866_v31  ;;  %v11858_v21 = vld [vmem:[%s21645_s5 + $0x160] sm:$0xf]  ;;  %v11850_v62 = vld [vmem:[%s21645_s5 + $0x150] sm:$0xf]  ;;  %v13883_v59 = vld [vmem:[%s21731_s30 + $0x6ac] sm:$0xf] }
 0x601   :  { %v4315_v63 = vpack.c.bf16 %v4086_v16, %v4086_v16  ;;  %v21949_v33 = vld [vmem:[#allocation19_spill] sm:$0xff] }
 0x602   :  { %5772 = vmatpush.bf16.msra.mxu2 %v11867_v52  ;;  %v11388_v52 = vld [vmem:[%s21731_s30 + $0x6b8] sm:$0xf0] }
 0x603   :  { %v4635_v25 = vunpack.c.l.b16 %v4315_v63  ;;  %v17975_v54 = vpop.f32.mrf.mxu2  ;;  %v17977_v28 = vpop.f32.mrf.mxu3 }
 0x604   :  { %21944 = vst [vmem:[#allocation26_spill] sm:$0xff] %v17975_v54 }
 0x605   :  { %v17985_v38 = vpack.c.b16 %v4635_v25, %v4634_v58  ;;  %v14003_v58 = vld [vmem:[%s21645_s5 + $0x164] sm:$0xf0] }
 0x606   :  { %v4088_v16 = vpop.f32.mrf.mxu0  ;;  %v3759_v54 = vpop.f32.mrf.mxu1  ;;  %v11859_v25 = vor.u32 %v14003_v58, %v11858_v21 }
 0x607   :  { %21945 = vst [vmem:[#allocation68_spill] sm:$0xff] %v17985_v38  ;;  %v4089_v63 = vadd.f32 %v4088_v16, %v17628_v56  ;;  %v17997_v11 = vadd.f32 %v3759_v54, %v3391_v15  ;;  %v3393_v54 = vadd.f32 %v17659_v32, %v21949_v33  ;;  %v14001_v15 = vld [vmem:[%s21645_s5 + $0x154] sm:$0xf0]  ;;  %v13946_v32 = vld [vmem:[%s21731_s30 + $0x8a4] sm:$0xf] }
 0x608   :  { %3469 = vmatmul.bf16.gmra.mxu3 %v11623_v60  ;;  %5702 = vmatmul.bf16.gmra.mxu2 %v21947_v40 }
 0x609   :  { %4127 = vmatmul.bf16.gmra.mxu0 %v11375_v24  ;;  %3798 = vmatmul.bf16.gmra.mxu1 %v11499_v44  ;;  %v4316_v31 = vpack.c.bf16 %v4089_v63, %v4089_v63  ;;  %v11851_v63 = vor.u32 %v14001_v15, %v11850_v62  ;;  %v11391_v62 = vor.u32 %v13883_v59, %v11388_v52  ;;  %v13997_v59 = vld [vmem:[%s21645_s5 + $0x134] sm:$0xf0] }
 0x60a   :  { %5773 = vmatpush.bf16.msra.mxu2 %v11859_v25 }
 0x60b   :  { %v17999_v3 = vpop.f32.mrf.mxu2  ;;  %v18001_v56 = vpop.f32.mrf.mxu3  ;;  %v4636_v21 = vunpack.c.l.b16 %v4316_v31  ;;  %v13999_v31 = vld [vmem:[%s21645_s5 + $0x144] sm:$0xf0] }
 0x60c   :  { %21948 = vst [vmem:[#allocation39_spill] sm:$0xff] %v17999_v3 }
 0x60e   :  { %v4090_v48 = vpop.f32.mrf.mxu0  ;;  %v3761_v24 = vpop.f32.mrf.mxu1  ;;  %5774 = vmatpush.bf16.msra.mxu2 %v11851_v63  ;;  %v21952_v63 = vld [vmem:[#allocation40_spill] sm:$0xff] }
 0x60f   :  { %v4091_v60 = vadd.f32 %v4090_v48, %v17640_v39  ;;  %v18018_v16 = vadd.f32 %v3761_v24, %v3393_v54  ;;  %v11636_v39 = vld [vmem:[%s21731_s30 + $0x8b0] sm:$0xf0]  ;;  %v11514_v54 = vld [vmem:[%s21731_s30 + $0x7a8] sm:$0xf]  ;;  %v13917_v48 = vld [vmem:[%s21731_s30 + $0x7b4] sm:$0xf0] }
 0x610   :  { %v11842_v24 = vld [vmem:[%s21645_s5 + $0x140] sm:$0xf]  ;;  %v11515_v3 = vor.u32 %v13917_v48, %v11514_v54 }
 0x611   :  { %v4317_v44 = vpack.c.bf16 %v4091_v60, %v4091_v60  ;;  %v11639_v60 = vor.u32 %v13946_v32, %v11636_v39  ;;  %v11843_v15 = vor.u32 %v13999_v31, %v11842_v24  ;;  %v21953_v39 = vld [vmem:[#allocation34_spill] sm:$0xff]  ;;  %v21955_v48 = vld [vmem:[#allocation55_spill] sm:$0xff]  ;;  %v11754_v31 = vld [vmem:[%s21645_s5 + $0x90] sm:$0xf] }
 0x613   :  { %v4637_v58 = vunpack.c.l.b16 %v4317_v44  ;;  %v18032_v25 = vpop.f32.mrf.mxu2  ;;  %v18034_v33 = vpop.f32.mrf.mxu3  ;;  %5775 = vmatpush.bf16.msra.mxu2 %v11843_v15  ;;  %v11818_v15 = vld [vmem:[%s21645_s5 + $0x110] sm:$0xf] }
 0x614   :  { %21950 = vst [vmem:[#allocation19_spill] sm:$0xff] %v18032_v25  ;;  %v3396_v25 = vadd.f32 %v17676_v36, %v21952_v63  ;;  %v11835_v36 = vor.u32 %v13997_v59, %v11834_v42  ;;  %v13993_v59 = vld [vmem:[%s21645_s5 + $0x114] sm:$0xf0] }
 0x615   :  { %v18048_v44 = vpack.c.b16 %v4637_v58, %v4636_v21  ;;  %v13995_v58 = vld [vmem:[%s21645_s5 + $0x124] sm:$0xf0] }
 0x616   :  { %v4093_v40 = vpop.f32.mrf.mxu0  ;;  %v3764_v32 = vpop.f32.mrf.mxu1 }
 0x617   :  { %21951 = vst [vmem:[#allocation69_spill] sm:$0xff] %v18048_v44  ;;  %v4094_v38 = vadd.f32 %v4093_v40, %v17672_v17  ;;  %v18060_v52 = vadd.f32 %v3764_v32, %v3396_v25  ;;  %5776 = vmatpush.bf16.msra.mxu2 %v11835_v36  ;;  %v11826_v40 = vld [vmem:[%s21645_s5 + $0x120] sm:$0xf]  ;;  %v3398_v25 = vadd.f32 %v17715_v61, %v21955_v48  ;;  %v13887_v36 = vld [vmem:[%s21731_s30 + $0x6cc] sm:$0xf] }
 0x618   :  { %3474 = vmatmul.bf16.gmra.mxu3 %v11639_v60  ;;  %5707 = vmatmul.bf16.gmra.mxu2 %v21953_v39  ;;  %v11827_v54 = vor.u32 %v13995_v58, %v11826_v40  ;;  %v11404_v40 = vld [vmem:[%s21731_s30 + $0x6d8] sm:$0xf0]  ;;  %v11819_v58 = vor.u32 %v13993_v59, %v11818_v15  ;;  %v11810_v15 = vld [vmem:[%s21645_s5 + $0x100] sm:$0xf]  ;;  %v13991_v59 = vld [vmem:[%s21645_s5 + $0x104] sm:$0xf0] }
 0x619   :  { %4132 = vmatmul.bf16.gmra.mxu0 %v11391_v62  ;;  %3803 = vmatmul.bf16.gmra.mxu1 %v11515_v3  ;;  %v4318_v42 = vpack.c.bf16 %v4094_v38, %v4094_v38  ;;  %v13977_v62 = vld [vmem:[%s21645_s5 + $0x94] sm:$0xf0]  ;;  %v11652_v38 = vld [vmem:[%s21731_s30 + $0x8d0] sm:$0xf0]  ;;  %v11811_v39 = vor.u32 %v13991_v59, %v11810_v15 }
 0x61a   :  { %v11755_v32 = vor.u32 %v13977_v62, %v11754_v31  ;;  %v13975_v62 = vld [vmem:[%s21645_s5 + $0x84] sm:$0xf0] }
 0x61b   :  { %v18062_v21 = vpop.f32.mrf.mxu2  ;;  %v18064_v17 = vpop.f32.mrf.mxu3  ;;  %5777 = vmatpush.bf16.msra.mxu2 %v11827_v54  ;;  %v4638_v54 = vunpack.c.l.b16 %v4318_v42  ;;  %v11746_v42 = vld [vmem:[%s21645_s5 + $0x80] sm:$0xf] }
 0x61c   :  { %21954 = vst [vmem:[#allocation40_spill] sm:$0xff] %v18062_v21  ;;  %5729 = vmatpush.bf16.msrb.mxu3 %v11755_v32  ;;  %v11747_v32 = vor.u32 %v13975_v62, %v11746_v42 }
 0x61e   :  { %v4095_v60 = vpop.f32.mrf.mxu0  ;;  %v3766_v24 = vpop.f32.mrf.mxu1 }
 0x61f   :  { %v4096_v3 = vadd.f32 %v4095_v60, %v17696_v0  ;;  %v18084_v63 = vadd.f32 %v3766_v24, %v3398_v25  ;;  %v13950_v0 = vld [vmem:[%s21731_s30 + $0x8c4] sm:$0xf]  ;;  %v13921_v24 = vld [vmem:[%s21731_s30 + $0x7d4] sm:$0xf0]  ;;  %5778 = vmatpush.bf16.msra.mxu2 %v11819_v58 }
 0x620   :  { %v11655_v31 = vor.u32 %v13950_v0, %v11652_v38  ;;  %v21958_v38 = vld [vmem:[#allocation57_spill] sm:$0xff]  ;;  %5730 = vmatpush.bf16.msrb.mxu3 %v11747_v32 }
 0x621   :  { %v4319_v61 = vpack.c.bf16 %v4096_v3, %v4096_v3  ;;  %v11530_v3 = vld [vmem:[%s21731_s30 + $0x7c8] sm:$0xf]  ;;  %v3401_v58 = vadd.f32 %v17738_v1, %v21958_v38  ;;  %v13925_v32 = vld [vmem:[%s21731_s30 + $0x7f4] sm:$0xf0] }
 0x622   :  { %v11531_v21 = vor.u32 %v13921_v24, %v11530_v3  ;;  %v21961_v1 = vld [vmem:[#allocation32_spill] sm:$0xff] }
 0x623   :  { %v4639_v48 = vunpack.c.l.b16 %v4319_v61  ;;  %v18101_v25 = vpop.f32.mrf.mxu2  ;;  %v18103_v60 = vpop.f32.mrf.mxu3  ;;  %v11407_v61 = vor.u32 %v13887_v36, %v11404_v40  ;;  %5779 = vmatpush.bf16.msra.mxu2 %v11811_v39  ;;  %v11668_v39 = vld [vmem:[%s21731_s30 + $0x8f0] sm:$0xf0] }
 0x624   :  { %21956 = vst [vmem:[#allocation55_spill] sm:$0xff] %v18101_v25 }
 0x625   :  { %v18123_v0 = vpack.c.b16 %v4639_v48, %v4638_v54  ;;  %v3403_v48 = vadd.f32 %v17765_v10, %v21961_v1  ;;  %v13891_v10 = vld [vmem:[%s21731_s30 + $0x6ec] sm:$0xf]  ;;  %v21964_v1 = vld [vmem:[#allocation5_spill] sm:$0xff] }
 0x626   :  { %v4098_v25 = vpop.f32.mrf.mxu0  ;;  %v3769_v12 = vpop.f32.mrf.mxu1 }
 0x627   :  { %21957 = vst [vmem:[#allocation70_spill] sm:$0xff] %v18123_v0  ;;  %v4099_v44 = vadd.f32 %v4098_v25, %v17734_v41  ;;  %v18129_v36 = vadd.f32 %v3769_v12, %v3401_v58  ;;  %v13954_v12 = vld [vmem:[%s21731_s30 + $0x8e4] sm:$0xf] }
 0x628   :  { %3479 = vmatmul.bf16.gmra.mxu3 %v11655_v31  ;;  %5712 = vmatmul.bf16.gmra.mxu2 %v21959_v18  ;;  %v11671_v59 = vor.u32 %v13954_v12, %v11668_v39  ;;  %v21967_v39 = vld [vmem:[#allocation6_spill] sm:$0xff] }
 0x629   :  { %4137 = vmatmul.bf16.gmra.mxu0 %v11407_v61  ;;  %3808 = vmatmul.bf16.gmra.mxu1 %v11531_v21  ;;  %v4320_v24 = vpack.c.bf16 %v4099_v44, %v4099_v44  ;;  %v11546_v61 = vld [vmem:[%s21731_s30 + $0x7e8] sm:$0xf] }
 0x62b   :  { %v18131_v40 = vpop.f32.mrf.mxu2  ;;  %v18133_v54 = vpop.f32.mrf.mxu3  ;;  %v4640_v44 = vunpack.c.l.b16 %v4320_v24  ;;  %v11547_v24 = vor.u32 %v13925_v32, %v11546_v61  ;;  %v13895_v32 = vld [vmem:[%s21731_s30 + $0x70c] sm:$0xf] }
 0x62c   :  { %21960 = vst [vmem:[#allocation57_spill] sm:$0xff] %v18131_v40  ;;  %v21988_v40 = vld [vmem:[#allocation30_spill] sm:$0xff] }
 0x62e   :  { %v4100_v3 = vpop.f32.mrf.mxu0  ;;  %v3771_v25 = vpop.f32.mrf.mxu1 }
 0x62f   :  { %v4101_v41 = vadd.f32 %v4100_v3, %v17746_v26  ;;  %v18138_v31 = vadd.f32 %v3771_v25, %v3403_v48  ;;  %v11420_v26 = vld [vmem:[%s21731_s30 + $0x6f8] sm:$0xf0]  ;;  %v3406_v48 = vadd.f32 %v17782_v4, %v21964_v1 }
 0x630   :  { %v11423_v38 = vor.u32 %v13891_v10, %v11420_v26  ;;  %v3408_v10 = vadd.f32 %v17815_v6, %v21967_v39 }
 0x631   :  { %v4321_v42 = vpack.c.bf16 %v4101_v41, %v4101_v41 }
 0x633   :  { %v4641_v21 = vunpack.c.l.b16 %v4321_v42  ;;  %v18152_v62 = vpop.f32.mrf.mxu2  ;;  %v18154_v15 = vpop.f32.mrf.mxu3  ;;  %v21965_v42 = vld [vmem:[#allocation36_spill] sm:$0xff] }
 0x634   :  { %21962 = vst [vmem:[#allocation32_spill] sm:$0xff] %v18152_v62 }
 0x635   :  { %v18162_v58 = vpack.c.b16 %v4641_v21, %v4640_v44 }
 0x636   :  { %v4103_v3 = vpop.f32.mrf.mxu0  ;;  %v3774_v25 = vpop.f32.mrf.mxu1 }
 0x637   :  { %21963 = vst [vmem:[#allocation71_spill] sm:$0xff] %v18162_v58  ;;  %v4104_v41 = vadd.f32 %v4103_v3, %v17778_v53  ;;  %v18168_v62 = vadd.f32 %v3774_v25, %v3406_v48  ;;  %v13929_v3 = vld [vmem:[%s21731_s30 + $0x814] sm:$0xf0]  ;;  %v21970_v25 = vld [vmem:[#allocation8_spill] sm:$0xff] }
 0x638   :  { %3484 = vmatmul.bf16.gmra.mxu3 %v11671_v59  ;;  %5717 = vmatmul.bf16.gmra.mxu2 %v21965_v42  ;;  %v11436_v59 = vld [vmem:[%s21731_s30 + $0x718] sm:$0xf0]  ;;  %v3411_v39 = vadd.f32 %v17833_v20, %v21970_v25  ;;  %v12226_v20 = vld [vmem:[%s21645_s5 + $0x440] sm:$0xf] }
 0x639   :  { %4142 = vmatmul.bf16.gmra.mxu0 %v11423_v38  ;;  %3813 = vmatmul.bf16.gmra.mxu1 %v11547_v24  ;;  %v4322_v26 = vpack.c.bf16 %v4104_v41, %v4104_v41  ;;  %v11439_v24 = vor.u32 %v13895_v32, %v11436_v59  ;;  %v13966_v59 = vld [vmem:[%s21645_s5 + $0x44] sm:$0xf] }
 0x63b   :  { %v18170_v18 = vpop.f32.mrf.mxu2  ;;  %v18172_v12 = vpop.f32.mrf.mxu3  ;;  %v4642_v38 = vunpack.c.l.b16 %v4322_v26 }
 0x63c   :  { %21966 = vst [vmem:[#allocation5_spill] sm:$0xff] %v18170_v18 }
 0x63e   :  { %v4105_v4 = vpop.f32.mrf.mxu0  ;;  %v3776_v53 = vpop.f32.mrf.mxu1 }
 0x63f   :  { %v4106_v44 = vadd.f32 %v4105_v4, %v17799_v23  ;;  %v18177_v21 = vadd.f32 %v3776_v53, %v3408_v10  ;;  %v11562_v23 = vld [vmem:[%s21731_s30 + $0x808] sm:$0xf]  ;;  %v21971_v53 = vld [vmem:[#allocation37_spill] sm:$0xff] }
 0x640   :  { %v11563_v4 = vor.u32 %v13929_v3, %v11562_v23  ;;  %v21973_v3 = vld [vmem:[#allocation9_spill] sm:$0xff] }
 0x641   :  { %v4323_v61 = vpack.c.bf16 %v4106_v44, %v4106_v44 }
 0x643   :  { %v4643_v1 = vunpack.c.l.b16 %v4323_v61  ;;  %v18185_v48 = vpop.f32.mrf.mxu2  ;;  %v18187_v6 = vpop.f32.mrf.mxu3  ;;  %v21972_v61 = vld [vmem:[#allocation11_spill] sm:$0xff] }
 0x644   :  { %21968 = vst [vmem:[#allocation6_spill] sm:$0xff] %v18185_v48 }
 0x645   :  { %v18195_v41 = vpack.c.b16 %v4643_v1, %v4642_v38  ;;  %v11716_v1 = vld [vmem:[%s21645_s5 + $0x48] sm:$0xf0] }
 0x646   :  { %v4108_v10 = vpop.f32.mrf.mxu0  ;;  %v3779_v44 = vpop.f32.mrf.mxu1  ;;  %v11719_v23 = vor.u32 %v13966_v59, %v11716_v1 }
 0x647   :  { %21969 = vst [vmem:[#allocation72_spill] sm:$0xff] %v18195_v41  ;;  %v4109_v26 = vadd.f32 %v4108_v10, %v17829_v27  ;;  %v18202_v48 = vadd.f32 %v3779_v44, %v3411_v39  ;;  %v14095_v27 = vld [vmem:[%s21645_s5 + $0x444] sm:$0xf0] }
 0x648   :  { %5731 = vmatmul.bf16.vlgmr.msrb.gmra.mxu3 %v21971_v53  ;;  %5780 = vmatmul.bf16.vlgmr.msra.gmra.mxu2 %v21972_v61  ;;  %v12227_v38 = vor.u32 %v14095_v27, %v12226_v20  ;;  %v13899_v20 = vld [vmem:[%s21731_s30 + $0x72c] sm:$0xf]  ;;  %v11452_v27 = vld [vmem:[%s21731_s30 + $0x738] sm:$0xf0] }
 0x649   :  { %4147 = vmatmul.bf16.gmra.mxu0 %v11439_v24  ;;  %3818 = vmatmul.bf16.gmra.mxu1 %v11563_v4  ;;  %v3413_v24 = vadd.f32 %v17854_v29, %v21973_v3  ;;  %v4324_v39 = vpack.c.bf16 %v4109_v26, %v4109_v26  ;;  %v11455_v3 = vor.u32 %v13899_v20, %v11452_v27  ;;  %v21976_v53 = vld [vmem:[#allocation28_spill] sm:$0xff] }
 0x64a   :  { %6069 = vmatpush.bf16.msra.mxu1 %v12227_v38  ;;  %6118 = vmatpush.bf16.msra.mxu0 %v11719_v23  ;;  %v13933_v38 = vld [vmem:[%s21731_s30 + $0x834] sm:$0xf0] }
 0x64b   :  { %v18204_v42 = vpop.f32.mrf.mxu3  ;;  %v18206_v32 = vpop.f32.mrf.mxu2  ;;  %v4676_v59 = vunpack.c.l.b16 %v4324_v39 }
 0x64e   :  { %v4110_v25 = vpop.f32.mrf.mxu0  ;;  %v3781_v4 = vpop.f32.mrf.mxu1 }
 0x64f   :  { %v4111_v10 = vadd.f32 %v4110_v25, %v17838_v49  ;;  %v18223_v44 = vadd.f32 %v3781_v4, %v3413_v24  ;;  %v11578_v49 = vld [vmem:[%s21731_s30 + $0x828] sm:$0xf]  ;;  %v3416_v24 = vadd.f32 %v17872_v19, %v17498_v9  ;;  %v21975_v4 = vld [vmem:[#allocation22_spill] sm:$0xff]  ;;  %v3418_v9 = vadd.f32 %v17896_v46, %v17525_v5 }
 0x650   :  { %v13937_v46 = vld [vmem:[%s21731_s30 + $0x854] sm:$0xf0] }
 0x651   :  { %v4325_v61 = vpack.c.bf16 %v4111_v10, %v4111_v10 }
 0x653   :  { %v4677_v29 = vunpack.c.l.b16 %v4325_v61  ;;  %v18231_v1 = vpop.f32.mrf.mxu3  ;;  %v18233_v26 = vpop.f32.mrf.mxu2  ;;  %v11579_v61 = vor.u32 %v13933_v38, %v11578_v49  ;;  %v13903_v38 = vld [vmem:[%s21731_s30 + $0x74c] sm:$0xf] }
 0x655   :  { %v18241_v23 = vpack.c.b16 %v4677_v29, %v4676_v59 }
 0x656   :  { %v4113_v25 = vpop.f32.mrf.mxu0  ;;  %v3784_v10 = vpop.f32.mrf.mxu1 }
 0x657   :  { %21974 = vst [vmem:[#allocation8_spill] sm:$0xff] %v18241_v23  ;;  %v4114_v39 = vadd.f32 %v4113_v25, %v17868_v51  ;;  %v18248_v41 = vadd.f32 %v3784_v10, %v3416_v24 }
 0x658   :  { %5736 = vmatmul.bf16.gmra.mxu3 %v21975_v4  ;;  %5785 = vmatmul.bf16.gmra.mxu2 %v21976_v53  ;;  %v21981_v53 = vld [vmem:[#allocation29_spill] sm:$0xff] }
 0x659   :  { %4152 = vmatmul.bf16.gmra.mxu0 %v11455_v3  ;;  %3823 = vmatmul.bf16.gmra.mxu1 %v11579_v61  ;;  %v4326_v20 = vpack.c.bf16 %v4114_v39, %v4114_v39  ;;  %v11468_v3 = vld [vmem:[%s21731_s30 + $0x758] sm:$0xf0] }
 0x65a   :  { %v11471_v39 = vor.u32 %v13903_v38, %v11468_v3  ;;  %v21983_v3 = vld [vmem:[#allocation12_spill] sm:$0xff] }
 0x65b   :  { %v18250_v18 = vpop.f32.mrf.mxu3  ;;  %v18252_v59 = vpop.f32.mrf.mxu2  ;;  %v4678_v24 = vunpack.c.l.b16 %v4326_v20 }
 0x65c   :  { %21977 = vst [vmem:[#allocation9_spill] sm:$0xff] %v18250_v18  ;;  %v22004_v18 = vld [vmem:[#allocation4_spill] sm:$0xff] }
 0x65e   :  { %v4115_v19 = vpop.f32.mrf.mxu0  ;;  %v3786_v27 = vpop.f32.mrf.mxu1 }
 0x65f   :  { %v4116_v51 = vadd.f32 %v4115_v19, %v17877_v55  ;;  %v18257_v29 = vadd.f32 %v3786_v27, %v3418_v9  ;;  %v11594_v55 = vld [vmem:[%s21731_s30 + $0x848] sm:$0xf]  ;;  %v3421_v9 = vadd.f32 %v17917_v45, %v17542_v8  ;;  %v3423_v8 = vadd.f32 %v17938_v43, %v21983_v3 }
 0x660   :  { %v11595_v20 = vor.u32 %v13937_v46, %v11594_v55 }
 0x661   :  { %v4327_v49 = vpack.c.bf16 %v4116_v51, %v4116_v51 }
 0x663   :  { %v4679_v25 = vunpack.c.l.b16 %v4327_v49  ;;  %v18265_v61 = vpop.f32.mrf.mxu3  ;;  %v18267_v5 = vpop.f32.mrf.mxu2  ;;  %v21980_v49 = vld [vmem:[#allocation25_spill] sm:$0xff] }
 0x664   :  { %21978 = vst [vmem:[#allocation73_spill] sm:$0xff] %v18265_v61  ;;  %v21998_v61 = vld [vmem:[#allocation21_spill] sm:$0xff] }
 0x665   :  { %v18275_v10 = vpack.c.b16 %v4679_v25, %v4678_v24 }
 0x666   :  { %v4118_v19 = vpop.f32.mrf.mxu0  ;;  %v3789_v27 = vpop.f32.mrf.mxu1 }
 0x667   :  { %21979 = vst [vmem:[#allocation74_spill] sm:$0xff] %v18275_v10  ;;  %v4119_v51 = vadd.f32 %v4118_v19, %v17913_v57  ;;  %v18282_v4 = vadd.f32 %v3789_v27, %v3421_v9  ;;  %v11484_v9 = vld [vmem:[%s21731_s30 + $0x778] sm:$0xf0] }
 0x668   :  { %5741 = vmatmul.bf16.gmra.mxu3 %v21980_v49  ;;  %5790 = vmatmul.bf16.gmra.mxu2 %v21981_v53  ;;  %v21987_v49 = vld [vmem:[#allocation27_spill] sm:$0xff] }
 0x669   :  { %4157 = vmatmul.bf16.gmra.mxu0 %v11471_v39  ;;  %3828 = vmatmul.bf16.gmra.mxu1 %v11595_v20  ;;  %v4328_v24 = vpack.c.bf16 %v4119_v51, %v4119_v51  ;;  %v13907_v39 = vld [vmem:[%s21731_s30 + $0x76c] sm:$0xf]  ;;  %v13941_v51 = vld [vmem:[%s21731_s30 + $0x874] sm:$0xf0] }
 0x66a   :  { %v11487_v3 = vor.u32 %v13907_v39, %v11484_v9  ;;  %v21990_v9 = vld [vmem:[#allocation43_spill] sm:$0xff] }
 0x66b   :  { %v18284_v58 = vpop.f32.mrf.mxu3  ;;  %v18286_v38 = vpop.f32.mrf.mxu2  ;;  %v4680_v19 = vunpack.c.l.b16 %v4328_v24 }
 0x66c   :  { %21982 = vst [vmem:[#allocation75_spill] sm:$0xff] %v18284_v58 }
 0x66e   :  { %v4120_v45 = vpop.f32.mrf.mxu0  ;;  %v3791_v25 = vpop.f32.mrf.mxu1 }
 0x66f   :  { %v4121_v57 = vadd.f32 %v4120_v45, %v17922_v22  ;;  %v18291_v55 = vadd.f32 %v3791_v25, %v3423_v8  ;;  %v11610_v22 = vld [vmem:[%s21731_s30 + $0x868] sm:$0xf]  ;;  %v21986_v45 = vld [vmem:[#allocation14_spill] sm:$0xff] }
 0x670   :  { %v11611_v25 = vor.u32 %v13941_v51, %v11610_v22 }
 0x671   :  { %v4329_v46 = vpack.c.bf16 %v4121_v57, %v4121_v57  ;;  %v3426_v57 = vadd.f32 %v17956_v35, %v21986_v45  ;;  %v3428_v35 = vadd.f32 %v17977_v28, %v21990_v9 }
 0x673   :  { %v4681_v20 = vunpack.c.l.b16 %v4329_v46  ;;  %v18299_v27 = vpop.f32.mrf.mxu3  ;;  %v18301_v43 = vpop.f32.mrf.mxu2 }
 0x674   :  { %21984 = vst [vmem:[#allocation12_spill] sm:$0xff] %v18299_v27 }
 0x675   :  { %v18309_v8 = vpack.c.b16 %v4681_v20, %v4680_v19 }
 0x676   :  { %v4123_v24 = vpop.f32.mrf.mxu0  ;;  %v3794_v53 = vpop.f32.mrf.mxu1 }
 0x677   :  { %21985 = vst [vmem:[#allocation76_spill] sm:$0xff] %v18309_v8  ;;  %v4124_v46 = vadd.f32 %v4123_v24, %v17952_v34  ;;  %v18316_v0 = vadd.f32 %v3794_v53, %v3426_v57  ;;  %v13911_v53 = vld [vmem:[%s21731_s30 + $0x78c] sm:$0xf] }
 0x678   :  { %5746 = vmatmul.bf16.gmra.mxu3 %v21987_v49  ;;  %5795 = vmatmul.bf16.gmra.mxu2 %v21988_v40  ;;  %v21993_v40 = vld [vmem:[#allocation3_spill] sm:$0xff] }
 0x679   :  { %4162 = vmatmul.bf16.gmra.mxu0 %v11487_v3  ;;  %3833 = vmatmul.bf16.gmra.mxu1 %v11611_v25  ;;  %v4330_v20 = vpack.c.bf16 %v4124_v46, %v4124_v46  ;;  %v11500_v3 = vld [vmem:[%s21731_s30 + $0x798] sm:$0xf0]  ;;  %v13945_v46 = vld [vmem:[%s21731_s30 + $0x894] sm:$0xf0]  ;;  %v21994_v49 = vld [vmem:[#allocation31_spill] sm:$0xff] }
 0x67a   :  { %v11503_v9 = vor.u32 %v13911_v53, %v11500_v3  ;;  %v14021_v53 = vld [vmem:[%s21645_s5 + $0x1f4] sm:$0xf0] }
 0x67b   :  { %v18318_v27 = vpop.f32.mrf.mxu3  ;;  %v18320_v39 = vpop.f32.mrf.mxu2  ;;  %v4682_v57 = vunpack.c.l.b16 %v4330_v20  ;;  %v14037_v3 = vld [vmem:[%s21645_s5 + $0x274] sm:$0xf0] }
 0x67c   :  { %21989 = vst [vmem:[#allocation14_spill] sm:$0xff] %v18318_v27 }
 0x67e   :  { %v4125_v19 = vpop.f32.mrf.mxu0  ;;  %v3796_v22 = vpop.f32.mrf.mxu1 }
 0x67f   :  { %v4126_v34 = vadd.f32 %v4125_v19, %v17961_v47  ;;  %v18325_v51 = vadd.f32 %v3796_v22, %v3428_v35  ;;  %v11626_v47 = vld [vmem:[%s21731_s30 + $0x888] sm:$0xf]  ;;  %v3431_v19 = vadd.f32 %v18001_v56, %v17630_v7  ;;  %v11994_v7 = vld [vmem:[%s21645_s5 + $0x270] sm:$0xf] }
 0x681   :  { %v4331_v45 = vpack.c.bf16 %v4126_v34, %v4126_v34  ;;  %v11627_v34 = vor.u32 %v13945_v46, %v11626_v47  ;;  %v11922_v46 = vld [vmem:[%s21645_s5 + $0x1e0] sm:$0xf] }
 0x683   :  { %v4683_v24 = vunpack.c.l.b16 %v4331_v45  ;;  %v18333_v25 = vpop.f32.mrf.mxu3  ;;  %v18335_v28 = vpop.f32.mrf.mxu2 }
 0x684   :  { %21991 = vst [vmem:[#allocation43_spill] sm:$0xff] %v18333_v25  ;;  %v11930_v25 = vld [vmem:[%s21645_s5 + $0x1f0] sm:$0xf] }
 0x685   :  { %v18343_v35 = vpack.c.b16 %v4683_v24, %v4682_v57  ;;  %v11995_v57 = vor.u32 %v14037_v3, %v11994_v7  ;;  %v11914_v3 = vld [vmem:[%s21645_s5 + $0x1d0] sm:$0xf] }
 0x686   :  { %v4128_v20 = vpop.f32.mrf.mxu0  ;;  %v3799_v45 = vpop.f32.mrf.mxu1 }
 0x687   :  { %21992 = vst [vmem:[#allocation77_spill] sm:$0xff] %v18343_v35  ;;  %v4129_v22 = vadd.f32 %v4128_v20, %v17997_v11  ;;  %v18359_v56 = vadd.f32 %v3799_v45, %v3431_v19  ;;  %v11931_v11 = vor.u32 %v14021_v53, %v11930_v25  ;;  %5870 = vmatpush.bf16.msrb.mxu2 %v11995_v57  ;;  %v14019_v25 = vld [vmem:[%s21645_s5 + $0x1e4] sm:$0xf0]  ;;  %v14017_v57 = vld [vmem:[%s21645_s5 + $0x1d4] sm:$0xf0] }
 0x688   :  { %5751 = vmatmul.bf16.gmra.mxu3 %v21993_v40  ;;  %5800 = vmatmul.bf16.gmra.mxu2 %v21994_v49  ;;  %v11923_v19 = vor.u32 %v14019_v25, %v11922_v46  ;;  %v14035_v20 = vld [vmem:[%s21645_s5 + $0x264] sm:$0xf0]  ;;  %v11978_v46 = vld [vmem:[%s21645_s5 + $0x250] sm:$0xf] }
 0x689   :  { %4167 = vmatmul.bf16.gmra.mxu0 %v11503_v9  ;;  %3838 = vmatmul.bf16.gmra.mxu1 %v11627_v34  ;;  %v11986_v9 = vld [vmem:[%s21645_s5 + $0x260] sm:$0xf]  ;;  %v4332_v53 = vpack.c.bf16 %v4129_v22, %v4129_v22  ;;  %v11915_v22 = vor.u32 %v14017_v57, %v11914_v3  ;;  %v13949_v3 = vld [vmem:[%s21731_s30 + $0x8b4] sm:$0xf0] }
 0x68a   :  { %5821 = vmatpush.bf16.msra.mxu3 %v11931_v11  ;;  %v11987_v45 = vor.u32 %v14035_v20, %v11986_v9  ;;  %v13915_v9 = vld [vmem:[%s21731_s30 + $0x7ac] sm:$0xf]  ;;  %v11906_v57 = vld [vmem:[%s21645_s5 + $0x1c0] sm:$0xf] }
 0x68b   :  { %v18364_v24 = vpop.f32.mrf.mxu3  ;;  %v18366_v47 = vpop.f32.mrf.mxu2 }
 0x68c   :  { %21995 = vst [vmem:[#allocation78_spill] sm:$0xff] %v18364_v24  ;;  %5871 = vmatpush.bf16.msrb.mxu2 %v11987_v45 }
 0x68e   :  { %v4130_v34 = vpop.f32.mrf.mxu0  ;;  %5822 = vmatpush.bf16.msra.mxu3 %v11923_v19  ;;  %v18381_v11 = vpop.f32.mrf.mxu1  ;;  %v11516_v19 = vld [vmem:[%s21731_s30 + $0x7b8] sm:$0xf0] }
 0x68f   :  { %v4131_v7 = vadd.f32 %v4130_v34, %v18018_v16  ;;  %v14033_v16 = vld [vmem:[%s21645_s5 + $0x254] sm:$0xf0]  ;;  %v4684_v34 = vunpack.c.l.b16 %v4332_v53  ;;  %v14015_v53 = vld [vmem:[%s21645_s5 + $0x1c4] sm:$0xf0] }
 0x690   :  { %v11979_v20 = vor.u32 %v14033_v16, %v11978_v46  ;;  %v11970_v46 = vld [vmem:[%s21645_s5 + $0x240] sm:$0xf]  ;;  %v14031_v16 = vld [vmem:[%s21645_s5 + $0x244] sm:$0xf0] }
 0x691   :  { %v4333_v25 = vpack.c.bf16 %v4131_v7, %v4131_v7  ;;  %v11642_v7 = vld [vmem:[%s21731_s30 + $0x8a8] sm:$0xf]  ;;  %v11971_v35 = vor.u32 %v14031_v16, %v11970_v46 }
 0x692   :  { %5823 = vmatpush.bf16.msra.mxu3 %v11915_v22  ;;  %5872 = vmatpush.bf16.msrb.mxu2 %v11979_v20  ;;  %v11907_v22 = vor.u32 %v14015_v53, %v11906_v57  ;;  %v3436_v20 = vadd.f32 %v18064_v17, %v17674_v13  ;;  %v11643_v27 = vor.u32 %v13949_v3, %v11642_v7  ;;  %v11962_v13 = vld [vmem:[%s21645_s5 + $0x230] sm:$0xf]  ;;  %v11890_v57 = vld [vmem:[%s21645_s5 + $0x1a0] sm:$0xf] }
 0x693   :  { %v4685_v45 = vunpack.c.l.b16 %v4333_v25  ;;  %v18401_v49 = vpop.f32.mrf.mxu3  ;;  %v18403_v40 = vpop.f32.mrf.mxu2  ;;  %v11519_v25 = vor.u32 %v13915_v9, %v11516_v19  ;;  %v21999_v9 = vld [vmem:[#allocation45_spill] sm:$0xff] }
 0x694   :  { %21996 = vst [vmem:[#allocation79_spill] sm:$0xff] %v18401_v49  ;;  %v11898_v19 = vld [vmem:[%s21645_s5 + $0x1b0] sm:$0xf] }
 0x695   :  { %v18423_v49 = vpack.c.b16 %v4685_v45, %v4684_v34  ;;  %v14013_v34 = vld [vmem:[%s21645_s5 + $0x1b4] sm:$0xf0] }
 0x696   :  { %v4133_v24 = vpop.f32.mrf.mxu0  ;;  %5824 = vmatpush.bf16.msra.mxu3 %v11907_v22  ;;  %v3804_v58 = vpop.f32.mrf.mxu1  ;;  %5873 = vmatpush.bf16.msrb.mxu2 %v11971_v35  ;;  %v11954_v35 = vld [vmem:[%s21645_s5 + $0x220] sm:$0xf] }
 0x697   :  { %21997 = vst [vmem:[#allocation80_spill] sm:$0xff] %v18423_v49  ;;  %v4134_v8 = vadd.f32 %v4133_v24, %v18060_v52  ;;  %v18439_v17 = vadd.f32 %v3804_v58, %v3436_v20  ;;  %v11899_v52 = vor.u32 %v14013_v34, %v11898_v19  ;;  %v14029_v24 = vld [vmem:[%s21645_s5 + $0x234] sm:$0xf0]  ;;  %v14011_v58 = vld [vmem:[%s21645_s5 + $0x1a4] sm:$0xf0] }
 0x698   :  { %5756 = vmatmul.bf16.gmra.mxu3 %v21998_v61  ;;  %5805 = vmatmul.bf16.gmra.mxu2 %v21999_v9  ;;  %v11963_v45 = vor.u32 %v14029_v24, %v11962_v13  ;;  %v11891_v53 = vor.u32 %v14011_v58, %v11890_v57  ;;  %v11882_v19 = vld [vmem:[%s21645_s5 + $0x190] sm:$0xf]  ;;  %v14009_v34 = vld [vmem:[%s21645_s5 + $0x194] sm:$0xf0]  ;;  %v13919_v24 = vld [vmem:[%s21731_s30 + $0x7cc] sm:$0xf] }
 0x699   :  { %4172 = vmatmul.bf16.gmra.mxu0 %v11519_v25  ;;  %3843 = vmatmul.bf16.gmra.mxu1 %v11643_v27  ;;  %v14027_v27 = vld [vmem:[%s21645_s5 + $0x224] sm:$0xf0]  ;;  %v4334_v22 = vpack.c.bf16 %v4134_v8, %v4134_v8  ;;  %v11946_v13 = vld [vmem:[%s21645_s5 + $0x210] sm:$0xf]  ;;  %v11883_v8 = vor.u32 %v14009_v34, %v11882_v19  ;;  %v11938_v19 = vld [vmem:[%s21645_s5 + $0x200] sm:$0xf] }
 0x69a   :  { %5825 = vmatpush.bf16.msra.mxu3 %v11899_v52  ;;  %5874 = vmatpush.bf16.msrb.mxu2 %v11963_v45  ;;  %v11955_v25 = vor.u32 %v14027_v27, %v11954_v35  ;;  %v11532_v45 = vld [vmem:[%s21731_s30 + $0x7d8] sm:$0xf0] }
 0x69b   :  { %v18444_v7 = vpop.f32.mrf.mxu3  ;;  %v18446_v3 = vpop.f32.mrf.mxu2  ;;  %v4686_v58 = vunpack.c.l.b16 %v4334_v22  ;;  %v14007_v22 = vld [vmem:[%s21645_s5 + $0x184] sm:$0xf0]  ;;  %v11535_v34 = vor.u32 %v13919_v24, %v11532_v45 }
 0x69c   :  { %22000 = vst [vmem:[#allocation81_spill] sm:$0xff] %v18444_v7  ;;  %v22005_v24 = vld [vmem:[#allocation47_spill] sm:$0xff] }
 0x69e   :  { %v4135_v46 = vpop.f32.mrf.mxu0  ;;  %5826 = vmatpush.bf16.msra.mxu3 %v11891_v53  ;;  %v18461_v20 = vpop.f32.mrf.mxu1  ;;  %5875 = vmatpush.bf16.msrb.mxu2 %v11955_v25  ;;  %v13953_v25 = vld [vmem:[%s21731_s30 + $0x8d4] sm:$0xf0] }
 0x69f   :  { %v4136_v16 = vadd.f32 %v4135_v46, %v18084_v63  ;;  %v14025_v63 = vld [vmem:[%s21645_s5 + $0x214] sm:$0xf0]  ;;  %v11658_v46 = vld [vmem:[%s21731_s30 + $0x8c8] sm:$0xf] }
 0x6a0   :  { %v11947_v57 = vor.u32 %v14025_v63, %v11946_v13  ;;  %v22003_v63 = vld [vmem:[#allocation62_spill] sm:$0xff]  ;;  %v11659_v7 = vor.u32 %v13953_v25, %v11658_v46  ;;  %v13923_v25 = vld [vmem:[%s21731_s30 + $0x7ec] sm:$0xf] }
 0x6a1   :  { %v4335_v52 = vpack.c.bf16 %v4136_v16, %v4136_v16  ;;  %v11874_v16 = vld [vmem:[%s21645_s5 + $0x180] sm:$0xf]  ;;  %v3441_v9 = vadd.f32 %v18133_v54, %v22003_v63 }
 0x6a2   :  { %5827 = vmatpush.bf16.msra.mxu3 %v11883_v8  ;;  %5876 = vmatpush.bf16.msrb.mxu2 %v11947_v57  ;;  %v11875_v13 = vor.u32 %v14007_v22, %v11874_v16 }
 0x6a3   :  { %v4687_v35 = vunpack.c.l.b16 %v4335_v52  ;;  %v18481_v53 = vpop.f32.mrf.mxu3  ;;  %v18483_v27 = vpop.f32.mrf.mxu2  ;;  %v14023_v52 = vld [vmem:[%s21645_s5 + $0x204] sm:$0xf0] }
 0x6a4   :  { %22001 = vst [vmem:[#allocation82_spill] sm:$0xff] %v18481_v53  ;;  %v11939_v53 = vor.u32 %v14023_v52, %v11938_v19 }
 0x6a5   :  { %v18503_v8 = vpack.c.b16 %v4687_v35, %v4686_v58 }
 0x6a6   :  { %v4138_v61 = vpop.f32.mrf.mxu0  ;;  %5828 = vmatpush.bf16.msra.mxu3 %v11875_v13  ;;  %v3809_v10 = vpop.f32.mrf.mxu1  ;;  %5877 = vmatpush.bf16.msrb.mxu2 %v11939_v53 }
 0x6a7   :  { %22002 = vst [vmem:[#allocation83_spill] sm:$0xff] %v18503_v8  ;;  %v4139_v49 = vadd.f32 %v4138_v61, %v18129_v36  ;;  %v18510_v45 = vadd.f32 %v3809_v10, %v3441_v9  ;;  %v11548_v10 = vld [vmem:[%s21731_s30 + $0x7f8] sm:$0xf0] }
 0x6a8   :  { %5761 = vmatmul.bf16.gmra.mxu3 %v22004_v18  ;;  %5810 = vmatmul.bf16.gmra.mxu2 %v22005_v24  ;;  %v11551_v22 = vor.u32 %v13923_v25, %v11548_v10 }
 0x6a9   :  { %4177 = vmatmul.bf16.gmra.mxu0 %v11535_v34  ;;  %3848 = vmatmul.bf16.gmra.mxu1 %v11659_v7  ;;  %v4336_v35 = vpack.c.bf16 %v4139_v49, %v4139_v49  ;;  %v13957_v49 = vld [vmem:[%s21731_s30 + $0x8f4] sm:$0xf0]  ;;  %v3446_v34 = vadd.f32 %v18172_v12, %v17780_v14 }
 0x6ab   :  { %v18512_v57 = vpop.f32.mrf.mxu3  ;;  %v18514_v58 = vpop.f32.mrf.mxu2  ;;  %v4688_v9 = vunpack.c.l.b16 %v4336_v35  ;;  %v22007_v35 = vld [vmem:[#allocation7_spill] sm:$0xff] }
 0x6ae   :  { %v4140_v54 = vpop.f32.mrf.mxu0  ;;  %v18517_v36 = vpop.f32.mrf.mxu1 }
 0x6af   :  { %v4141_v46 = vadd.f32 %v4140_v54, %v18138_v31  ;;  %v11674_v31 = vld [vmem:[%s21731_s30 + $0x8e8] sm:$0xf] }
 0x6b0   :  { %v11675_v52 = vor.u32 %v13957_v49, %v11674_v31  ;;  %v4948_v31 = vld [vmem:[%s21646_s6] sm:$0x3] }
 0x6b1   :  { %v4337_v61 = vpack.c.bf16 %v4141_v46, %v4141_v46  ;;  %v22008_v46 = vld [vmem:[#allocation50_spill] sm:$0xff] }
 0x6b3   :  { %v4689_v7 = vunpack.c.l.b16 %v4337_v61  ;;  %v18525_v53 = vpop.f32.mrf.mxu3  ;;  %v18527_v16 = vpop.f32.mrf.mxu2 }
 0x6b5   :  { %v18535_v19 = vpack.c.b16 %v4689_v7, %v4688_v9  ;;  %v11564_v7 = vld [vmem:[%s21731_s30 + $0x818] sm:$0xf0] }
 0x6b6   :  { %v4143_v13 = vpop.f32.mrf.mxu0  ;;  %v3814_v54 = vpop.f32.mrf.mxu1 }
 0x6b7   :  { %22006 = vst [vmem:[#allocation62_spill] sm:$0xff] %v18535_v19  ;;  %v4144_v63 = vadd.f32 %v4143_v13, %v18168_v62  ;;  %v18542_v61 = vadd.f32 %v3814_v54, %v3446_v34  ;;  %v13927_v62 = vld [vmem:[%s21731_s30 + $0x80c] sm:$0xf] }
 0x6b8   :  { %5766 = vmatmul.bf16.gmra.mxu3 %v22007_v35  ;;  %5815 = vmatmul.bf16.gmra.mxu2 %v22008_v46  ;;  %v22012_v46 = vld [vmem:[#allocation60_spill] sm:$0xff] }
 0x6b9   :  { %4182 = vmatmul.bf16.gmra.mxu0 %v11551_v22  ;;  %3853 = vmatmul.bf16.gmra.mxu1 %v11675_v52  ;;  %v4338_v9 = vpack.c.bf16 %v4144_v63, %v4144_v63  ;;  %v18564_v63 = vperm.slane %v4948_v31, 0 }
 0x6bb   :  { %v18544_v24 = vpop.f32.mrf.mxu3  ;;  %v18546_v25 = vpop.f32.mrf.mxu2  ;;  %v4690_v49 = vunpack.c.l.b16 %v4338_v9  ;;  %v5684_v9 = vadd.f32 %v18206_v32, %v18564_v63  ;;  %v11580_v32 = vld [vmem:[%s21731_s30 + $0x838] sm:$0xf0] }
 0x6be   :  { %v4145_v10 = vpop.f32.mrf.mxu0 }
 0x6bf   :  { %v4146_v14 = vadd.f32 %v4145_v10, %v18177_v21  ;;  %v11567_v21 = vor.u32 %v13927_v62, %v11564_v7 }
 0x6c1   :  { %v4339_v12 = vpack.c.bf16 %v4146_v14, %v4146_v14  ;;  %v22011_v14 = vld [vmem:[#allocation51_spill] sm:$0xff] }
 0x6c3   :  { %v4691_v22 = vunpack.c.l.b16 %v4339_v12  ;;  %v18558_v34 = vpop.f32.mrf.mxu3  ;;  %v18560_v13 = vpop.f32.mrf.mxu2 }
 0x6c4   :  { %22009 = vst [vmem:[#allocation84_spill] sm:$0xff] %v18558_v34 }
 0x6c5   :  { %v18562_v52 = vpack.c.b16 %v4691_v22, %v4690_v49  ;;  %v13931_v22 = vld [vmem:[%s21731_s30 + $0x82c] sm:$0xf] }
 0x6c6   :  { %v4148_v54 = vpop.f32.mrf.mxu0 }
 0x6c7   :  { %22010 = vst [vmem:[#allocation85_spill] sm:$0xff] %v18562_v52  ;;  %v4149_v10 = vadd.f32 %v4148_v54, %v18202_v48  ;;  %v5686_v48 = vadd.f32 %v18233_v26, %v18564_v63 }
 0x6c8   :  { %5829 = vmatmul.bf16.vlgmr.msra.gmra.mxu3 %v22011_v14  ;;  %5878 = vmatmul.bf16.vlgmr.msrb.gmra.mxu2 %v22012_v46  ;;  %v22014_v14 = vld [vmem:[#allocation41_spill] sm:$0xff] }
 0x6c9   :  { %4187 = vmatmul.bf16.gmra.mxu0 %v11567_v21  ;;  %v4340_v7 = vpack.c.bf16 %v4149_v10, %v4149_v10 }
 0x6cb   :  { %v5732_v12 = vpop.f32.mrf.mxu3  ;;  %v5781_v35 = vpop.f32.mrf.mxu2  ;;  %v4724_v21 = vunpack.c.l.b16 %v4340_v7  ;;  %v5689_v7 = vadd.f32 %v18252_v59, %v18564_v63  ;;  %v11708_v59 = vld [vmem:[%s21645_s5 + $0x38] sm:$0xf0] }
 0x6cc   :  { %v5733_v18 = vadd.f32 %v5732_v12, %v5684_v9 }
 0x6ce   :  { %v18571_v34 = vadd.f32 %v5781_v35, %v5733_v18  ;;  %v4150_v62 = vpop.f32.mrf.mxu0 }
 0x6cf   :  { %v4151_v31 = vadd.f32 %v4150_v62, %v18223_v44  ;;  %v11583_v44 = vor.u32 %v13931_v22, %v11580_v32  ;;  %v14093_v22 = vld [vmem:[%s21645_s5 + $0x434] sm:$0xf0] }
 0x6d1   :  { %v4341_v49 = vpack.c.bf16 %v4151_v31, %v4151_v31  ;;  %v22013_v31 = vld [vmem:[#allocation52_spill] sm:$0xff] }
 0x6d3   :  { %v4725_v54 = vunpack.c.l.b16 %v4341_v49  ;;  %v5734_v18 = vpop.f32.mrf.mxu3  ;;  %v5783_v35 = vpop.f32.mrf.mxu2 }
 0x6d4   :  { %v5735_v9 = vadd.f32 %v5734_v18, %v5686_v48  ;;  %v12218_v48 = vld [vmem:[%s21645_s5 + $0x430] sm:$0xf] }
 0x6d5   :  { %v18582_v10 = vpack.c.b16 %v4725_v54, %v4724_v21  ;;  %v12219_v21 = vor.u32 %v14093_v22, %v12218_v48 }
 0x6d6   :  { %v18584_v12 = vadd.f32 %v5783_v35, %v5735_v9  ;;  %v4153_v62 = vpop.f32.mrf.mxu0 }
 0x6d7   :  { %v4154_v26 = vadd.f32 %v4153_v62, %v18248_v41  ;;  %v13964_v41 = vld [vmem:[%s21645_s5 + $0x34] sm:$0xf]  ;;  %6070 = vmatpush.bf16.msra.mxu1 %v12219_v21 }
 0x6d8   :  { %5834 = vmatmul.bf16.gmra.mxu3 %v22013_v31  ;;  %5883 = vmatmul.bf16.gmra.mxu2 %v22014_v14  ;;  %v11711_v54 = vor.u32 %v13964_v41, %v11708_v59  ;;  %v5691_v31 = vadd.f32 %v18267_v5, %v18564_v63 }
 0x6d9   :  { %4192 = vmatmul.bf16.gmra.mxu0 %v11583_v44  ;;  %v4342_v9 = vpack.c.bf16 %v4154_v26, %v4154_v26 }
 0x6da   :  { %6119 = vmatpush.bf16.msra.mxu0 %v11711_v54  ;;  %v22015_v54 = vld [vmem:[#allocation24_spill] sm:$0xff] }
 0x6db   :  { %v5737_v49 = vpop.f32.mrf.mxu3  ;;  %v5786_v46 = vpop.f32.mrf.mxu2 }
 0x6dc   :  { %v5738_v32 = vadd.f32 %v5737_v49, %v5689_v7  ;;  %v13935_v7 = vld [vmem:[%s21731_s30 + $0x84c] sm:$0xf]  ;;  %v11596_v49 = vld [vmem:[%s21731_s30 + $0x858] sm:$0xf0] }
 0x6de   :  { %v18603_v18 = vadd.f32 %v5786_v46, %v5738_v32  ;;  %v4155_v35 = vpop.f32.mrf.mxu0  ;;  %v4726_v46 = vunpack.c.l.b16 %v4342_v9  ;;  %v11599_v32 = vor.u32 %v13935_v7, %v11596_v49  ;;  %v5694_v9 = vadd.f32 %v18286_v38, %v18564_v63  ;;  %v11612_v38 = vld [vmem:[%s21731_s30 + $0x878] sm:$0xf0] }
 0x6df   :  { %v4156_v44 = vadd.f32 %v4155_v35, %v18257_v29  ;;  %v22016_v35 = vld [vmem:[#allocation42_spill] sm:$0xff] }
 0x6e1   :  { %v4343_v62 = vpack.c.bf16 %v4156_v44, %v4156_v44 }
 0x6e3   :  { %v4727_v48 = vunpack.c.l.b16 %v4343_v62  ;;  %v5739_v22 = vpop.f32.mrf.mxu3  ;;  %v5788_v41 = vpop.f32.mrf.mxu2 }
 0x6e4   :  { %v5740_v26 = vadd.f32 %v5739_v22, %v5691_v31  ;;  %v13939_v22 = vld [vmem:[%s21731_s30 + $0x86c] sm:$0xf] }
 0x6e5   :  { %v18614_v29 = vpack.c.b16 %v4727_v48, %v4726_v46 }
 0x6e6   :  { %v18616_v21 = vadd.f32 %v5788_v41, %v5740_v26  ;;  %v4158_v59 = vpop.f32.mrf.mxu0 }
 0x6e7   :  { %v4159_v5 = vadd.f32 %v4158_v59, %v18282_v4  ;;  %v5696_v4 = vadd.f32 %v18301_v43, %v18564_v63 }
 0x6e8   :  { %5839 = vmatmul.bf16.gmra.mxu3 %v22015_v54  ;;  %5888 = vmatmul.bf16.gmra.mxu2 %v22016_v35 }
 0x6e9   :  { %4197 = vmatmul.bf16.gmra.mxu0 %v11599_v32  ;;  %v4344_v49 = vpack.c.bf16 %v4159_v5, %v4159_v5  ;;  %v11615_v5 = vor.u32 %v13939_v22, %v11612_v38 }
 0x6eb   :  { %v5742_v44 = vpop.f32.mrf.mxu3  ;;  %v5791_v62 = vpop.f32.mrf.mxu2  ;;  %v4728_v41 = vunpack.c.l.b16 %v4344_v49  ;;  %v5699_v49 = vadd.f32 %v18320_v39, %v18564_v63  ;;  %v11628_v39 = vld [vmem:[%s21731_s30 + $0x898] sm:$0xf0] }
 0x6ec   :  { %v5743_v14 = vadd.f32 %v5742_v44, %v5694_v9 }
 0x6ee   :  { %v18623_v31 = vadd.f32 %v5791_v62, %v5743_v14  ;;  %v4160_v7 = vpop.f32.mrf.mxu0  ;;  %v22017_v62 = vld [vmem:[#allocation53_spill] sm:$0xff] }
 0x6ef   :  { %v4161_v46 = vadd.f32 %v4160_v7, %v18291_v55  ;;  %v22018_v7 = vld [vmem:[#allocation16_spill] sm:$0xff] }
 0x6f1   :  { %v4345_v48 = vpack.c.bf16 %v4161_v46, %v4161_v46 }
 0x6f3   :  { %v4729_v26 = vunpack.c.l.b16 %v4345_v48  ;;  %v5744_v14 = vpop.f32.mrf.mxu3  ;;  %v5793_v32 = vpop.f32.mrf.mxu2 }
 0x6f4   :  { %v5745_v59 = vadd.f32 %v5744_v14, %v5696_v4  ;;  %v13943_v14 = vld [vmem:[%s21731_s30 + $0x88c] sm:$0xf] }
 0x6f5   :  { %v18634_v9 = vpack.c.b16 %v4729_v26, %v4728_v41 }
 0x6f6   :  { %v18636_v55 = vadd.f32 %v5793_v32, %v5745_v59  ;;  %v4163_v44 = vpop.f32.mrf.mxu0 }
 0x6f7   :  { %v4164_v43 = vadd.f32 %v4163_v44, %v18316_v0  ;;  %v5701_v0 = vadd.f32 %v18335_v28, %v18564_v63 }
 0x6f8   :  { %5844 = vmatmul.bf16.gmra.mxu3 %v22017_v62  ;;  %5893 = vmatmul.bf16.gmra.mxu2 %v22018_v7 }
 0x6f9   :  { %4202 = vmatmul.bf16.gmra.mxu0 %v11615_v5  ;;  %v4346_v38 = vpack.c.bf16 %v4164_v43, %v4164_v43  ;;  %v11631_v43 = vor.u32 %v13943_v14, %v11628_v39  ;;  %v5704_v14 = vadd.f32 %v18366_v47, %v18564_v63  ;;  %v12114_v47 = vld [vmem:[%s21645_s5 + $0x360] sm:$0xf] }
 0x6fb   :  { %v5747_v46 = vpop.f32.mrf.mxu3  ;;  %v5796_v48 = vpop.f32.mrf.mxu2  ;;  %v4730_v32 = vunpack.c.l.b16 %v4346_v38  ;;  %v12058_v38 = vld [vmem:[%s21645_s5 + $0x2f0] sm:$0xf] }
 0x6fc   :  { %v5748_v54 = vadd.f32 %v5747_v46, %v5699_v49 }
 0x6fe   :  { %v18643_v4 = vadd.f32 %v5796_v48, %v5748_v54  ;;  %v4165_v22 = vpop.f32.mrf.mxu0  ;;  %v22019_v48 = vld [vmem:[#allocation54_spill] sm:$0xff] }
 0x6ff   :  { %v4166_v41 = vadd.f32 %v4165_v22, %v18325_v51  ;;  %v22020_v22 = vld [vmem:[#allocation18_spill] sm:$0xff] }
 0x701   :  { %v4347_v26 = vpack.c.bf16 %v4166_v41, %v4166_v41  ;;  %v14053_v41 = vld [vmem:[%s21645_s5 + $0x2f4] sm:$0xf0] }
 0x703   :  { %v4731_v59 = vunpack.c.l.b16 %v4347_v26  ;;  %v5749_v54 = vpop.f32.mrf.mxu3  ;;  %v5798_v5 = vpop.f32.mrf.mxu2  ;;  %v12122_v26 = vld [vmem:[%s21645_s5 + $0x370] sm:$0xf] }
 0x704   :  { %v5750_v44 = vadd.f32 %v5749_v54, %v5701_v0  ;;  %v12059_v0 = vor.u32 %v14053_v41, %v12058_v38  ;;  %v14067_v41 = vld [vmem:[%s21645_s5 + $0x364] sm:$0xf0] }
 0x705   :  { %v18654_v49 = vpack.c.b16 %v4731_v59, %v4730_v32  ;;  %v22021_v32 = vld [vmem:[#allocation44_spill] sm:$0xff] }
 0x706   :  { %v18656_v51 = vadd.f32 %v5798_v5, %v5750_v44  ;;  %v4168_v46 = vpop.f32.mrf.mxu0  ;;  %v3433_v59 = vadd.f32 %v18034_v33, %v22021_v32  ;;  %5919 = vmatpush.bf16.msrb.mxu3 %v12059_v0  ;;  %v12042_v32 = vld [vmem:[%s21645_s5 + $0x2d0] sm:$0xf] }
 0x707   :  { %v4169_v28 = vadd.f32 %v4168_v46, %v18359_v56  ;;  %v14069_v56 = vld [vmem:[%s21645_s5 + $0x374] sm:$0xf0]  ;;  %v14051_v46 = vld [vmem:[%s21645_s5 + $0x2e4] sm:$0xf0] }
 0x708   :  { %5849 = vmatmul.bf16.gmra.mxu3 %v22019_v48  ;;  %5898 = vmatmul.bf16.gmra.mxu2 %v22020_v22  ;;  %v12123_v39 = vor.u32 %v14069_v56, %v12122_v26  ;;  %v3802_v38 = vadd.f32 %v18381_v11, %v3433_v59  ;;  %v12115_v56 = vor.u32 %v14067_v41, %v12114_v47  ;;  %v14049_v11 = vld [vmem:[%s21645_s5 + $0x2d4] sm:$0xf0]  ;;  %v12106_v59 = vld [vmem:[%s21645_s5 + $0x350] sm:$0xf] }
 0x709   :  { %4207 = vmatmul.bf16.gmra.mxu0 %v11631_v43  ;;  %v12050_v43 = vld [vmem:[%s21645_s5 + $0x2e0] sm:$0xf]  ;;  %v22023_v48 = vld [vmem:[#allocation61_spill] sm:$0xff] }
 0x70a   :  { %5968 = vmatpush.bf16.msra.mxu2 %v12123_v39  ;;  %v12051_v33 = vor.u32 %v14051_v46, %v12050_v43  ;;  %v13947_v43 = vld [vmem:[%s21731_s30 + $0x8ac] sm:$0xf]  ;;  %v11644_v46 = vld [vmem:[%s21731_s30 + $0x8b8] sm:$0xf0] }
 0x70b   :  { %v5752_v54 = vpop.f32.mrf.mxu3  ;;  %v5801_v5 = vpop.f32.mrf.mxu2 }
 0x70c   :  { %v5753_v44 = vadd.f32 %v5752_v54, %v5704_v14  ;;  %v4348_v14 = vpack.c.bf16 %v4169_v28, %v4169_v28  ;;  %5920 = vmatpush.bf16.msrb.mxu3 %v12051_v33  ;;  %v14065_v28 = vld [vmem:[%s21645_s5 + $0x354] sm:$0xf0] }
 0x70d   :  { %v12107_v47 = vor.u32 %v14065_v28, %v12106_v59  ;;  %v14063_v59 = vld [vmem:[%s21645_s5 + $0x344] sm:$0xf0] }
 0x70e   :  { %v18690_v26 = vadd.f32 %v5801_v5, %v5753_v44  ;;  %v4170_v0 = vpop.f32.mrf.mxu0  ;;  %5969 = vmatpush.bf16.msra.mxu2 %v12115_v56  ;;  %v12043_v5 = vor.u32 %v14049_v11, %v12042_v32  ;;  %v5706_v44 = vadd.f32 %v18403_v40, %v18564_v63  ;;  %v12034_v40 = vld [vmem:[%s21645_s5 + $0x2c0] sm:$0xf]  ;;  %v11647_v11 = vor.u32 %v13947_v43, %v11644_v46  ;;  %v12026_v43 = vld [vmem:[%s21645_s5 + $0x2b0] sm:$0xf]  ;;  %v14045_v46 = vld [vmem:[%s21645_s5 + $0x2b4] sm:$0xf0] }
 0x70f   :  { %v4171_v39 = vadd.f32 %v4170_v0, %v3802_v38  ;;  %v4732_v38 = vunpack.c.l.b16 %v4348_v14  ;;  %v12098_v32 = vld [vmem:[%s21645_s5 + $0x340] sm:$0xf] }
 0x710   :  { %5921 = vmatpush.bf16.msrb.mxu3 %v12043_v5 }
 0x711   :  { %v4349_v54 = vpack.c.bf16 %v4171_v39, %v4171_v39  ;;  %v14047_v39 = vld [vmem:[%s21645_s5 + $0x2c4] sm:$0xf0] }
 0x712   :  { %5970 = vmatpush.bf16.msra.mxu2 %v12107_v47  ;;  %v12035_v14 = vor.u32 %v14047_v39, %v12034_v40  ;;  %v18745_v40 = vpop.f32.mrf.mxu1  ;;  %v22024_v39 = vld [vmem:[#allocation33_spill] sm:$0xff] }
 0x713   :  { %v4733_v33 = vunpack.c.l.b16 %v4349_v54  ;;  %v5754_v41 = vpop.f32.mrf.mxu3  ;;  %v5803_v0 = vpop.f32.mrf.mxu2 }
 0x714   :  { %v5755_v56 = vadd.f32 %v5754_v41, %v5706_v44  ;;  %v12099_v44 = vor.u32 %v14063_v59, %v12098_v32  ;;  %5922 = vmatpush.bf16.msrb.mxu3 %v12035_v14  ;;  %v22022_v41 = vld [vmem:[#allocation56_spill] sm:$0xff]  ;;  %v3438_v32 = vadd.f32 %v18103_v60, %v22024_v39 }
 0x715   :  { %v18724_v54 = vpack.c.b16 %v4733_v33, %v4732_v38  ;;  %v12090_v38 = vld [vmem:[%s21645_s5 + $0x330] sm:$0xf]  ;;  %v14061_v33 = vld [vmem:[%s21645_s5 + $0x334] sm:$0xf0] }
 0x716   :  { %v18726_v5 = vadd.f32 %v5803_v0, %v5755_v56  ;;  %v4173_v28 = vpop.f32.mrf.mxu0  ;;  %5971 = vmatpush.bf16.msra.mxu2 %v12099_v44  ;;  %v5709_v0 = vadd.f32 %v18446_v3, %v18564_v63  ;;  %v12091_v56 = vor.u32 %v14061_v33, %v12090_v38  ;;  %v14043_v44 = vld [vmem:[%s21645_s5 + $0x2a4] sm:$0xf0]  ;;  %v12082_v3 = vld [vmem:[%s21645_s5 + $0x320] sm:$0xf]  ;;  %v13962_v38 = vld [vmem:[%s21645_s5 + $0x24] sm:$0xf] }
 0x717   :  { %v4174_v47 = vadd.f32 %v4173_v28, %v18439_v17  ;;  %v12027_v17 = vor.u32 %v14045_v46, %v12026_v43  ;;  %v3807_v43 = vadd.f32 %v18461_v20, %v3438_v32  ;;  %v14059_v46 = vld [vmem:[%s21645_s5 + $0x324] sm:$0xf0]  ;;  %v12010_v32 = vld [vmem:[%s21645_s5 + $0x290] sm:$0xf] }
 0x718   :  { %5854 = vmatmul.bf16.gmra.mxu3 %v22022_v41  ;;  %5903 = vmatmul.bf16.gmra.mxu2 %v22023_v48  ;;  %v12083_v39 = vor.u32 %v14059_v46, %v12082_v3  ;;  %v13960_v3 = vld [vmem:[%s21645_s5 + $0x14] sm:$0xf]  ;;  %v13951_v46 = vld [vmem:[%s21731_s30 + $0x8cc] sm:$0xf]  ;;  %v14039_v48 = vld [vmem:[%s21645_s5 + $0x284] sm:$0xf0] }
 0x719   :  { %4212 = vmatmul.bf16.gmra.mxu0 %v11647_v11  ;;  %5923 = vmatpush.bf16.msrb.mxu3 %v12027_v17  ;;  %v12018_v11 = vld [vmem:[%s21645_s5 + $0x2a0] sm:$0xf]  ;;  %v11700_v17 = vld [vmem:[%s21645_s5 + $0x28] sm:$0xf0]  ;;  %v4350_v20 = vpack.c.bf16 %v4174_v47, %v4174_v47  ;;  %v14057_v47 = vld [vmem:[%s21645_s5 + $0x314] sm:$0xf0] }
 0x71a   :  { %5972 = vmatpush.bf16.msra.mxu2 %v12091_v56  ;;  %v12019_v60 = vor.u32 %v14043_v44, %v12018_v11  ;;  %v14041_v11 = vld [vmem:[%s21645_s5 + $0x294] sm:$0xf0]  ;;  %v18796_v41 = vpop.f32.mrf.mxu1 }
 0x71b   :  { %v5757_v14 = vpop.f32.mrf.mxu3  ;;  %v5806_v59 = vpop.f32.mrf.mxu2  ;;  %v12011_v44 = vor.u32 %v14041_v11, %v12010_v32 }
 0x71c   :  { %v5758_v28 = vadd.f32 %v5757_v14, %v5709_v0  ;;  %v11703_v14 = vor.u32 %v13962_v38, %v11700_v17  ;;  %v11660_v38 = vld [vmem:[%s21731_s30 + $0x8d8] sm:$0xf0] }
 0x71d   :  { %5924 = vmatpush.bf16.msrb.mxu3 %v12019_v60  ;;  %v5711_v60 = vadd.f32 %v18483_v27, %v18564_v63  ;;  %v12002_v27 = vld [vmem:[%s21645_s5 + $0x280] sm:$0xf] }
 0x71e   :  { %v18768_v33 = vadd.f32 %v5806_v59, %v5758_v28  ;;  %v4175_v0 = vpop.f32.mrf.mxu0  ;;  %6120 = vmatpush.bf16.msra.mxu0 %v11703_v14  ;;  %v12074_v59 = vld [vmem:[%s21645_s5 + $0x310] sm:$0xf]  ;;  %5973 = vmatpush.bf16.msra.mxu2 %v12083_v39  ;;  %v4734_v39 = vunpack.c.l.b16 %v4350_v20  ;;  %v12066_v20 = vld [vmem:[%s21645_s5 + $0x300] sm:$0xf] }
 0x71f   :  { %v4176_v56 = vadd.f32 %v4175_v0, %v3807_v43  ;;  %v11692_v43 = vld [vmem:[%s21645_s5 + $0x18] sm:$0xf0]  ;;  %v12075_v17 = vor.u32 %v14057_v47, %v12074_v59  ;;  %v11663_v59 = vor.u32 %v13951_v46, %v11660_v38  ;;  %v13958_v47 = vld [vmem:[%s21645_s5 + $0x4] sm:$0xf] }
 0x720   :  { %v11695_v0 = vor.u32 %v13960_v3, %v11692_v43  ;;  %v11684_v3 = vld [vmem:[%s21645_s5 + $0x8] sm:$0xf0] }
 0x721   :  { %v4351_v28 = vpack.c.bf16 %v4176_v56, %v4176_v56  ;;  %5925 = vmatpush.bf16.msrb.mxu3 %v12011_v44  ;;  %v14055_v44 = vld [vmem:[%s21645_s5 + $0x304] sm:$0xf0]  ;;  %v11687_v38 = vor.u32 %v13958_v47, %v11684_v3  ;;  %v12202_v3 = vld [vmem:[%s21645_s5 + $0x410] sm:$0xf] }
 0x722   :  { %6121 = vmatpush.bf16.msra.mxu0 %v11695_v0  ;;  %5974 = vmatpush.bf16.msra.mxu2 %v12075_v17  ;;  %v12067_v46 = vor.u32 %v14055_v44, %v12066_v20  ;;  %v22026_v17 = vld [vmem:[#allocation58_spill] sm:$0xff]  ;;  %v3821_v47 = vpop.f32.mrf.mxu1 }
 0x723   :  { %v4735_v14 = vunpack.c.l.b16 %v4351_v28  ;;  %v5759_v56 = vpop.f32.mrf.mxu3  ;;  %v5808_v32 = vpop.f32.mrf.mxu2  ;;  %v12003_v28 = vor.u32 %v14039_v48, %v12002_v27 }
 0x724   :  { %v5760_v11 = vadd.f32 %v5759_v56, %v5711_v60  ;;  %v5714_v56 = vadd.f32 %v18514_v58, %v18564_v63 }
 0x725   :  { %v18816_v43 = vpack.c.b16 %v4735_v14, %v4734_v39  ;;  %5926 = vmatpush.bf16.msrb.mxu3 %v12003_v28  ;;  %v12210_v39 = vld [vmem:[%s21645_s5 + $0x420] sm:$0xf]  ;;  %v14091_v14 = vld [vmem:[%s21645_s5 + $0x424] sm:$0xf0] }
 0x726   :  { %v18818_v60 = vadd.f32 %v5808_v32, %v5760_v11  ;;  %v4178_v0 = vpop.f32.mrf.mxu0  ;;  %5975 = vmatpush.bf16.msra.mxu2 %v12067_v46  ;;  %6122 = vmatpush.bf16.msra.mxu0 %v11687_v38  ;;  %v12211_v20 = vor.u32 %v14091_v14, %v12210_v39  ;;  %v11676_v14 = vld [vmem:[%s21731_s30 + $0x8f8] sm:$0xf0] }
 0x727   :  { %22025 = vst [vmem:[#allocation42_spill] sm:$0xff] %v18816_v43  ;;  %v4179_v48 = vadd.f32 %v4178_v0, %v18510_v45  ;;  %v22027_v45 = vld [vmem:[#allocation46_spill] sm:$0xff] }
 0x728   :  { %5859 = vmatmul.bf16.gmra.mxu3 %v22026_v17  ;;  %5908 = vmatmul.bf16.gmra.mxu2 %v17773_v2  ;;  %v3443_v32 = vadd.f32 %v18154_v15, %v22027_v45  ;;  %v14089_v0 = vld [vmem:[%s21645_s5 + $0x414] sm:$0xf0]  ;;  %v12194_v45 = vld [vmem:[%s21645_s5 + $0x400] sm:$0xf] }
 0x729   :  { %4217 = vmatmul.bf16.gmra.mxu0 %v11663_v59  ;;  %6071 = vmatpush.bf16.msra.mxu1 %v12211_v20  ;;  %v4352_v15 = vpack.c.bf16 %v4179_v48, %v4179_v48  ;;  %v12203_v38 = vor.u32 %v14089_v0, %v12202_v3  ;;  %v14087_v48 = vld [vmem:[%s21645_s5 + $0x404] sm:$0xf0] }
 0x72a   :  { %v3812_v28 = vadd.f32 %v18517_v36, %v3443_v32  ;;  %v13955_v36 = vld [vmem:[%s21731_s30 + $0x8ec] sm:$0xf]  ;;  %v3824_v17 = vpop.f32.mrf.mxu1 }
 0x72b   :  { %v5762_v11 = vpop.f32.mrf.mxu3  ;;  %v5811_v27 = vpop.f32.mrf.mxu2  ;;  %v4736_v32 = vunpack.c.l.b16 %v4352_v15  ;;  %v5719_v15 = vadd.f32 %v18546_v25, %v18564_v63 }
 0x72c   :  { %v5763_v59 = vadd.f32 %v5762_v11, %v5714_v56  ;;  %v5716_v56 = vadd.f32 %v18527_v16, %v18564_v63 }
 0x72d   :  { %6072 = vmatpush.bf16.msra.mxu1 %v12203_v38  ;;  %v22028_v38 = vld [vmem:[#allocation59_spill] sm:$0xff] }
 0x72e   :  { %v18834_v58 = vadd.f32 %v5811_v27, %v5763_v59  ;;  %v4180_v44 = vpop.f32.mrf.mxu0  ;;  %v12195_v59 = vor.u32 %v14087_v48, %v12194_v45 }
 0x72f   :  { %v4181_v46 = vadd.f32 %v4180_v44, %v3812_v28  ;;  %v11679_v44 = vor.u32 %v13955_v36, %v11676_v14 }
 0x731   :  { %v4353_v39 = vpack.c.bf16 %v4181_v46, %v4181_v46  ;;  %6073 = vmatpush.bf16.msra.mxu1 %v12195_v59 }
 0x732   :  { %v3826_v59 = vpop.f32.mrf.mxu1 }
 0x733   :  { %v4737_v11 = vunpack.c.l.b16 %v4353_v39  ;;  %v5764_v27 = vpop.f32.mrf.mxu3  ;;  %v5813_v20 = vpop.f32.mrf.mxu2  ;;  %v3448_v39 = vadd.f32 %v18187_v6, %v17813_v30 }
 0x734   :  { %v5765_v28 = vadd.f32 %v5764_v27, %v5716_v56 }
 0x735   :  { %v18856_v16 = vpack.c.b16 %v4737_v11, %v4736_v32  ;;  %v3817_v45 = vadd.f32 %v18745_v40, %v3448_v39  ;;  %v3451_v39 = vadd.f32 %v18204_v42, %v17831_v37 }
 0x736   :  { %v18858_v3 = vadd.f32 %v5813_v20, %v5765_v28  ;;  %v4183_v0 = vpop.f32.mrf.mxu0  ;;  %v5721_v20 = vadd.f32 %v18560_v13, %v18564_v63  ;;  %v22030_v63 = vld [vmem:[#allocation10_spill] sm:$0xff] }
 0x737   :  { %v4184_v46 = vadd.f32 %v4183_v0, %v18542_v61  ;;  %v3820_v13 = vadd.f32 %v18796_v41, %v3451_v39 }
 0x738   :  { %5864 = vmatmul.bf16.gmra.mxu3 %v22028_v38  ;;  %5913 = vmatmul.bf16.gmra.mxu2 %v17823_v50 }
 0x739   :  { %4222 = vmatmul.bf16.gmra.mxu0 %v11679_v44  ;;  %v4354_v32 = vpack.c.bf16 %v4184_v46, %v4184_v46  ;;  %v22029_v46 = vld [vmem:[#allocation49_spill] sm:$0xff] }
 0x73b   :  { %v5767_v36 = vpop.f32.mrf.mxu3  ;;  %v5816_v56 = vpop.f32.mrf.mxu2  ;;  %v4738_v28 = vunpack.c.l.b16 %v4354_v32 }
 0x73c   :  { %v5768_v14 = vadd.f32 %v5767_v36, %v5719_v15  ;;  %v22031_v36 = vld [vmem:[#allocation48_spill] sm:$0xff] }
 0x73e   :  { %v18868_v48 = vadd.f32 %v5816_v56, %v5768_v14  ;;  %v4185_v61 = vpop.f32.mrf.mxu0  ;;  %v3453_v56 = vadd.f32 %v18231_v1, %v22031_v36 }
 0x73f   :  { %v4186_v11 = vadd.f32 %v4185_v61, %v3817_v45 }
 0x741   :  { %v4355_v27 = vpack.c.bf16 %v4186_v11, %v4186_v11  ;;  %v3829_v11 = vpop.f32.mrf.mxu1 }
 0x743   :  { %v4739_v25 = vunpack.c.l.b16 %v4355_v27  ;;  %v5769_v44 = vpop.f32.mrf.mxu3  ;;  %v5818_v0 = vpop.f32.mrf.mxu2  ;;  %v3822_v27 = vadd.f32 %v3821_v47, %v3453_v56  ;;  %v22033_v47 = vld [vmem:[#allocation9_spill] sm:$0xff] }
 0x744   :  { %v5770_v30 = vadd.f32 %v5769_v44, %v5721_v20  ;;  %v22034_v56 = vld [vmem:[#allocation65_spill] sm:$0xff] }
 0x745   :  { %v18872_v6 = vpack.c.b16 %v4739_v25, %v4738_v28 }
 0x746   :  { %v18874_v15 = vadd.f32 %v5818_v0, %v5770_v30  ;;  %v4188_v40 = vpop.f32.mrf.mxu0 }
 0x747   :  { %v4189_v14 = vadd.f32 %v4188_v40, %v3820_v13 }
 0x748   :  { %5927 = vmatmul.bf16.vlgmr.msrb.gmra.mxu3 %v22029_v46  ;;  %5976 = vmatmul.bf16.vlgmr.msra.gmra.mxu2 %v18241_v23 }
 0x749   :  { %6123 = vmatmul.bf16.vlgmr.msra.gmra.mxu0 %v22030_v63  ;;  %v4356_v42 = vpack.c.bf16 %v4189_v14, %v4189_v14  ;;  %v22032_v63 = vld [vmem:[#allocation63_spill] sm:$0xff]  ;;  %v22035_v14 = vld [vmem:[#allocation74_spill] sm:$0xff] }
 0x74a   :  { %v3456_v36 = vadd.f32 %v22033_v47, %v22032_v63 }
 0x74b   :  { %v5830_v45 = vpop.f32.mrf.mxu3  ;;  %v5879_v61 = vpop.f32.mrf.mxu2  ;;  %v4772_v44 = vunpack.c.l.b16 %v4356_v42 }
 0x74c   :  { %v5831_v32 = vadd.f32 %v5830_v45, %v18571_v34  ;;  %v3831_v34 = vpop.f32.mrf.mxu1  ;;  %v3825_v45 = vadd.f32 %v3824_v17, %v3456_v36 }
 0x74e   :  { %v18885_v20 = vadd.f32 %v5879_v61, %v5831_v32  ;;  %v4190_v37 = vpop.f32.mrf.mxu0  ;;  %v22036_v61 = vld [vmem:[#allocation13_spill] sm:$0xff]  ;;  %v22037_v32 = vld [vmem:[#allocation64_spill] sm:$0xff] }
 0x74f   :  { %v4191_v28 = vadd.f32 %v4190_v37, %v3822_v27 }
 0x751   :  { %v4357_v25 = vpack.c.bf16 %v4191_v28, %v4191_v28 }
 0x753   :  { %v4773_v41 = vunpack.c.l.b16 %v4357_v25  ;;  %v5832_v0 = vpop.f32.mrf.mxu3  ;;  %v5881_v30 = vpop.f32.mrf.mxu2 }
 0x754   :  { %v5833_v39 = vadd.f32 %v5832_v0, %v18584_v12  ;;  %v22038_v12 = vld [vmem:[#allocation73_spill] sm:$0xff]  ;;  %v3834_v63 = vpop.f32.mrf.mxu1 }
 0x755   :  { %v18888_v1 = vpack.c.b16 %v4773_v41, %v4772_v44  ;;  %v3458_v27 = vadd.f32 %v22038_v12, %v22037_v32 }
 0x756   :  { %v18890_v40 = vadd.f32 %v5881_v30, %v5833_v39  ;;  %v4193_v13 = vpop.f32.mrf.mxu0 }
 0x757   :  { %6074 = vmatmul.bf16.vlgmr.msra.gmra.mxu1 %v18888_v1  ;;  %v4194_v37 = vadd.f32 %v4193_v13, %v3825_v45  ;;  %v3827_v44 = vadd.f32 %v3826_v59, %v3458_v27  ;;  %v22041_v59 = vld [vmem:[#allocation75_spill] sm:$0xff] }
 0x758   :  { %5932 = vmatmul.bf16.gmra.mxu3 %v22034_v56  ;;  %5981 = vmatmul.bf16.gmra.mxu2 %v22035_v14  ;;  %v22042_v27 = vld [vmem:[#allocation67_spill] sm:$0xff] }
 0x759   :  { %6128 = vmatmul.bf16.gmra.mxu0 %v22036_v61  ;;  %v4358_v30 = vpack.c.bf16 %v4194_v37, %v4194_v37  ;;  %v22043_v37 = vld [vmem:[#allocation76_spill] sm:$0xff] }
 0x75b   :  { %v5835_v42 = vpop.f32.mrf.mxu3  ;;  %v5884_v28 = vpop.f32.mrf.mxu2  ;;  %v4774_v14 = vunpack.c.l.b16 %v4358_v30 }
 0x75c   :  { %v5836_v25 = vadd.f32 %v5835_v42, %v18603_v18  ;;  %v22040_v18 = vld [vmem:[#allocation66_spill] sm:$0xff] }
 0x75d   :  { %v3461_v12 = vadd.f32 %v22041_v59, %v22040_v18 }
 0x75e   :  { %v18901_v41 = vadd.f32 %v5884_v28, %v5836_v25  ;;  %v4195_v0 = vpop.f32.mrf.mxu0  ;;  %v22044_v28 = vld [vmem:[#allocation15_spill] sm:$0xff]  ;;  %v3836_v25 = vpop.f32.mrf.mxu1 }
 0x75f   :  { %v4196_v39 = vadd.f32 %v4195_v0, %v3827_v44  ;;  %v3830_v42 = vadd.f32 %v3829_v11, %v3461_v12  ;;  %v22045_v44 = vld [vmem:[#allocation23_spill] sm:$0xff] }
 0x761   :  { %v4359_v47 = vpack.c.bf16 %v4196_v39, %v4196_v39 }
 0x763   :  { %v4775_v17 = vunpack.c.l.b16 %v4359_v47  ;;  %v5837_v36 = vpop.f32.mrf.mxu3  ;;  %v5886_v61 = vpop.f32.mrf.mxu2 }
 0x764   :  { %v5838_v23 = vadd.f32 %v5837_v36, %v18616_v21  ;;  %v22046_v21 = vld [vmem:[#allocation12_spill] sm:$0xff] }
 0x765   :  { %v18904_v32 = vpack.c.b16 %v4775_v17, %v4774_v14  ;;  %v3463_v14 = vadd.f32 %v22046_v21, %v22045_v44 }
 0x766   :  { %v18906_v13 = vadd.f32 %v5886_v61, %v5838_v23  ;;  %v4198_v45 = vpop.f32.mrf.mxu0 }
 0x767   :  { %22039 = vst [vmem:[#allocation53_spill] sm:$0xff] %v18904_v32  ;;  %6079 = vmatmul.bf16.gmra.mxu1 %v18904_v32  ;;  %v4199_v0 = vadd.f32 %v4198_v45, %v3830_v42  ;;  %v3832_v47 = vadd.f32 %v3831_v34, %v3463_v14  ;;  %v3839_v32 = vpop.f32.mrf.mxu1  ;;  %v22048_v34 = vld [vmem:[#allocation14_spill] sm:$0xff]  ;;  %v22049_v14 = vld [vmem:[#allocation68_spill] sm:$0xff] }
 0x768   :  { %5937 = vmatmul.bf16.gmra.mxu3 %v22042_v27  ;;  %5986 = vmatmul.bf16.gmra.mxu2 %v22043_v37 }
 0x769   :  { %6133 = vmatmul.bf16.gmra.mxu0 %v22044_v28  ;;  %v4360_v61 = vpack.c.bf16 %v4199_v0, %v4199_v0  ;;  %v22050_v0 = vld [vmem:[#allocation77_spill] sm:$0xff] }
 0x76b   :  { %v5840_v23 = vpop.f32.mrf.mxu3  ;;  %v5889_v30 = vpop.f32.mrf.mxu2  ;;  %v4776_v37 = vunpack.c.l.b16 %v4360_v61 }
 0x76c   :  { %v5841_v39 = vadd.f32 %v5840_v23, %v18623_v31  ;;  %v22047_v31 = vld [vmem:[#allocation38_spill] sm:$0xff] }
 0x76d   :  { %v3466_v21 = vadd.f32 %v22048_v34, %v22047_v31 }
 0x76e   :  { %v18917_v17 = vadd.f32 %v5889_v30, %v5841_v39  ;;  %v4200_v36 = vpop.f32.mrf.mxu0  ;;  %v22051_v30 = vld [vmem:[#allocation17_spill] sm:$0xff]  ;;  %v22052_v39 = vld [vmem:[#allocation26_spill] sm:$0xff] }
 0x76f   :  { %v4201_v18 = vadd.f32 %v4200_v36, %v3832_v47  ;;  %v3835_v23 = vadd.f32 %v3834_v63, %v3466_v21 }
 0x771   :  { %v4361_v59 = vpack.c.bf16 %v4201_v18, %v4201_v18 }
 0x773   :  { %v4777_v11 = vunpack.c.l.b16 %v4361_v59  ;;  %v5842_v12 = vpop.f32.mrf.mxu3  ;;  %v5891_v28 = vpop.f32.mrf.mxu2 }
 0x774   :  { %v5843_v27 = vadd.f32 %v5842_v12, %v18636_v55  ;;  %v22053_v55 = vld [vmem:[#allocation43_spill] sm:$0xff]  ;;  %v3841_v12 = vpop.f32.mrf.mxu1 }
 0x775   :  { %v18920_v44 = vpack.c.b16 %v4777_v11, %v4776_v37  ;;  %v3468_v47 = vadd.f32 %v22053_v55, %v22052_v39 }
 0x776   :  { %v18922_v45 = vadd.f32 %v5891_v28, %v5843_v27  ;;  %v4203_v42 = vpop.f32.mrf.mxu0 }
 0x777   :  { %6084 = vmatmul.bf16.gmra.mxu1 %v18920_v44  ;;  %v4204_v37 = vadd.f32 %v4203_v42, %v3835_v23  ;;  %v3837_v18 = vadd.f32 %v3836_v25, %v3468_v47  ;;  %v22055_v25 = vld [vmem:[#allocation78_spill] sm:$0xff]  ;;  %v22056_v47 = vld [vmem:[#allocation69_spill] sm:$0xff] }
 0x778   :  { %5942 = vmatmul.bf16.gmra.mxu3 %v22049_v14  ;;  %5991 = vmatmul.bf16.gmra.mxu2 %v22050_v0 }
 0x779   :  { %6138 = vmatmul.bf16.gmra.mxu0 %v22051_v30  ;;  %v4362_v28 = vpack.c.bf16 %v4204_v37, %v4204_v37  ;;  %v22057_v37 = vld [vmem:[#allocation80_spill] sm:$0xff] }
 0x77b   :  { %v5845_v36 = vpop.f32.mrf.mxu3  ;;  %v5894_v27 = vpop.f32.mrf.mxu2  ;;  %v4778_v0 = vunpack.c.l.b16 %v4362_v28  ;;  %v14036_v28 = vld [vmem:[%s21645_s5 + $0x274] sm:$0xf] }
 0x77c   :  { %v5846_v61 = vadd.f32 %v5845_v36, %v18643_v4  ;;  %v22054_v4 = vld [vmem:[#allocation39_spill] sm:$0xff]  ;;  %v18945_v36 = vpop.f32.mrf.mxu1 }
 0x77d   :  { %v3471_v55 = vadd.f32 %v22055_v25, %v22054_v4 }
 0x77e   :  { %v18933_v59 = vadd.f32 %v5894_v27, %v5846_v61  ;;  %v4205_v11 = vpop.f32.mrf.mxu0  ;;  %v22058_v61 = vld [vmem:[#allocation20_spill] sm:$0xff] }
 0x77f   :  { %v4206_v31 = vadd.f32 %v4205_v11, %v3837_v18  ;;  %v3840_v27 = vadd.f32 %v3839_v32, %v3471_v55  ;;  %v11804_v11 = vld [vmem:[%s21645_s5 + $0xf8] sm:$0xf0] }
 0x781   :  { %v4363_v34 = vpack.c.bf16 %v4206_v31, %v4206_v31  ;;  %v11996_v31 = vld [vmem:[%s21645_s5 + $0x278] sm:$0xf0] }
 0x783   :  { %v4779_v63 = vunpack.c.l.b16 %v4363_v34  ;;  %v5847_v21 = vpop.f32.mrf.mxu3  ;;  %v5896_v30 = vpop.f32.mrf.mxu2 }
 0x784   :  { %v5848_v14 = vadd.f32 %v5847_v21, %v18656_v51  ;;  %v12186_v51 = vld [vmem:[%s21645_s5 + $0x3f0] sm:$0xf]  ;;  %v22059_v21 = vld [vmem:[#allocation19_spill] sm:$0xff] }
 0x785   :  { %v18936_v39 = vpack.c.b16 %v4779_v63, %v4778_v0  ;;  %v13988_v0 = vld [vmem:[%s21645_s5 + $0xf4] sm:$0xf]  ;;  %v11999_v63 = vor.u32 %v14036_v28, %v11996_v31 }
 0x786   :  { %v18938_v42 = vadd.f32 %v5896_v30, %v5848_v14  ;;  %v4208_v23 = vpop.f32.mrf.mxu0  ;;  %v14085_v14 = vld [vmem:[%s21645_s5 + $0x3f4] sm:$0xf0]  ;;  %v11807_v34 = vor.u32 %v13988_v0, %v11804_v11  ;;  %v22060_v30 = vld [vmem:[#allocation79_spill] sm:$0xff]  ;;  %v11988_v11 = vld [vmem:[%s21645_s5 + $0x268] sm:$0xf0] }
 0x787   :  { %6089 = vmatmul.bf16.gmra.mxu1 %v18936_v39  ;;  %v12187_v18 = vor.u32 %v14085_v14, %v12186_v51  ;;  %v3473_v32 = vadd.f32 %v22060_v30, %v22059_v21  ;;  %v4209_v4 = vadd.f32 %v4208_v23, %v3840_v27  ;;  %6311 = vmatpush.bf16.msrb.mxu0 %v11999_v63  ;;  %v12178_v14 = vld [vmem:[%s21645_s5 + $0x3e0] sm:$0xf]  ;;  %v14083_v0 = vld [vmem:[%s21645_s5 + $0x3e4] sm:$0xf0]  ;;  %v12170_v30 = vld [vmem:[%s21645_s5 + $0x3d0] sm:$0xf] }
 0x788   :  { %5947 = vmatmul.bf16.gmra.mxu3 %v22056_v47  ;;  %5996 = vmatmul.bf16.gmra.mxu2 %v22057_v37  ;;  %v12179_v27 = vor.u32 %v14083_v0, %v12178_v14  ;;  %v14032_v14 = vld [vmem:[%s21645_s5 + $0x254] sm:$0xf]  ;;  %v11980_v0 = vld [vmem:[%s21645_s5 + $0x258] sm:$0xf0] }
 0x789   :  { %6143 = vmatmul.bf16.gmra.mxu0 %v22058_v61  ;;  %6017 = vmatpush.bf16.msra.mxu3 %v12187_v18  ;;  %v13986_v61 = vld [vmem:[%s21645_s5 + $0xe4] sm:$0xf]  ;;  %v3842_v23 = vadd.f32 %v3841_v12, %v3473_v32  ;;  %v4364_v21 = vpack.c.bf16 %v4209_v4, %v4209_v4  ;;  %v14081_v32 = vld [vmem:[%s21645_s5 + $0x3d4] sm:$0xf0]  ;;  %v11788_v4 = vld [vmem:[%s21645_s5 + $0xd8] sm:$0xf0] }
 0x78a   :  { %6164 = vmatpush.bf16.msrb.mxu2 %v11807_v34  ;;  %v14034_v18 = vld [vmem:[%s21645_s5 + $0x264] sm:$0xf] }
 0x78b   :  { %v5850_v25 = vpop.f32.mrf.mxu3  ;;  %v5899_v55 = vpop.f32.mrf.mxu2  ;;  %v11991_v63 = vor.u32 %v14034_v18, %v11988_v11 }
 0x78c   :  { %v5851_v51 = vadd.f32 %v5850_v25, %v18690_v26  ;;  %v11796_v26 = vld [vmem:[%s21645_s5 + $0xe8] sm:$0xf0]  ;;  %v13984_v25 = vld [vmem:[%s21645_s5 + $0xd4] sm:$0xf] }
 0x78d   :  { %v11799_v34 = vor.u32 %v13986_v61, %v11796_v26  ;;  %6018 = vmatpush.bf16.msra.mxu3 %v12179_v27  ;;  %6312 = vmatpush.bf16.msrb.mxu0 %v11991_v63  ;;  %v3846_v61 = vpop.f32.mrf.mxu1  ;;  %v11983_v27 = vor.u32 %v14032_v14, %v11980_v0  ;;  %v4780_v26 = vunpack.c.l.b16 %v4364_v21  ;;  %v12162_v63 = vld [vmem:[%s21645_s5 + $0x3c0] sm:$0xf]  ;;  %v13982_v21 = vld [vmem:[%s21645_s5 + $0xc4] sm:$0xf] }
 0x78e   :  { %v18987_v28 = vadd.f32 %v5899_v55, %v5851_v51  ;;  %v4210_v31 = vpop.f32.mrf.mxu0  ;;  %v12171_v51 = vor.u32 %v14081_v32, %v12170_v30 }
 0x78f   :  { %v4211_v12 = vadd.f32 %v4210_v31, %v3842_v23  ;;  %6165 = vmatpush.bf16.msrb.mxu2 %v11799_v34  ;;  %v11791_v23 = vor.u32 %v13984_v25, %v11788_v4  ;;  %v14030_v25 = vld [vmem:[%s21645_s5 + $0x244] sm:$0xf] }
 0x791   :  { %v4365_v55 = vpack.c.bf16 %v4211_v12, %v4211_v12  ;;  %6019 = vmatpush.bf16.msra.mxu3 %v12171_v51  ;;  %6313 = vmatpush.bf16.msrb.mxu0 %v11983_v27  ;;  %v14079_v12 = vld [vmem:[%s21645_s5 + $0x3c4] sm:$0xf0]  ;;  %v11932_v27 = vld [vmem:[%s21645_s5 + $0x1f8] sm:$0xf0] }
 0x792   :  { %v12163_v32 = vor.u32 %v14079_v12, %v12162_v63  ;;  %v14077_v12 = vld [vmem:[%s21645_s5 + $0x3b4] sm:$0xf0] }
 0x793   :  { %v4781_v18 = vunpack.c.l.b16 %v4365_v55  ;;  %v5852_v11 = vpop.f32.mrf.mxu3  ;;  %v5901_v31 = vpop.f32.mrf.mxu2  ;;  %6166 = vmatpush.bf16.msrb.mxu2 %v11791_v23  ;;  %v11972_v55 = vld [vmem:[%s21645_s5 + $0x248] sm:$0xf0]  ;;  %v14020_v23 = vld [vmem:[%s21645_s5 + $0x1f4] sm:$0xf] }
 0x794   :  { %v5853_v34 = vadd.f32 %v5852_v11, %v18726_v5  ;;  %v11780_v5 = vld [vmem:[%s21645_s5 + $0xc8] sm:$0xf0]  ;;  %v11975_v0 = vor.u32 %v14030_v25, %v11972_v55  ;;  %v11935_v63 = vor.u32 %v14020_v23, %v11932_v27  ;;  %v11772_v55 = vld [vmem:[%s21645_s5 + $0xb8] sm:$0xf0]  ;;  %v14028_v23 = vld [vmem:[%s21645_s5 + $0x234] sm:$0xf] }
 0x795   :  { %v19017_v30 = vpack.c.b16 %v4781_v18, %v4780_v26  ;;  %v11783_v14 = vor.u32 %v13982_v21, %v11780_v5  ;;  %v22061_v26 = vld [vmem:[#allocation40_spill] sm:$0xff]  ;;  %v22062_v18 = vld [vmem:[#allocation81_spill] sm:$0xff]  ;;  %6020 = vmatpush.bf16.msra.mxu3 %v12163_v32  ;;  %v22064_v32 = vld [vmem:[#allocation34_spill] sm:$0xff] }
 0x796   :  { %v19028_v51 = vadd.f32 %v5901_v31, %v5853_v34  ;;  %v4213_v4 = vpop.f32.mrf.mxu0  ;;  %v3476_v11 = vadd.f32 %v22062_v18, %v22061_v26  ;;  %v22063_v31 = vld [vmem:[#allocation70_spill] sm:$0xff]  ;;  %v12154_v34 = vld [vmem:[%s21645_s5 + $0x3b0] sm:$0xf]  ;;  %v13980_v21 = vld [vmem:[%s21645_s5 + $0xb4] sm:$0xf]  ;;  %6314 = vmatpush.bf16.msrb.mxu0 %v11975_v0  ;;  %6262 = vmatpush.bf16.msrb.mxu1 %v11935_v63  ;;  %v19070_v63 = vpop.f32.mrf.mxu1 }
 0x797   :  { %6094 = vmatmul.bf16.gmra.mxu1 %v19017_v30  ;;  %6167 = vmatpush.bf16.msrb.mxu2 %v11783_v14  ;;  %v12155_v25 = vor.u32 %v14077_v12, %v12154_v34  ;;  %v11964_v27 = vld [vmem:[%s21645_s5 + $0x238] sm:$0xf0]  ;;  %v11775_v26 = vor.u32 %v13980_v21, %v11772_v55  ;;  %v14018_v14 = vld [vmem:[%s21645_s5 + $0x1e4] sm:$0xf]  ;;  %v11924_v18 = vld [vmem:[%s21645_s5 + $0x1e8] sm:$0xf0] }
 0x798   :  { %5952 = vmatmul.bf16.gmra.mxu3 %v22063_v31  ;;  %6001 = vmatmul.bf16.gmra.mxu2 %v18503_v8  ;;  %v3845_v5 = vadd.f32 %v18945_v36, %v3476_v11  ;;  %v11967_v36 = vor.u32 %v14028_v23, %v11964_v27  ;;  %v22065_v11 = vld [vmem:[#allocation55_spill] sm:$0xff]  ;;  %v22066_v34 = vld [vmem:[#allocation82_spill] sm:$0xff]  ;;  %v11927_v31 = vor.u32 %v14018_v14, %v11924_v18  ;;  %v11956_v23 = vld [vmem:[%s21645_s5 + $0x228] sm:$0xf0] }
 0x799   :  { %6148 = vmatmul.bf16.gmra.mxu0 %v22064_v32  ;;  %v3478_v12 = vadd.f32 %v22066_v34, %v22065_v11  ;;  %6021 = vmatpush.bf16.msra.mxu3 %v12155_v25  ;;  %v12146_v21 = vld [vmem:[%s21645_s5 + $0x3a0] sm:$0xf]  ;;  %v14075_v55 = vld [vmem:[%s21645_s5 + $0x3a4] sm:$0xf0]  ;;  %v14016_v18 = vld [vmem:[%s21645_s5 + $0x1d4] sm:$0xf] }
 0x79a   :  { %v4214_v32 = vadd.f32 %v4213_v4, %v3845_v5  ;;  %v13978_v4 = vld [vmem:[%s21645_s5 + $0xa4] sm:$0xf]  ;;  %v12147_v25 = vor.u32 %v14075_v55, %v12146_v21  ;;  %6315 = vmatpush.bf16.msrb.mxu0 %v11967_v36  ;;  %6263 = vmatpush.bf16.msrb.mxu1 %v11927_v31  ;;  %v11916_v11 = vld [vmem:[%s21645_s5 + $0x1d8] sm:$0xf0]  ;;  %v14073_v31 = vld [vmem:[%s21645_s5 + $0x394] sm:$0xf0] }
 0x79b   :  { %v5855_v8 = vpop.f32.mrf.mxu3  ;;  %v5904_v37 = vpop.f32.mrf.mxu2  ;;  %v3847_v5 = vadd.f32 %v3846_v61, %v3478_v12  ;;  %6168 = vmatpush.bf16.msrb.mxu2 %v11775_v26  ;;  %v11919_v21 = vor.u32 %v14016_v18, %v11916_v11  ;;  %v13976_v36 = vld [vmem:[%s21645_s5 + $0x94] sm:$0xf] }
 0x79c   :  { %v5856_v0 = vadd.f32 %v5855_v8, %v18768_v33  ;;  %v11764_v8 = vld [vmem:[%s21645_s5 + $0xa8] sm:$0xf0]  ;;  %v14026_v33 = vld [vmem:[%s21645_s5 + $0x224] sm:$0xf]  ;;  %v4366_v34 = vpack.c.bf16 %v4214_v32, %v4214_v32  ;;  %v11756_v32 = vld [vmem:[%s21645_s5 + $0x98] sm:$0xf0] }
 0x79d   :  { %v11767_v61 = vor.u32 %v13978_v4, %v11764_v8  ;;  %v11959_v26 = vor.u32 %v14026_v33, %v11956_v23  ;;  %6022 = vmatpush.bf16.msra.mxu3 %v12147_v25  ;;  %v14024_v4 = vld [vmem:[%s21645_s5 + $0x214] sm:$0xf]  ;;  %v11759_v25 = vor.u32 %v13976_v36, %v11756_v32  ;;  %v14014_v33 = vld [vmem:[%s21645_s5 + $0x1c4] sm:$0xf]  ;;  %v11908_v23 = vld [vmem:[%s21645_s5 + $0x1c8] sm:$0xf0] }
 0x79e   :  { %v19090_v27 = vadd.f32 %v5904_v37, %v5856_v0  ;;  %v4215_v14 = vpop.f32.mrf.mxu0  ;;  %v12138_v37 = vld [vmem:[%s21645_s5 + $0x390] sm:$0xf]  ;;  %6264 = vmatpush.bf16.msrb.mxu1 %v11919_v21  ;;  %v14071_v21 = vld [vmem:[%s21645_s5 + $0x384] sm:$0xf0] }
 0x79f   :  { %v4216_v12 = vadd.f32 %v4215_v14, %v3847_v5  ;;  %6169 = vmatpush.bf16.msrb.mxu2 %v11767_v61  ;;  %v12139_v55 = vor.u32 %v14073_v31, %v12138_v37  ;;  %v11948_v5 = vld [vmem:[%s21645_s5 + $0x218] sm:$0xf0]  ;;  %6316 = vmatpush.bf16.msrb.mxu0 %v11959_v26  ;;  %v4782_v14 = vunpack.c.l.b16 %v4366_v34  ;;  %v12130_v26 = vld [vmem:[%s21645_s5 + $0x380] sm:$0xf]  ;;  %v13974_v31 = vld [vmem:[%s21645_s5 + $0x84] sm:$0xf] }
 0x7a0   :  { %v11951_v8 = vor.u32 %v14024_v4, %v11948_v5  ;;  %v12131_v36 = vor.u32 %v14071_v21, %v12130_v26  ;;  %v3851_v5 = vpop.f32.mrf.mxu1  ;;  %v14010_v26 = vld [vmem:[%s21645_s5 + $0x1a4] sm:$0xf]  ;;  %v22071_v21 = vld [vmem:[#allocation32_spill] sm:$0xff] }
 0x7a1   :  { %v4367_v0 = vpack.c.bf16 %v4216_v12, %v4216_v12  ;;  %6023 = vmatpush.bf16.msra.mxu3 %v12139_v55  ;;  %v11911_v12 = vor.u32 %v14014_v33, %v11908_v23  ;;  %v11940_v55 = vld [vmem:[%s21645_s5 + $0x208] sm:$0xf0]  ;;  %v14012_v23 = vld [vmem:[%s21645_s5 + $0x1b4] sm:$0xf] }
 0x7a3   :  { %v4783_v61 = vunpack.c.l.b16 %v4367_v0  ;;  %v5857_v18 = vpop.f32.mrf.mxu3  ;;  %v5906_v11 = vpop.f32.mrf.mxu2  ;;  %6170 = vmatpush.bf16.msrb.mxu2 %v11759_v25  ;;  %v14022_v0 = vld [vmem:[%s21645_s5 + $0x204] sm:$0xf]  ;;  %6317 = vmatpush.bf16.msrb.mxu0 %v11951_v8 }
 0x7a4   :  { %v5858_v37 = vadd.f32 %v5857_v18, %v18818_v60  ;;  %v11748_v60 = vld [vmem:[%s21645_s5 + $0x88] sm:$0xf0]  ;;  %6265 = vmatpush.bf16.msrb.mxu1 %v11911_v12  ;;  %v11943_v33 = vor.u32 %v14022_v0, %v11940_v55  ;;  %v22070_v12 = vld [vmem:[#allocation35_spill] sm:$0xff] }
 0x7a5   :  { %v19132_v34 = vpack.c.b16 %v4783_v61, %v4782_v14  ;;  %v11751_v25 = vor.u32 %v13974_v31, %v11748_v60  ;;  %v11900_v14 = vld [vmem:[%s21645_s5 + $0x1b8] sm:$0xf0]  ;;  %v22068_v61 = vld [vmem:[#allocation57_spill] sm:$0xff]  ;;  %6024 = vmatpush.bf16.msra.mxu3 %v12131_v36  ;;  %v3483_v31 = vadd.f32 %v18525_v53, %v22071_v21 }
 0x7a6   :  { %v19143_v32 = vadd.f32 %v5906_v11, %v5858_v37  ;;  %v4218_v4 = vpop.f32.mrf.mxu0  ;;  %v3481_v18 = vadd.f32 %v18512_v57, %v22068_v61  ;;  %v11903_v11 = vor.u32 %v14012_v23, %v11900_v14  ;;  %v22069_v37 = vld [vmem:[#allocation71_spill] sm:$0xff]  ;;  %v11892_v57 = vld [vmem:[%s21645_s5 + $0x1a8] sm:$0xf0]  ;;  %v14008_v14 = vld [vmem:[%s21645_s5 + $0x194] sm:$0xf] }
 0x7a7   :  { %22067 = vst [vmem:[#allocation16_spill] sm:$0xff] %v19132_v34  ;;  %6099 = vmatmul.bf16.gmra.mxu1 %v19132_v34  ;;  %6171 = vmatpush.bf16.msrb.mxu2 %v11751_v25  ;;  %v3852_v25 = vadd.f32 %v3851_v5, %v3483_v31  ;;  %v11884_v61 = vld [vmem:[%s21645_s5 + $0x198] sm:$0xf0]  ;;  %v11876_v5 = vld [vmem:[%s21645_s5 + $0x188] sm:$0xf0] }
 0x7a8   :  { %5957 = vmatmul.bf16.gmra.mxu3 %v22069_v37  ;;  %6006 = vmatmul.bf16.gmra.mxu2 %v18535_v19  ;;  %v3850_v8 = vadd.f32 %v19070_v63, %v3481_v18  ;;  %v11895_v63 = vor.u32 %v14010_v26, %v11892_v57  ;;  %v11887_v18 = vor.u32 %v14008_v14, %v11884_v61  ;;  %v22075_v61 = vld [vmem:[#allocation36_spill] sm:$0xff] }
 0x7a9   :  { %6153 = vmatmul.bf16.gmra.mxu0 %v22070_v12  ;;  %6266 = vmatpush.bf16.msrb.mxu1 %v11903_v11  ;;  %v3854_v11 = vpop.f32.mrf.mxu1 }
 0x7aa   :  { %6318 = vmatpush.bf16.msrb.mxu0 %v11943_v33  ;;  %v4219_v36 = vadd.f32 %v4218_v4, %v3850_v8 }
 0x7ab   :  { %v5860_v60 = vpop.f32.mrf.mxu3  ;;  %v5909_v0 = vpop.f32.mrf.mxu2 }
 0x7ac   :  { %v5861_v55 = vadd.f32 %v5860_v60, %v18834_v58  ;;  %v4368_v53 = vpack.c.bf16 %v4219_v36, %v4219_v36  ;;  %v14006_v58 = vld [vmem:[%s21645_s5 + $0x184] sm:$0xf] }
 0x7ad   :  { %6267 = vmatpush.bf16.msrb.mxu1 %v11895_v63  ;;  %v11879_v31 = vor.u32 %v14006_v58, %v11876_v5 }
 0x7ae   :  { %v19167_v33 = vadd.f32 %v5909_v0, %v5861_v55  ;;  %v4220_v23 = vpop.f32.mrf.mxu0  ;;  %v4784_v12 = vunpack.c.l.b16 %v4368_v53  ;;  %v22073_v55 = vld [vmem:[#allocation5_spill] sm:$0xff] }
 0x7af   :  { %v4221_v4 = vadd.f32 %v4220_v23, %v3852_v25  ;;  %v3486_v25 = vadd.f32 %v18544_v24, %v22073_v55  ;;  %v22074_v23 = vld [vmem:[#allocation72_spill] sm:$0xff] }
 0x7b1   :  { %v4369_v8 = vpack.c.bf16 %v4221_v4, %v4221_v4  ;;  %6268 = vmatpush.bf16.msrb.mxu1 %v11887_v18  ;;  %v3855_v14 = vadd.f32 %v3854_v11, %v3486_v25  ;;  %v3856_v53 = vpop.f32.mrf.mxu1  ;;  %v22077_v4 = vld [vmem:[#allocation84_spill] sm:$0xff] }
 0x7b3   :  { %v4785_v26 = vunpack.c.l.b16 %v4369_v8  ;;  %v5862_v57 = vpop.f32.mrf.mxu3  ;;  %v5911_v21 = vpop.f32.mrf.mxu2 }
 0x7b4   :  { %v5863_v36 = vadd.f32 %v5862_v57, %v18858_v3  ;;  %v22076_v3 = vld [vmem:[#allocation6_spill] sm:$0xff] }
 0x7b5   :  { %v19182_v60 = vpack.c.b16 %v4785_v26, %v4784_v12  ;;  %6269 = vmatpush.bf16.msrb.mxu1 %v11879_v31  ;;  %v3488_v18 = vadd.f32 %v22077_v4, %v22076_v3 }
 0x7b6   :  { %v19184_v0 = vadd.f32 %v5911_v21, %v5863_v36  ;;  %v4223_v63 = vpop.f32.mrf.mxu0 }
 0x7b7   :  { %22072 = vst [vmem:[#allocation18_spill] sm:$0xff] %v19182_v60  ;;  %6104 = vmatmul.bf16.gmra.mxu1 %v19182_v60  ;;  %v4224_v8 = vadd.f32 %v4223_v63, %v3855_v14  ;;  %v3857_v26 = vadd.f32 %v3856_v53, %v3488_v18  ;;  %v22080_v14 = vld [vmem:[#allocation60_spill] sm:$0xff] }
 0x7b8   :  { %5962 = vmatmul.bf16.gmra.mxu3 %v22074_v23  ;;  %6011 = vmatmul.bf16.gmra.mxu2 %v18562_v52 }
 0x7b9   :  { %6158 = vmatmul.bf16.gmra.mxu0 %v22075_v61  ;;  %v4370_v21 = vpack.c.bf16 %v4224_v8, %v4224_v8 }
 0x7bb   :  { %v5865_v58 = vpop.f32.mrf.mxu3  ;;  %v5914_v5 = vpop.f32.mrf.mxu2  ;;  %v4786_v55 = vunpack.c.l.b16 %v4370_v21 }
 0x7bc   :  { %v5866_v12 = vadd.f32 %v5865_v58, %v18868_v48  ;;  %v22079_v48 = vld [vmem:[#allocation37_spill] sm:$0xff] }
 0x7be   :  { %v19195_v24 = vadd.f32 %v5914_v5, %v5866_v12  ;;  %v4225_v57 = vpop.f32.mrf.mxu0  ;;  %v22081_v12 = vld [vmem:[#allocation51_spill] sm:$0xff] }
 0x7bf   :  { %v4226_v31 = vadd.f32 %v4225_v57, %v3857_v26  ;;  %v22082_v26 = vld [vmem:[#allocation22_spill] sm:$0xff]  ;;  %v22083_v57 = vld [vmem:[#allocation41_spill] sm:$0xff] }
 0x7c1   :  { %v4371_v36 = vpack.c.bf16 %v4226_v31, %v4226_v31 }
 0x7c3   :  { %v4787_v11 = vunpack.c.l.b16 %v4371_v36  ;;  %v5867_v25 = vpop.f32.mrf.mxu3  ;;  %v5916_v61 = vpop.f32.mrf.mxu2 }
 0x7c4   :  { %v5868_v52 = vadd.f32 %v5867_v25, %v18874_v15 }
 0x7c5   :  { %v19198_v19 = vpack.c.b16 %v4787_v11, %v4786_v55 }
 0x7c6   :  { %v19200_v63 = vadd.f32 %v5916_v61, %v5868_v52  ;;  %v19209_v8 = vpop.f32.mrf.mxu0 }
 0x7c7   :  { %22078 = vst [vmem:[#allocation44_spill] sm:$0xff] %v19198_v19  ;;  %6109 = vmatmul.bf16.gmra.mxu1 %v19198_v19 }
 0x7c8   :  { %6025 = vmatmul.bf16.vlgmr.msra.gmra.mxu3 %v18582_v10  ;;  %6172 = vmatmul.bf16.vlgmr.msrb.gmra.mxu2 %v22079_v48 }
 0x7c9   :  { %6319 = vmatmul.bf16.vlgmr.msrb.gmra.mxu0 %v22080_v14 }
 0x7cb   :  { %v5928_v53 = vpop.f32.mrf.mxu3  ;;  %v5977_v3 = vpop.f32.mrf.mxu2 }
 0x7cc   :  { %v5929_v4 = vadd.f32 %v5928_v53, %v18885_v20  ;;  %v22084_v53 = vld [vmem:[#allocation52_spill] sm:$0xff] }
 0x7ce   :  { %v19207_v18 = vadd.f32 %v5977_v3, %v5929_v4  ;;  %v19218_v31 = vpop.f32.mrf.mxu0  ;;  %v22085_v3 = vld [vmem:[#allocation25_spill] sm:$0xff] }
 0x7d3   :  { %v5930_v15 = vpop.f32.mrf.mxu3  ;;  %v5979_v58 = vpop.f32.mrf.mxu2 }
 0x7d4   :  { %v5931_v52 = vadd.f32 %v5930_v15, %v18890_v40  ;;  %v19223_v11 = vpop.f32.mrf.mxu1 }
 0x7d6   :  { %v19212_v5 = vadd.f32 %v5979_v58, %v5931_v52  ;;  %v19226_v48 = vpop.f32.mrf.mxu0 }
 0x7d7   :  { %6270 = vmatmul.bf16.vlgmr.msrb.gmra.mxu1 %v22081_v12 }
 0x7d8   :  { %6030 = vmatmul.bf16.gmra.mxu3 %v18614_v29  ;;  %6177 = vmatmul.bf16.gmra.mxu2 %v22082_v26 }
 0x7d9   :  { %6324 = vmatmul.bf16.gmra.mxu0 %v22083_v57 }
 0x7db   :  { %v5933_v21 = vpop.f32.mrf.mxu3  ;;  %v5982_v20 = vpop.f32.mrf.mxu2 }
 0x7dc   :  { %v5934_v36 = vadd.f32 %v5933_v21, %v18901_v41  ;;  %v19234_v41 = vpop.f32.mrf.mxu1 }
 0x7de   :  { %v19221_v55 = vadd.f32 %v5982_v20, %v5934_v36  ;;  %v22086_v36 = vld [vmem:[#allocation24_spill] sm:$0xff] }
 0x7e3   :  { %v5935_v40 = vpop.f32.mrf.mxu3  ;;  %v5984_v25 = vpop.f32.mrf.mxu2 }
 0x7e4   :  { %v5936_v61 = vadd.f32 %v5935_v40, %v18906_v13  ;;  %v19239_v13 = vpop.f32.mrf.mxu0  ;;  %v19241_v57 = vpop.f32.mrf.mxu1 }
 0x7e6   :  { %v19228_v14 = vadd.f32 %v5984_v25, %v5936_v61 }
 0x7e7   :  { %6275 = vmatmul.bf16.gmra.mxu1 %v22084_v53 }
 0x7e8   :  { %6035 = vmatmul.bf16.gmra.mxu3 %v18634_v9  ;;  %6182 = vmatmul.bf16.gmra.mxu2 %v22085_v3 }
 0x7e9   :  { %6329 = vmatmul.bf16.gmra.mxu0 %v22016_v35  ;;  %v22087_v35 = vld [vmem:[#allocation27_spill] sm:$0xff] }
 0x7eb   :  { %v5938_v4 = vpop.f32.mrf.mxu3  ;;  %v5987_v15 = vpop.f32.mrf.mxu2 }
 0x7ec   :  { %v5939_v58 = vadd.f32 %v5938_v4, %v18917_v17  ;;  %v19250_v17 = vpop.f32.mrf.mxu0  ;;  %v19253_v53 = vpop.f32.mrf.mxu1 }
 0x7ee   :  { %v19237_v52 = vadd.f32 %v5987_v15, %v5939_v58 }
 0x7f3   :  { %v5940_v12 = vpop.f32.mrf.mxu3  ;;  %v5989_v26 = vpop.f32.mrf.mxu2 }
 0x7f4   :  { %v5941_v21 = vadd.f32 %v5940_v12, %v18922_v45  ;;  %v19257_v15 = vpop.f32.mrf.mxu0 }
 0x7f6   :  { %v19244_v20 = vadd.f32 %v5989_v26, %v5941_v21  ;;  %v22088_v26 = vld [vmem:[#allocation3_spill] sm:$0xff]  ;;  %v11868_v21 = vld [vmem:[%s21645_s5 + $0x178] sm:$0xf0] }
 0x7f7   :  { %6280 = vmatmul.bf16.gmra.mxu1 %v22086_v36  ;;  %v12060_v36 = vld [vmem:[%s21645_s5 + $0x2f8] sm:$0xf0] }
 0x7f8   :  { %6040 = vmatmul.bf16.gmra.mxu3 %v18654_v49  ;;  %6187 = vmatmul.bf16.gmra.mxu2 %v22087_v35  ;;  %v14100_v35 = vld [vmem:[%s21645_s5 + $0x474] sm:$0xf] }
 0x7f9   :  { %6334 = vmatmul.bf16.gmra.mxu0 %v22018_v7  ;;  %v19263_v7 = vpop.f32.mrf.mxu1 }
 0x7fb   :  { %v5943_v40 = vpop.f32.mrf.mxu3  ;;  %v5992_v25 = vpop.f32.mrf.mxu2 }
 0x7fc   :  { %v5944_v61 = vadd.f32 %v5943_v40, %v18933_v59  ;;  %v14004_v59 = vld [vmem:[%s21645_s5 + $0x174] sm:$0xf]  ;;  %v12252_v40 = vld [vmem:[%s21645_s5 + $0x478] sm:$0xf0] }
 0x7fe   :  { %v19255_v3 = vadd.f32 %v5992_v25, %v5944_v61  ;;  %v12255_v61 = vor.u32 %v14100_v35, %v12252_v40 }
 0x800   :  { %6507 = vmatpush.bf16.msra.mxu0 %v12255_v61  ;;  %v14000_v61 = vld [vmem:[%s21645_s5 + $0x154] sm:$0xf] }
 0x803   :  { %v5945_v45 = vpop.f32.mrf.mxu3  ;;  %v5994_v4 = vpop.f32.mrf.mxu2 }
 0x804   :  { %v5946_v58 = vadd.f32 %v5945_v45, %v18938_v42  ;;  %v14052_v42 = vld [vmem:[%s21645_s5 + $0x2f4] sm:$0xf] }
 0x805   :  { %v12063_v25 = vor.u32 %v14052_v42, %v12060_v36  ;;  %v12052_v42 = vld [vmem:[%s21645_s5 + $0x2e8] sm:$0xf0]  ;;  %v19305_v36 = vpop.f32.mrf.mxu0 }
 0x806   :  { %v19260_v12 = vadd.f32 %v5994_v4, %v5946_v58  ;;  %v14002_v58 = vld [vmem:[%s21645_s5 + $0x164] sm:$0xf] }
 0x807   :  { %6285 = vmatmul.bf16.gmra.mxu1 %v22017_v62  ;;  %v11871_v62 = vor.u32 %v14004_v59, %v11868_v21  ;;  %6360 = vmatpush.bf16.msra.mxu2 %v12063_v25  ;;  %v14050_v59 = vld [vmem:[%s21645_s5 + $0x2e4] sm:$0xf] }
 0x808   :  { %6045 = vmatmul.bf16.gmra.mxu3 %v18724_v54  ;;  %6192 = vmatmul.bf16.gmra.mxu2 %v22088_v26  ;;  %v11860_v26 = vld [vmem:[%s21645_s5 + $0x168] sm:$0xf0]  ;;  %v12055_v40 = vor.u32 %v14050_v59, %v12052_v42  ;;  %v12236_v59 = vld [vmem:[%s21645_s5 + $0x458] sm:$0xf0] }
 0x809   :  { %6339 = vmatmul.bf16.gmra.mxu0 %v22020_v22  ;;  %6213 = vmatpush.bf16.msrb.mxu3 %v11871_v62  ;;  %v11863_v21 = vor.u32 %v14002_v58, %v11860_v26  ;;  %v12244_v62 = vld [vmem:[%s21645_s5 + $0x468] sm:$0xf0]  ;;  %v14048_v58 = vld [vmem:[%s21645_s5 + $0x2d4] sm:$0xf] }
 0x80b   :  { %v5948_v45 = vpop.f32.mrf.mxu3  ;;  %v5997_v4 = vpop.f32.mrf.mxu2  ;;  %6361 = vmatpush.bf16.msra.mxu2 %v12055_v40 }
 0x80c   :  { %v5949_v22 = vadd.f32 %v5948_v45, %v18987_v28  ;;  %v14098_v28 = vld [vmem:[%s21645_s5 + $0x464] sm:$0xf]  ;;  %v11852_v45 = vld [vmem:[%s21645_s5 + $0x158] sm:$0xf0] }
 0x80d   :  { %v12247_v25 = vor.u32 %v14098_v28, %v12244_v62  ;;  %6214 = vmatpush.bf16.msrb.mxu3 %v11863_v21  ;;  %v11855_v26 = vor.u32 %v14000_v61, %v11852_v45  ;;  %v19327_v28 = vpop.f32.mrf.mxu1  ;;  %v13998_v61 = vld [vmem:[%s21645_s5 + $0x144] sm:$0xf]  ;;  %v11844_v45 = vld [vmem:[%s21645_s5 + $0x148] sm:$0xf0]  ;;  %v19357_v23 = vpop.f32.mrf.mxu0 }
 0x80e   :  { %v19307_v35 = vadd.f32 %v5997_v4, %v5949_v22  ;;  %v12044_v4 = vld [vmem:[%s21645_s5 + $0x2d8] sm:$0xf0]  ;;  %v14096_v22 = vld [vmem:[%s21645_s5 + $0x454] sm:$0xf] }
 0x80f   :  { %6508 = vmatpush.bf16.msra.mxu0 %v12247_v25  ;;  %v12047_v21 = vor.u32 %v14048_v58, %v12044_v4  ;;  %v12239_v42 = vor.u32 %v14096_v22, %v12236_v59  ;;  %v14046_v58 = vld [vmem:[%s21645_s5 + $0x2c4] sm:$0xf]  ;;  %v11847_v4 = vor.u32 %v13998_v61, %v11844_v45  ;;  %v12228_v22 = vld [vmem:[%s21645_s5 + $0x448] sm:$0xf0]  ;;  %v12188_v61 = vld [vmem:[%s21645_s5 + $0x3f8] sm:$0xf0] }
 0x810   :  { %v22089_v45 = vld [vmem:[#allocation54_spill] sm:$0xff] }
 0x811   :  { %6215 = vmatpush.bf16.msrb.mxu3 %v11855_v26  ;;  %6362 = vmatpush.bf16.msra.mxu2 %v12047_v21  ;;  %v12036_v26 = vld [vmem:[%s21645_s5 + $0x2c8] sm:$0xf0] }
 0x812   :  { %v12039_v21 = vor.u32 %v14046_v58, %v12036_v26  ;;  %v11836_v58 = vld [vmem:[%s21645_s5 + $0x138] sm:$0xf0]  ;;  %v14044_v26 = vld [vmem:[%s21645_s5 + $0x2b4] sm:$0xf] }
 0x813   :  { %v5950_v62 = vpop.f32.mrf.mxu3  ;;  %v5999_v40 = vpop.f32.mrf.mxu2  ;;  %6509 = vmatpush.bf16.msra.mxu0 %v12239_v42 }
 0x814   :  { %v5951_v25 = vadd.f32 %v5950_v62, %v19028_v51  ;;  %v14094_v51 = vld [vmem:[%s21645_s5 + $0x444] sm:$0xf]  ;;  %v14084_v62 = vld [vmem:[%s21645_s5 + $0x3f4] sm:$0xf] }
 0x815   :  { %v12231_v42 = vor.u32 %v14094_v51, %v12228_v22  ;;  %6216 = vmatpush.bf16.msrb.mxu3 %v11847_v4  ;;  %v12191_v19 = vor.u32 %v14084_v62, %v12188_v61  ;;  %v22091_v4 = vld [vmem:[#allocation61_spill] sm:$0xff]  ;;  %6363 = vmatpush.bf16.msra.mxu2 %v12039_v21  ;;  %v12028_v22 = vld [vmem:[%s21645_s5 + $0x2b8] sm:$0xf0]  ;;  %v14082_v21 = vld [vmem:[%s21645_s5 + $0x3e4] sm:$0xf]  ;;  %v19386_v37 = vpop.f32.mrf.mxu1 }
 0x816   :  { %v19348_v59 = vadd.f32 %v5999_v40, %v5951_v25  ;;  %v22090_v40 = vld [vmem:[#allocation21_spill] sm:$0xff]  ;;  %v12220_v61 = vld [vmem:[%s21645_s5 + $0x438] sm:$0xf0] }
 0x817   :  { %6290 = vmatmul.bf16.gmra.mxu1 %v22089_v45  ;;  %v13996_v25 = vld [vmem:[%s21645_s5 + $0x134] sm:$0xf]  ;;  %6510 = vmatpush.bf16.msra.mxu0 %v12231_v42  ;;  %v12031_v45 = vor.u32 %v14044_v26, %v12028_v22  ;;  %v11828_v42 = vld [vmem:[%s21645_s5 + $0x128] sm:$0xf0]  ;;  %v14042_v26 = vld [vmem:[%s21645_s5 + $0x2a4] sm:$0xf] }
 0x818   :  { %6050 = vmatmul.bf16.gmra.mxu3 %v18816_v43  ;;  %6197 = vmatmul.bf16.gmra.mxu2 %v22090_v40  ;;  %v11839_v51 = vor.u32 %v13996_v25, %v11836_v58  ;;  %v14092_v62 = vld [vmem:[%s21645_s5 + $0x434] sm:$0xf]  ;;  %v12180_v25 = vld [vmem:[%s21645_s5 + $0x3e8] sm:$0xf0] }
 0x819   :  { %6344 = vmatmul.bf16.gmra.mxu0 %v22091_v4  ;;  %6458 = vmatpush.bf16.msra.mxu1 %v12191_v19  ;;  %v12223_v40 = vor.u32 %v14092_v62, %v12220_v61  ;;  %v12183_v60 = vor.u32 %v14082_v21, %v12180_v25  ;;  %v13994_v19 = vld [vmem:[%s21645_s5 + $0x124] sm:$0xf]  ;;  %v12212_v62 = vld [vmem:[%s21645_s5 + $0x428] sm:$0xf0] }
 0x81a   :  { %6217 = vmatpush.bf16.msrb.mxu3 %v11839_v51  ;;  %6364 = vmatpush.bf16.msra.mxu2 %v12031_v45  ;;  %v11831_v22 = vor.u32 %v13994_v19, %v11828_v42  ;;  %v12020_v51 = vld [vmem:[%s21645_s5 + $0x2a8] sm:$0xf0]  ;;  %v14080_v45 = vld [vmem:[%s21645_s5 + $0x3d4] sm:$0xf] }
 0x81b   :  { %v5953_v58 = vpop.f32.mrf.mxu3  ;;  %v6002_v4 = vpop.f32.mrf.mxu2  ;;  %6511 = vmatpush.bf16.msra.mxu0 %v12223_v40  ;;  %v12023_v21 = vor.u32 %v14042_v26, %v12020_v51  ;;  %v13992_v42 = vld [vmem:[%s21645_s5 + $0x114] sm:$0xf] }
 0x81c   :  { %v5954_v43 = vadd.f32 %v5953_v58, %v19090_v27  ;;  %v14090_v27 = vld [vmem:[%s21645_s5 + $0x424] sm:$0xf]  ;;  %v12172_v58 = vld [vmem:[%s21645_s5 + $0x3d8] sm:$0xf0]  ;;  %v14088_v26 = vld [vmem:[%s21645_s5 + $0x414] sm:$0xf] }
 0x81d   :  { %6459 = vmatpush.bf16.msra.mxu1 %v12183_v60  ;;  %v12215_v25 = vor.u32 %v14090_v27, %v12212_v62  ;;  %v12175_v19 = vor.u32 %v14080_v45, %v12172_v58  ;;  %v14040_v60 = vld [vmem:[%s21645_s5 + $0x294] sm:$0xf]  ;;  %v19433_v27 = vpop.f32.mrf.mxu0  ;;  %v14078_v45 = vld [vmem:[%s21645_s5 + $0x3c4] sm:$0xf]  ;;  %v12164_v58 = vld [vmem:[%s21645_s5 + $0x3c8] sm:$0xf0] }
 0x81e   :  { %v19407_v61 = vadd.f32 %v6002_v4, %v5954_v43  ;;  %6218 = vmatpush.bf16.msrb.mxu3 %v11831_v22  ;;  %v11820_v43 = vld [vmem:[%s21645_s5 + $0x118] sm:$0xf0]  ;;  %6365 = vmatpush.bf16.msra.mxu2 %v12023_v21 }
 0x81f   :  { %v11823_v40 = vor.u32 %v13992_v42, %v11820_v43  ;;  %v12012_v4 = vld [vmem:[%s21645_s5 + $0x298] sm:$0xf0]  ;;  %6512 = vmatpush.bf16.msra.mxu0 %v12215_v25  ;;  %v13990_v25 = vld [vmem:[%s21645_s5 + $0x104] sm:$0xf] }
 0x820   :  { %22092 = vst [vmem:[#allocation33_spill] sm:$0xff] %v19407_v61  ;;  %v12204_v22 = vld [vmem:[%s21645_s5 + $0x418] sm:$0xf0]  ;;  %v12015_v51 = vor.u32 %v14040_v60, %v12012_v4  ;;  %v12167_v61 = vor.u32 %v14078_v45, %v12164_v58  ;;  %v14038_v60 = vld [vmem:[%s21645_s5 + $0x284] sm:$0xf] }
 0x821   :  { %6460 = vmatpush.bf16.msra.mxu1 %v12175_v19  ;;  %v12207_v62 = vor.u32 %v14088_v26, %v12204_v22  ;;  %v11812_v19 = vld [vmem:[%s21645_s5 + $0x108] sm:$0xf0]  ;;  %v19460_v22 = vpop.f32.mrf.mxu1 }
 0x822   :  { %6219 = vmatpush.bf16.msrb.mxu3 %v11823_v40  ;;  %6366 = vmatpush.bf16.msra.mxu2 %v12015_v51  ;;  %v11815_v4 = vor.u32 %v13990_v25, %v11812_v19  ;;  %v12004_v40 = vld [vmem:[%s21645_s5 + $0x288] sm:$0xf0]  ;;  %v12156_v25 = vld [vmem:[%s21645_s5 + $0x3b8] sm:$0xf0] }
 0x823   :  { %v5955_v42 = vpop.f32.mrf.mxu3  ;;  %v6004_v43 = vpop.f32.mrf.mxu2  ;;  %v12196_v26 = vld [vmem:[%s21645_s5 + $0x408] sm:$0xf0]  ;;  %6513 = vmatpush.bf16.msra.mxu0 %v12207_v62  ;;  %v12007_v51 = vor.u32 %v14038_v60, %v12004_v40 }
 0x824   :  { %v5956_v21 = vadd.f32 %v5955_v42, %v19143_v32  ;;  %v14086_v32 = vld [vmem:[%s21645_s5 + $0x404] sm:$0xf]  ;;  %v14076_v42 = vld [vmem:[%s21645_s5 + $0x3b4] sm:$0xf]  ;;  %v22093_v19 = vld [vmem:[#allocation56_spill] sm:$0xff] }
 0x825   :  { %6461 = vmatpush.bf16.msra.mxu1 %v12167_v61  ;;  %v12199_v58 = vor.u32 %v14086_v32, %v12196_v26  ;;  %v12159_v34 = vor.u32 %v14076_v42, %v12156_v25  ;;  %v14074_v61 = vld [vmem:[%s21645_s5 + $0x3a4] sm:$0xf]  ;;  %v12148_v62 = vld [vmem:[%s21645_s5 + $0x3a8] sm:$0xf0]  ;;  %v19480_v40 = vpop.f32.mrf.mxu0 }
 0x826   :  { %v19462_v45 = vadd.f32 %v6004_v43, %v5956_v21  ;;  %6220 = vmatpush.bf16.msrb.mxu3 %v11815_v4  ;;  %v22094_v43 = vld [vmem:[#allocation4_spill] sm:$0xff]  ;;  %6367 = vmatpush.bf16.msra.mxu2 %v12007_v51  ;;  %v12151_v4 = vor.u32 %v14074_v61, %v12148_v62  ;;  %v14070_v42 = vld [vmem:[%s21645_s5 + $0x384] sm:$0xf] }
 0x827   :  { %6295 = vmatmul.bf16.gmra.mxu1 %v22093_v19  ;;  %6514 = vmatpush.bf16.msra.mxu0 %v12199_v58 }
 0x828   :  { %6055 = vmatmul.bf16.gmra.mxu3 %v18856_v16  ;;  %6202 = vmatmul.bf16.gmra.mxu2 %v22094_v43 }
 0x829   :  { %6349 = vmatmul.bf16.gmra.mxu0 %v17773_v2  ;;  %6462 = vmatpush.bf16.msra.mxu1 %v12159_v34  ;;  %v14072_v2 = vld [vmem:[%s21645_s5 + $0x394] sm:$0xf]  ;;  %v12140_v34 = vld [vmem:[%s21645_s5 + $0x398] sm:$0xf0]  ;;  %v19491_v58 = vpop.f32.mrf.mxu1 }
 0x82a   :  { %v12143_v51 = vor.u32 %v14072_v2, %v12140_v34 }
 0x82b   :  { %v5958_v21 = vpop.f32.mrf.mxu3  ;;  %v6007_v60 = vpop.f32.mrf.mxu2 }
 0x82c   :  { %v5959_v32 = vadd.f32 %v5958_v21, %v19167_v33  ;;  %v12132_v33 = vld [vmem:[%s21645_s5 + $0x388] sm:$0xf0] }
 0x82d   :  { %6463 = vmatpush.bf16.msra.mxu1 %v12151_v4  ;;  %v12135_v43 = vor.u32 %v14070_v42, %v12132_v33  ;;  %v19500_v62 = vpop.f32.mrf.mxu0  ;;  %v22096_v4 = vld [vmem:[#allocation7_spill] sm:$0xff] }
 0x82e   :  { %v19483_v26 = vadd.f32 %v6007_v60, %v5959_v32  ;;  %v22095_v60 = vld [vmem:[#allocation58_spill] sm:$0xff] }
 0x831   :  { %6464 = vmatpush.bf16.msra.mxu1 %v12143_v51  ;;  %v19508_v32 = vpop.f32.mrf.mxu1 }
 0x833   :  { %v5960_v25 = vpop.f32.mrf.mxu3  ;;  %v6009_v19 = vpop.f32.mrf.mxu2 }
 0x834   :  { %v5961_v61 = vadd.f32 %v5960_v25, %v19184_v0 }
 0x835   :  { %6465 = vmatpush.bf16.msra.mxu1 %v12135_v43  ;;  %v19513_v42 = vpop.f32.mrf.mxu0 }
 0x836   :  { %v19502_v21 = vadd.f32 %v6009_v19, %v5961_v61  ;;  %22097 = vst [vmem:[#allocation46_spill] sm:$0xff] %v19513_v42 }
 0x837   :  { %6300 = vmatmul.bf16.gmra.mxu1 %v22095_v60 }
 0x838   :  { %6060 = vmatmul.bf16.gmra.mxu3 %v18872_v6  ;;  %6207 = vmatmul.bf16.gmra.mxu2 %v22096_v4 }
 0x839   :  { %6354 = vmatmul.bf16.gmra.mxu0 %v17823_v50  ;;  %v19515_v19 = vpop.f32.mrf.mxu1  ;;  %v14442_v50 = vld [vmem:[%s21646_s6] sm:$0x3] }
 0x83a   :  { %v19521_v61 = vperm.slane %v14442_v50, 1 }
 0x83b   :  { %v5963_v2 = vpop.f32.mrf.mxu3  ;;  %v6012_v34 = vpop.f32.mrf.mxu2 }
 0x83c   :  { %v5964_v51 = vadd.f32 %v5963_v2, %v19195_v24  ;;  %v22098_v24 = vld [vmem:[#allocation11_spill] sm:$0xff]  ;;  %v6125_v4 = vadd.f32 %v19209_v8, %v19521_v61 }
 0x83e   :  { %v19511_v0 = vadd.f32 %v6012_v34, %v5964_v51 }
 0x843   :  { %v5965_v33 = vpop.f32.mrf.mxu3  ;;  %v6014_v25 = vpop.f32.mrf.mxu2 }
 0x844   :  { %v5966_v43 = vadd.f32 %v5965_v33, %v19200_v63  ;;  %v19531_v63 = vpop.f32.mrf.mxu0 }
 0x846   :  { %v19523_v60 = vadd.f32 %v6014_v25, %v5966_v43  ;;  %v19536_v25 = vpop.f32.mrf.mxu1 }
 0x847   :  { %6305 = vmatmul.bf16.gmra.mxu1 %v22028_v38  ;;  %v6127_v38 = vadd.f32 %v19218_v31, %v19521_v61  ;;  %v22100_v31 = vld [vmem:[#allocation53_spill] sm:$0xff] }
 0x848   :  { %6221 = vmatmul.bf16.vlgmr.msrb.gmra.mxu3 %v22098_v24  ;;  %6368 = vmatmul.bf16.vlgmr.msra.gmra.mxu2 %v22029_v46 }
 0x849   :  { %6515 = vmatmul.bf16.vlgmr.msra.gmra.mxu0 %v18888_v1 }
 0x84b   :  { %v6026_v2 = vpop.f32.mrf.mxu3  ;;  %v6173_v34 = vpop.f32.mrf.mxu2 }
 0x84c   :  { %v6027_v51 = vadd.f32 %v6026_v2, %v19207_v18  ;;  %v19534_v33 = vadd.f32 %v6173_v34, %v6125_v4  ;;  %v19540_v50 = vpop.f32.mrf.mxu0  ;;  %v22099_v34 = vld [vmem:[#allocation28_spill] sm:$0xff] }
 0x84e   :  { %v6076_v1 = vadd.f32 %v19223_v11, %v6027_v51  ;;  %v19548_v18 = vpop.f32.mrf.mxu1  ;;  %v6130_v11 = vadd.f32 %v19226_v48, %v19521_v61 }
 0x850   :  { %v6556_v4 = vmax.f32 %v6076_v1, 0.0 }
 0x853   :  { %v6028_v43 = vpop.f32.mrf.mxu3  ;;  %v6175_v46 = vpop.f32.mrf.mxu2 }
 0x854   :  { %v6029_v8 = vadd.f32 %v6028_v43, %v19212_v5  ;;  %v19544_v24 = vadd.f32 %v6175_v46, %v6127_v38  ;;  %v19560_v43 = vpop.f32.mrf.mxu0 }
 0x856   :  { %v6078_v42 = vadd.f32 %v19234_v41, %v6029_v8  ;;  %v19564_v46 = vpop.f32.mrf.mxu1 }
 0x857   :  { %6466 = vmatmul.bf16.vlgmr.msra.gmra.mxu1 %v18582_v10 }
 0x858   :  { %v6558_v2 = vmax.f32 %v6078_v42, 0.0  ;;  %6226 = vmatmul.bf16.gmra.mxu3 %v22099_v34  ;;  %6373 = vmatmul.bf16.gmra.mxu2 %v22034_v56  ;;  %v6132_v42 = vadd.f32 %v19239_v13, %v19521_v61  ;;  %v22103_v13 = vld [vmem:[#allocation67_spill] sm:$0xff] }
 0x859   :  { %6520 = vmatmul.bf16.gmra.mxu0 %v22100_v31 }
 0x85a   :  { %v19555_v5 = vpack.c.bf16 %v6558_v2, %v6556_v4 }
 0x85b   :  { %v6031_v51 = vpop.f32.mrf.mxu3  ;;  %v6178_v38 = vpop.f32.mrf.mxu2 }
 0x85c   :  { %v6032_v41 = vadd.f32 %v6031_v51, %v19221_v55  ;;  %v19558_v10 = vadd.f32 %v6178_v38, %v6130_v11  ;;  %v19572_v55 = vpop.f32.mrf.mxu0  ;;  %v22102_v11 = vld [vmem:[#allocation29_spill] sm:$0xff] }
 0x85d   :  { %22101 = vst [vmem:[#allocation59_spill] sm:$0xff] %v19572_v55 }
 0x85e   :  { %v6081_v8 = vadd.f32 %v19241_v57, %v6032_v41  ;;  %v6135_v57 = vadd.f32 %v19250_v17, %v19521_v61 }
 0x860   :  { %v6560_v34 = vmax.f32 %v6081_v8, 0.0 }
 0x863   :  { %v6033_v56 = vpop.f32.mrf.mxu3  ;;  %v6180_v1 = vpop.f32.mrf.mxu2 }
 0x864   :  { %v6034_v48 = vadd.f32 %v6033_v56, %v19228_v14  ;;  %v19568_v4 = vadd.f32 %v6180_v1, %v6132_v42  ;;  %v6137_v42 = vadd.f32 %v19257_v15, %v19521_v61  ;;  %v19588_v56 = vpop.f32.mrf.mxu0  ;;  %v22105_v15 = vld [vmem:[#allocation68_spill] sm:$0xff] }
 0x866   :  { %v6083_v2 = vadd.f32 %v19253_v53, %v6034_v48  ;;  %v19581_v53 = vpop.f32.mrf.mxu1 }
 0x867   :  { %6471 = vmatmul.bf16.gmra.mxu1 %v18614_v29 }
 0x868   :  { %v6562_v31 = vmax.f32 %v6083_v2, 0.0  ;;  %6231 = vmatmul.bf16.gmra.mxu3 %v22102_v11  ;;  %6378 = vmatmul.bf16.gmra.mxu2 %v22103_v13  ;;  %v22104_v11 = vld [vmem:[#allocation30_spill] sm:$0xff] }
 0x869   :  { %6525 = vmatmul.bf16.gmra.mxu0 %v18920_v44 }
 0x86a   :  { %v19579_v14 = vpack.c.bf16 %v6562_v31, %v6560_v34 }
 0x86b   :  { %v6036_v51 = vpop.f32.mrf.mxu3  ;;  %v6183_v38 = vpop.f32.mrf.mxu2 }
 0x86c   :  { %v6037_v29 = vadd.f32 %v6036_v51, %v19237_v52  ;;  %v19584_v41 = vadd.f32 %v6183_v38, %v6135_v57  ;;  %v19605_v51 = vpop.f32.mrf.mxu0 }
 0x86e   :  { %v6086_v8 = vadd.f32 %v19263_v7, %v6037_v29  ;;  %v19594_v2 = vpop.f32.mrf.mxu1  ;;  %v6140_v7 = vadd.f32 %v19305_v36, %v19521_v61  ;;  %v6142_v29 = vadd.f32 %v19357_v23, %v19521_v61  ;;  %v12124_v23 = vld [vmem:[%s21645_s5 + $0x378] sm:$0xf0] }
 0x870   :  { %v6564_v52 = vmax.f32 %v6086_v8, 0.0 }
 0x873   :  { %v6038_v1 = vpop.f32.mrf.mxu3  ;;  %v6185_v44 = vpop.f32.mrf.mxu2 }
 0x874   :  { %v6039_v17 = vadd.f32 %v6038_v1, %v19244_v20  ;;  %v19592_v48 = vadd.f32 %v6185_v44, %v6137_v42  ;;  %v19618_v8 = vpop.f32.mrf.mxu0 }
 0x876   :  { %v6088_v34 = vadd.f32 %v19327_v28, %v6039_v17  ;;  %v19610_v38 = vpop.f32.mrf.mxu1 }
 0x877   :  { %6476 = vmatmul.bf16.gmra.mxu1 %v18634_v9 }
 0x878   :  { %v6566_v31 = vmax.f32 %v6088_v34, 0.0  ;;  %6236 = vmatmul.bf16.gmra.mxu3 %v22104_v11  ;;  %6383 = vmatmul.bf16.gmra.mxu2 %v22105_v15 }
 0x879   :  { %6530 = vmatmul.bf16.gmra.mxu0 %v18936_v39 }
 0x87a   :  { %v19603_v20 = vpack.c.bf16 %v6566_v31, %v6564_v52  ;;  %v22106_v52 = vld [vmem:[#allocation31_spill] sm:$0xff] }
 0x87b   :  { %v6041_v13 = vpop.f32.mrf.mxu3  ;;  %v6188_v57 = vpop.f32.mrf.mxu2 }
 0x87c   :  { %v6042_v28 = vadd.f32 %v6041_v13, %v19255_v3  ;;  %v19608_v9 = vadd.f32 %v6188_v57, %v6140_v7  ;;  %v14066_v13 = vld [vmem:[%s21645_s5 + $0x364] sm:$0xf]  ;;  %v19646_v57 = vpop.f32.mrf.mxu0 }
 0x87e   :  { %v6091_v1 = vadd.f32 %v19386_v37, %v6042_v28  ;;  %v14068_v37 = vld [vmem:[%s21645_s5 + $0x374] sm:$0xf] }
 0x87f   :  { %v14064_v28 = vld [vmem:[%s21645_s5 + $0x354] sm:$0xf] }
 0x880   :  { %v6568_v3 = vmax.f32 %v6091_v1, 0.0 }
 0x883   :  { %v6043_v42 = vpop.f32.mrf.mxu3  ;;  %v6190_v39 = vpop.f32.mrf.mxu2 }
 0x884   :  { %v6044_v36 = vadd.f32 %v6043_v42, %v19260_v12  ;;  %v19616_v44 = vadd.f32 %v6190_v39, %v6142_v29  ;;  %v12127_v12 = vor.u32 %v14068_v37, %v12124_v23 }
 0x886   :  { %v6093_v17 = vadd.f32 %v19460_v22, %v6044_v36  ;;  %v19633_v22 = vpop.f32.mrf.mxu1  ;;  %6409 = vmatpush.bf16.msra.mxu3 %v12127_v12 }
 0x887   :  { %6481 = vmatmul.bf16.gmra.mxu1 %v18654_v49  ;;  %v6145_v49 = vadd.f32 %v19433_v27, %v19521_v61 }
 0x888   :  { %v6570_v34 = vmax.f32 %v6093_v17, 0.0  ;;  %6241 = vmatmul.bf16.gmra.mxu3 %v22106_v52  ;;  %6388 = vmatmul.bf16.gmra.mxu2 %v22056_v47 }
 0x889   :  { %6535 = vmatmul.bf16.gmra.mxu0 %v19017_v30  ;;  %v12116_v30 = vld [vmem:[%s21645_s5 + $0x368] sm:$0xf0] }
 0x88a   :  { %v19635_v31 = vpack.c.bf16 %v6570_v34, %v6568_v3  ;;  %v12119_v27 = vor.u32 %v14066_v13, %v12116_v30  ;;  %v14062_v3 = vld [vmem:[%s21645_s5 + $0x344] sm:$0xf]  ;;  %v12100_v34 = vld [vmem:[%s21645_s5 + $0x348] sm:$0xf0] }
 0x88b   :  { %v6046_v11 = vpop.f32.mrf.mxu3  ;;  %v6193_v47 = vpop.f32.mrf.mxu2  ;;  %v12103_v52 = vor.u32 %v14062_v3, %v12100_v34  ;;  %v14056_v3 = vld [vmem:[%s21645_s5 + $0x314] sm:$0xf]  ;;  %v12076_v34 = vld [vmem:[%s21645_s5 + $0x318] sm:$0xf0] }
 0x88c   :  { %v6047_v15 = vadd.f32 %v6046_v11, %v19307_v35  ;;  %v19638_v7 = vadd.f32 %v6193_v47, %v6145_v49  ;;  %6410 = vmatpush.bf16.msra.mxu3 %v12119_v27  ;;  %v12108_v35 = vld [vmem:[%s21645_s5 + $0x358] sm:$0xf0]  ;;  %v22107_v49 = vld [vmem:[#allocation45_spill] sm:$0xff]  ;;  %v22109_v47 = vld [vmem:[#allocation16_spill] sm:$0xff] }
 0x88d   :  { %v12111_v29 = vor.u32 %v14064_v28, %v12108_v35  ;;  %v12092_v11 = vld [vmem:[%s21645_s5 + $0x338] sm:$0xf0]  ;;  %v14058_v35 = vld [vmem:[%s21645_s5 + $0x324] sm:$0xf] }
 0x88e   :  { %v19656_v1 = vpop.f32.mrf.mxu1  ;;  %v6096_v36 = vadd.f32 %v19491_v58, %v6047_v15  ;;  %v22108_v58 = vld [vmem:[#allocation70_spill] sm:$0xff]  ;;  %v19679_v15 = vpop.f32.mrf.mxu0 }
 0x890   :  { %6411 = vmatpush.bf16.msra.mxu3 %v12111_v29  ;;  %v6572_v23 = vmax.f32 %v6096_v36, 0.0  ;;  %v12084_v29 = vld [vmem:[%s21645_s5 + $0x328] sm:$0xf0] }
 0x893   :  { %v6048_v42 = vpop.f32.mrf.mxu3  ;;  %v19654_v39 = vpop.f32.mrf.mxu2 }
 0x894   :  { %v6049_v17 = vadd.f32 %v6048_v42, %v19348_v59  ;;  %6412 = vmatpush.bf16.msra.mxu3 %v12103_v52  ;;  %v14060_v59 = vld [vmem:[%s21645_s5 + $0x334] sm:$0xf]  ;;  %v12087_v42 = vor.u32 %v14058_v35, %v12084_v29  ;;  %v12079_v52 = vor.u32 %v14056_v3, %v12076_v34  ;;  %v22113_v35 = vld [vmem:[#allocation71_spill] sm:$0xff]  ;;  %v22114_v29 = vld [vmem:[#allocation18_spill] sm:$0xff] }
 0x896   :  { %v6098_v37 = vadd.f32 %v19508_v32, %v6049_v17  ;;  %v12095_v32 = vor.u32 %v14060_v59, %v12092_v11  ;;  %v19691_v36 = vpop.f32.mrf.mxu1  ;;  %v12068_v59 = vld [vmem:[%s21645_s5 + $0x308] sm:$0xf0]  ;;  %v19710_v11 = vpop.f32.mrf.mxu0 }
 0x897   :  { %6486 = vmatmul.bf16.gmra.mxu1 %v18724_v54  ;;  %v6150_v54 = vadd.f32 %v19500_v62, %v19521_v61  ;;  %v22110_v62 = vld [vmem:[#allocation33_spill] sm:$0xff] }
 0x898   :  { %v6574_v12 = vmax.f32 %v6098_v37, 0.0  ;;  %6246 = vmatmul.bf16.gmra.mxu3 %v22107_v49  ;;  %6393 = vmatmul.bf16.gmra.mxu2 %v22108_v58  ;;  %v14054_v58 = vld [vmem:[%s21645_s5 + $0x304] sm:$0xf] }
 0x899   :  { %6540 = vmatmul.bf16.gmra.mxu0 %v22109_v47  ;;  %6413 = vmatpush.bf16.msra.mxu3 %v12095_v32  ;;  %v12071_v47 = vor.u32 %v14054_v58, %v12068_v59 }
 0x89a   :  { %v19681_v13 = vpack.c.bf16 %v6574_v12, %v6572_v23 }
 0x89b   :  { %v6051_v30 = vpop.f32.mrf.mxu3  ;;  %v6198_v27 = vpop.f32.mrf.mxu2 }
 0x89c   :  { %v19683_v28 = vadd.f32 %v6198_v27, %v6150_v54  ;;  %v6052_v17 = vadd.f32 %v6051_v30, %v22110_v62  ;;  %v22111_v54 = vld [vmem:[#allocation42_spill] sm:$0xff]  ;;  %v22112_v27 = vld [vmem:[#allocation47_spill] sm:$0xff] }
 0x89d   :  { %6414 = vmatpush.bf16.msra.mxu3 %v12087_v42  ;;  %v6155_v42 = vadd.f32 %v19531_v63, %v19521_v61 }
 0x89e   :  { %v6101_v12 = vadd.f32 %v19515_v19, %v6052_v17  ;;  %v19714_v30 = vpop.f32.mrf.mxu1  ;;  %v19723_v34 = vpop.f32.mrf.mxu0 }
 0x8a0   :  { %v6576_v19 = vmax.f32 %v6101_v12, 0.0 }
 0x8a1   :  { %6415 = vmatpush.bf16.msra.mxu3 %v12079_v52 }
 0x8a3   :  { %v6053_v37 = vpop.f32.mrf.mxu3  ;;  %v19700_v23 = vpop.f32.mrf.mxu2 }
 0x8a4   :  { %v6054_v49 = vadd.f32 %v6053_v37, %v19462_v45 }
 0x8a5   :  { %6416 = vmatpush.bf16.msra.mxu3 %v12071_v47 }
 0x8a6   :  { %v6103_v32 = vadd.f32 %v19536_v25, %v6054_v49  ;;  %v19726_v37 = vpop.f32.mrf.mxu1 }
 0x8a7   :  { %6491 = vmatmul.bf16.gmra.mxu1 %v22111_v54  ;;  %v22115_v54 = vld [vmem:[#allocation50_spill] sm:$0xff] }
 0x8a8   :  { %v6578_v45 = vmax.f32 %v6103_v32, 0.0  ;;  %6251 = vmatmul.bf16.gmra.mxu3 %v22112_v27  ;;  %6398 = vmatmul.bf16.gmra.mxu2 %v22113_v35  ;;  %v6160_v27 = vadd.f32 %v19560_v43, %v19521_v61 }
 0x8a9   :  { %6545 = vmatmul.bf16.gmra.mxu0 %v22114_v29 }
 0x8aa   :  { %v6598_v62 = vpack.c.bf16 %v6578_v45, %v6576_v19  ;;  %v22116_v19 = vld [vmem:[#allocation72_spill] sm:$0xff] }
 0x8ab   :  { %v6056_v17 = vpop.f32.mrf.mxu3  ;;  %v6203_v3 = vpop.f32.mrf.mxu2  ;;  %v22117_v45 = vld [vmem:[#allocation44_spill] sm:$0xff] }
 0x8ac   :  { %v19721_v25 = vadd.f32 %v6203_v3, %v6155_v42  ;;  %v6057_v52 = vadd.f32 %v6056_v17, %v19483_v26  ;;  %v19736_v26 = vpop.f32.mrf.mxu0 }
 0x8ae   :  { %v6106_v58 = vadd.f32 %v19548_v18, %v6057_v52 }
 0x8b0   :  { %v6580_v47 = vmax.f32 %v6106_v58, 0.0 }
 0x8b3   :  { %v6058_v12 = vpop.f32.mrf.mxu3  ;;  %v19728_v49 = vpop.f32.mrf.mxu2 }
 0x8b4   :  { %v6059_v59 = vadd.f32 %v6058_v12, %v19502_v21 }
 0x8b6   :  { %v6108_v63 = vadd.f32 %v19564_v46, %v6059_v59 }
 0x8b7   :  { %6496 = vmatmul.bf16.gmra.mxu1 %v18856_v16  ;;  %v6286_v16 = vpop.f32.mrf.mxu1 }
 0x8b8   :  { %v6582_v32 = vmax.f32 %v6108_v63, 0.0  ;;  %6256 = vmatmul.bf16.gmra.mxu3 %v22115_v54  ;;  %6403 = vmatmul.bf16.gmra.mxu2 %v22116_v19  ;;  %v22119_v63 = vld [vmem:[#allocation8_spill] sm:$0xff] }
 0x8b9   :  { %6550 = vmatmul.bf16.gmra.mxu0 %v22117_v45 }
 0x8ba   :  { %v6600_v18 = vpack.c.bf16 %v6582_v32, %v6580_v47 }
 0x8bb   :  { %v6061_v35 = vpop.f32.mrf.mxu3  ;;  %v6208_v21 = vpop.f32.mrf.mxu2 }
 0x8bc   :  { %v6062_v46 = vadd.f32 %v6061_v35, %v19511_v0  ;;  %v19742_v29 = vadd.f32 %v6208_v21, %v6160_v27  ;;  %v22120_v27 = vld [vmem:[#allocation74_spill] sm:$0xff]  ;;  %v6340_v21 = vpop.f32.mrf.mxu0 }
 0x8be   :  { %v6111_v42 = vadd.f32 %v19581_v53, %v6062_v46 }
 0x8bf   :  { %v19749_v58 = vpop.f32.mrf.mxu1 }
 0x8c0   :  { %v6584_v43 = vmax.f32 %v6111_v42, 0.0 }
 0x8c3   :  { %v6063_v17 = vpop.f32.mrf.mxu3  ;;  %v19745_v3 = vpop.f32.mrf.mxu2 }
 0x8c4   :  { %22118 = vst [vmem:[#allocation49_spill] sm:$0xff] %v19745_v3  ;;  %v6064_v52 = vadd.f32 %v6063_v17, %v19523_v60 }
 0x8c6   :  { %v6113_v12 = vadd.f32 %v19594_v2, %v6064_v52 }
 0x8c7   :  { %6501 = vmatmul.bf16.gmra.mxu1 %v18872_v6 }
 0x8c8   :  { %v6586_v59 = vmax.f32 %v6113_v12, 0.0  ;;  %6417 = vmatmul.bf16.vlgmr.msra.gmra.mxu3 %v22119_v63 }
 0x8ca   :  { %v6602_v0 = vpack.c.bf16 %v6586_v59, %v6584_v43 }
 0x8cb   :  { %v6222_v47 = vpop.f32.mrf.mxu3  ;;  %v6369_v32 = vpop.f32.mrf.mxu2 }
 0x8cc   :  { %v6223_v53 = vadd.f32 %v6222_v47, %v19534_v33  ;;  %6748 = vmatpush.bf16.msrb.mxu2 %v6602_v0  ;;  %v22122_v0 = vld [vmem:[#allocation77_spill] sm:$0xff] }
 0x8ce   :  { %v6272_v54 = vadd.f32 %v19610_v38, %v6223_v53 }
 0x8d0   :  { %v6321_v60 = vadd.f32 %v19588_v56, %v6272_v54  ;;  %6749 = vmatpush.bf16.msrb.mxu2 %v6600_v18  ;;  %v6291_v56 = vpop.f32.mrf.mxu1 }
 0x8d2   :  { %v19756_v2 = vadd.f32 %v6369_v32, %v6321_v60 }
 0x8d3   :  { %v6224_v19 = vpop.f32.mrf.mxu3  ;;  %v19758_v45 = vpop.f32.mrf.mxu2 }
 0x8d4   :  { %v19761_v6 = vadd.f32 %v6224_v19, %v19544_v24  ;;  %6750 = vmatpush.bf16.msrb.mxu2 %v6598_v62 }
 0x8d8   :  { %6422 = vmatmul.bf16.gmra.mxu3 %v22120_v27  ;;  %6751 = vmatpush.bf16.msrb.mxu2 %v19681_v13 }
 0x8db   :  { %v6227_v33 = vpop.f32.mrf.mxu3  ;;  %v6374_v35 = vpop.f32.mrf.mxu2 }
 0x8dc   :  { %v6228_v38 = vadd.f32 %v6227_v33, %v19558_v10  ;;  %6752 = vmatpush.bf16.msrb.mxu2 %v19635_v31  ;;  %v19778_v10 = vpop.f32.mrf.mxu1  ;;  %v22121_v31 = vld [vmem:[#allocation76_spill] sm:$0xff] }
 0x8de   :  { %v6277_v18 = vadd.f32 %v19656_v1, %v6228_v38  ;;  %v19782_v1 = vpop.f32.mrf.mxu0 }
 0x8e0   :  { %v6326_v46 = vadd.f32 %v19618_v8, %v6277_v18  ;;  %6753 = vmatpush.bf16.msrb.mxu2 %v19603_v20 }
 0x8e2   :  { %v19770_v24 = vadd.f32 %v6374_v35, %v6326_v46  ;;  %v22123_v35 = vld [vmem:[#allocation80_spill] sm:$0xff] }
 0x8e3   :  { %v6229_v62 = vpop.f32.mrf.mxu3  ;;  %v19772_v42 = vpop.f32.mrf.mxu2 }
 0x8e4   :  { %v19775_v13 = vadd.f32 %v6229_v62, %v19568_v4  ;;  %6754 = vmatpush.bf16.msrb.mxu2 %v19579_v14  ;;  %v19787_v4 = vpop.f32.mrf.mxu1 }
 0x8e8   :  { %6427 = vmatmul.bf16.gmra.mxu3 %v22121_v31  ;;  %6755 = vmatpush.bf16.msrb.mxu2 %v19555_v5  ;;  %v19796_v5 = vpop.f32.mrf.mxu0 }
 0x8eb   :  { %v6232_v8 = vpop.f32.mrf.mxu3  ;;  %v6379_v20 = vpop.f32.mrf.mxu2 }
 0x8ec   :  { %v6233_v17 = vadd.f32 %v6232_v8, %v19584_v41 }
 0x8ee   :  { %v6282_v52 = vadd.f32 %v19714_v30, %v6233_v17  ;;  %v19800_v30 = vpop.f32.mrf.mxu1 }
 0x8f0   :  { %v6331_v12 = vadd.f32 %v19679_v15, %v6282_v52  ;;  %v19802_v53 = vpop.f32.mrf.mxu0 }
 0x8f2   :  { %v19789_v43 = vadd.f32 %v6379_v20, %v6331_v12  ;;  %v22124_v20 = vld [vmem:[#allocation83_spill] sm:$0xff] }
 0x8f3   :  { %v6234_v14 = vpop.f32.mrf.mxu3  ;;  %v19791_v59 = vpop.f32.mrf.mxu2 }
 0x8f4   :  { %v19794_v63 = vadd.f32 %v6234_v14, %v19592_v48 }
 0x8f6   :  { %v19810_v27 = vpop.f32.mrf.mxu1 }
 0x8f8   :  { %6432 = vmatmul.bf16.gmra.mxu3 %v22122_v0  ;;  %v22129_v0 = vld [vmem:[#allocation62_spill] sm:$0xff] }
 0x8fb   :  { %v6237_v47 = vpop.f32.mrf.mxu3  ;;  %v6384_v15 = vpop.f32.mrf.mxu2 }
 0x8fc   :  { %v6238_v41 = vadd.f32 %v6237_v47, %v19608_v9  ;;  %v19815_v9 = vpop.f32.mrf.mxu0 }
 0x8fe   :  { %v6287_v32 = vadd.f32 %v6286_v16, %v6238_v41 }
 0x900   :  { %v6336_v54 = vadd.f32 %v19723_v34, %v6287_v32  ;;  %v19818_v34 = vpop.f32.mrf.mxu1 }
 0x902   :  { %v19805_v60 = vadd.f32 %v6384_v15, %v6336_v54 }
 0x903   :  { %v6239_v19 = vpop.f32.mrf.mxu3  ;;  %v19812_v33 = vpop.f32.mrf.mxu2 }
 0x904   :  { %v19808_v48 = vadd.f32 %v6239_v19, %v19616_v44  ;;  %v19822_v44 = vpop.f32.mrf.mxu0 }
 0x908   :  { %6437 = vmatmul.bf16.gmra.mxu3 %v22123_v35  ;;  %v19827_v17 = vpop.f32.mrf.mxu1 }
 0x909   :  { %22125 = vst [vmem:[#allocation10_spill] sm:$0xff] %v19827_v17 }
 0x90b   :  { %v6242_v38 = vpop.f32.mrf.mxu3  ;;  %v6389_v62 = vpop.f32.mrf.mxu2 }
 0x90c   :  { %v6243_v16 = vadd.f32 %v6242_v38, %v19638_v7  ;;  %v19832_v7 = vpop.f32.mrf.mxu0 }
 0x90d   :  { %22126 = vst [vmem:[#allocation48_spill] sm:$0xff] %v19832_v7 }
 0x90e   :  { %v6292_v18 = vadd.f32 %v6291_v56, %v6243_v16 }
 0x910   :  { %v6341_v46 = vadd.f32 %v6340_v21, %v6292_v18  ;;  %v19836_v21 = vpop.f32.mrf.mxu1 }
 0x911   :  { %22127 = vst [vmem:[#allocation63_spill] sm:$0xff] %v19836_v21 }
 0x912   :  { %v19820_v31 = vadd.f32 %v6389_v62, %v6341_v46 }
 0x913   :  { %v19824_v8 = vpop.f32.mrf.mxu3 }
 0x914   :  { %v19838_v14 = vpop.f32.mrf.mxu0 }
 0x915   :  { %22128 = vst [vmem:[#allocation9_spill] sm:$0xff] %v19838_v14 }
 0x918   :  { %6442 = vmatmul.bf16.gmra.mxu3 %v22124_v20  ;;  %v6467_v15 = vpop.f32.mrf.mxu1 }
 0x91b   :  { %v6247_v52 = vpop.f32.mrf.mxu3 }
 0x91c   :  { %v19830_v12 = vadd.f32 %v6247_v52, %v19683_v28  ;;  %v6516_v32 = vpop.f32.mrf.mxu0  ;;  %v22130_v28 = vld [vmem:[#allocation85_spill] sm:$0xff] }
 0x920   :  { %v6469_v19 = vpop.f32.mrf.mxu1 }
 0x923   :  { %v19834_v56 = vpop.f32.mrf.mxu3 }
 0x924   :  { %v6518_v35 = vpop.f32.mrf.mxu0 }
 0x928   :  { %6447 = vmatmul.bf16.gmra.mxu3 %v22129_v0  ;;  %v6472_v18 = vpop.f32.mrf.mxu1 }
 0x92b   :  { %v6252_v47 = vpop.f32.mrf.mxu3 }
 0x92c   :  { %v19842_v41 = vadd.f32 %v6252_v47, %v19721_v25  ;;  %v6521_v62 = vpop.f32.mrf.mxu0  ;;  %v6274_v25 = vadd.f32 %v19633_v22, %v19761_v6  ;;  %v6279_v22 = vadd.f32 %v19691_v36, %v19775_v13  ;;  %v6284_v36 = vadd.f32 %v19726_v37, %v19794_v63 }
 0x92e   :  { %v6323_v47 = vadd.f32 %v19605_v51, %v6274_v25 }
 0x930   :  { %v6474_v0 = vpop.f32.mrf.mxu1  ;;  %v6372_v14 = vadd.f32 %v19758_v45, %v6323_v47  ;;  %v6328_v45 = vadd.f32 %v19646_v57, %v6279_v22 }
 0x933   :  { %v19844_v54 = vpop.f32.mrf.mxu3 }
 0x938   :  { %6452 = vmatmul.bf16.gmra.mxu3 %v22130_v28  ;;  %v6523_v28 = vpop.f32.mrf.mxu0 }
 0x93b   :  { %v6257_v38 = vpop.f32.mrf.mxu3 }
 0x93c   :  { %v19848_v16 = vadd.f32 %v6257_v38, %v19742_v29 }
 0x93e   :  { %22131 = vst [vmem:[#allocation65_spill] sm:$0xff] %v19848_v16  ;;  %v6477_v16 = vpop.f32.mrf.mxu1 }
 0x940   :  { %v6526_v3 = vpop.f32.mrf.mxu0 }
 0x943   :  { %v19850_v46 = vpop.f32.mrf.mxu3 }
 0x944   :  { %22132 = vst [vmem:[#allocation13_spill] sm:$0xff] %v19850_v46 }
 0x94b   :  { %v6418_v20 = vpop.f32.mrf.mxu3 }
 0x94c   :  { %v6419_v52 = vadd.f32 %v6418_v20, %v19756_v2 }
 0x94e   :  { %v6468_v21 = vadd.f32 %v6467_v15, %v6419_v52  ;;  %v6479_v15 = vpop.f32.mrf.mxu1 }
 0x950   :  { %v6517_v38 = vadd.f32 %v6516_v32, %v6468_v21 }
 0x952   :  { %v6557_v6 = vmax.f32 %v6517_v38, 0.0 }
 0x953   :  { %v6420_v7 = vpop.f32.mrf.mxu3 }
 0x954   :  { %v6421_v29 = vadd.f32 %v6420_v7, %v6372_v14  ;;  %v6377_v7 = vadd.f32 %v19772_v42, %v6328_v45  ;;  %v6528_v14 = vpop.f32.mrf.mxu0  ;;  %v6333_v42 = vadd.f32 %v19710_v11, %v6284_v36 }
 0x956   :  { %v6470_v17 = vadd.f32 %v6469_v19, %v6421_v29 }
 0x958   :  { %v6519_v46 = vadd.f32 %v6518_v35, %v6470_v17 }
 0x95a   :  { %v6559_v55 = vmax.f32 %v6519_v46, 0.0 }
 0x95b   :  { %v6423_v2 = vpop.f32.mrf.mxu3 }
 0x95c   :  { %v6424_v20 = vadd.f32 %v6423_v2, %v19770_v24  ;;  %v19860_v51 = vpack.c.bf16 %v6559_v55, %v6557_v6  ;;  %v6482_v24 = vpop.f32.mrf.mxu1  ;;  %v6531_v47 = vpop.f32.mrf.mxu0  ;;  %v6289_v6 = vadd.f32 %v19749_v58, %v19808_v48 }
 0x95e   :  { %v6473_v21 = vadd.f32 %v6472_v18, %v6424_v20  ;;  %v6382_v18 = vadd.f32 %v19791_v59, %v6333_v42  ;;  %v6338_v11 = vadd.f32 %v19736_v26, %v6289_v6 }
 0x960   :  { %v6522_v19 = vadd.f32 %v6521_v62, %v6473_v21 }
 0x962   :  { %v6561_v13 = vmax.f32 %v6522_v19, 0.0 }
 0x963   :  { %v6425_v32 = vpop.f32.mrf.mxu3 }
 0x964   :  { %v6426_v17 = vadd.f32 %v6425_v32, %v6377_v7  ;;  %v6533_v37 = vpop.f32.mrf.mxu0  ;;  %v6391_v32 = vpop.f32.mrf.mxu2 }
 0x966   :  { %v6475_v35 = vadd.f32 %v6474_v0, %v6426_v17 }
 0x968   :  { %v6524_v25 = vadd.f32 %v6523_v28, %v6475_v35  ;;  %v6484_v28 = vpop.f32.mrf.mxu1 }
 0x96a   :  { %v6563_v46 = vmax.f32 %v6524_v25, 0.0 }
 0x96b   :  { %v6428_v55 = vpop.f32.mrf.mxu3 }
 0x96c   :  { %v6429_v52 = vadd.f32 %v6428_v55, %v19789_v43  ;;  %v19867_v57 = vpack.c.bf16 %v6563_v46, %v6561_v13 }
 0x96e   :  { %v6478_v29 = vadd.f32 %v6477_v16, %v6429_v52  ;;  %v6536_v16 = vpop.f32.mrf.mxu0  ;;  %v6394_v52 = vpop.f32.mrf.mxu2 }
 0x970   :  { %v6527_v38 = vadd.f32 %v6526_v3, %v6478_v29  ;;  %v6487_v59 = vpop.f32.mrf.mxu1  ;;  %v6147_v3 = vadd.f32 %v19480_v40, %v19521_v61 }
 0x972   :  { %v6565_v2 = vmax.f32 %v6527_v38, 0.0  ;;  %v6196_v58 = vadd.f32 %v19654_v39, %v6147_v3 }
 0x973   :  { %v6430_v62 = vpop.f32.mrf.mxu3 }
 0x974   :  { %v6431_v0 = vadd.f32 %v6430_v62, %v6382_v18  ;;  %v6245_v17 = vadd.f32 %v19824_v8, %v6196_v58  ;;  %v22133_v8 = vld [vmem:[#allocation46_spill] sm:$0xff] }
 0x976   :  { %v6480_v22 = vadd.f32 %v6479_v15, %v6431_v0  ;;  %v6387_v15 = vadd.f32 %v19812_v33, %v6338_v11  ;;  %v6294_v26 = vadd.f32 %v19778_v10, %v6245_v17  ;;  %v6538_v46 = vpop.f32.mrf.mxu0  ;;  %v6297_v0 = vadd.f32 %v19787_v4, %v19830_v12 }
 0x978   :  { %v6529_v63 = vadd.f32 %v6528_v14, %v6480_v22  ;;  %v6489_v25 = vpop.f32.mrf.mxu1  ;;  %v6343_v39 = vadd.f32 %v19782_v1, %v6294_v26  ;;  %v6346_v1 = vadd.f32 %v19796_v5, %v6297_v0 }
 0x97a   :  { %v6567_v43 = vmax.f32 %v6529_v63, 0.0  ;;  %v6392_v18 = vadd.f32 %v6391_v32, %v6343_v39  ;;  %v6396_v63 = vpop.f32.mrf.mxu2 }
 0x97b   :  { %v6433_v20 = vpop.f32.mrf.mxu3 }
 0x97c   :  { %v6434_v45 = vadd.f32 %v6433_v20, %v19805_v60  ;;  %v19874_v7 = vpack.c.bf16 %v6567_v43, %v6565_v2 }
 0x97e   :  { %v6483_v21 = vadd.f32 %v6482_v24, %v6434_v45  ;;  %v6395_v45 = vadd.f32 %v6394_v52, %v6346_v1  ;;  %v22135_v52 = vld [vmem:[#allocation49_spill] sm:$0xff] }
 0x980   :  { %v6532_v60 = vadd.f32 %v6531_v47, %v6483_v21  ;;  %v6152_v47 = vadd.f32 %v22133_v8, %v19521_v61  ;;  %v6492_v29 = vpop.f32.mrf.mxu1  ;;  %v6302_v21 = vadd.f32 %v19810_v27, %v19842_v41  ;;  %v22137_v8 = vld [vmem:[#allocation10_spill] sm:$0xff] }
 0x982   :  { %v6569_v36 = vmax.f32 %v6532_v60, 0.0  ;;  %v6201_v10 = vadd.f32 %v19700_v23, %v6152_v47  ;;  %v6399_v3 = vpop.f32.mrf.mxu2  ;;  %v6351_v17 = vadd.f32 %v19815_v9, %v6302_v21 }
 0x983   :  { %v6435_v14 = vpop.f32.mrf.mxu3 }
 0x984   :  { %v6436_v48 = vadd.f32 %v6435_v14, %v6387_v15  ;;  %v6250_v38 = vadd.f32 %v19834_v56, %v6201_v10  ;;  %v6157_v56 = vadd.f32 %v19540_v50, %v19521_v61 }
 0x986   :  { %v6485_v19 = vadd.f32 %v6484_v28, %v6436_v48  ;;  %v6299_v6 = vadd.f32 %v19800_v30, %v6250_v38  ;;  %v6206_v30 = vadd.f32 %v19728_v49, %v6157_v56 }
 0x988   :  { %v6534_v35 = vadd.f32 %v6533_v37, %v6485_v19  ;;  %v6494_v23 = vpop.f32.mrf.mxu1  ;;  %v6348_v4 = vadd.f32 %v19802_v53, %v6299_v6  ;;  %v6255_v58 = vadd.f32 %v19844_v54, %v6206_v30  ;;  %v22134_v54 = vld [vmem:[#allocation59_spill] sm:$0xff] }
 0x98a   :  { %v6571_v13 = vmax.f32 %v6534_v35, 0.0  ;;  %v6304_v50 = vadd.f32 %v19818_v34, %v6255_v58  ;;  %v22136_v34 = vld [vmem:[#allocation65_spill] sm:$0xff] }
 0x98b   :  { %v6438_v40 = vpop.f32.mrf.mxu3  ;;  %v6307_v47 = vadd.f32 %v22137_v8, %v22136_v34  ;;  %v14120_v34 = vld [vmem:[%s21648_s8] sm:$0xff] }
 0x98c   :  { %v6439_v33 = vadd.f32 %v6438_v40, %v19820_v31  ;;  %v19884_v24 = vpack.c.bf16 %v6571_v13, %v6569_v36  ;;  %v6541_v31 = vpop.f32.mrf.mxu0  ;;  %v6400_v36 = vadd.f32 %v6399_v3, %v6351_v17  ;;  %v6401_v13 = vpop.f32.mrf.mxu2  ;;  %v6353_v27 = vadd.f32 %v19822_v44, %v6304_v50  ;;  %v14103_v17 = vld [vmem:[%s21647_s7 + $0x8] sm:$0xff]  ;;  %v14135_v50 = vld [vmem:[%s21648_s8 + $0x78] sm:$0xff]  ;;  %v14128_v8 = vld [vmem:[%s21648_s8 + $0x40] sm:$0xff] }
 0x98d   :  { %v6162_v40 = vadd.f32 %v22134_v54, %v19521_v61  ;;  %8337 = vmatpush.bf16.msrb.mxu0 %v14135_v50  ;;  %v14131_v54 = vld [vmem:[%s21648_s8 + $0x58] sm:$0xff] }
 0x98e   :  { %v6488_v55 = vadd.f32 %v6487_v59, %v6439_v33  ;;  %v6402_v33 = vadd.f32 %v6401_v13, %v6353_v27  ;;  %v14124_v27 = vld [vmem:[%s21648_s8 + $0x20] sm:$0xff] }
 0x990   :  { %v6537_v42 = vadd.f32 %v6536_v16, %v6488_v55  ;;  %v6397_v16 = vadd.f32 %v6396_v63, %v6348_v4  ;;  %v6497_v53 = vpop.f32.mrf.mxu1 }
 0x992   :  { %v6573_v2 = vmax.f32 %v6537_v42, 0.0  ;;  %v6211_v42 = vadd.f32 %v22135_v52, %v6162_v40  ;;  %v14129_v52 = vld [vmem:[%s21648_s8 + $0x48] sm:$0xff] }
 0x993   :  { %v6440_v62 = vpop.f32.mrf.mxu3 }
 0x994   :  { %v6441_v28 = vadd.f32 %v6440_v62, %v6392_v18  ;;  %v6543_v59 = vpop.f32.mrf.mxu0  ;;  %v6404_v44 = vpop.f32.mrf.mxu2 }
 0x996   :  { %v6490_v22 = vadd.f32 %v6489_v25, %v6441_v28  ;;  %v22139_v28 = vld [vmem:[#allocation48_spill] sm:$0xff] }
 0x998   :  { %v6539_v37 = vadd.f32 %v6538_v46, %v6490_v22  ;;  %v6499_v46 = vpop.f32.mrf.mxu1  ;;  %v22140_v22 = vld [vmem:[#allocation63_spill] sm:$0xff] }
 0x99a   :  { %v6575_v43 = vmax.f32 %v6539_v37, 0.0 }
 0x99b   :  { %v6443_v20 = vpop.f32.mrf.mxu3 }
 0x99c   :  { %v19895_v11 = vpack.c.bf16 %v6575_v43, %v6573_v2  ;;  %v6444_v12 = vadd.f32 %v6443_v20, %v6395_v45  ;;  %v6546_v19 = vpop.f32.mrf.mxu0  ;;  %v22141_v45 = vld [vmem:[#allocation9_spill] sm:$0xff] }
 0x99e   :  { %v6493_v5 = vadd.f32 %v6492_v29, %v6444_v12  ;;  %v22138_v29 = vld [vmem:[#allocation13_spill] sm:$0xff]  ;;  %v6406_v12 = vpop.f32.mrf.mxu2 }
 0x99f   :  { %v6260_v62 = vadd.f32 %v22138_v29, %v6211_v42 }
 0x9a0   :  { %v6542_v48 = vadd.f32 %v6541_v31, %v6493_v5  ;;  %v6356_v31 = vadd.f32 %v22139_v28, %v6307_v47  ;;  %v6502_v63 = vpop.f32.mrf.mxu1  ;;  %v14143_v47 = vld [vmem:[%s21648_s8 + $0xb8] sm:$0xff]  ;;  %v14149_v28 = vld [vmem:[%s21648_s8 + $0xe8] sm:$0xff] }
 0x9a1   :  { %v6309_v61 = vadd.f32 %v22140_v22, %v6260_v62  ;;  %v14142_v62 = vld [vmem:[%s21648_s8 + $0xb0] sm:$0xff]  ;;  %v14148_v22 = vld [vmem:[%s21648_s8 + $0xe0] sm:$0xff] }
 0x9a2   :  { %v6577_v35 = vmax.f32 %v6542_v48, 0.0  ;;  %v6405_v2 = vadd.f32 %v6404_v44, %v6356_v31  ;;  %v14141_v44 = vld [vmem:[%s21648_s8 + $0xa8] sm:$0xff] }
 0x9a3   :  { %v6445_v15 = vpop.f32.mrf.mxu3 }
 0x9a4   :  { %v6446_v14 = vadd.f32 %v6445_v15, %v6397_v16  ;;  %v6548_v9 = vpop.f32.mrf.mxu0  ;;  %v14102_v15 = vld [vmem:[%s21647_s7] sm:$0xff] }
 0x9a5   :  { %6756 = vmatmul.bf16.vlgmr.msrb.gmra.mxu2 %v14102_v15 }
 0x9a6   :  { %v6495_v32 = vadd.f32 %v6494_v23, %v6446_v14  ;;  %v6358_v23 = vadd.f32 %v22141_v45, %v6309_v61 }
 0x9a8   :  { %v6544_v60 = vadd.f32 %v6543_v59, %v6495_v32  ;;  %v6407_v59 = vadd.f32 %v6406_v12, %v6358_v23  ;;  %v6504_v3 = vpop.f32.mrf.mxu1  ;;  %v14137_v23 = vld [vmem:[%s21648_s8 + $0x88] sm:$0xff] }
 0x9aa   :  { %v6579_v25 = vmax.f32 %v6544_v60, 0.0  ;;  %v14104_v60 = vld [vmem:[%s21647_s7 + $0x10] sm:$0xff] }
 0x9ab   :  { %v6448_v26 = vpop.f32.mrf.mxu3 }
 0x9ac   :  { %v6599_v49 = vpack.c.bf16 %v6579_v25, %v6577_v35  ;;  %v6449_v41 = vadd.f32 %v6448_v26, %v6400_v36  ;;  %v6551_v20 = vpop.f32.mrf.mxu0  ;;  %v14110_v35 = vld [vmem:[%s21647_s7 + $0x40] sm:$0xff]  ;;  %v14126_v25 = vld [vmem:[%s21648_s8 + $0x30] sm:$0xff]  ;;  %v14125_v36 = vld [vmem:[%s21648_s8 + $0x28] sm:$0xff] }
 0x9ad   :  { %v14134_v26 = vld [vmem:[%s21648_s8 + $0x70] sm:$0xff] }
 0x9ae   :  { %v6498_v39 = vadd.f32 %v6497_v53, %v6449_v41  ;;  %8338 = vmatpush.bf16.msrb.mxu0 %v14134_v26  ;;  %v14132_v41 = vld [vmem:[%s21648_s8 + $0x60] sm:$0xff] }
 0x9b0   :  { %v6547_v10 = vadd.f32 %v6546_v19, %v6498_v39  ;;  %v14105_v19 = vld [vmem:[%s21647_s7 + $0x18] sm:$0xff]  ;;  %v14130_v39 = vld [vmem:[%s21648_s8 + $0x50] sm:$0xff] }
 0x9b2   :  { %v6581_v1 = vmax.f32 %v6547_v10, 0.0  ;;  %v14150_v10 = vld [vmem:[%s21648_s8 + $0xf0] sm:$0xff] }
 0x9b3   :  { %v6450_v55 = vpop.f32.mrf.mxu3 }
 0x9b4   :  { %v6451_v18 = vadd.f32 %v6450_v55, %v6402_v33  ;;  %v6553_v14 = vpop.f32.mrf.mxu0  ;;  %v14122_v33 = vld [vmem:[%s21648_s8 + $0x10] sm:$0xff]  ;;  %v14121_v55 = vld [vmem:[%s21648_s8 + $0x8] sm:$0xff] }
 0x9b5   :  { %6761 = vmatmul.bf16.gmra.mxu2 %v14103_v17 }
 0x9b6   :  { %v6500_v0 = vadd.f32 %v6499_v46, %v6451_v18  ;;  %v14123_v46 = vld [vmem:[%s21648_s8 + $0x18] sm:$0xff] }
 0x9b7   :  { %v14151_v18 = vld [vmem:[%s21648_s8 + $0xf8] sm:$0xff] }
 0x9b8   :  { %v6549_v38 = vadd.f32 %v6548_v9, %v6500_v0  ;;  %v19987_v9 = vld [vmem:[%s21647_s7 + $0x48] sm:$0xff]  ;;  %v20021_v0 = vld [vmem:[%s21647_s7 + $0x50] sm:$0xff] }
 0x9ba   :  { %v6583_v37 = vmax.f32 %v6549_v38, 0.0  ;;  %v14140_v38 = vld [vmem:[%s21648_s8 + $0xa0] sm:$0xff] }
 0x9bb   :  { %v6453_v6 = vpop.f32.mrf.mxu3 }
 0x9bc   :  { %v6601_v43 = vpack.c.bf16 %v6583_v37, %v6581_v1  ;;  %v6454_v4 = vadd.f32 %v6453_v6, %v6405_v2  ;;  %v14139_v1 = vld [vmem:[%s21648_s8 + $0x98] sm:$0xff]  ;;  %v14138_v6 = vld [vmem:[%s21648_s8 + $0x90] sm:$0xff] }
 0x9bd   :  { %v14147_v37 = vld [vmem:[%s21648_s8 + $0xd8] sm:$0xff]  ;;  %v14146_v2 = vld [vmem:[%s21648_s8 + $0xd0] sm:$0xff] }
 0x9be   :  { %v6503_v56 = vadd.f32 %v6502_v63, %v6454_v4  ;;  %v14145_v4 = vld [vmem:[%s21648_s8 + $0xc8] sm:$0xff] }
 0x9c0   :  { %v6552_v30 = vadd.f32 %v6551_v20, %v6503_v56 }
 0x9c2   :  { %v6585_v48 = vmax.f32 %v6552_v30, 0.0  ;;  %v14144_v30 = vld [vmem:[%s21648_s8 + $0xc0] sm:$0xff] }
 0x9c3   :  { %v6455_v16 = vpop.f32.mrf.mxu3 }
 0x9c4   :  { %v6456_v5 = vadd.f32 %v6455_v16, %v6407_v59 }
 0x9c5   :  { %6766 = vmatmul.bf16.gmra.mxu2 %v14104_v60 }
 0x9c6   :  { %v6505_v21 = vadd.f32 %v6504_v3, %v6456_v5 }
 0x9c8   :  { %v6554_v58 = vadd.f32 %v6553_v14, %v6505_v21 }
 0x9ca   :  { %v6587_v32 = vmax.f32 %v6554_v58, 0.0 }
 0x9cc   :  { %v6603_v53 = vpack.c.bf16 %v6587_v32, %v6585_v48  ;;  %v14159_v48 = vld [vmem:[%s21648_s8 + $0x138] sm:$0xff] }
 0x9cd   :  { %v14167_v32 = vld [vmem:[%s21648_s8 + $0x178] sm:$0xff] }
 0x9ce   :  { %6847 = vmatpush.bf16.msrb.mxu3 %v6603_v53 }
 0x9d2   :  { %6848 = vmatpush.bf16.msrb.mxu3 %v6601_v43  ;;  %v20055_v43 = vld [vmem:[%s21647_s7 + $0x58] sm:$0xff] }
 0x9d5   :  { %6771 = vmatmul.bf16.gmra.mxu2 %v14105_v19 }
 0x9d6   :  { %6849 = vmatpush.bf16.msrb.mxu3 %v6599_v49  ;;  %v14133_v49 = vld [vmem:[%s21648_s8 + $0x68] sm:$0xff] }
 0x9d7   :  { %8339 = vmatpush.bf16.msrb.mxu0 %v14133_v49  ;;  %v14156_v49 = vld [vmem:[%s21648_s8 + $0x120] sm:$0xff] }
 0x9da   :  { %6850 = vmatpush.bf16.msrb.mxu3 %v19895_v11  ;;  %v14127_v11 = vld [vmem:[%s21648_s8 + $0x38] sm:$0xff] }
 0x9db   :  { %8318 = vmatpush.bf16.msrb.mxu1 %v14127_v11  ;;  %8340 = vmatpush.bf16.msrb.mxu0 %v14132_v41 }
 0x9de   :  { %6851 = vmatpush.bf16.msrb.mxu3 %v19884_v24  ;;  %v14109_v24 = vld [vmem:[%s21647_s7 + $0x38] sm:$0xff] }
 0x9df   :  { %8319 = vmatpush.bf16.msrb.mxu1 %v14126_v25  ;;  %8341 = vmatpush.bf16.msrb.mxu0 %v14131_v54  ;;  %v14155_v54 = vld [vmem:[%s21648_s8 + $0x118] sm:$0xff] }
 0x9e2   :  { %6852 = vmatpush.bf16.msrb.mxu3 %v19874_v7  ;;  %v14106_v7 = vld [vmem:[%s21647_s7 + $0x20] sm:$0xff] }
 0x9e3   :  { %8320 = vmatpush.bf16.msrb.mxu1 %v14125_v36  ;;  %8342 = vmatpush.bf16.msrb.mxu0 %v14130_v39  ;;  %v14154_v39 = vld [vmem:[%s21648_s8 + $0x110] sm:$0xff] }
 0x9e5   :  { %6776 = vmatmul.bf16.gmra.mxu2 %v14106_v7 }
 0x9e6   :  { %6853 = vmatpush.bf16.msrb.mxu3 %v19867_v57  ;;  %v14107_v57 = vld [vmem:[%s21647_s7 + $0x28] sm:$0xff] }
 0x9e7   :  { %8321 = vmatpush.bf16.msrb.mxu1 %v14124_v27  ;;  %8343 = vmatpush.bf16.msrb.mxu0 %v14129_v52 }
 0x9ea   :  { %6854 = vmatpush.bf16.msrb.mxu3 %v19860_v51  ;;  %v14108_v51 = vld [vmem:[%s21647_s7 + $0x30] sm:$0xff] }
 0x9eb   :  { %8322 = vmatpush.bf16.msrb.mxu1 %v14123_v46  ;;  %8344 = vmatpush.bf16.msrb.mxu0 %v14128_v8  ;;  %v14161_v8 = vld [vmem:[%s21648_s8 + $0x148] sm:$0xff] }
 0x9ed   :  { %6855 = vmatmul.bf16.vlgmr.msrb.gmra.mxu3 %v14102_v15  ;;  %v14136_v15 = vld [vmem:[%s21648_s8 + $0x80] sm:$0xff] }
 0x9ef   :  { %8323 = vmatpush.bf16.msrb.mxu1 %v14122_v33  ;;  %8375 = vmatpush.bf16.msra.mxu0 %v14151_v18 }
 0x9f3   :  { %8324 = vmatpush.bf16.msrb.mxu1 %v14121_v55  ;;  %8376 = vmatpush.bf16.msra.mxu0 %v14150_v10  ;;  %v20127_v55 = vld [vmem:[%s21647_s7 + $0x68] sm:$0xff] }
 0x9f5   :  { %6781 = vmatmul.bf16.gmra.mxu2 %v14107_v57 }
 0x9f7   :  { %8325 = vmatpush.bf16.msrb.mxu1 %v14120_v34  ;;  %8377 = vmatpush.bf16.msra.mxu0 %v14149_v28  ;;  %v14153_v34 = vld [vmem:[%s21648_s8 + $0x108] sm:$0xff]  ;;  %v14160_v28 = vld [vmem:[%s21648_s8 + $0x140] sm:$0xff] }
 0x9fb   :  { %8356 = vmatpush.bf16.msra.mxu1 %v14143_v47  ;;  %8378 = vmatpush.bf16.msra.mxu0 %v14148_v22 }
 0x9fd   :  { %6860 = vmatmul.bf16.gmra.mxu3 %v14103_v17  ;;  %v14158_v17 = vld [vmem:[%s21648_s8 + $0x130] sm:$0xff] }
 0x9ff   :  { %8357 = vmatpush.bf16.msra.mxu1 %v14142_v62  ;;  %8379 = vmatpush.bf16.msra.mxu0 %v14147_v37 }
 0xa03   :  { %8358 = vmatpush.bf16.msra.mxu1 %v14141_v44  ;;  %8380 = vmatpush.bf16.msra.mxu0 %v14146_v2  ;;  %v14152_v44 = vld [vmem:[%s21648_s8 + $0x100] sm:$0xff]  ;;  %v20164_v2 = vld [vmem:[%s21647_s7 + $0x70] sm:$0xff] }
 0xa05   :  { %6786 = vmatmul.bf16.gmra.mxu2 %v14108_v51 }
 0xa07   :  { %8359 = vmatpush.bf16.msra.mxu1 %v14140_v38  ;;  %8381 = vmatpush.bf16.msra.mxu0 %v14145_v4 }
 0xa0b   :  { %8360 = vmatpush.bf16.msra.mxu1 %v14139_v1  ;;  %8382 = vmatpush.bf16.msra.mxu0 %v14144_v30  ;;  %v14183_v1 = vld [vmem:[%s21648_s8 + $0x1f8] sm:$0xff] }
 0xa0d   :  { %6865 = vmatmul.bf16.gmra.mxu3 %v14104_v60  ;;  %v14166_v60 = vld [vmem:[%s21648_s8 + $0x170] sm:$0xff] }
 0xa0f   :  { %8361 = vmatpush.bf16.msra.mxu1 %v14138_v6  ;;  %v14182_v6 = vld [vmem:[%s21648_s8 + $0x1f0] sm:$0xff] }
 0xa13   :  { %8362 = vmatpush.bf16.msra.mxu1 %v14137_v23  ;;  %v14181_v23 = vld [vmem:[%s21648_s8 + $0x1e8] sm:$0xff] }
 0xa15   :  { %6791 = vmatmul.bf16.gmra.mxu2 %v14109_v24 }
 0xa17   :  { %8363 = vmatpush.bf16.msra.mxu1 %v14136_v15  ;;  %v14180_v15 = vld [vmem:[%s21648_s8 + $0x1e0] sm:$0xff] }
 0xa1d   :  { %6870 = vmatmul.bf16.gmra.mxu3 %v14105_v19  ;;  %v20090_v19 = vld [vmem:[%s21647_s7 + $0x60] sm:$0xff] }
 0xa25   :  { %6796 = vmatmul.bf16.gmra.mxu2 %v14110_v35 }
 0xa28   :  { %v6757_v13 = vpop.f32.mrf.mxu2 }
 0xa2d   :  { %6875 = vmatmul.bf16.gmra.mxu3 %v14106_v7 }
 0xa30   :  { %v6759_v40 = vpop.f32.mrf.mxu2 }
 0xa35   :  { %6801 = vmatmul.bf16.gmra.mxu2 %v19987_v9 }
 0xa38   :  { %v19996_v42 = vpop.f32.mrf.mxu2 }
 0xa3d   :  { %6880 = vmatmul.bf16.gmra.mxu3 %v14107_v57 }
 0xa40   :  { %v20010_v29 = vpop.f32.mrf.mxu2 }
 0xa45   :  { %6806 = vmatmul.bf16.gmra.mxu2 %v20021_v0 }
 0xa48   :  { %v20030_v31 = vpop.f32.mrf.mxu2 }
 0xa4d   :  { %6885 = vmatmul.bf16.gmra.mxu3 %v14108_v51  ;;  %v14157_v51 = vld [vmem:[%s21648_s8 + $0x128] sm:$0xff] }
 0xa50   :  { %v20044_v63 = vpop.f32.mrf.mxu2 }
 0xa55   :  { %6811 = vmatmul.bf16.gmra.mxu2 %v20055_v43 }
 0xa58   :  { %v20064_v59 = vpop.f32.mrf.mxu2 }
 0xa5d   :  { %6890 = vmatmul.bf16.gmra.mxu3 %v14109_v24  ;;  %v14165_v24 = vld [vmem:[%s21648_s8 + $0x168] sm:$0xff] }
 0xa60   :  { %v20079_v53 = vpop.f32.mrf.mxu2 }
 0xa65   :  { %6816 = vmatmul.bf16.gmra.mxu2 %v20090_v19 }
 0xa68   :  { %v20101_v50 = vpop.f32.mrf.mxu2 }
 0xa6d   :  { %6895 = vmatmul.bf16.gmra.mxu3 %v14110_v35 }
 0xa70   :  { %v6856_v61 = vpop.f32.mrf.mxu3  ;;  %v20116_v33 = vpop.f32.mrf.mxu2 }
 0xa71   :  { %v6946_v20 = vpack.c.bf16 %v6856_v61, %v6757_v13  ;;  %v14164_v13 = vld [vmem:[%s21648_s8 + $0x160] sm:$0xff]  ;;  %v14175_v61 = vld [vmem:[%s21648_s8 + $0x1b8] sm:$0xff] }
 0xa73   :  { %v6986_v56 = vunpack.c.l.b16 %v6946_v20  ;;  %v6987_v16 = vunpack.c.h.b16 %v6946_v20 }
 0xa75   :  { %6821 = vmatmul.bf16.gmra.mxu2 %v20127_v55 }
 0xa78   :  { %v6858_v45 = vpop.f32.mrf.mxu3  ;;  %v20138_v18 = vpop.f32.mrf.mxu2 }
 0xa79   :  { %v6947_v12 = vpack.c.bf16 %v6858_v45, %v6759_v40  ;;  %v14163_v40 = vld [vmem:[%s21648_s8 + $0x158] sm:$0xff]  ;;  %v14173_v45 = vld [vmem:[%s21648_s8 + $0x1a8] sm:$0xff] }
 0xa7b   :  { %v6988_v5 = vunpack.c.l.b16 %v6947_v12  ;;  %v6989_v3 = vunpack.c.h.b16 %v6947_v12 }
 0xa7d   :  { %v6994_v21 = vpack.c.b16 %v6988_v5, %v6986_v56  ;;  %v6995_v14 = vpack.c.b16 %v6989_v3, %v6987_v16  ;;  %6900 = vmatmul.bf16.gmra.mxu3 %v19987_v9  ;;  %v14162_v9 = vld [vmem:[%s21648_s8 + $0x150] sm:$0xff]  ;;  %v14172_v3 = vld [vmem:[%s21648_s8 + $0x1a0] sm:$0xff] }
 0xa7f   :  { %8326 = vmatmul.bf16.vlgmr.msrb.gmra.mxu1 %v6994_v21  ;;  %8345 = vmatmul.bf16.vlgmr.msrb.gmra.mxu0 %v6995_v14 }
 0xa80   :  { %v6861_v58 = vpop.f32.mrf.mxu3  ;;  %8394 = vmatpush.bf16.msrb.mxu1 %v14159_v48  ;;  %8413 = vmatpush.bf16.msrb.mxu0 %v14167_v32  ;;  %v20153_v37 = vpop.f32.mrf.mxu2  ;;  %v14179_v48 = vld [vmem:[%s21648_s8 + $0x1d8] sm:$0xff] }
 0xa81   :  { %v6948_v7 = vpack.c.bf16 %v6861_v58, %v19996_v42  ;;  %v14171_v58 = vld [vmem:[%s21648_s8 + $0x198] sm:$0xff] }
 0xa83   :  { %v6990_v35 = vunpack.c.l.b16 %v6948_v7  ;;  %v6991_v25 = vunpack.c.h.b16 %v6948_v7 }
 0xa84   :  { %8395 = vmatpush.bf16.msrb.mxu1 %v14158_v17  ;;  %8414 = vmatpush.bf16.msrb.mxu0 %v14166_v60  ;;  %v14178_v17 = vld [vmem:[%s21648_s8 + $0x1d0] sm:$0xff]  ;;  %v20201_v60 = vld [vmem:[%s21647_s7 + $0x78] sm:$0xff] }
 0xa85   :  { %6826 = vmatmul.bf16.gmra.mxu2 %v20164_v2 }
 0xa88   :  { %v6863_v57 = vpop.f32.mrf.mxu3  ;;  %8396 = vmatpush.bf16.msrb.mxu1 %v14157_v51  ;;  %8415 = vmatpush.bf16.msrb.mxu0 %v14165_v24  ;;  %v20175_v12 = vpop.f32.mrf.mxu2  ;;  %v14177_v51 = vld [vmem:[%s21648_s8 + $0x1c8] sm:$0xff] }
 0xa89   :  { %v6949_v11 = vpack.c.bf16 %v6863_v57, %v20010_v29  ;;  %v14169_v57 = vld [vmem:[%s21648_s8 + $0x188] sm:$0xff] }
 0xa8b   :  { %v6992_v26 = vunpack.c.l.b16 %v6949_v11  ;;  %v6993_v36 = vunpack.c.h.b16 %v6949_v11 }
 0xa8c   :  { %8397 = vmatpush.bf16.msrb.mxu1 %v14156_v49  ;;  %8416 = vmatpush.bf16.msrb.mxu0 %v14164_v13  ;;  %v14176_v49 = vld [vmem:[%s21648_s8 + $0x1c0] sm:$0xff] }
 0xa8d   :  { %6905 = vmatmul.bf16.gmra.mxu3 %v20021_v0  ;;  %v6996_v27 = vpack.c.b16 %v6992_v26, %v6990_v35  ;;  %v6997_v41 = vpack.c.b16 %v6993_v36, %v6991_v25  ;;  %v14168_v36 = vld [vmem:[%s21648_s8 + $0x180] sm:$0xff] }
 0xa8f   :  { %8331 = vmatmul.bf16.gmra.mxu1 %v6996_v27  ;;  %8350 = vmatmul.bf16.gmra.mxu0 %v6997_v41 }
 0xa90   :  { %v6866_v46 = vpop.f32.mrf.mxu3  ;;  %8398 = vmatpush.bf16.msrb.mxu1 %v14155_v54  ;;  %8417 = vmatpush.bf16.msrb.mxu0 %v14163_v40  ;;  %v20190_v32 = vpop.f32.mrf.mxu2  ;;  %v14199_v54 = vld [vmem:[%s21648_s8 + $0x278] sm:$0xff] }
 0xa91   :  { %v6950_v52 = vpack.c.bf16 %v6866_v46, %v20030_v31  ;;  %v14191_v46 = vld [vmem:[%s21648_s8 + $0x238] sm:$0xff] }
 0xa93   :  { %v7006_v29 = vunpack.c.l.b16 %v6950_v52  ;;  %v7007_v62 = vunpack.c.h.b16 %v6950_v52 }
 0xa94   :  { %8399 = vmatpush.bf16.msrb.mxu1 %v14154_v39  ;;  %8418 = vmatpush.bf16.msrb.mxu0 %v14162_v9  ;;  %v14198_v39 = vld [vmem:[%s21648_s8 + $0x270] sm:$0xff]  ;;  %v20238_v9 = vld [vmem:[%s21647_s7 + $0x80] sm:$0xff] }
 0xa95   :  { %6831 = vmatmul.bf16.gmra.mxu2 %v20201_v60 }
 0xa98   :  { %v6868_v42 = vpop.f32.mrf.mxu3  ;;  %8400 = vmatpush.bf16.msrb.mxu1 %v14153_v34  ;;  %8419 = vmatpush.bf16.msrb.mxu0 %v14161_v8  ;;  %v20212_v11 = vpop.f32.mrf.mxu2  ;;  %v14197_v34 = vld [vmem:[%s21648_s8 + $0x268] sm:$0xff] }
 0xa99   :  { %v6951_v47 = vpack.c.bf16 %v6868_v42, %v20044_v63  ;;  %v14174_v63 = vld [vmem:[%s21648_s8 + $0x1b0] sm:$0xff]  ;;  %v14189_v42 = vld [vmem:[%s21648_s8 + $0x228] sm:$0xff] }
 0xa9b   :  { %v7008_v10 = vunpack.c.l.b16 %v6951_v47  ;;  %v7009_v0 = vunpack.c.h.b16 %v6951_v47 }
 0xa9c   :  { %8401 = vmatpush.bf16.msrb.mxu1 %v14152_v44  ;;  %8420 = vmatpush.bf16.msrb.mxu0 %v14160_v28  ;;  %v14196_v44 = vld [vmem:[%s21648_s8 + $0x260] sm:$0xff] }
 0xa9d   :  { %v7014_v31 = vpack.c.b16 %v7008_v10, %v7006_v29  ;;  %v7015_v38 = vpack.c.b16 %v7009_v0, %v7007_v62  ;;  %6910 = vmatmul.bf16.gmra.mxu3 %v20055_v43  ;;  %v14188_v0 = vld [vmem:[%s21648_s8 + $0x220] sm:$0xff] }
 0xa9f   :  { %8364 = vmatmul.bf16.vlgmr.msra.gmra.mxu1 %v7014_v31  ;;  %8383 = vmatmul.bf16.vlgmr.msra.gmra.mxu0 %v7015_v38 }
 0xaa0   :  { %v6871_v22 = vpop.f32.mrf.mxu3  ;;  %8432 = vmatpush.bf16.msra.mxu1 %v14175_v61  ;;  %8451 = vmatpush.bf16.msra.mxu0 %v14183_v1  ;;  %v20227_v40 = vpop.f32.mrf.mxu2  ;;  %v14195_v61 = vld [vmem:[%s21648_s8 + $0x258] sm:$0xff] }
 0xaa1   :  { %v6952_v43 = vpack.c.bf16 %v6871_v22, %v20064_v59  ;;  %v14187_v22 = vld [vmem:[%s21648_s8 + $0x218] sm:$0xff] }
 0xaa3   :  { %v7010_v56 = vunpack.c.l.b16 %v6952_v43  ;;  %v7011_v16 = vunpack.c.h.b16 %v6952_v43 }
 0xaa4   :  { %8433 = vmatpush.bf16.msra.mxu1 %v14174_v63  ;;  %8452 = vmatpush.bf16.msra.mxu0 %v14182_v6  ;;  %v14194_v63 = vld [vmem:[%s21648_s8 + $0x250] sm:$0xff]  ;;  %v20275_v6 = vld [vmem:[%s21647_s7 + $0x88] sm:$0xff] }
 0xaa5   :  { %6836 = vmatmul.bf16.gmra.mxu2 %v20238_v9 }
 0xaa8   :  { %v6873_v20 = vpop.f32.mrf.mxu3  ;;  %8434 = vmatpush.bf16.msra.mxu1 %v14173_v45  ;;  %8453 = vmatpush.bf16.msra.mxu0 %v14181_v23  ;;  %v20249_v47 = vpop.f32.mrf.mxu2  ;;  %v14193_v45 = vld [vmem:[%s21648_s8 + $0x248] sm:$0xff] }
 0xaa9   :  { %v6953_v4 = vpack.c.bf16 %v6873_v20, %v20079_v53  ;;  %v14170_v53 = vld [vmem:[%s21648_s8 + $0x190] sm:$0xff]  ;;  %v14185_v20 = vld [vmem:[%s21648_s8 + $0x208] sm:$0xff] }
 0xaab   :  { %v7012_v59 = vunpack.c.l.b16 %v6953_v4  ;;  %v7013_v5 = vunpack.c.h.b16 %v6953_v4 }
 0xaac   :  { %8435 = vmatpush.bf16.msra.mxu1 %v14172_v3  ;;  %8454 = vmatpush.bf16.msra.mxu0 %v14180_v15 }
 0xaad   :  { %6915 = vmatmul.bf16.gmra.mxu3 %v20090_v19  ;;  %v7016_v30 = vpack.c.b16 %v7012_v59, %v7010_v56  ;;  %v7017_v21 = vpack.c.b16 %v7013_v5, %v7011_v16  ;;  %v14192_v5 = vld [vmem:[%s21648_s8 + $0x240] sm:$0xff] }
 0xaaf   :  { %8369 = vmatmul.bf16.gmra.mxu1 %v7016_v30  ;;  %8388 = vmatmul.bf16.gmra.mxu0 %v7017_v21 }
 0xab0   :  { %v6876_v14 = vpop.f32.mrf.mxu3  ;;  %8436 = vmatpush.bf16.msra.mxu1 %v14171_v58  ;;  %8455 = vmatpush.bf16.msra.mxu0 %v14179_v48  ;;  %v20264_v1 = vpop.f32.mrf.mxu2  ;;  %v14215_v58 = vld [vmem:[%s21648_s8 + $0x2f8] sm:$0xff]  ;;  %v14206_v48 = vld [vmem:[%s21648_s8 + $0x2b0] sm:$0xff] }
 0xab1   :  { %v6954_v19 = vpack.c.bf16 %v6876_v14, %v20101_v50  ;;  %v14207_v14 = vld [vmem:[%s21648_s8 + $0x2b8] sm:$0xff] }
 0xab3   :  { %v7026_v35 = vunpack.c.l.b16 %v6954_v19  ;;  %v7027_v25 = vunpack.c.h.b16 %v6954_v19  ;;  %v14205_v19 = vld [vmem:[%s21648_s8 + $0x2a8] sm:$0xff] }
 0xab4   :  { %8437 = vmatpush.bf16.msra.mxu1 %v14170_v53  ;;  %8456 = vmatpush.bf16.msra.mxu0 %v14178_v17 }
 0xab5   :  { %6841 = vmatmul.bf16.gmra.mxu2 %v20275_v6 }
 0xab8   :  { %v6878_v7 = vpop.f32.mrf.mxu3  ;;  %8438 = vmatpush.bf16.msra.mxu1 %v14169_v57  ;;  %8457 = vmatpush.bf16.msra.mxu0 %v14177_v51  ;;  %v20293_v30 = vpop.f32.mrf.mxu2 }
 0xab9   :  { %v6955_v24 = vpack.c.bf16 %v6878_v7, %v20116_v33  ;;  %v14190_v33 = vld [vmem:[%s21648_s8 + $0x230] sm:$0xff]  ;;  %v14213_v7 = vld [vmem:[%s21648_s8 + $0x2e8] sm:$0xff] }
 0xabb   :  { %v7028_v50 = vunpack.c.l.b16 %v6955_v24  ;;  %v7029_v26 = vunpack.c.h.b16 %v6955_v24 }
 0xabc   :  { %8439 = vmatpush.bf16.msra.mxu1 %v14168_v36  ;;  %8458 = vmatpush.bf16.msra.mxu0 %v14176_v49 }
 0xabd   :  { %v7034_v13 = vpack.c.b16 %v7028_v50, %v7026_v35  ;;  %v7035_v27 = vpack.c.b16 %v7029_v26, %v7027_v25  ;;  %6920 = vmatmul.bf16.gmra.mxu3 %v20127_v55  ;;  %v14212_v50 = vld [vmem:[%s21648_s8 + $0x2e0] sm:$0xff] }
 0xabf   :  { %8402 = vmatmul.bf16.vlgmr.msrb.gmra.mxu1 %v7034_v13  ;;  %8421 = vmatmul.bf16.vlgmr.msrb.gmra.mxu0 %v7035_v27  ;;  %v14203_v13 = vld [vmem:[%s21648_s8 + $0x298] sm:$0xff] }
 0xac0   :  { %v6881_v41 = vpop.f32.mrf.mxu3  ;;  %8470 = vmatpush.bf16.msrb.mxu1 %v14191_v46  ;;  %8489 = vmatpush.bf16.msrb.mxu0 %v14199_v54  ;;  %v20308_v17 = vpop.f32.mrf.mxu2  ;;  %v14211_v27 = vld [vmem:[%s21648_s8 + $0x2d8] sm:$0xff]  ;;  %v14202_v46 = vld [vmem:[%s21648_s8 + $0x290] sm:$0xff] }
 0xac1   :  { %v6956_v55 = vpack.c.bf16 %v6881_v41, %v20138_v18  ;;  %v14210_v54 = vld [vmem:[%s21648_s8 + $0x2d0] sm:$0xff] }
 0xac3   :  { %v7030_v29 = vunpack.c.l.b16 %v6956_v55  ;;  %v7031_v62 = vunpack.c.h.b16 %v6956_v55 }
 0xac4   :  { %8471 = vmatpush.bf16.msrb.mxu1 %v14190_v33  ;;  %8490 = vmatpush.bf16.msrb.mxu0 %v14198_v39  ;;  %v14201_v39 = vld [vmem:[%s21648_s8 + $0x288] sm:$0xff] }
 0xac8   :  { %v6883_v52 = vpop.f32.mrf.mxu3  ;;  %8472 = vmatpush.bf16.msrb.mxu1 %v14189_v42  ;;  %8491 = vmatpush.bf16.msrb.mxu0 %v14197_v34  ;;  %v20330_v41 = vpop.f32.mrf.mxu2 }
 0xac9   :  { %v6957_v8 = vpack.c.bf16 %v6883_v52, %v20153_v37  ;;  %v14186_v37 = vld [vmem:[%s21648_s8 + $0x210] sm:$0xff]  ;;  %v20349_v52 = vld [vmem:[%s21649_s9] ss:$0 sm:$0xff] }
 0xacb   :  { %v7032_v18 = vunpack.c.l.b16 %v6957_v8  ;;  %v7033_v10 = vunpack.c.h.b16 %v6957_v8 }
 0xacc   :  { %8473 = vmatpush.bf16.msrb.mxu1 %v14188_v0  ;;  %8492 = vmatpush.bf16.msrb.mxu0 %v14196_v44  ;;  %v14208_v0 = vld [vmem:[%s21648_s8 + $0x2c0] sm:$0xff] }
 0xacd   :  { %6925 = vmatmul.bf16.gmra.mxu3 %v20164_v2  ;;  %v7036_v28 = vpack.c.b16 %v7032_v18, %v7030_v29  ;;  %v7037_v31 = vpack.c.b16 %v7033_v10, %v7031_v62  ;;  %v14200_v10 = vld [vmem:[%s21648_s8 + $0x280] sm:$0xff] }
 0xacf   :  { %8407 = vmatmul.bf16.gmra.mxu1 %v7036_v28  ;;  %8426 = vmatmul.bf16.gmra.mxu0 %v7037_v31 }
 0xad0   :  { %v6886_v38 = vpop.f32.mrf.mxu3  ;;  %8474 = vmatpush.bf16.msrb.mxu1 %v14187_v22  ;;  %8493 = vmatpush.bf16.msrb.mxu0 %v14195_v61  ;;  %v20351_v29 = vpop.f32.mrf.mxu2  ;;  %v14223_v61 = vld [vmem:[%s21648_s8 + $0x338] sm:$0xff] }
 0xad1   :  { %v6958_v2 = vpack.c.bf16 %v6886_v38, %v20175_v12  ;;  %v14184_v12 = vld [vmem:[%s21648_s8 + $0x200] sm:$0xff]  ;;  %8546 = vmatpush.bf16.msra.mxu2 %v14223_v61 }
 0xad3   :  { %v7046_v4 = vunpack.c.l.b16 %v6958_v2  ;;  %v7047_v56 = vunpack.c.h.b16 %v6958_v2 }
 0xad4   :  { %8475 = vmatpush.bf16.msrb.mxu1 %v14186_v37  ;;  %8494 = vmatpush.bf16.msrb.mxu0 %v14194_v63  ;;  %v14222_v37 = vld [vmem:[%s21648_s8 + $0x330] sm:$0xff] }
 0xad5   :  { %8547 = vmatpush.bf16.msra.mxu2 %v14222_v37 }
 0xad8   :  { %v6888_v43 = vpop.f32.mrf.mxu3  ;;  %8476 = vmatpush.bf16.msrb.mxu1 %v14185_v20  ;;  %8495 = vmatpush.bf16.msrb.mxu0 %v14193_v45 }
 0xad9   :  { %v6959_v23 = vpack.c.bf16 %v6888_v43, %v20190_v32  ;;  %v14214_v32 = vld [vmem:[%s21648_s8 + $0x2f0] sm:$0xff]  ;;  %v20379_v43 = vpop.f32.mrf.mxu2 }
 0xadb   :  { %v7048_v16 = vunpack.c.l.b16 %v6959_v23  ;;  %v7049_v59 = vunpack.c.h.b16 %v6959_v23  ;;  %v14221_v23 = vld [vmem:[%s21648_s8 + $0x328] sm:$0xff] }
 0xadc   :  { %8477 = vmatpush.bf16.msrb.mxu1 %v14184_v12  ;;  %8496 = vmatpush.bf16.msrb.mxu0 %v14192_v5 }
 0xadd   :  { %v7054_v3 = vpack.c.b16 %v7048_v16, %v7046_v4  ;;  %v7055_v15 = vpack.c.b16 %v7049_v59, %v7047_v56  ;;  %6930 = vmatmul.bf16.gmra.mxu3 %v20201_v60  ;;  %v14229_v4 = vld [vmem:[%s21648_s8 + $0x368] sm:$0xff]  ;;  %8548 = vmatpush.bf16.msra.mxu2 %v14221_v23  ;;  %v14244_v23 = vld [vmem:[%s21648_s8 + $0x3e0] sm:$0xff] }
 0xadf   :  { %8440 = vmatmul.bf16.vlgmr.msra.gmra.mxu1 %v7054_v3  ;;  %8459 = vmatmul.bf16.vlgmr.msra.gmra.mxu0 %v7055_v15  ;;  %v14220_v3 = vld [vmem:[%s21648_s8 + $0x320] sm:$0xff] }
 0xae0   :  { %v6891_v21 = vpop.f32.mrf.mxu3  ;;  %8508 = vmatpush.bf16.msra.mxu1 %v14207_v14  ;;  %8527 = vmatpush.bf16.msra.mxu0 %v14215_v58 }
 0xae1   :  { %v6960_v53 = vpack.c.bf16 %v6891_v21, %v20212_v11  ;;  %v14204_v11 = vld [vmem:[%s21648_s8 + $0x2a0] sm:$0xff]  ;;  %8549 = vmatpush.bf16.msra.mxu2 %v14220_v3  ;;  %v14235_v3 = vld [vmem:[%s21648_s8 + $0x398] sm:$0xff] }
 0xae3   :  { %v7050_v51 = vunpack.c.l.b16 %v6960_v53  ;;  %v7051_v24 = vunpack.c.h.b16 %v6960_v53 }
 0xae4   :  { %8509 = vmatpush.bf16.msra.mxu1 %v14206_v48  ;;  %8528 = vmatpush.bf16.msra.mxu0 %v14214_v32  ;;  %v6814_v32 = vpop.f32.mrf.mxu2 }
 0xae8   :  { %v6893_v60 = vpop.f32.mrf.mxu3  ;;  %8510 = vmatpush.bf16.msra.mxu1 %v14205_v19  ;;  %8529 = vmatpush.bf16.msra.mxu0 %v14213_v7  ;;  %v14227_v19 = vld [vmem:[%s21648_s8 + $0x358] sm:$0xff]  ;;  %v14218_v7 = vld [vmem:[%s21648_s8 + $0x310] sm:$0xff] }
 0xae9   :  { %v6961_v57 = vpack.c.bf16 %v6893_v60, %v20227_v40  ;;  %v14219_v60 = vld [vmem:[%s21648_s8 + $0x318] sm:$0xff] }
 0xaea   :  { %8550 = vmatpush.bf16.msra.mxu2 %v14219_v60  ;;  %v14241_v60 = vld [vmem:[%s21648_s8 + $0x3c8] sm:$0xff] }
 0xaeb   :  { %v7052_v35 = vunpack.c.l.b16 %v6961_v57  ;;  %v7053_v25 = vunpack.c.h.b16 %v6961_v57 }
 0xaec   :  { %8511 = vmatpush.bf16.msra.mxu1 %v14204_v11  ;;  %8530 = vmatpush.bf16.msra.mxu0 %v14212_v50  ;;  %v14217_v11 = vld [vmem:[%s21648_s8 + $0x308] sm:$0xff] }
 0xaed   :  { %6935 = vmatmul.bf16.gmra.mxu3 %v20238_v9  ;;  %v7056_v26 = vpack.c.b16 %v7052_v35, %v7050_v51  ;;  %v7057_v36 = vpack.c.b16 %v7053_v25, %v7051_v24  ;;  %v14209_v9 = vld [vmem:[%s21648_s8 + $0x2c8] sm:$0xff]  ;;  %v14226_v51 = vld [vmem:[%s21648_s8 + $0x350] sm:$0xff] }
 0xaee   :  { %8551 = vmatpush.bf16.msra.mxu2 %v14218_v7  ;;  %v14225_v50 = vld [vmem:[%s21648_s8 + $0x348] sm:$0xff] }
 0xaef   :  { %8445 = vmatmul.bf16.gmra.mxu1 %v7056_v26  ;;  %8464 = vmatmul.bf16.gmra.mxu0 %v7057_v36  ;;  %v20422_v36 = vpop.f32.mrf.mxu2 }
 0xaf0   :  { %v6896_v49 = vpop.f32.mrf.mxu3  ;;  %8512 = vmatpush.bf16.msra.mxu1 %v14203_v13  ;;  %8531 = vmatpush.bf16.msra.mxu0 %v14211_v27 }
 0xaf1   :  { %v6962_v40 = vpack.c.bf16 %v6896_v49, %v20249_v47 }
 0xaf2   :  { %8552 = vmatpush.bf16.msra.mxu2 %v14217_v11 }
 0xaf3   :  { %v7066_v42 = vunpack.c.l.b16 %v6962_v40  ;;  %v7067_v34 = vunpack.c.h.b16 %v6962_v40  ;;  %v14224_v40 = vld [vmem:[%s21648_s8 + $0x340] sm:$0xff] }
 0xaf4   :  { %8513 = vmatpush.bf16.msra.mxu1 %v14202_v46  ;;  %8532 = vmatpush.bf16.msra.mxu0 %v14210_v54 }
 0xaf8   :  { %v6898_v33 = vpop.f32.mrf.mxu3  ;;  %8514 = vmatpush.bf16.msra.mxu1 %v14201_v39  ;;  %8533 = vmatpush.bf16.msra.mxu0 %v14209_v9 }
 0xaf9   :  { %v6963_v55 = vpack.c.bf16 %v6898_v33, %v20264_v1  ;;  %v14231_v1 = vld [vmem:[%s21648_s8 + $0x378] sm:$0xff] }
 0xafa   :  { %8565 = vmatpush.bf16.msra.mxu3 %v14231_v1 }
 0xafb   :  { %v7068_v8 = vunpack.c.l.b16 %v6963_v55  ;;  %v7069_v47 = vunpack.c.h.b16 %v6963_v55 }
 0xafc   :  { %v8327_v62 = vpop.f32.mrf.mxu1  ;;  %v8346_v18 = vpop.f32.mrf.mxu0  ;;  %8515 = vmatpush.bf16.msra.mxu1 %v14200_v10  ;;  %8534 = vmatpush.bf16.msra.mxu0 %v14208_v0  ;;  %v14246_v0 = vld [vmem:[%s21648_s8 + $0x3f0] sm:$0xff] }
 0xafd   :  { %v7074_v44 = vpack.c.b16 %v7068_v8, %v7066_v42  ;;  %v7075_v28 = vpack.c.b16 %v7069_v47, %v7067_v34  ;;  %6940 = vmatmul.bf16.gmra.mxu3 %v20275_v6  ;;  %v8328_v31 = vadd.f32 %v20349_v52, %v8327_v62  ;;  %v14230_v6 = vld [vmem:[%s21648_s8 + $0x370] sm:$0xff]  ;;  %v14239_v8 = vld [vmem:[%s21648_s8 + $0x3b8] sm:$0xff] }
 0xafe   :  { %8566 = vmatpush.bf16.msra.mxu3 %v14230_v6  ;;  %v14247_v47 = vld [vmem:[%s21648_s8 + $0x3f8] sm:$0xff] }
 0xaff   :  { %v20361_v38 = vadd.f32 %v8346_v18, %v8328_v31  ;;  %8478 = vmatmul.bf16.vlgmr.msrb.gmra.mxu1 %v7074_v44  ;;  %8497 = vmatmul.bf16.vlgmr.msrb.gmra.mxu0 %v7075_v28  ;;  %v14238_v18 = vld [vmem:[%s21648_s8 + $0x3b0] sm:$0xff]  ;;  %v14237_v31 = vld [vmem:[%s21648_s8 + $0x3a8] sm:$0xff] }
 0xb00   :  { %v6901_v22 = vpop.f32.mrf.mxu3  ;;  %8584 = vmatpush.bf16.msrb.mxu1 %v14239_v8  ;;  %8603 = vmatpush.bf16.msrb.mxu0 %v14247_v47  ;;  %v14253_v47 = vld [vmem:[%s21648_s8 + $0x428] sm:$0xff] }
 0xb01   :  { %v6964_v20 = vpack.c.bf16 %v6901_v22, %v20293_v30  ;;  %v14228_v30 = vld [vmem:[%s21648_s8 + $0x360] sm:$0xff] }
 0xb02   :  { %8567 = vmatpush.bf16.msra.mxu3 %v14229_v4 }
 0xb03   :  { %v7070_v16 = vunpack.c.l.b16 %v6964_v20  ;;  %v7071_v59 = vunpack.c.h.b16 %v6964_v20 }
 0xb04   :  { %v20372_v63 = vpop.f32.mrf.mxu1  ;;  %v20377_v2 = vpop.f32.mrf.mxu0  ;;  %8585 = vmatpush.bf16.msrb.mxu1 %v14238_v18  ;;  %8604 = vmatpush.bf16.msrb.mxu0 %v14246_v0 }
 0xb06   :  { %8568 = vmatpush.bf16.msra.mxu3 %v14228_v30 }
 0xb08   :  { %v6903_v45 = vpop.f32.mrf.mxu3  ;;  %8586 = vmatpush.bf16.msrb.mxu1 %v14237_v31 }
 0xb09   :  { %v6965_v56 = vpack.c.bf16 %v6903_v45, %v20308_v17 }
 0xb0a   :  { %8569 = vmatpush.bf16.msra.mxu3 %v14227_v19 }
 0xb0b   :  { %v7072_v12 = vunpack.c.l.b16 %v6965_v56  ;;  %v7073_v5 = vunpack.c.h.b16 %v6965_v56 }
 0xb0c   :  { %v8332_v15 = vpop.f32.mrf.mxu1  ;;  %v8351_v21 = vpop.f32.mrf.mxu0 }
 0xb0d   :  { %v8333_v14 = vadd.f32 %v20349_v52, %v8332_v15  ;;  %v7076_v58 = vpack.c.b16 %v7072_v12, %v7070_v16  ;;  %v7077_v48 = vpack.c.b16 %v7073_v5, %v7071_v59  ;;  %v14243_v15 = vld [vmem:[%s21648_s8 + $0x3d8] sm:$0xff] }
 0xb0e   :  { %8570 = vmatpush.bf16.msra.mxu3 %v14226_v51 }
 0xb0f   :  { %v20396_v53 = vadd.f32 %v8351_v21, %v8333_v14  ;;  %8483 = vmatmul.bf16.gmra.mxu1 %v7076_v58  ;;  %8502 = vmatmul.bf16.gmra.mxu0 %v7077_v48  ;;  %v14234_v21 = vld [vmem:[%s21648_s8 + $0x390] sm:$0xff] }
 0xb10   :  { %v6906_v17 = vpop.f32.mrf.mxu3  ;;  %v14242_v58 = vld [vmem:[%s21648_s8 + $0x3d0] sm:$0xff] }
 0xb11   :  { %v6966_v35 = vpack.c.bf16 %v6906_v17, %v20330_v41  ;;  %v14216_v41 = vld [vmem:[%s21648_s8 + $0x300] sm:$0xff]  ;;  %v14233_v17 = vld [vmem:[%s21648_s8 + $0x388] sm:$0xff] }
 0xb12   :  { %8571 = vmatpush.bf16.msra.mxu3 %v14225_v50  ;;  %8553 = vmatpush.bf16.msra.mxu2 %v14216_v41  ;;  %v14232_v50 = vld [vmem:[%s21648_s8 + $0x380] sm:$0xff] }
 0xb13   :  { %v7086_v49 = vunpack.c.l.b16 %v6966_v35  ;;  %v7087_v13 = vunpack.c.h.b16 %v6966_v35 }
 0xb14   :  { %v20407_v57 = vpop.f32.mrf.mxu1  ;;  %v20412_v24 = vpop.f32.mrf.mxu0 }
 0xb16   :  { %8572 = vmatpush.bf16.msra.mxu3 %v14224_v40  ;;  %v14263_v40 = vld [vmem:[%s21648_s8 + $0x478] sm:$0xff] }
 0xb18   :  { %v6908_v25 = vpop.f32.mrf.mxu3 }
 0xb19   :  { %v6967_v26 = vpack.c.bf16 %v6908_v25, %v20351_v29  ;;  %v6819_v29 = vpop.f32.mrf.mxu2 }
 0xb1a   :  { %8641 = vmatpush.bf16.msrb.mxu3 %v14263_v40 }
 0xb1b   :  { %v7088_v27 = vunpack.c.l.b16 %v6967_v26  ;;  %v7089_v46 = vunpack.c.h.b16 %v6967_v26 }
 0xb1c   :  { %v8365_v54 = vpop.f32.mrf.mxu1  ;;  %v8384_v33 = vpop.f32.mrf.mxu0 }
 0xb1d   :  { %v7094_v39 = vpack.c.b16 %v7088_v27, %v7086_v49  ;;  %v7095_v9 = vpack.c.b16 %v7089_v46, %v7087_v13  ;;  %v8366_v55 = vadd.f32 %v8365_v54, %v20361_v38  ;;  %v14245_v38 = vld [vmem:[%s21648_s8 + $0x3e8] sm:$0xff]  ;;  %v14255_v54 = vld [vmem:[%s21648_s8 + $0x438] sm:$0xff] }
 0xb1e   :  { %8605 = vmatpush.bf16.msrb.mxu0 %v14245_v38  ;;  %8622 = vmatpush.bf16.msrb.mxu2 %v14255_v54 }
 0xb1f   :  { %v20431_v42 = vadd.f32 %v8384_v33, %v8366_v55  ;;  %8516 = vmatmul.bf16.vlgmr.msra.gmra.mxu1 %v7094_v39  ;;  %8535 = vmatmul.bf16.vlgmr.msra.gmra.mxu0 %v7095_v9  ;;  %v14254_v39 = vld [vmem:[%s21648_s8 + $0x430] sm:$0xff] }
 0xb20   :  { %v6911_v34 = vpop.f32.mrf.mxu3  ;;  %v14262_v9 = vld [vmem:[%s21648_s8 + $0x470] sm:$0xff] }
 0xb21   :  { %v6968_v44 = vpack.c.bf16 %v6911_v34, %v20379_v43  ;;  %v14236_v43 = vld [vmem:[%s21648_s8 + $0x3a0] sm:$0xff]  ;;  %v6822_v4 = vpop.f32.mrf.mxu2  ;;  %8642 = vmatpush.bf16.msrb.mxu3 %v14262_v9 }
 0xb22   :  { %8587 = vmatpush.bf16.msrb.mxu1 %v14236_v43  ;;  %8606 = vmatpush.bf16.msrb.mxu0 %v14244_v23 }
 0xb23   :  { %v7090_v61 = vunpack.c.l.b16 %v6968_v44  ;;  %v7091_v1 = vunpack.c.h.b16 %v6968_v44  ;;  %8623 = vmatpush.bf16.msrb.mxu2 %v14254_v39 }
 0xb24   :  { %v20439_v62 = vpop.f32.mrf.mxu1  ;;  %v20444_v10 = vpop.f32.mrf.mxu0 }
 0xb26   :  { %8588 = vmatpush.bf16.msrb.mxu1 %v14235_v3  ;;  %8607 = vmatpush.bf16.msrb.mxu0 %v14243_v15 }
 0xb27   :  { %8624 = vmatpush.bf16.msrb.mxu2 %v14253_v47 }
 0xb28   :  { %v6913_v28 = vpop.f32.mrf.mxu3 }
 0xb29   :  { %v6969_v22 = vpack.c.bf16 %v6913_v28, %v6814_v32  ;;  %v6824_v32 = vpop.f32.mrf.mxu2 }
 0xb2a   :  { %8589 = vmatpush.bf16.msrb.mxu1 %v14234_v21  ;;  %8608 = vmatpush.bf16.msrb.mxu0 %v14242_v58  ;;  %v14249_v58 = vld [vmem:[%s21648_s8 + $0x408] sm:$0xff] }
 0xb2b   :  { %v7092_v37 = vunpack.c.l.b16 %v6969_v22  ;;  %v7093_v6 = vunpack.c.h.b16 %v6969_v22  ;;  %v14252_v22 = vld [vmem:[%s21648_s8 + $0x420] sm:$0xff] }
 0xb2c   :  { %v8370_v20 = vpop.f32.mrf.mxu1  ;;  %v8389_v45 = vpop.f32.mrf.mxu0  ;;  %8625 = vmatpush.bf16.msrb.mxu2 %v14252_v22 }
 0xb2d   :  { %v8371_v56 = vadd.f32 %v8370_v20, %v20396_v53  ;;  %v7096_v16 = vpack.c.b16 %v7092_v37, %v7090_v61  ;;  %v7097_v59 = vpack.c.b16 %v7093_v6, %v7091_v1  ;;  %v14260_v61 = vld [vmem:[%s21648_s8 + $0x460] sm:$0xff] }
 0xb2e   :  { %8590 = vmatpush.bf16.msrb.mxu1 %v14233_v17  ;;  %8609 = vmatpush.bf16.msrb.mxu0 %v14241_v60 }
 0xb2f   :  { %v20463_v12 = vadd.f32 %v8389_v45, %v8371_v56  ;;  %8521 = vmatmul.bf16.gmra.mxu1 %v7096_v16  ;;  %8540 = vmatmul.bf16.gmra.mxu0 %v7097_v59  ;;  %v14259_v56 = vld [vmem:[%s21648_s8 + $0x458] sm:$0xff]  ;;  %v14250_v16 = vld [vmem:[%s21648_s8 + $0x410] sm:$0xff] }
 0xb30   :  { %v6916_v5 = vpop.f32.mrf.mxu3  ;;  %v14258_v59 = vld [vmem:[%s21648_s8 + $0x450] sm:$0xff] }
 0xb31   :  { %v6970_v48 = vpack.c.bf16 %v6916_v5, %v20422_v36  ;;  %v14240_v36 = vld [vmem:[%s21648_s8 + $0x3c0] sm:$0xff]  ;;  %v6827_v33 = vpop.f32.mrf.mxu2 }
 0xb32   :  { %8591 = vmatpush.bf16.msrb.mxu1 %v14232_v50  ;;  %8610 = vmatpush.bf16.msrb.mxu0 %v14240_v36 }
 0xb33   :  { %v7106_v7 = vunpack.c.l.b16 %v6970_v48  ;;  %v7107_v51 = vunpack.c.h.b16 %v6970_v48  ;;  %v14257_v48 = vld [vmem:[%s21648_s8 + $0x448] sm:$0xff] }
 0xb34   :  { %v20471_v30 = vpop.f32.mrf.mxu1  ;;  %v20476_v14 = vpop.f32.mrf.mxu0 }
 0xb38   :  { %v6918_v53 = vpop.f32.mrf.mxu3 }
 0xb39   :  { %v6971_v19 = vpack.c.bf16 %v6918_v53, %v6819_v29  ;;  %v14261_v29 = vld [vmem:[%s21648_s8 + $0x468] sm:$0xff]  ;;  %v6829_v38 = vpop.f32.mrf.mxu2 }
 0xb3a   :  { %8643 = vmatpush.bf16.msrb.mxu3 %v14261_v29 }
 0xb3b   :  { %v7108_v35 = vunpack.c.l.b16 %v6971_v19  ;;  %v7109_v25 = vunpack.c.h.b16 %v6971_v19 }
 0xb3c   :  { %v8403_v11 = vpop.f32.mrf.mxu1  ;;  %v8422_v26 = vpop.f32.mrf.mxu0 }
 0xb3d   :  { %v7114_v49 = vpack.c.b16 %v7108_v35, %v7106_v7  ;;  %v7115_v13 = vpack.c.b16 %v7109_v25, %v7107_v51  ;;  %v8404_v27 = vadd.f32 %v8403_v11, %v20431_v42  ;;  %v14248_v7 = vld [vmem:[%s21648_s8 + $0x400] sm:$0xff] }
 0xb3e   :  { %8644 = vmatpush.bf16.msrb.mxu3 %v14260_v61  ;;  %v14256_v51 = vld [vmem:[%s21648_s8 + $0x440] sm:$0xff] }
 0xb3f   :  { %8554 = vmatmul.bf16.vlgmr.msra.gmra.mxu2 %v7114_v49  ;;  %8573 = vmatmul.bf16.vlgmr.msra.gmra.mxu3 %v7115_v13  ;;  %v20495_v46 = vadd.f32 %v8422_v26, %v8404_v27 }
 0xb40   :  { %v6921_v41 = vpop.f32.mrf.mxu3 }
 0xb41   :  { %v6972_v34 = vpack.c.bf16 %v6921_v41, %v6822_v4  ;;  %v14251_v4 = vld [vmem:[%s21648_s8 + $0x418] sm:$0xff]  ;;  %v6832_v3 = vpop.f32.mrf.mxu2 }
 0xb42   :  { %8626 = vmatpush.bf16.msrb.mxu2 %v14251_v4  ;;  %8645 = vmatpush.bf16.msrb.mxu3 %v14259_v56 }
 0xb43   :  { %v7110_v0 = vunpack.c.l.b16 %v6972_v34  ;;  %v7111_v44 = vunpack.c.h.b16 %v6972_v34 }
 0xb44   :  { %v20509_v55 = vpop.f32.mrf.mxu1  ;;  %v20511_v42 = vpop.f32.mrf.mxu0 }
 0xb46   :  { %8627 = vmatpush.bf16.msrb.mxu2 %v14250_v16  ;;  %8646 = vmatpush.bf16.msrb.mxu3 %v14258_v59 }
 0xb48   :  { %v6923_v8 = vpop.f32.mrf.mxu3 }
 0xb49   :  { %v6973_v18 = vpack.c.bf16 %v6923_v8, %v6824_v32  ;;  %v6834_v13 = vpop.f32.mrf.mxu2 }
 0xb4a   :  { %8628 = vmatpush.bf16.msrb.mxu2 %v14249_v58  ;;  %8647 = vmatpush.bf16.msrb.mxu3 %v14257_v48 }
 0xb4b   :  { %v7112_v28 = vunpack.c.l.b16 %v6973_v18  ;;  %v7113_v31 = vunpack.c.h.b16 %v6973_v18 }
 0xb4c   :  { %v8408_v1 = vpop.f32.mrf.mxu1  ;;  %v8427_v37 = vpop.f32.mrf.mxu0 }
 0xb4d   :  { %v7116_v6 = vpack.c.b16 %v7112_v28, %v7110_v0  ;;  %v7117_v20 = vpack.c.b16 %v7113_v31, %v7111_v44  ;;  %v8409_v43 = vadd.f32 %v8408_v1, %v20463_v12 }
 0xb4e   :  { %8629 = vmatpush.bf16.msrb.mxu2 %v14248_v7  ;;  %8648 = vmatpush.bf16.msrb.mxu3 %v14256_v51  ;;  %v13022_v7 = vld [vmem:[%s21650_s10 + $0xe0] sm:$0xf]  ;;  %v14294_v51 = vld [vmem:[%s21650_s10 + $0xec] sm:$0xf0] }
 0xb4f   :  { %8559 = vmatmul.bf16.gmra.mxu2 %v7116_v6  ;;  %8578 = vmatmul.bf16.gmra.mxu3 %v7117_v20  ;;  %v8428_v45 = vadd.f32 %v8427_v37, %v8409_v43 }
 0xb50   :  { %v6926_v23 = vpop.f32.mrf.mxu3 }
 0xb51   :  { %v6974_v15 = vpack.c.bf16 %v6926_v23, %v6827_v33  ;;  %v6837_v39 = vpop.f32.mrf.mxu2 }
 0xb53   :  { %v7126_v53 = vunpack.c.l.b16 %v6974_v15  ;;  %v7127_v17 = vunpack.c.h.b16 %v6974_v15 }
 0xb54   :  { %v20538_v12 = vpop.f32.mrf.mxu1  ;;  %v20540_v5 = vpop.f32.mrf.mxu0 }
 0xb58   :  { %v6928_v21 = vpop.f32.mrf.mxu3 }
 0xb59   :  { %v6975_v32 = vpack.c.bf16 %v6928_v21, %v6829_v38  ;;  %v6839_v38 = vpop.f32.mrf.mxu2 }
 0xb5b   :  { %v7128_v60 = vunpack.c.l.b16 %v6975_v32  ;;  %v7129_v19 = vunpack.c.h.b16 %v6975_v32 }
 0xb5c   :  { %v8441_v35 = vpop.f32.mrf.mxu1  ;;  %v8460_v25 = vpop.f32.mrf.mxu0 }
 0xb5d   :  { %v7134_v11 = vpack.c.b16 %v7128_v60, %v7126_v53  ;;  %v7135_v50 = vpack.c.b16 %v7129_v19, %v7127_v17  ;;  %v8442_v26 = vadd.f32 %v8441_v35, %v20495_v46  ;;  %v13023_v35 = vor.u32 %v14294_v51, %v13022_v7  ;;  %v13374_v7 = vld [vmem:[%s21650_s10 + $0x3a0] sm:$0xf] }
 0xb5f   :  { %8592 = vmatmul.bf16.vlgmr.msrb.gmra.mxu1 %v7134_v11  ;;  %8611 = vmatmul.bf16.vlgmr.msrb.gmra.mxu0 %v7135_v50  ;;  %v20555_v36 = vadd.f32 %v8460_v25, %v8442_v26  ;;  %v8797_v11 = vld [vmem:[%s21651_s11] sm:$0xff]  ;;  %v14290_v26 = vld [vmem:[%s21650_s10 + $0xcc] sm:$0xf0] }
 0xb60   :  { %v6931_v49 = vpop.f32.mrf.mxu3  ;;  %v13006_v50 = vld [vmem:[%s21650_s10 + $0xc0] sm:$0xf]  ;;  %9518 = vmatpush.bf16.msra.mxu3 %v13023_v35 }
 0xb61   :  { %v6976_v54 = vpack.c.bf16 %v6931_v49, %v6832_v3  ;;  %v6842_v56 = vpop.f32.mrf.mxu2  ;;  %v8801_v49 = vunpack.c.l.b16 %v8797_v11 }
 0xb63   :  { %v7130_v9 = vunpack.c.l.b16 %v6976_v54  ;;  %v7131_v34 = vunpack.c.h.b16 %v6976_v54  ;;  %v8798_v54 = vld [vmem:[%s21651_s11 + $0x8] sm:$0xff] }
 0xb64   :  { %v20557_v27 = vpop.f32.mrf.mxu1  ;;  %v20559_v41 = vpop.f32.mrf.mxu0 }
 0xb68   :  { %v6933_v40 = vpop.f32.mrf.mxu3 }
 0xb69   :  { %v6977_v33 = vpack.c.bf16 %v6933_v40, %v6834_v13  ;;  %v6844_v59 = vpop.f32.mrf.mxu2  ;;  %v13007_v13 = vor.u32 %v14290_v26, %v13006_v50  ;;  %v13406_v40 = vld [vmem:[%s21650_s10 + $0x3e0] sm:$0xf] }
 0xb6b   :  { %v7132_v8 = vunpack.c.l.b16 %v6977_v33  ;;  %v7133_v46 = vunpack.c.h.b16 %v6977_v33  ;;  %v14390_v33 = vld [vmem:[%s21650_s10 + $0x3ec] sm:$0xf0]  ;;  %9519 = vmatpush.bf16.msra.mxu3 %v13007_v13 }
 0xb6c   :  { %v8446_v47 = vpop.f32.mrf.mxu1  ;;  %v8465_v44 = vpop.f32.mrf.mxu0  ;;  %v14278_v13 = vld [vmem:[%s21650_s10 + $0x6c] sm:$0xf0] }
 0xb6d   :  { %v7136_v29 = vpack.c.b16 %v7132_v8, %v7130_v9  ;;  %v7137_v18 = vpack.c.b16 %v7133_v46, %v7131_v34  ;;  %v8447_v0 = vadd.f32 %v8446_v47, %v8428_v45  ;;  %v8805_v9 = vpack.c.b16 %v8801_v49, %v8801_v49  ;;  %v12958_v49 = vld [vmem:[%s21650_s10 + $0x60] sm:$0xf] }
 0xb6e   :  { %v13407_v8 = vor.u32 %v14390_v33, %v13406_v40  ;;  %v12959_v40 = vor.u32 %v14278_v13, %v12958_v49  ;;  %v14318_v33 = vld [vmem:[%s21650_s10 + $0x1ac] sm:$0xf0]  ;;  %v13070_v49 = vld [vmem:[%s21650_s10 + $0x140] sm:$0xf] }
 0xb6f   :  { %8597 = vmatmul.bf16.gmra.mxu1 %v7136_v29  ;;  %8616 = vmatmul.bf16.gmra.mxu0 %v7137_v18  ;;  %v20561_v28 = vadd.f32 %v8465_v44, %v8447_v0  ;;  %v8815_v46 = vsel %vm8813_vm1, %v8805_v9, 0  ;;  %v8802_v29 = vunpack.c.h.b16 %v8797_v11  ;;  %v20598_v18 = vld [vmem:[%s21652_s1] sm:$0xf]  ;;  %v14382_v11 = vld [vmem:[%s21650_s10 + $0x3ac] sm:$0xf0] }
 0xb70   :  { %v6936_v31 = vpop.f32.mrf.mxu3  ;;  %8833 = vmatpush.bf16.msra.mxu1 %v8815_v46  ;;  %v12990_v0 = vld [vmem:[%s21650_s10 + $0xa0] sm:$0xf]  ;;  %v13375_v50 = vor.u32 %v14382_v11, %v13374_v7  ;;  %v14370_v7 = vld [vmem:[%s21650_s10 + $0x34c] sm:$0xf0] }
 0xb71   :  { %v6978_v22 = vpack.c.bf16 %v6936_v31, %v6837_v39  ;;  %v8804_v39 = vunpack.c.h.b16 %v8798_v54  ;;  %v14286_v31 = vld [vmem:[%s21650_s10 + $0xac] sm:$0xf0]  ;;  %v13246_v9 = vld [vmem:[%s21650_s10 + $0x2a0] sm:$0xf] }
 0xb72   :  { %v14306_v13 = vld [vmem:[%s21650_s10 + $0x14c] sm:$0xf0] }
 0xb73   :  { %v7146_v37 = vunpack.c.l.b16 %v6978_v22  ;;  %v7147_v6 = vunpack.c.h.b16 %v6978_v22  ;;  %v8808_v34 = vpack.c.b16 %v8804_v39, %v8804_v39  ;;  %v14326_v22 = vld [vmem:[%s21650_s10 + $0x1ec] sm:$0xf0] }
 0xb74   :  { %v20563_v60 = vpop.f32.mrf.mxu1  ;;  %v20565_v19 = vpop.f32.mrf.mxu0 }
 0xb75   :  { %v8824_v47 = vsel %vm8813_vm1, %v8808_v34, 0  ;;  %v14350_v34 = vld [vmem:[%s21650_s10 + $0x2ac] sm:$0xf0] }
 0xb76   :  { %8872 = vmatpush.bf16.msra.mxu2 %v8824_v47  ;;  %v14378_v47 = vld [vmem:[%s21650_s10 + $0x38c] sm:$0xf0] }
 0xb78   :  { %v6938_v61 = vpop.f32.mrf.mxu3 }
 0xb79   :  { %v6979_v1 = vpack.c.bf16 %v6938_v61, %v6839_v38  ;;  %v13150_v38 = vld [vmem:[%s21650_s10 + $0x1e0] sm:$0xf]  ;;  %v8806_v61 = vpack.c.b16 %v8802_v29, %v8802_v29 }
 0xb7a   :  { %v12942_v29 = vld [vmem:[%s21650_s10 + $0x40] sm:$0xf] }
 0xb7b   :  { %v7148_v20 = vunpack.c.l.b16 %v6979_v1  ;;  %v7149_v43 = vunpack.c.h.b16 %v6979_v1  ;;  %v12991_v1 = vor.u32 %v14286_v31, %v12990_v0  ;;  %v14274_v0 = vld [vmem:[%s21650_s10 + $0x4c] sm:$0xf0]  ;;  %v13247_v31 = vor.u32 %v14350_v34, %v13246_v9 }
 0xb7c   :  { %v20573_v25 = vpop.f32.mrf.mxu1  ;;  %v20603_v44 = vpop.f32.mrf.mxu0  ;;  %v13071_v9 = vor.u32 %v14306_v13, %v13070_v49  ;;  %v13136_v49 = vld [vmem:[%s21650_s10 + $0x1d0] sm:$0xf0]  ;;  %v8330_v13 = vadd.f32 %v20349_v52, %v20372_v63  ;;  %v14356_v52 = vld [vmem:[%s21650_s10 + $0x2e4] sm:$0xf] }
 0xb7d   :  { %v7154_v23 = vpack.c.b16 %v7148_v20, %v7146_v37  ;;  %v7155_v4 = vpack.c.b16 %v7149_v43, %v7147_v6  ;;  %v13151_v37 = vor.u32 %v14326_v22, %v13150_v38  ;;  %v8803_v6 = vunpack.c.l.b16 %v8798_v54  ;;  %v13278_v20 = vld [vmem:[%s21650_s10 + $0x2e0] sm:$0xf]  ;;  %v14358_v43 = vld [vmem:[%s21650_s10 + $0x2ec] sm:$0xf0]  ;;  %9520 = vmatpush.bf16.msra.mxu3 %v12991_v1  ;;  %v13280_v63 = vld [vmem:[%s21650_s10 + $0x2f0] sm:$0xf0] }
 0xb7e   :  { %v13118_v54 = vld [vmem:[%s21650_s10 + $0x1a0] sm:$0xf]  ;;  %v12943_v22 = vor.u32 %v14274_v0, %v12942_v29  ;;  %v14314_v1 = vld [vmem:[%s21650_s10 + $0x18c] sm:$0xf0] }
 0xb7f   :  { %8630 = vmatmul.bf16.vlgmr.msrb.gmra.mxu2 %v7154_v23  ;;  %8649 = vmatmul.bf16.vlgmr.msrb.gmra.mxu3 %v7155_v4  ;;  %v13390_v23 = vld [vmem:[%s21650_s10 + $0x3c0] sm:$0xf]  ;;  %v13279_v4 = vor.u32 %v14358_v43, %v13278_v20  ;;  %v13119_v39 = vor.u32 %v14318_v33, %v13118_v54  ;;  %v14374_v43 = vld [vmem:[%s21650_s10 + $0x36c] sm:$0xf0]  ;;  %v14292_v54 = vld [vmem:[%s21650_s10 + $0xe4] sm:$0xf] }
 0xb80   :  { %v6941_v45 = vpop.f32.mrf.mxu3  ;;  %9557 = vmatpush.bf16.msrb.mxu2 %v13407_v8  ;;  %12904 = vmatmul.msk.bf16.vlgmr.msra.gmra.mxu1 %vm8809_vm2, %v20598_v18  ;;  %v13358_v8 = vld [vmem:[%s21650_s10 + $0x380] sm:$0xf] }
 0xb81   :  { %v6980_v16 = vpack.c.bf16 %v6941_v45, %v6842_v56  ;;  %v14386_v56 = vld [vmem:[%s21650_s10 + $0x3cc] sm:$0xf0]  ;;  %v12974_v45 = vld [vmem:[%s21650_s10 + $0x80] sm:$0xf]  ;;  %v13359_v38 = vor.u32 %v14378_v47, %v13358_v8 }
 0xb82   :  { %v13342_v20 = vld [vmem:[%s21650_s10 + $0x360] sm:$0xf]  ;;  %v14366_v47 = vld [vmem:[%s21650_s10 + $0x32c] sm:$0xf0] }
 0xb83   :  { %v7150_v21 = vunpack.c.l.b16 %v6980_v16  ;;  %v7151_v58 = vunpack.c.h.b16 %v6980_v16  ;;  %v14282_v16 = vld [vmem:[%s21650_s10 + $0x8c] sm:$0xf0]  ;;  %v13198_v33 = vld [vmem:[%s21650_s10 + $0x240] sm:$0xf] }
 0xb84   :  { %v20679_v46 = vpop.f32.mrf.mxu0  ;;  %v13310_v8 = vld [vmem:[%s21650_s10 + $0x320] sm:$0xf] }
 0xb85   :  { %v13311_v29 = vor.u32 %v14366_v47, %v13310_v8  ;;  %v14276_v8 = vld [vmem:[%s21650_s10 + $0x64] sm:$0xf] }
 0xb88   :  { %v6943_v3 = vpop.f32.mrf.mxu3 }
 0xb89   :  { %v6981_v15 = vpack.c.bf16 %v6943_v3, %v6844_v59  ;;  %v20634_v59 = vpop.f32.mrf.mxu1  ;;  %v8818_v3 = vsel %vm8813_vm1, %v8806_v61, 0  ;;  %v13102_v61 = vld [vmem:[%s21650_s10 + $0x180] sm:$0xf] }
 0xb8a   :  { %8846 = vmatpush.bf16.msrb.mxu1 %v8818_v3  ;;  %v14270_v3 = vld [vmem:[%s21650_s10 + $0x2c] sm:$0xf0] }
 0xb8b   :  { %v7152_v48 = vunpack.c.l.b16 %v6981_v15  ;;  %v7153_v32 = vunpack.c.h.b16 %v6981_v15  ;;  %v8807_v15 = vpack.c.b16 %v8803_v6, %v8803_v6  ;;  %v14346_v6 = vld [vmem:[%s21650_s10 + $0x28c] sm:$0xf0] }
 0xb8d   :  { %v7156_v53 = vpack.c.b16 %v7152_v48, %v7150_v21  ;;  %v7157_v17 = vpack.c.b16 %v7153_v32, %v7151_v58  ;;  %v13391_v21 = vor.u32 %v14386_v56, %v13390_v23  ;;  %v12975_v58 = vor.u32 %v14282_v16, %v12974_v45  ;;  %v13134_v48 = vld [vmem:[%s21650_s10 + $0x1c0] sm:$0xf]  ;;  %v14322_v32 = vld [vmem:[%s21650_s10 + $0x1cc] sm:$0xf0] }
 0xb8e   :  { %9531 = vmatpush.bf16.msra.mxu1 %v13151_v37  ;;  %v8821_v51 = vsel %vm8813_vm1, %v8807_v15, 0  ;;  %v13135_v35 = vor.u32 %v14322_v32, %v13134_v48  ;;  %v13230_v37 = vld [vmem:[%s21650_s10 + $0x280] sm:$0xf]  ;;  %v13343_v56 = vor.u32 %v14374_v43, %v13342_v20  ;;  %v13008_v20 = vld [vmem:[%s21650_s10 + $0xd0] sm:$0xf0] }
 0xb8f   :  { %8635 = vmatmul.bf16.gmra.mxu2 %v7156_v53  ;;  %8654 = vmatmul.bf16.gmra.mxu3 %v7157_v17  ;;  %v13262_v53 = vld [vmem:[%s21650_s10 + $0x2c0] sm:$0xf]  ;;  %v14354_v17 = vld [vmem:[%s21650_s10 + $0x2cc] sm:$0xf0]  ;;  %v13231_v45 = vor.u32 %v14346_v6, %v13230_v37  ;;  %v14288_v6 = vld [vmem:[%s21650_s10 + $0xc4] sm:$0xf] }
 0xb90   :  { %9558 = vmatpush.bf16.msrb.mxu2 %v13391_v21  ;;  %8859 = vmatpush.bf16.msra.mxu0 %v8821_v51  ;;  %v13263_v26 = vor.u32 %v14354_v17, %v13262_v53  ;;  %v12926_v16 = vld [vmem:[%s21650_s10 + $0x20] sm:$0xf]  ;;  %v14342_v53 = vld [vmem:[%s21650_s10 + $0x26c] sm:$0xf0]  ;;  %v13011_v43 = vor.u32 %v14288_v6, %v13008_v20 }
 0xb91   :  { %9521 = vmatpush.bf16.msra.mxu3 %v12975_v58  ;;  %v20710_v23 = vpop.f32.mrf.mxu1  ;;  %v13086_v15 = vld [vmem:[%s21650_s10 + $0x160] sm:$0xf]  ;;  %v12927_v21 = vor.u32 %v14270_v3, %v12926_v16  ;;  %v14310_v58 = vld [vmem:[%s21650_s10 + $0x16c] sm:$0xf0]  ;;  %12905 = vmatmul.msk.bf16.vlgmr.msrb.gmra.mxu1 %vm8809_vm2, %v20598_v18  ;;  %v14284_v3 = vld [vmem:[%s21650_s10 + $0xa4] sm:$0xf] }
 0xb92   :  { %9532 = vmatpush.bf16.msra.mxu1 %v13135_v35  ;;  %v13087_v48 = vor.u32 %v14310_v58, %v13086_v15  ;;  %v13214_v32 = vld [vmem:[%s21650_s10 + $0x260] sm:$0xf]  ;;  %v14266_v35 = vld [vmem:[%s21650_s10 + $0xc] sm:$0xf0]  ;;  %v12992_v15 = vld [vmem:[%s21650_s10 + $0xb0] sm:$0xf0] }
 0xb93   :  { %12906 = vmatmul.msk.bf16.vlgmr.msra.gmra.mxu0 %vm8809_vm2, %v20598_v18  ;;  %v13326_v17 = vld [vmem:[%s21650_s10 + $0x340] sm:$0xf]  ;;  %v13215_v11 = vor.u32 %v14342_v53, %v13214_v32  ;;  %v12995_v58 = vor.u32 %v14284_v3, %v12992_v15  ;;  %v14312_v15 = vld [vmem:[%s21650_s10 + $0x184] sm:$0xf] }
 0xb94   :  { %9544 = vmatpush.bf16.msrb.mxu0 %v13279_v4  ;;  %9559 = vmatpush.bf16.msrb.mxu2 %v13375_v50  ;;  %v13103_v4 = vor.u32 %v14314_v1, %v13102_v61  ;;  %v12910_v51 = vld [vmem:[%s21650_s10] sm:$0xf]  ;;  %v13327_v50 = vor.u32 %v14370_v7, %v13326_v17  ;;  %v14302_v1 = vld [vmem:[%s21650_s10 + $0x12c] sm:$0xf0] }
 0xb95   :  { %9522 = vmatpush.bf16.msra.mxu3 %v12959_v40  ;;  %v20753_v40 = vpop.f32.mrf.mxu0  ;;  %v13054_v61 = vld [vmem:[%s21650_s10 + $0x120] sm:$0xf]  ;;  %v14334_v7 = vld [vmem:[%s21650_s10 + $0x22c] sm:$0xf0] }
 0xb96   :  { %9533 = vmatpush.bf16.msra.mxu1 %v13119_v39  ;;  %v14338_v39 = vld [vmem:[%s21650_s10 + $0x24c] sm:$0xf0]  ;;  %v13055_v37 = vor.u32 %v14302_v1, %v13054_v61  ;;  %v13182_v17 = vld [vmem:[%s21650_s10 + $0x220] sm:$0xf]  ;;  %v14316_v61 = vld [vmem:[%s21650_s10 + $0x1a4] sm:$0xf] }
 0xb97   :  { %v13120_v1 = vld [vmem:[%s21650_s10 + $0x1b0] sm:$0xf0] }
 0xb98   :  { %9545 = vmatpush.bf16.msrb.mxu0 %v13263_v26  ;;  %9560 = vmatpush.bf16.msrb.mxu2 %v13359_v38  ;;  %v12911_v26 = vor.u32 %v14266_v35, %v12910_v51  ;;  %v13183_v51 = vor.u32 %v14334_v7, %v13182_v17  ;;  %v14280_v35 = vld [vmem:[%s21650_s10 + $0x84] sm:$0xf]  ;;  %v13123_v20 = vor.u32 %v14316_v61, %v13120_v1  ;;  %v14362_v17 = vld [vmem:[%s21650_s10 + $0x30c] sm:$0xf0] }
 0xb99   :  { %9523 = vmatpush.bf16.msra.mxu3 %v12943_v22  ;;  %v20770_v0 = vpop.f32.mrf.mxu1  ;;  %v14384_v61 = vld [vmem:[%s21650_s10 + $0x3c4] sm:$0xf] }
 0xb9a   :  { %9534 = vmatpush.bf16.msra.mxu1 %v13103_v4  ;;  %v14344_v1 = vld [vmem:[%s21650_s10 + $0x284] sm:$0xf] }
 0xb9c   :  { %9546 = vmatpush.bf16.msrb.mxu0 %v13247_v31  ;;  %9561 = vmatpush.bf16.msrb.mxu2 %v13343_v56  ;;  %v13199_v31 = vor.u32 %v14338_v39, %v13198_v33  ;;  %v13038_v56 = vld [vmem:[%s21650_s10 + $0x100] sm:$0xf] }
 0xb9d   :  { %9524 = vmatpush.bf16.msra.mxu3 %v12927_v21  ;;  %v20772_v38 = vpop.f32.mrf.mxu0  ;;  %v14324_v21 = vld [vmem:[%s21650_s10 + $0x1e4] sm:$0xf]  ;;  %v13166_v39 = vld [vmem:[%s21650_s10 + $0x200] sm:$0xf] }
 0xb9e   :  { %9535 = vmatpush.bf16.msra.mxu1 %v13087_v48  ;;  %v13152_v48 = vld [vmem:[%s21650_s10 + $0x1f0] sm:$0xf0] }
 0xb9f   :  { %12907 = vmatmul.msk.bf16.vlgmr.msra.gmra.mxu2 %vm8809_vm2, %v20598_v18  ;;  %v13024_v18 = vld [vmem:[%s21650_s10 + $0xf0] sm:$0xf0]  ;;  %v13155_v53 = vor.u32 %v14324_v21, %v13152_v48 }
 0xba0   :  { %9547 = vmatpush.bf16.msrb.mxu0 %v13231_v45  ;;  %9562 = vmatpush.bf16.msrb.mxu2 %v13327_v50  ;;  %v13027_v34 = vor.u32 %v14292_v54, %v13024_v18  ;;  %v14298_v45 = vld [vmem:[%s21650_s10 + $0x10c] sm:$0xf0]  ;;  %v14320_v50 = vld [vmem:[%s21650_s10 + $0x1c4] sm:$0xf]  ;;  %v13104_v21 = vld [vmem:[%s21650_s10 + $0x190] sm:$0xf0] }
 0xba1   :  { %9525 = vmatpush.bf16.msra.mxu3 %v12911_v26  ;;  %v20774_v22 = vpop.f32.mrf.mxu1  ;;  %v13039_v16 = vor.u32 %v14298_v45, %v13038_v56  ;;  %v13139_v18 = vor.u32 %v14320_v50, %v13136_v49  ;;  %v14352_v45 = vld [vmem:[%s21650_s10 + $0x2c4] sm:$0xf]  ;;  %v13107_v48 = vor.u32 %v14312_v15, %v13104_v21  ;;  %v13408_v50 = vld [vmem:[%s21650_s10 + $0x3f0] sm:$0xf0] }
 0xba2   :  { %9536 = vmatpush.bf16.msra.mxu1 %v13071_v9  ;;  %v14330_v9 = vld [vmem:[%s21650_s10 + $0x20c] sm:$0xf0]  ;;  %v14304_v21 = vld [vmem:[%s21650_s10 + $0x144] sm:$0xf] }
 0xba4   :  { %9548 = vmatpush.bf16.msrb.mxu0 %v13215_v11  ;;  %9563 = vmatpush.bf16.msrb.mxu2 %v13311_v29  ;;  %v12976_v11 = vld [vmem:[%s21650_s10 + $0x90] sm:$0xf0]  ;;  %v13283_v29 = vor.u32 %v14356_v52, %v13280_v63  ;;  %v14308_v63 = vld [vmem:[%s21650_s10 + $0x164] sm:$0xf] }
 0xba5   :  { %9570 = vmatpush.bf16.msrb.mxu3 %v13027_v34  ;;  %v20788_v4 = vpop.f32.mrf.mxu0  ;;  %v12979_v26 = vor.u32 %v14280_v35, %v12976_v11  ;;  %v13167_v34 = vor.u32 %v14330_v9, %v13166_v39  ;;  %v14388_v11 = vld [vmem:[%s21650_s10 + $0x3e4] sm:$0xf]  ;;  %v12928_v39 = vld [vmem:[%s21650_s10 + $0x30] sm:$0xf0] }
 0xba6   :  { %9537 = vmatpush.bf16.msra.mxu1 %v13055_v37  ;;  %v8349_v37 = vadd.f32 %v20377_v2, %v8330_v13  ;;  %v14272_v2 = vld [vmem:[%s21650_s10 + $0x44] sm:$0xf]  ;;  %v13248_v13 = vld [vmem:[%s21650_s10 + $0x2b0] sm:$0xf0] }
 0xba8   :  { %9549 = vmatpush.bf16.msrb.mxu0 %v13199_v31  ;;  %v12960_v31 = vld [vmem:[%s21650_s10 + $0x70] sm:$0xf0] }
 0xba9   :  { %9571 = vmatpush.bf16.msrb.mxu3 %v13011_v43  ;;  %v20808_v32 = vpop.f32.mrf.mxu1  ;;  %v12963_v6 = vor.u32 %v14276_v8, %v12960_v31  ;;  %v8368_v43 = vadd.f32 %v20439_v62, %v8349_v37  ;;  %v12944_v62 = vld [vmem:[%s21650_s10 + $0x50] sm:$0xf0]  ;;  %v14443_v37 = vld [vmem:[%s21649_s9] ss:$0 sm:$0xff] }
 0xbaa   :  { %9538 = vmatpush.bf16.msra.mxu1 %v13039_v16  ;;  %v13264_v16 = vld [vmem:[%s21650_s10 + $0x2d0] sm:$0xf0] }
 0xbab   :  { %v13267_v3 = vor.u32 %v14352_v45, %v13264_v16  ;;  %v8387_v7 = vadd.f32 %v20444_v10, %v8368_v43  ;;  %v13411_v10 = vor.u32 %v14388_v11, %v13408_v50  ;;  %v13088_v8 = vld [vmem:[%s21650_s10 + $0x170] sm:$0xf0]  ;;  %v14264_v45 = vld [vmem:[%s21650_s10 + $0x4] sm:$0xf] }
 0xbac   :  { %9550 = vmatpush.bf16.msrb.mxu0 %v13183_v51  ;;  %v13091_v31 = vor.u32 %v14308_v63, %v13088_v8  ;;  %v13232_v43 = vld [vmem:[%s21650_s10 + $0x290] sm:$0xf0] }
 0xbad   :  { %9572 = vmatpush.bf16.msrb.mxu3 %v12995_v58  ;;  %v20849_v47 = vpop.f32.mrf.mxu0  ;;  %v12947_v58 = vor.u32 %v14272_v2, %v12944_v62  ;;  %v8406_v9 = vadd.f32 %v20509_v55, %v8387_v7  ;;  %v13392_v55 = vld [vmem:[%s21650_s10 + $0x3d0] sm:$0xf0]  ;;  %v13235_v62 = vor.u32 %v14344_v1, %v13232_v43 }
 0xbae   :  { %9583 = vmatpush.bf16.msrb.mxu1 %v13155_v53  ;;  %v13294_v53 = vld [vmem:[%s21650_s10 + $0x300] sm:$0xf]  ;;  %v12912_v16 = vld [vmem:[%s21650_s10 + $0x10] sm:$0xf0] }
 0xbaf   :  { %v13295_v35 = vor.u32 %v14362_v17, %v13294_v53  ;;  %v8425_v2 = vadd.f32 %v20511_v42, %v8406_v9  ;;  %v12915_v15 = vor.u32 %v14264_v45, %v12912_v16  ;;  %v14380_v42 = vld [vmem:[%s21650_s10 + $0x3a4] sm:$0xf]  ;;  %v13216_v7 = vld [vmem:[%s21650_s10 + $0x270] sm:$0xf0] }
 0xbb0   :  { %9551 = vmatpush.bf16.msrb.mxu0 %v13167_v34  ;;  %v13040_v8 = vld [vmem:[%s21650_s10 + $0x110] sm:$0xf0] }
 0xbb1   :  { %9573 = vmatpush.bf16.msrb.mxu3 %v12979_v26  ;;  %v20862_v56 = vpop.f32.mrf.mxu1  ;;  %v14348_v26 = vld [vmem:[%s21650_s10 + $0x2a4] sm:$0xf]  ;;  %9564 = vmatpush.bf16.msrb.mxu2 %v13295_v35  ;;  %v8444_v53 = vadd.f32 %v20557_v27, %v8425_v2  ;;  %v13056_v35 = vld [vmem:[%s21650_s10 + $0x130] sm:$0xf0] }
 0xbb2   :  { %9584 = vmatpush.bf16.msrb.mxu1 %v13139_v18  ;;  %v14268_v18 = vld [vmem:[%s21650_s10 + $0x24] sm:$0xf]  ;;  %v13251_v34 = vor.u32 %v14348_v26, %v13248_v13  ;;  %v13344_v43 = vld [vmem:[%s21650_s10 + $0x370] sm:$0xf0] }
 0xbb3   :  { %v12931_v52 = vor.u32 %v14268_v18, %v12928_v39  ;;  %v14300_v27 = vld [vmem:[%s21650_s10 + $0x124] sm:$0xf]  ;;  %v8463_v9 = vadd.f32 %v20559_v41, %v8444_v53  ;;  %v13200_v41 = vld [vmem:[%s21650_s10 + $0x250] sm:$0xf0] }
 0xbb4   :  { %9596 = vmatpush.bf16.msra.mxu0 %v13283_v29  ;;  %v13059_v13 = vor.u32 %v14300_v27, %v13056_v35 }
 0xbb5   :  { %9574 = vmatpush.bf16.msrb.mxu3 %v12963_v6  ;;  %v20918_v29 = vpop.f32.mrf.mxu0  ;;  %9609 = vmatpush.bf16.msra.mxu2 %v13411_v10  ;;  %v8335_v6 = vadd.f32 %v14443_v37, %v20407_v57 }
 0xbb6   :  { %9585 = vmatpush.bf16.msrb.mxu1 %v13123_v20  ;;  %v13395_v20 = vor.u32 %v14384_v61, %v13392_v55 }
 0xbb7   :  { %v8354_v11 = vadd.f32 %v20412_v24, %v8335_v6  ;;  %v13360_v24 = vld [vmem:[%s21650_s10 + $0x390] sm:$0xf0] }
 0xbb8   :  { %9597 = vmatpush.bf16.msra.mxu0 %v13267_v3  ;;  %v8480_v3 = vadd.f32 %v20573_v25, %v20555_v36  ;;  %v13376_v36 = vld [vmem:[%s21650_s10 + $0x3b0] sm:$0xf0]  ;;  %v14340_v25 = vld [vmem:[%s21650_s10 + $0x264] sm:$0xf] }
 0xbb9   :  { %9575 = vmatpush.bf16.msrb.mxu3 %v12947_v58  ;;  %v20945_v57 = vpop.f32.mrf.mxu1  ;;  %v13072_v58 = vld [vmem:[%s21650_s10 + $0x150] sm:$0xf0]  ;;  %9610 = vmatpush.bf16.msra.mxu2 %v13395_v20  ;;  %v13379_v17 = vor.u32 %v14380_v42, %v13376_v36  ;;  %v13219_v10 = vor.u32 %v14340_v25, %v13216_v7  ;;  %v8373_v39 = vadd.f32 %v20471_v30, %v8354_v11  ;;  %v14372_v20 = vld [vmem:[%s21650_s10 + $0x364] sm:$0xf] }
 0xbba   :  { %9586 = vmatpush.bf16.msrb.mxu1 %v13107_v48  ;;  %v13075_v48 = vor.u32 %v14304_v21, %v13072_v58  ;;  %v8499_v50 = vadd.f32 %v20603_v44, %v8480_v3  ;;  %v14336_v44 = vld [vmem:[%s21650_s10 + $0x244] sm:$0xf]  ;;  %v13347_v45 = vor.u32 %v14372_v20, %v13344_v43  ;;  %v13328_v58 = vld [vmem:[%s21650_s10 + $0x350] sm:$0xf0]  ;;  %v8485_v42 = vadd.f32 %v20710_v23, %v20561_v28  ;;  %v12998_v43 = vld [vmem:[%s21650_s10 + $0xa8] sm:$0xf] }
 0xbbb   :  { %v13203_v55 = vor.u32 %v14336_v44, %v13200_v41  ;;  %v8392_v37 = vadd.f32 %v20476_v14, %v8373_v39  ;;  %v13184_v14 = vld [vmem:[%s21650_s10 + $0x230] sm:$0xf0]  ;;  %v14368_v21 = vld [vmem:[%s21650_s10 + $0x344] sm:$0xf]  ;;  %v14295_v41 = vld [vmem:[%s21650_s10 + $0xf4] sm:$0xf0] }
 0xbbc   :  { %9598 = vmatpush.bf16.msra.mxu0 %v13251_v34  ;;  %v8518_v34 = vadd.f32 %v20774_v22, %v8499_v50  ;;  %v14296_v22 = vld [vmem:[%s21650_s10 + $0x104] sm:$0xf]  ;;  %v8504_v23 = vadd.f32 %v20753_v40, %v8485_v42 }
 0xbbd   :  { %9576 = vmatpush.bf16.msrb.mxu3 %v12931_v52  ;;  %9611 = vmatpush.bf16.msra.mxu2 %v13379_v17  ;;  %v14376_v52 = vld [vmem:[%s21650_s10 + $0x384] sm:$0xf]  ;;  %v20990_v63 = vpop.f32.mrf.mxu0  ;;  %v13043_v1 = vor.u32 %v14296_v22, %v13040_v8 }
 0xbbe   :  { %9587 = vmatpush.bf16.msrb.mxu1 %v13091_v31  ;;  %v13363_v30 = vor.u32 %v14376_v52, %v13360_v24  ;;  %v8482_v31 = vadd.f32 %v20634_v59, %v8463_v9  ;;  %v8537_v6 = vadd.f32 %v20788_v4, %v8518_v34  ;;  %v14332_v59 = vld [vmem:[%s21650_s10 + $0x224] sm:$0xf]  ;;  %v8411_v4 = vadd.f32 %v20538_v12, %v8392_v37  ;;  %v14291_v37 = vld [vmem:[%s21650_s10 + $0xd4] sm:$0xf0] }
 0xbbf   :  { %v13187_v3 = vor.u32 %v14332_v59, %v13184_v14  ;;  %v14328_v12 = vld [vmem:[%s21650_s10 + $0x204] sm:$0xf] }
 0xbc0   :  { %9599 = vmatpush.bf16.msra.mxu0 %v13235_v62  ;;  %v8501_v16 = vadd.f32 %v20679_v46, %v8482_v31  ;;  %v8430_v53 = vadd.f32 %v20540_v5, %v8411_v4  ;;  %v14364_v11 = vld [vmem:[%s21650_s10 + $0x324] sm:$0xf]  ;;  %v13312_v5 = vld [vmem:[%s21650_s10 + $0x330] sm:$0xf0]  ;;  %v14287_v4 = vld [vmem:[%s21650_s10 + $0xb4] sm:$0xf0] }
 0xbc1   :  { %9577 = vmatpush.bf16.msrb.mxu3 %v12915_v15  ;;  %9612 = vmatpush.bf16.msra.mxu2 %v13363_v30  ;;  %v13315_v28 = vor.u32 %v14364_v11, %v13312_v5  ;;  %v13030_v30 = vld [vmem:[%s21650_s10 + $0xe8] sm:$0xf] }
 0xbc2   :  { %v20830_v54 = vpop.f32.mrf.mxu2  ;;  %v20832_v33 = vpop.f32.mrf.mxu3  ;;  %9588 = vmatpush.bf16.msrb.mxu1 %v13075_v48  ;;  %v8520_v62 = vadd.f32 %v20808_v32, %v8501_v16  ;;  %v13331_v48 = vor.u32 %v14368_v21, %v13328_v58  ;;  %v13168_v32 = vld [vmem:[%s21650_s10 + $0x210] sm:$0xf0]  ;;  %v8449_v17 = vadd.f32 %v20563_v60, %v8430_v53  ;;  %v13031_v31 = vor.u32 %v14295_v41, %v13030_v30  ;;  %v14327_v16 = vld [vmem:[%s21650_s10 + $0x1f4] sm:$0xf0]  ;;  %v12982_v58 = vld [vmem:[%s21650_s10 + $0x88] sm:$0xf] }
 0xbc3   :  { %v8556_v2 = vadd.f32 %v20830_v54, %v8537_v6  ;;  %v13171_v25 = vor.u32 %v14328_v12, %v13168_v32  ;;  %v14283_v32 = vld [vmem:[%s21650_s10 + $0x94] sm:$0xf0] }
 0xbc4   :  { %9600 = vmatpush.bf16.msra.mxu0 %v13219_v10  ;;  %v8539_v7 = vadd.f32 %v20849_v47, %v8520_v62  ;;  %v8468_v60 = vadd.f32 %v20565_v19, %v8449_v17  ;;  %v8523_v47 = vadd.f32 %v20862_v56, %v8504_v23  ;;  %v14360_v10 = vld [vmem:[%s21650_s10 + $0x304] sm:$0xf]  ;;  %v14323_v53 = vld [vmem:[%s21650_s10 + $0x1d4] sm:$0xf0] }
 0xbc5   :  { %9613 = vmatpush.bf16.msra.mxu2 %v13347_v45  ;;  %v8575_v36 = vadd.f32 %v20832_v33, %v8556_v2  ;;  %v14279_v23 = vld [vmem:[%s21650_s10 + $0x74] sm:$0xf0] }
 0xbc6   :  { %9589 = vmatpush.bf16.msrb.mxu1 %v13059_v13  ;;  %v13296_v13 = vld [vmem:[%s21650_s10 + $0x310] sm:$0xf0]  ;;  %v8487_v40 = vadd.f32 %v20770_v0, %v8468_v60  ;;  %v8542_v56 = vadd.f32 %v20918_v29, %v8523_v47  ;;  %v14319_v60 = vld [vmem:[%s21650_s10 + $0x1b4] sm:$0xf0] }
 0xbc7   :  { %v13299_v34 = vor.u32 %v14360_v10, %v13296_v13  ;;  %v13270_v13 = vld [vmem:[%s21650_s10 + $0x2c8] sm:$0xf] }
 0xbc8   :  { %9601 = vmatpush.bf16.msra.mxu0 %v13203_v55  ;;  %v8506_v22 = vadd.f32 %v20772_v38, %v8487_v40  ;;  %v14355_v40 = vld [vmem:[%s21650_s10 + $0x2d4] sm:$0xf0] }
 0xbc9   :  { %9614 = vmatpush.bf16.msra.mxu2 %v13331_v48 }
 0xbca   :  { %v20889_v51 = vpop.f32.mrf.mxu2  ;;  %v20900_v49 = vpop.f32.mrf.mxu3  ;;  %9590 = vmatpush.bf16.msrb.mxu1 %v13043_v1  ;;  %v13014_v1 = vld [vmem:[%s21650_s10 + $0xc8] sm:$0xf] }
 0xbcb   :  { %v8558_v33 = vadd.f32 %v20889_v51, %v8539_v7  ;;  %v13286_v7 = vld [vmem:[%s21650_s10 + $0x2e8] sm:$0xf] }
 0xbcc   :  { %9602 = vmatpush.bf16.msra.mxu0 %v13187_v3 }
 0xbcd   :  { %9615 = vmatpush.bf16.msra.mxu2 %v13315_v28  ;;  %v8577_v51 = vadd.f32 %v20900_v49, %v8558_v33  ;;  %v14359_v28 = vld [vmem:[%s21650_s10 + $0x2f4] sm:$0xf0]  ;;  %v13126_v33 = vld [vmem:[%s21650_s10 + $0x1a8] sm:$0xf] }
 0xbce   :  { %v13287_v10 = vor.u32 %v14359_v28, %v13286_v7 }
 0xbd0   :  { %9603 = vmatpush.bf16.msra.mxu0 %v13171_v25 }
 0xbd1   :  { %9616 = vmatpush.bf16.msra.mxu2 %v13299_v34 }
 0xbd2   :  { %v20974_v26 = vpop.f32.mrf.mxu2  ;;  %v20976_v18 = vpop.f32.mrf.mxu3 }
 0xbd3   :  { %v8561_v0 = vadd.f32 %v20974_v26, %v8542_v56 }
 0xbd5   :  { %v8580_v26 = vadd.f32 %v20976_v18, %v8561_v0  ;;  %v13158_v18 = vld [vmem:[%s21650_s10 + $0x1e8] sm:$0xf]  ;;  %v14391_v0 = vld [vmem:[%s21650_s10 + $0x3f4] sm:$0xf0] }
 0xbd6   :  { %v13159_v21 = vor.u32 %v14327_v16, %v13158_v18  ;;  %v14347_v18 = vld [vmem:[%s21650_s10 + $0x294] sm:$0xf0] }
 0xbda   :  { %v21020_v15 = vpop.f32.mrf.mxu2  ;;  %v21031_v46 = vpop.f32.mrf.mxu3 }
 0xbdc   :  { %v8593_v61 = vpop.f32.mrf.mxu1  ;;  %v8612_v54 = vpop.f32.mrf.mxu0 }
 0xbdd   :  { %v8594_v27 = vadd.f32 %v8593_v61, %v8575_v36  ;;  %v8525_v61 = vadd.f32 %v20945_v57, %v8506_v22  ;;  %v13015_v57 = vor.u32 %v14291_v37, %v13014_v1  ;;  %v13414_v22 = vld [vmem:[%s21650_s10 + $0x3e8] sm:$0xf] }
 0xbde   :  { %v12934_v37 = vld [vmem:[%s21650_s10 + $0x28] sm:$0xf] }
 0xbdf   :  { %v8613_v50 = vadd.f32 %v8612_v54, %v8594_v27  ;;  %v8544_v59 = vadd.f32 %v20990_v63, %v8525_v61  ;;  %v12999_v63 = vor.u32 %v14287_v4, %v12998_v43  ;;  %v12983_v27 = vor.u32 %v14283_v32, %v12982_v58  ;;  %v13254_v61 = vld [vmem:[%s21650_s10 + $0x2a8] sm:$0xf]  ;;  %v14293_v58 = vld [vmem:[%s21650_s10 + $0xec] sm:$0xf] }
 0xbe0   :  { %v13398_v43 = vld [vmem:[%s21650_s10 + $0x3c8] sm:$0xf] }
 0xbe1   :  { %v8563_v3 = vadd.f32 %v21020_v15, %v8544_v59  ;;  %v13142_v15 = vld [vmem:[%s21650_s10 + $0x1c8] sm:$0xf]  ;;  %v14387_v59 = vld [vmem:[%s21650_s10 + $0x3d4] sm:$0xf0] }
 0xbe2   :  { %v13238_v4 = vld [vmem:[%s21650_s10 + $0x288] sm:$0xf] }
 0xbe3   :  { %v8582_v25 = vadd.f32 %v21031_v46, %v8563_v3  ;;  %v12966_v46 = vld [vmem:[%s21650_s10 + $0x68] sm:$0xf] }
 0xbe4   :  { %v8595_v35 = vpop.f32.mrf.mxu1  ;;  %v8614_v19 = vpop.f32.mrf.mxu0  ;;  %v12918_v3 = vld [vmem:[%s21650_s10 + $0x8] sm:$0xf] }
 0xbe5   :  { %v8596_v44 = vadd.f32 %v8595_v35, %v8577_v51  ;;  %v13143_v35 = vor.u32 %v14323_v53, %v13142_v15  ;;  %v13127_v51 = vor.u32 %v14319_v60, %v13126_v33  ;;  %v13382_v32 = vld [vmem:[%s21650_s10 + $0x3a8] sm:$0xf]  ;;  %v13239_v15 = vor.u32 %v14347_v18, %v13238_v4  ;;  %v14383_v53 = vld [vmem:[%s21650_s10 + $0x3b4] sm:$0xf0]  ;;  %v14277_v4 = vld [vmem:[%s21650_s10 + $0x6c] sm:$0xf] }
 0xbe6   :  { %v13383_v28 = vor.u32 %v14383_v53, %v13382_v32  ;;  %v14379_v33 = vld [vmem:[%s21650_s10 + $0x394] sm:$0xf0]  ;;  %v13206_v60 = vld [vmem:[%s21650_s10 + $0x248] sm:$0xf]  ;;  %v12968_v18 = vld [vmem:[%s21650_s10 + $0x78] sm:$0xf0] }
 0xbe7   :  { %v8615_v55 = vadd.f32 %v8614_v19, %v8596_v44  ;;  %v14275_v19 = vld [vmem:[%s21650_s10 + $0x54] sm:$0xf0]  ;;  %v12971_v32 = vor.u32 %v14277_v4, %v12968_v18  ;;  %v14273_v53 = vld [vmem:[%s21650_s10 + $0x4c] sm:$0xf]  ;;  %v13368_v4 = vld [vmem:[%s21650_s10 + $0x398] sm:$0xf0] }
 0xbe8   :  { %v14315_v44 = vld [vmem:[%s21650_s10 + $0x194] sm:$0xf0]  ;;  %v14337_v18 = vld [vmem:[%s21650_s10 + $0x24c] sm:$0xf] }
 0xbec   :  { %v8598_v8 = vpop.f32.mrf.mxu1  ;;  %v8617_v2 = vpop.f32.mrf.mxu0 }
 0xbed   :  { %v8599_v14 = vadd.f32 %v8598_v8, %v8580_v26  ;;  %v14311_v26 = vld [vmem:[%s21650_s10 + $0x174] sm:$0xf0] }
 0xbef   :  { %v8618_v54 = vadd.f32 %v8617_v2, %v8599_v14 }
 0xbf4   :  { %v8600_v48 = vpop.f32.mrf.mxu1 }
 0xbf5   :  { %v8601_v5 = vadd.f32 %v8600_v48, %v8582_v25  ;;  %v13399_v48 = vor.u32 %v14387_v59, %v13398_v43  ;;  %v13288_v43 = vld [vmem:[%s21650_s10 + $0x2f8] sm:$0xf0] }
 0xc02   :  { %v8631_v39 = vpop.f32.mrf.mxu2  ;;  %v8650_v9 = vpop.f32.mrf.mxu3 }
 0xc03   :  { %v8632_v52 = vadd.f32 %v8631_v39, %v8613_v50  ;;  %v8619_v50 = vpop.f32.mrf.mxu0  ;;  %v12967_v39 = vor.u32 %v14279_v23, %v12966_v46  ;;  %v13366_v46 = vld [vmem:[%s21650_s10 + $0x388] sm:$0xf] }
 0xc04   :  { %v8620_v34 = vadd.f32 %v8619_v50, %v8601_v5  ;;  %v13016_v5 = vld [vmem:[%s21650_s10 + $0xd8] sm:$0xf0] }
 0xc05   :  { %v8651_v24 = vadd.f32 %v8650_v9, %v8632_v52  ;;  %v12950_v52 = vld [vmem:[%s21650_s10 + $0x48] sm:$0xf] }
 0xc06   :  { %v12951_v8 = vor.u32 %v14275_v19, %v12950_v52  ;;  %v13160_v52 = vld [vmem:[%s21650_s10 + $0x1f8] sm:$0xf0]  ;;  %v13367_v19 = vor.u32 %v14379_v33, %v13366_v46 }
 0xc07   :  { %v8660_v49 = vmax.f32 %v8651_v24, 0.0  ;;  %v13110_v24 = vld [vmem:[%s21650_s10 + $0x188] sm:$0xf]  ;;  %v13256_v46 = vld [vmem:[%s21650_s10 + $0x2b8] sm:$0xf0] }
 0xc08   :  { %v13111_v1 = vor.u32 %v14315_v44, %v13110_v24  ;;  %v14375_v44 = vld [vmem:[%s21650_s10 + $0x374] sm:$0xf0] }
 0xc09   :  { %v21070_v29 = vpack.c.bf16 %v8660_v49, %v8660_v49  ;;  %v13271_v49 = vor.u32 %v14355_v40, %v13270_v13  ;;  %v13046_v13 = vld [vmem:[%s21650_s10 + $0x108] sm:$0xf]  ;;  %v13000_v40 = vld [vmem:[%s21650_s10 + $0xb8] sm:$0xf0] }
 0xc0a   :  { %v8633_v6 = vpop.f32.mrf.mxu2  ;;  %v8652_v38 = vpop.f32.mrf.mxu3 }
 0xc0b   :  { %v8634_v20 = vadd.f32 %v8633_v6, %v8615_v55  ;;  %9526 = vmatmul.bf16.vlgmr.msra.gmra.mxu3 %v21070_v29  ;;  %v14351_v55 = vld [vmem:[%s21650_s10 + $0x2b4] sm:$0xf0] }
 0xc0c   :  { %9622 = vmatpush.bf16.msra.mxu3 %v13031_v31  ;;  %v14271_v6 = vld [vmem:[%s21650_s10 + $0x34] sm:$0xf0] }
 0xc0d   :  { %v8653_v45 = vadd.f32 %v8652_v38, %v8634_v20  ;;  %v13094_v38 = vld [vmem:[%s21650_s10 + $0x168] sm:$0xf]  ;;  %v12935_v16 = vor.u32 %v14271_v6, %v12934_v37 }
 0xc0e   :  { %v13095_v2 = vor.u32 %v14311_v26, %v13094_v38  ;;  %v13334_v37 = vld [vmem:[%s21650_s10 + $0x348] sm:$0xf]  ;;  %v14371_v38 = vld [vmem:[%s21650_s10 + $0x354] sm:$0xf0] }
 0xc0f   :  { %v8661_v62 = vmax.f32 %v8653_v45, 0.0  ;;  %v13255_v45 = vor.u32 %v14351_v55, %v13254_v61  ;;  %v14321_v61 = vld [vmem:[%s21650_s10 + $0x1cc] sm:$0xf]  ;;  %v13144_v55 = vld [vmem:[%s21650_s10 + $0x1d8] sm:$0xf0] }
 0xc10   :  { %9623 = vmatpush.bf16.msra.mxu3 %v13015_v57  ;;  %v13415_v57 = vor.u32 %v14391_v0, %v13414_v22  ;;  %v13174_v26 = vld [vmem:[%s21650_s10 + $0x208] sm:$0xf] }
 0xc11   :  { %v21097_v12 = vpack.c.bf16 %v8661_v62, %v8661_v62  ;;  %v14267_v62 = vld [vmem:[%s21650_s10 + $0x14] sm:$0xf0] }
 0xc12   :  { %v8636_v42 = vpop.f32.mrf.mxu2  ;;  %v8655_v36 = vpop.f32.mrf.mxu3  ;;  %v12919_v25 = vor.u32 %v14267_v62, %v12918_v3  ;;  %v13335_v3 = vor.u32 %v14371_v38, %v13334_v37  ;;  %v14341_v37 = vld [vmem:[%s21650_s10 + $0x26c] sm:$0xf] }
 0xc13   :  { %v8637_v17 = vadd.f32 %v8636_v42, %v8618_v54  ;;  %9539 = vmatmul.bf16.vlgmr.msra.gmra.mxu1 %v21097_v12  ;;  %v13032_v54 = vld [vmem:[%s21650_s10 + $0xf8] sm:$0xf0]  ;;  %v13222_v42 = vld [vmem:[%s21650_s10 + $0x268] sm:$0xf] }
 0xc14   :  { %9624 = vmatpush.bf16.msra.mxu3 %v12999_v63  ;;  %9635 = vmatpush.bf16.msra.mxu1 %v13159_v21  ;;  %v13078_v63 = vld [vmem:[%s21650_s10 + $0x148] sm:$0xf]  ;;  %v14307_v21 = vld [vmem:[%s21650_s10 + $0x154] sm:$0xf0]  ;;  %v13035_v7 = vor.u32 %v14293_v58, %v13032_v54  ;;  %v14353_v54 = vld [vmem:[%s21650_s10 + $0x2cc] sm:$0xf] }
 0xc15   :  { %v8656_v11 = vadd.f32 %v8655_v36, %v8637_v17  ;;  %v14343_v36 = vld [vmem:[%s21650_s10 + $0x274] sm:$0xf0]  ;;  %v13079_v17 = vor.u32 %v14307_v21, %v13078_v63  ;;  %v13318_v63 = vld [vmem:[%s21650_s10 + $0x328] sm:$0xf] }
 0xc16   :  { %v13223_v23 = vor.u32 %v14343_v36, %v13222_v42  ;;  %v14367_v21 = vld [vmem:[%s21650_s10 + $0x334] sm:$0xf0]  ;;  %v12952_v42 = vld [vmem:[%s21650_s10 + $0x58] sm:$0xf0]  ;;  %v14313_v36 = vld [vmem:[%s21650_s10 + $0x18c] sm:$0xf] }
 0xc17   :  { %v8662_v47 = vmax.f32 %v8656_v11, 0.0  ;;  %v14289_v11 = vld [vmem:[%s21650_s10 + $0xcc] sm:$0xf] }
 0xc18   :  { %9625 = vmatpush.bf16.msra.mxu3 %v12983_v27  ;;  %9636 = vmatpush.bf16.msra.mxu1 %v13143_v35  ;;  %v13062_v27 = vld [vmem:[%s21650_s10 + $0x128] sm:$0xf]  ;;  %v14303_v35 = vld [vmem:[%s21650_s10 + $0x134] sm:$0xf0] }
 0xc19   :  { %v21131_v9 = vpack.c.bf16 %v8662_v47, %v8662_v47  ;;  %v14339_v47 = vld [vmem:[%s21650_s10 + $0x254] sm:$0xf0]  ;;  %v13063_v50 = vor.u32 %v14303_v35, %v13062_v27  ;;  %v14389_v35 = vld [vmem:[%s21650_s10 + $0x3ec] sm:$0xf] }
 0xc1a   :  { %v8638_v56 = vpop.f32.mrf.mxu2  ;;  %v8657_v41 = vpop.f32.mrf.mxu3  ;;  %v13207_v24 = vor.u32 %v14339_v47, %v13206_v60  ;;  %v14363_v27 = vld [vmem:[%s21650_s10 + $0x314] sm:$0xf0]  ;;  %v14269_v60 = vld [vmem:[%s21650_s10 + $0x2c] sm:$0xf]  ;;  %v12936_v47 = vld [vmem:[%s21650_s10 + $0x38] sm:$0xf0] }
 0xc1b   :  { %v8639_v30 = vadd.f32 %v8638_v56, %v8620_v34  ;;  %9552 = vmatmul.bf16.vlgmr.msrb.gmra.mxu0 %v21131_v9  ;;  %9578 = vmatmul.bf16.vlgmr.msrb.gmra.mxu3 %v21070_v29  ;;  %v14285_v34 = vld [vmem:[%s21650_s10 + $0xac] sm:$0xf]  ;;  %v13350_v56 = vld [vmem:[%s21650_s10 + $0x368] sm:$0xf] }
 0xc1c   :  { %9648 = vmatpush.bf16.msrb.mxu0 %v13287_v10  ;;  %9626 = vmatpush.bf16.msra.mxu3 %v12967_v39  ;;  %v13019_v10 = vor.u32 %v14289_v11, %v13016_v5  ;;  %v14299_v39 = vld [vmem:[%s21650_s10 + $0x114] sm:$0xf0]  ;;  %v13003_v0 = vor.u32 %v14285_v34, %v13000_v40  ;;  %v13416_v11 = vld [vmem:[%s21650_s10 + $0x3f8] sm:$0xf0]  ;;  %v14385_v34 = vld [vmem:[%s21650_s10 + $0x3cc] sm:$0xf] }
 0xc1d   :  { %v8658_v31 = vadd.f32 %v8657_v41, %v8639_v30  ;;  %9637 = vmatpush.bf16.msra.mxu1 %v13127_v51  ;;  %v14325_v51 = vld [vmem:[%s21650_s10 + $0x1ec] sm:$0xf]  ;;  %v13190_v30 = vld [vmem:[%s21650_s10 + $0x228] sm:$0xf]  ;;  %v14335_v41 = vld [vmem:[%s21650_s10 + $0x234] sm:$0xf0]  ;;  %v13047_v22 = vor.u32 %v14299_v39, %v13046_v13  ;;  %v13419_v39 = vor.u32 %v14389_v35, %v13416_v11 }
 0xc1e   :  { %v13191_v6 = vor.u32 %v14335_v41, %v13190_v30  ;;  %v13400_v40 = vld [vmem:[%s21650_s10 + $0x3d8] sm:$0xf0]  ;;  %v14305_v41 = vld [vmem:[%s21650_s10 + $0x14c] sm:$0xf] }
 0xc1f   :  { %v8663_v20 = vmax.f32 %v8658_v31, 0.0  ;;  %v12984_v31 = vld [vmem:[%s21650_s10 + $0x98] sm:$0xf0] }
 0xc20   :  { %9649 = vmatpush.bf16.msrb.mxu0 %v13271_v49  ;;  %9627 = vmatpush.bf16.msra.mxu3 %v12951_v8  ;;  %v13163_v49 = vor.u32 %v14325_v51, %v13160_v52  ;;  %v14281_v8 = vld [vmem:[%s21650_s10 + $0x8c] sm:$0xf]  ;;  %v12920_v30 = vld [vmem:[%s21650_s10 + $0x18] sm:$0xf0] }
 0xc21   :  { %v21180_v14 = vpack.c.bf16 %v8663_v20, %v8663_v20  ;;  %9638 = vmatpush.bf16.msra.mxu1 %v13111_v1  ;;  %v13351_v1 = vor.u32 %v14375_v44, %v13350_v56  ;;  %v14331_v20 = vld [vmem:[%s21650_s10 + $0x214] sm:$0xf0]  ;;  %v12987_v59 = vor.u32 %v14281_v8, %v12984_v31  ;;  %v14345_v52 = vld [vmem:[%s21650_s10 + $0x28c] sm:$0xf]  ;;  %v12939_v56 = vor.u32 %v14269_v60, %v12936_v47  ;;  %v13176_v35 = vld [vmem:[%s21650_s10 + $0x218] sm:$0xf0] }
 0xc22   :  { %v13175_v62 = vor.u32 %v14331_v20, %v13174_v26  ;;  %v14265_v44 = vld [vmem:[%s21650_s10 + $0xc] sm:$0xf]  ;;  %v13403_v8 = vor.u32 %v14385_v34, %v13400_v40  ;;  %v13304_v47 = vld [vmem:[%s21650_s10 + $0x318] sm:$0xf0]  ;;  %v14406_v40 = vld [vmem:[%s21654_s13 + $0x70] sm:$0xff] }
 0xc23   :  { %9565 = vmatmul.bf16.vlgmr.msrb.gmra.mxu2 %v21180_v14  ;;  %9591 = vmatmul.bf16.vlgmr.msrb.gmra.mxu1 %v21097_v12  ;;  %v14381_v31 = vld [vmem:[%s21650_s10 + $0x3ac] sm:$0xf]  ;;  %v12923_v38 = vor.u32 %v14265_v44, %v12920_v30  ;;  %v14395_v34 = vld [vmem:[%s21654_s13 + $0x18] sm:$0xff] }
 0xc24   :  { %9661 = vmatpush.bf16.msrb.mxu2 %v13415_v57  ;;  %9650 = vmatpush.bf16.msrb.mxu0 %v13255_v45  ;;  %v14357_v57 = vld [vmem:[%s21650_s10 + $0x2ec] sm:$0xf]  ;;  %v13147_v45 = vor.u32 %v14321_v61, %v13144_v55  ;;  %v21406_v55 = vpop.f32.mrf.mxu2 }
 0xc25   :  { %9628 = vmatpush.bf16.msra.mxu3 %v12935_v16  ;;  %9639 = vmatpush.bf16.msra.mxu1 %v13095_v2  ;;  %v14317_v16 = vld [vmem:[%s21650_s10 + $0x1ac] sm:$0xf]  ;;  %v13128_v2 = vld [vmem:[%s21650_s10 + $0x1b8] sm:$0xf0]  ;;  %v13291_v58 = vor.u32 %v14357_v57, %v13288_v43 }
 0xc26   :  { %v14301_v20 = vld [vmem:[%s21650_s10 + $0x12c] sm:$0xf]  ;;  %v13064_v57 = vld [vmem:[%s21650_s10 + $0x138] sm:$0xf0] }
 0xc27   :  { %v14361_v60 = vld [vmem:[%s21650_s10 + $0x30c] sm:$0xf] }
 0xc28   :  { %9662 = vmatpush.bf16.msrb.mxu2 %v13399_v48  ;;  %9651 = vmatpush.bf16.msrb.mxu0 %v13239_v15  ;;  %v13272_v48 = vld [vmem:[%s21650_s10 + $0x2d8] sm:$0xf0]  ;;  %v13131_v15 = vor.u32 %v14317_v16, %v13128_v2  ;;  %v13067_v2 = vor.u32 %v14301_v20, %v13064_v57  ;;  %v14400_v20 = vld [vmem:[%s21654_s13 + $0x40] sm:$0xff] }
 0xc29   :  { %9629 = vmatpush.bf16.msra.mxu3 %v12919_v25  ;;  %9640 = vmatpush.bf16.msra.mxu1 %v13079_v17  ;;  %v13112_v25 = vld [vmem:[%s21650_s10 + $0x198] sm:$0xf0]  ;;  %v13319_v17 = vor.u32 %v14367_v21, %v13318_v63  ;;  %v13275_v5 = vor.u32 %v14353_v54, %v13272_v48  ;;  %v14373_v54 = vld [vmem:[%s21650_s10 + $0x36c] sm:$0xf] }
 0xc2a   :  { %v13115_v33 = vor.u32 %v14313_v36, %v13112_v25  ;;  %v13208_v16 = vld [vmem:[%s21650_s10 + $0x258] sm:$0xf0] }
 0xc2b   :  { %9604 = vmatmul.bf16.vlgmr.msra.gmra.mxu0 %v21131_v9  ;;  %v13211_v48 = vor.u32 %v14337_v18, %v13208_v16  ;;  %v14422_v18 = vld [vmem:[%s21654_s13 + $0xf0] sm:$0xff]  ;;  %v14411_v16 = vld [vmem:[%s21654_s13 + $0x98] sm:$0xff] }
 0xc2c   :  { %9663 = vmatpush.bf16.msrb.mxu2 %v13383_v28  ;;  %9652 = vmatpush.bf16.msrb.mxu0 %v13223_v23  ;;  %v14349_v28 = vld [vmem:[%s21650_s10 + $0x2ac] sm:$0xf]  ;;  %v12955_v23 = vor.u32 %v14273_v53, %v12952_v42  ;;  %v13192_v42 = vld [vmem:[%s21650_s10 + $0x238] sm:$0xf0] }
 0xc2d   :  { %9674 = vmatpush.bf16.msrb.mxu3 %v13035_v7  ;;  %9641 = vmatpush.bf16.msra.mxu1 %v13063_v50  ;;  %v13302_v7 = vld [vmem:[%s21650_s10 + $0x308] sm:$0xf]  ;;  %v14309_v50 = vld [vmem:[%s21650_s10 + $0x16c] sm:$0xf]  ;;  %v13259_v51 = vor.u32 %v14349_v28, %v13256_v46 }
 0xc2e   :  { %9630 = vmatmul.bf16.vlgmr.msra.gmra.mxu3 %v21070_v29  ;;  %v13303_v13 = vor.u32 %v14363_v27, %v13302_v7  ;;  %v14333_v53 = vld [vmem:[%s21650_s10 + $0x22c] sm:$0xf] }
 0xc2f   :  { %v13195_v7 = vor.u32 %v14333_v53, %v13192_v42  ;;  %v14329_v27 = vld [vmem:[%s21650_s10 + $0x20c] sm:$0xf] }
 0xc30   :  { %9664 = vmatpush.bf16.msrb.mxu2 %v13367_v19  ;;  %9653 = vmatpush.bf16.msrb.mxu0 %v13207_v24  ;;  %v13240_v19 = vld [vmem:[%s21650_s10 + $0x298] sm:$0xf0]  ;;  %v13179_v28 = vor.u32 %v14329_v27, %v13176_v35  ;;  %v14365_v46 = vld [vmem:[%s21650_s10 + $0x32c] sm:$0xf]  ;;  %v14420_v27 = vld [vmem:[%s21654_s13 + $0xe0] sm:$0xff] }
 0xc31   :  { %9675 = vmatpush.bf16.msrb.mxu3 %v13019_v10  ;;  %9642 = vmatpush.bf16.msra.mxu1 %v13047_v22  ;;  %v13096_v10 = vld [vmem:[%s21650_s10 + $0x178] sm:$0xf0]  ;;  %v13243_v61 = vor.u32 %v14345_v52, %v13240_v19  ;;  %v14405_v52 = vld [vmem:[%s21654_s13 + $0x68] sm:$0xff] }
 0xc32   :  { %v13099_v24 = vor.u32 %v14309_v50, %v13096_v10  ;;  %v13080_v22 = vld [vmem:[%s21650_s10 + $0x158] sm:$0xf0]  ;;  %v13307_v10 = vor.u32 %v14361_v60, %v13304_v47  ;;  %v14393_v19 = vld [vmem:[%s21654_s13 + $0x8] sm:$0xff] }
 0xc33   :  { %9617 = vmatmul.bf16.vlgmr.msra.gmra.mxu2 %v21180_v14  ;;  %v13083_v26 = vor.u32 %v14305_v41, %v13080_v22  ;;  %v14415_v41 = vld [vmem:[%s21654_s13 + $0xb8] sm:$0xff]  ;;  %v14409_v53 = vld [vmem:[%s21654_s13 + $0x88] sm:$0xff] }
 0xc34   :  { %9665 = vmatpush.bf16.msrb.mxu2 %v13351_v1  ;;  %9654 = vmatpush.bf16.msrb.mxu0 %v13191_v6  ;;  %v13384_v1 = vld [vmem:[%s21650_s10 + $0x3b8] sm:$0xf0] }
 0xc35   :  { %9676 = vmatpush.bf16.msrb.mxu3 %v13003_v0  ;;  %9687 = vmatpush.bf16.msrb.mxu1 %v13163_v49  ;;  %v21399_v0 = vpop.f32.mrf.mxu1  ;;  %v21401_v49 = vpop.f32.mrf.mxu0  ;;  %v13224_v6 = vld [vmem:[%s21650_s10 + $0x278] sm:$0xf0]  ;;  %v13387_v43 = vor.u32 %v14381_v31, %v13384_v1  ;;  %v14402_v31 = vld [vmem:[%s21654_s13 + $0x50] sm:$0xff] }
 0xc36   :  { %9643 = vmatmul.bf16.vlgmr.msra.gmra.mxu1 %v21097_v12  ;;  %v14403_v22 = vld [vmem:[%s21654_s13 + $0x58] sm:$0xff] }
 0xc38   :  { %9666 = vmatpush.bf16.msrb.mxu2 %v13335_v3  ;;  %9655 = vmatpush.bf16.msrb.mxu0 %v13175_v62  ;;  %v14297_v3 = vld [vmem:[%s21650_s10 + $0x10c] sm:$0xf]  ;;  %v13048_v62 = vld [vmem:[%s21650_s10 + $0x118] sm:$0xf0] }
 0xc39   :  { %9677 = vmatpush.bf16.msrb.mxu3 %v12987_v59  ;;  %9688 = vmatpush.bf16.msrb.mxu1 %v13147_v45  ;;  %v14377_v59 = vld [vmem:[%s21650_s10 + $0x38c] sm:$0xf]  ;;  %v13227_v45 = vor.u32 %v14341_v37, %v13224_v6  ;;  %v13051_v36 = vor.u32 %v14297_v3, %v13048_v62 }
 0xc3a   :  { %v14413_v6 = vld [vmem:[%s21654_s13 + $0xa8] sm:$0xff] }
 0xc3b   :  { %9656 = vmatmul.bf16.vlgmr.msrb.gmra.mxu0 %v21131_v9 }
 0xc3c   :  { %9700 = vmatpush.bf16.msra.mxu0 %v13291_v58  ;;  %9667 = vmatpush.bf16.msrb.mxu2 %v13319_v17  ;;  %v13371_v58 = vor.u32 %v14377_v59, %v13368_v4  ;;  %v14369_v17 = vld [vmem:[%s21650_s10 + $0x34c] sm:$0xf] }
 0xc3d   :  { %9678 = vmatpush.bf16.msrb.mxu3 %v12971_v32  ;;  %9689 = vmatpush.bf16.msrb.mxu1 %v13131_v15  ;;  %v8837_v63 = vpop.f32.mrf.mxu1  ;;  %v8863_v21 = vpop.f32.mrf.mxu0  ;;  %v13352_v15 = vld [vmem:[%s21650_s10 + $0x378] sm:$0xf0] }
 0xc3e   :  { %v8876_v32 = vpop.f32.mrf.mxu2  ;;  %v13355_v25 = vor.u32 %v14373_v54, %v13352_v15  ;;  %v14410_v63 = vld [vmem:[%s21654_s13 + $0x90] sm:$0xff] }
 0xc40   :  { %9701 = vmatpush.bf16.msra.mxu0 %v13275_v5  ;;  %9668 = vmatpush.bf16.msrb.mxu2 %v13303_v13  ;;  %v14398_v13 = vld [vmem:[%s21654_s13 + $0x30] sm:$0xff] }
 0xc41   :  { %9679 = vmatpush.bf16.msrb.mxu3 %v12955_v23  ;;  %9690 = vmatpush.bf16.msrb.mxu1 %v13115_v33  ;;  %v13320_v23 = vld [vmem:[%s21650_s10 + $0x338] sm:$0xf0] }
 0xc42   :  { %v13323_v33 = vor.u32 %v14365_v46, %v13320_v23  ;;  %v14419_v23 = vld [vmem:[%s21654_s13 + $0xd8] sm:$0xff] }
 0xc43   :  { %9669 = vmatmul.bf16.vlgmr.msrb.gmra.mxu2 %v21180_v14 }
 0xc44   :  { %9713 = vmatpush.bf16.msra.mxu2 %v13419_v39  ;;  %9702 = vmatpush.bf16.msra.mxu0 %v13259_v51  ;;  %v14396_v39 = vld [vmem:[%s21654_s13 + $0x20] sm:$0xff]  ;;  %v14394_v51 = vld [vmem:[%s21654_s13 + $0x10] sm:$0xff] }
 0xc45   :  { %9680 = vmatpush.bf16.msrb.mxu3 %v12939_v56  ;;  %9691 = vmatpush.bf16.msrb.mxu1 %v13099_v24  ;;  %v21467_v11 = vpop.f32.mrf.mxu1  ;;  %v14404_v56 = vld [vmem:[%s21654_s13 + $0x60] sm:$0xff] }
 0xc46   :  { %v14392_v24 = vld [vmem:[%s21654_s13] sm:$0xff] }
 0xc48   :  { %9714 = vmatpush.bf16.msra.mxu2 %v13403_v8  ;;  %9703 = vmatpush.bf16.msra.mxu0 %v13243_v61  ;;  %v14414_v8 = vld [vmem:[%s21654_s13 + $0xb0] sm:$0xff] }
 0xc49   :  { %9681 = vmatpush.bf16.msrb.mxu3 %v12923_v38  ;;  %9692 = vmatpush.bf16.msrb.mxu1 %v13083_v26  ;;  %v14401_v38 = vld [vmem:[%s21654_s13 + $0x48] sm:$0xff]  ;;  %v14412_v26 = vld [vmem:[%s21654_s13 + $0xa0] sm:$0xff] }
 0xc4c   :  { %9715 = vmatpush.bf16.msra.mxu2 %v13387_v43  ;;  %9704 = vmatpush.bf16.msra.mxu0 %v13227_v45  ;;  %v14423_v43 = vld [vmem:[%s21654_s13 + $0xf8] sm:$0xff] }
 0xc4d   :  { %9682 = vmatmul.bf16.vlgmr.msrb.gmra.mxu3 %v21070_v29  ;;  %9693 = vmatpush.bf16.msrb.mxu1 %v13067_v2  ;;  %v13336_v29 = vld [vmem:[%s21650_s10 + $0x358] sm:$0xf0]  ;;  %v8850_v50 = vpop.f32.mrf.mxu1  ;;  %v21557_v2 = vld [vmem:[%s21655_s12] sm:$0xf] }
 0xc4e   :  { %v13339_v5 = vor.u32 %v14369_v17, %v13336_v29  ;;  %v9728_v62 = vperm.slane %v21557_v2, 0  ;;  %v14408_v17 = vld [vmem:[%s21654_s13 + $0x80] sm:$0xff]  ;;  %v9729_v60 = vperm.slane %v21557_v2, 1  ;;  %v14418_v50 = vld [vmem:[%s21654_s13 + $0xd0] sm:$0xff] }
 0xc50   :  { %9716 = vmatpush.bf16.msra.mxu2 %v13371_v58  ;;  %9705 = vmatpush.bf16.msra.mxu0 %v13211_v48 }
 0xc51   :  { %9694 = vmatpush.bf16.msrb.mxu1 %v13051_v36 }
 0xc54   :  { %9717 = vmatpush.bf16.msra.mxu2 %v13355_v25  ;;  %9706 = vmatpush.bf16.msra.mxu0 %v13195_v7  ;;  %v14421_v25 = vld [vmem:[%s21654_s13 + $0xe8] sm:$0xff] }
 0xc55   :  { %9695 = vmatmul.bf16.vlgmr.msrb.gmra.mxu1 %v21097_v12  ;;  %v14399_v12 = vld [vmem:[%s21654_s13 + $0x38] sm:$0xff] }
 0xc56   :  { %10008 = vmatpush.bf16.msra.mxu3 %v14399_v12 }
 0xc58   :  { %9718 = vmatpush.bf16.msra.mxu2 %v13339_v5  ;;  %9707 = vmatpush.bf16.msra.mxu0 %v13179_v28 }
 0xc5a   :  { %10009 = vmatpush.bf16.msra.mxu3 %v14398_v13 }
 0xc5b   :  { %9708 = vmatmul.bf16.vlgmr.msra.gmra.mxu0 %v21131_v9  ;;  %v14397_v9 = vld [vmem:[%s21654_s13 + $0x28] sm:$0xff] }
 0xc5c   :  { %9719 = vmatpush.bf16.msra.mxu2 %v13323_v33  ;;  %10034 = vmatpush.bf16.msrb.mxu0 %v14415_v41 }
 0xc5e   :  { %10010 = vmatpush.bf16.msra.mxu3 %v14397_v9 }
 0xc60   :  { %9720 = vmatpush.bf16.msra.mxu2 %v13307_v10  ;;  %10035 = vmatpush.bf16.msrb.mxu0 %v14414_v8 }
 0xc62   :  { %10011 = vmatpush.bf16.msra.mxu3 %v14396_v39 }
 0xc63   :  { %9721 = vmatmul.bf16.vlgmr.msra.gmra.mxu2 %v21180_v14  ;;  %v14407_v14 = vld [vmem:[%s21654_s13 + $0x78] sm:$0xff] }
 0xc64   :  { %10021 = vmatpush.bf16.msra.mxu1 %v14407_v14  ;;  %10036 = vmatpush.bf16.msrb.mxu0 %v14413_v6 }
 0xc65   :  { %10047 = vmatpush.bf16.msrb.mxu2 %v14423_v43 }
 0xc66   :  { %10012 = vmatpush.bf16.msra.mxu3 %v14395_v34 }
 0xc68   :  { %10022 = vmatpush.bf16.msra.mxu1 %v14406_v40  ;;  %10037 = vmatpush.bf16.msrb.mxu0 %v14412_v26 }
 0xc69   :  { %10048 = vmatpush.bf16.msrb.mxu2 %v14422_v18 }
 0xc6a   :  { %10013 = vmatpush.bf16.msra.mxu3 %v14394_v51 }
 0xc6c   :  { %10023 = vmatpush.bf16.msra.mxu1 %v14405_v52  ;;  %10038 = vmatpush.bf16.msrb.mxu0 %v14411_v16 }
 0xc6d   :  { %10049 = vmatpush.bf16.msrb.mxu2 %v14421_v25 }
 0xc6e   :  { %10014 = vmatpush.bf16.msra.mxu3 %v14393_v19 }
 0xc70   :  { %10024 = vmatpush.bf16.msra.mxu1 %v14404_v56  ;;  %10039 = vmatpush.bf16.msrb.mxu0 %v14410_v63  ;;  %v9730_v56 = vperm.slane %v21557_v2, 2 }
 0xc71   :  { %10050 = vmatpush.bf16.msrb.mxu2 %v14420_v27 }
 0xc72   :  { %10015 = vmatpush.bf16.msra.mxu3 %v14392_v24  ;;  %v14417_v24 = vld [vmem:[%s21654_s13 + $0xc8] sm:$0xff] }
 0xc74   :  { %10025 = vmatpush.bf16.msra.mxu1 %v14403_v22  ;;  %10040 = vmatpush.bf16.msrb.mxu0 %v14409_v53  ;;  %v14416_v22 = vld [vmem:[%s21654_s13 + $0xc0] sm:$0xff] }
 0xc75   :  { %10051 = vmatpush.bf16.msrb.mxu2 %v14419_v23 }
 0xc78   :  { %10026 = vmatpush.bf16.msra.mxu1 %v14402_v31  ;;  %10041 = vmatpush.bf16.msrb.mxu0 %v14408_v17  ;;  %v14435_v17 = vld [vmem:[%s21658_s17 + $0x18] sm:$0xff] }
 0xc79   :  { %10052 = vmatpush.bf16.msrb.mxu2 %v14418_v50  ;;  %v24_v50 = vstv %s21659_s18 }
 0xc7a   :  { %25 = vst [vmem:[#allocation2] sm:$0x1] %v24_v50 }
 0xc7c   :  { %10027 = vmatpush.bf16.msra.mxu1 %v14401_v38  ;;  %v14429_v38 = vld [vmem:[%s21656_s15 + $0x28] sm:$0xff] }
 0xc7d   :  { %10053 = vmatpush.bf16.msrb.mxu2 %v14417_v24 }
 0xc80   :  { %10028 = vmatpush.bf16.msra.mxu1 %v14400_v20 }
 0xc81   :  { %10054 = vmatpush.bf16.msrb.mxu2 %v14416_v22 }
 0xc84   :  { %10189 = vmatpush.bf16.msrb.mxu1 %v14435_v17 }
 0xc8e   :  { %v9527_v44 = vpop.f32.mrf.mxu3 }
 0xc8f   :  { %v9528_v59 = vadd.f32 %v9527_v44, %v21399_v0 }
 0xc90   :  { %v9540_v30 = vpop.f32.mrf.mxu1 }
 0xc91   :  { %v9541_v3 = vadd.f32 %v9540_v30, %v9528_v59  ;;  %v14427_v59 = vld [vmem:[%s21656_s15 + $0x18] sm:$0xff] }
 0xc96   :  { %v9529_v61 = vpop.f32.mrf.mxu3 }
 0xc98   :  { %v9553_v1 = vpop.f32.mrf.mxu0  ;;  %v9542_v37 = vpop.f32.mrf.mxu1 }
 0xc99   :  { %v9554_v0 = vadd.f32 %v9553_v1, %v9541_v3  ;;  %v14430_v37 = vld [vmem:[%s21656_s15 + $0x30] sm:$0xff]  ;;  %v9731_v3 = vperm.slane %v21557_v2, 3  ;;  %v14425_v2 = vld [vmem:[%s21656_s15 + $0x8] sm:$0xff] }
 0xc9e   :  { %v9579_v57 = vpop.f32.mrf.mxu3 }
 0xc9f   :  { %v9580_v29 = vadd.f32 %v9579_v57, %v21467_v11  ;;  %v14428_v57 = vld [vmem:[%s21656_s15 + $0x20] sm:$0xff] }
 0xca0   :  { %v9555_v45 = vpop.f32.mrf.mxu0  ;;  %v9592_v4 = vpop.f32.mrf.mxu1 }
 0xca1   :  { %v9593_v46 = vadd.f32 %v9592_v4, %v9580_v29  ;;  %v14438_v29 = vld [vmem:[%s21653_s14] ss:$0 sm:$0xff] }
 0xca6   :  { %v9566_v21 = vpop.f32.mrf.mxu2  ;;  %v9581_v58 = vpop.f32.mrf.mxu3 }
 0xca7   :  { %v9567_v54 = vadd.f32 %v9566_v21, %v9554_v0 }
 0xca8   :  { %v9605_v48 = vpop.f32.mrf.mxu0  ;;  %v9594_v32 = vpop.f32.mrf.mxu1 }
 0xca9   :  { %v9736_v15 = vadd.f32 %v9728_v62, %v9567_v54  ;;  %v9606_v33 = vadd.f32 %v9605_v48, %v9593_v46  ;;  %v14426_v48 = vld [vmem:[%s21656_s15 + $0x10] sm:$0xff] }
 0xcab   :  { %v9740_v42 = vmax.f32 %v9736_v15, 0.0 }
 0xcad   :  { %v9808_v36 = vpack.c.bf16 %v9740_v42, %v9740_v42 }
 0xcae   :  { %v9568_v7 = vpop.f32.mrf.mxu2 }
 0xcaf   :  { %10016 = vmatmul.bf16.vlgmr.msra.gmra.mxu3 %v9808_v36  ;;  %v14424_v36 = vld [vmem:[%s21656_s15] sm:$0xff]  ;;  %v14434_v7 = vld [vmem:[%s21658_s17 + $0x10] sm:$0xff] }
 0xcb0   :  { %v9607_v35 = vpop.f32.mrf.mxu0  ;;  %10190 = vmatpush.bf16.msrb.mxu1 %v14434_v7 }
 0xcb1   :  { %v9631_v5 = vpop.f32.mrf.mxu3 }
 0xcb2   :  { %v9632_v40 = vadd.f32 %v9631_v5, %v21401_v49  ;;  %v14431_v49 = vld [vmem:[%s21656_s15 + $0x38] sm:$0xff] }
 0xcb3   :  { %v9644_v28 = vpop.f32.mrf.mxu1  ;;  %10130 = vmatpush.bf16.msrb.mxu3 %v14431_v49 }
 0xcb4   :  { %v9645_v52 = vadd.f32 %v9644_v28, %v9632_v40 }
 0xcb6   :  { %v9618_v11 = vpop.f32.mrf.mxu2 }
 0xcb7   :  { %v9619_v47 = vadd.f32 %v9618_v11, %v9606_v33  ;;  %10131 = vmatpush.bf16.msrb.mxu3 %v14430_v37  ;;  %v14433_v11 = vld [vmem:[%s21658_s17 + $0x8] sm:$0xff] }
 0xcb8   :  { %v9657_v10 = vpop.f32.mrf.mxu0  ;;  %10191 = vmatpush.bf16.msrb.mxu1 %v14433_v11 }
 0xcb9   :  { %v9633_v12 = vpop.f32.mrf.mxu3  ;;  %v9737_v13 = vadd.f32 %v9729_v60, %v9619_v47  ;;  %v9658_v19 = vadd.f32 %v9657_v10, %v9645_v52  ;;  %v14432_v47 = vld [vmem:[%s21658_s17] sm:$0xff] }
 0xcba   :  { %v14439_v10 = vld [vmem:[%s21657_s16] ss:$0 sm:$0xff] }
 0xcbb   :  { %v9646_v9 = vpop.f32.mrf.mxu1  ;;  %v9741_v39 = vmax.f32 %v9737_v13, 0.0  ;;  %10132 = vmatpush.bf16.msrb.mxu3 %v14429_v38 }
 0xcbc   :  { %10192 = vmatpush.bf16.msrb.mxu1 %v14432_v47 }
 0xcbd   :  { %v9809_v14 = vpack.c.bf16 %v9741_v39, %v9741_v39 }
 0xcbe   :  { %v9620_v34 = vpop.f32.mrf.mxu2 }
 0xcbf   :  { %10029 = vmatmul.bf16.vlgmr.msra.gmra.mxu1 %v9809_v14  ;;  %10133 = vmatpush.bf16.msrb.mxu3 %v14428_v57  ;;  %v14440_v34 = vld [vmem:[#allocation2] ss:$0 sm:$0xff] }
 0xcc0   :  { %v9659_v51 = vpop.f32.mrf.mxu0 }
 0xcc3   :  { %10134 = vmatpush.bf16.msrb.mxu3 %v14427_v59 }
 0xcc6   :  { %v9670_v44 = vpop.f32.mrf.mxu2 }
 0xcc7   :  { %v9671_v30 = vadd.f32 %v9670_v44, %v9658_v19  ;;  %10135 = vmatpush.bf16.msrb.mxu3 %v14426_v48 }
 0xcc9   :  { %v9738_v41 = vadd.f32 %v9730_v56, %v9671_v30 }
 0xccb   :  { %v9742_v8 = vmax.f32 %v9738_v41, 0.0  ;;  %10136 = vmatpush.bf16.msrb.mxu3 %v14425_v2 }
 0xccd   :  { %v9810_v31 = vpack.c.bf16 %v9742_v8, %v9742_v8 }
 0xcce   :  { %v9672_v1 = vpop.f32.mrf.mxu2 }
 0xccf   :  { %10042 = vmatmul.bf16.vlgmr.msrb.gmra.mxu0 %v9810_v31  ;;  %10137 = vmatpush.bf16.msrb.mxu3 %v14424_v36 }
 0xcd0   :  { %v9683_v61 = vpop.f32.mrf.mxu3 }
 0xcd1   :  { %v9684_v45 = vadd.f32 %v9683_v61, %v21406_v55 }
 0xcd2   :  { %v9696_v6 = vpop.f32.mrf.mxu1 }
 0xcd3   :  { %v9697_v18 = vadd.f32 %v9696_v6, %v9684_v45 }
 0xcd8   :  { %v9709_v26 = vpop.f32.mrf.mxu0  ;;  %v9685_v20 = vpop.f32.mrf.mxu3 }
 0xcd9   :  { %v9710_v16 = vadd.f32 %v9709_v26, %v9697_v18 }
 0xcda   :  { %v9698_v43 = vpop.f32.mrf.mxu1 }
 0xce0   :  { %v9711_v4 = vpop.f32.mrf.mxu0 }
 0xce6   :  { %v9722_v0 = vpop.f32.mrf.mxu2 }
 0xce7   :  { %v9723_v62 = vadd.f32 %v9722_v0, %v9710_v16 }
 0xce9   :  { %v9739_v63 = vadd.f32 %v9731_v3, %v9723_v62 }
 0xceb   :  { %v9743_v21 = vmax.f32 %v9739_v63, 0.0 }
 0xced   :  { %v9811_v58 = vpack.c.bf16 %v9743_v21, %v9743_v21 }
 0xcee   :  { %v9724_v54 = vpop.f32.mrf.mxu2 }
 0xcef   :  { %10055 = vmatmul.bf16.vlgmr.msrb.gmra.mxu2 %v9811_v58 }
 0xd32   :  { %v10017_v32 = vpop.f32.mrf.mxu3 }
 0xd33   :  { %v10018_v27 = vadd.f32 %v14438_v29, %v10017_v32 }
 0xd3a   :  { %v10019_v55 = vpop.f32.mrf.mxu3 }
 0xd3c   :  { %v10030_v15 = vpop.f32.mrf.mxu1 }
 0xd3d   :  { %v10031_v35 = vadd.f32 %v10030_v15, %v10018_v27 }
 0xd44   :  { %v10032_v53 = vpop.f32.mrf.mxu1 }
 0xd4c   :  { %v10043_v42 = vpop.f32.mrf.mxu0 }
 0xd4d   :  { %v10044_v5 = vadd.f32 %v10043_v42, %v10031_v35 }
 0xd54   :  { %v10045_v25 = vpop.f32.mrf.mxu0 }
 0xd72   :  { %v10056_v28 = vpop.f32.mrf.mxu2 }
 0xd73   :  { %v10057_v46 = vadd.f32 %v10056_v28, %v10044_v5 }
 0xd75   :  { %v10060_v23 = vmax.f32 %v10057_v46, 0.0 }
 0xd77   :  { %v10077_v33 = vpack.c.bf16 %v10060_v23, %v10060_v23 }
 0xd79   :  { %10138 = vmatmul.bf16.vlgmr.msrb.gmra.mxu3 %v10077_v33 }
 0xd7a   :  { %v10058_v60 = vpop.f32.mrf.mxu2 }
 0xdfc   :  { %v10139_v12 = vpop.f32.mrf.mxu3 }
 0xdfd   :  { %v10140_v13 = vadd.f32 %v14439_v10, %v10139_v12 }
 0xdff   :  { %v10143_v9 = vmax.f32 %v10140_v13, 0.0 }
 0xe01   :  { %v10152_v39 = vpack.c.bf16 %v10143_v9, %v10143_v9 }
 0xe03   :  { %13596 = vmatmul.msk.bf16.vlgmr.msrb.gmra.mxu1 %vm10181_vm3, %v10152_v39 }
 0xe04   :  { %v10141_v14 = vpop.f32.mrf.mxu3 }
 0xe80   :  { %v10194_v40 = vpop.f32.mrf.mxu1 }
 0xe81   :  { %v10195_v51 = vadd.f32 %v14440_v34, %v10194_v40 }
 0xe83   :  { %10199 = vst.msk [vmem:[%s21660_s19] sm:$0xff] %vm10198_vm4, %v10195_v51 }
 0xe88   :  { %v10196_v52 = vpop.f32.mrf.mxu1 }

</bundles_post_ra>
